<compile_context>
chip_gen: v6e
topology: v6e:2x2x1
jax: 0.10.0
libtpu: 0.0.40
codegen_flags: <defaults>
</compile_context>

<pallas_src>
import functools

import jax
import jax.numpy as jnp
from jax.experimental import pallas as pl
from jax.experimental.pallas import tpu as pltpu


def _conv3x3_relu(pad_ref, slab_ref, w_ref, b_ref, H, W):
    """One 3x3 SAME conv + ReLU as a single im2col matmul.

    pad_ref:  (H+2, W+2, Cin) VMEM, zero halo, interior = layer input
    slab_ref: (H*W, 9*Cmax)   VMEM im2col scratch (only first 9*Cin cols used)
    w_ref:    (9*Cin, Cout)   flattened weights, row = (dy*3+dx)*Cin + cin
    b_ref:    (1, Cout)
    returns   (H*W, Cout) float32 activation
    """
    cin = pad_ref.shape[-1]
    k = 9 * cin
    # im2col: one shifted copy per tap into a K-contiguous slab.
    for dy in range(3):
        for dx in range(3):
            tap = dy * 3 + dx
            slab_ref[:, tap * cin:(tap + 1) * cin] = (
                pad_ref[dy:dy + H, dx:dx + W, :].reshape(H * W, cin))
    y = jnp.dot(slab_ref[:, :k], w_ref[...],
                preferred_element_type=jnp.float32)
    return jnp.maximum(y + b_ref[...], 0.0)


def _cnn_fused_kernel(x_ref,
                      w1_ref, b1_ref, w2_ref, b2_ref,
                      w3_ref, b3_ref, w4_ref, b4_ref,
                      o_ref,
                      pad_in, pad_a, pad_b, slab,
                      *, H, W):
    # Zero the padded scratch buffers every grid step so the 1-pixel halo is
    # guaranteed zero on every core (scratch is per-core and uninitialized;
    # relying on program_id==0 would break when the batch grid is split
    # across TensorCores).  This is a trivial amount of store traffic.
    pad_in[...] = jnp.zeros_like(pad_in)
    pad_a[...] = jnp.zeros_like(pad_a)
    pad_b[...] = jnp.zeros_like(pad_b)

    # ---- layer 1: 3 -> 64 ----
    pad_in[1:H + 1, 1:W + 1, :] = x_ref[0]
    y = _conv3x3_relu(pad_in, slab, w1_ref, b1_ref, H, W)        # (H*W, 64)
    pad_a[1:H + 1, 1:W + 1, :] = y.reshape(H, W, -1)

    # ---- layer 2: 64 -> 64 ----
    y = _conv3x3_relu(pad_a, slab, w2_ref, b2_ref, H, W)         # (H*W, 64)
    pad_a[1:H + 1, 1:W + 1, :] = y.reshape(H, W, -1)             # reuse buffer

    # ---- layer 3: 64 -> 128 ----
    y = _conv3x3_relu(pad_a, slab, w3_ref, b3_ref, H, W)         # (H*W, 128)
    pad_b[1:H + 1, 1:W + 1, :] = y.reshape(H, W, -1)

    # ---- layer 4: 128 -> 128 ----
    y = _conv3x3_relu(pad_b, slab, w4_ref, b4_ref, H, W)         # (H*W, 128)
    o_ref[0] = y.reshape(H, W, -1).astype(o_ref.dtype)           # lane-dense


def custom_cnn_fused(x_nhwc, params):
    """Fused 4-layer CNN forward. x_nhwc: (N, H, W, 3) f32 -> (N, H, W, 128)."""
    N, H, W, cin0 = x_nhwc.shape
    c_mid = params[1][0].shape[2]          # 64   (input channels of layers 2/3)
    c_big = params[3][0].shape[2]          # 128  (input channels of layer 4)
    c_out = params[3][0].shape[3]          # 128

    flat_args = []
    in_specs = [pl.BlockSpec((1, H, W, cin0), lambda n: (n, 0, 0, 0))]
    for (w, b) in params:
        kh, kw, ci, co = w.shape
        flat_args.append(w.reshape(kh * kw * ci, co))      # (9*Cin, Cout)
        flat_args.append(b.reshape(1, co))                  # (1, Cout)
        in_specs.append(pl.BlockSpec((kh * kw * ci, co), lambda n: (0, 0)))
        in_specs.append(pl.BlockSpec((1, co), lambda n: (0, 0)))

    kernel = functools.partial(_cnn_fused_kernel, H=H, W=W)
    return pl.pallas_call(
        kernel,
        out_shape=jax.ShapeDtypeStruct((N, H, W, c_out), jnp.float32),
        grid_spec=pltpu.PrefetchScalarGridSpec(
            num_scalar_prefetch=0,
            grid=(N,),
            in_specs=in_specs,
            out_specs=pl.BlockSpec((1, H, W, c_out), lambda n: (n, 0, 0, 0)),
            scratch_shapes=[
                pltpu.VMEM((H + 2, W + 2, cin0), jnp.float32),   # layer-1 input pad
                pltpu.VMEM((H + 2, W + 2, c_mid), jnp.float32),  # 64-ch activation pad
                pltpu.VMEM((H + 2, W + 2, c_big), jnp.float32),  # 128-ch activation pad
                pltpu.VMEM((H * W, 9 * c_big), jnp.float32),     # im2col slab (max K)
            ],
        ),
        compiler_params=pltpu.CompilerParams(
            dimension_semantics=("parallel",)),
    )(x_nhwc, *flat_args)


def init_params(key):
    """Deterministic synthetic parameters matching CustomCNN's layer shapes."""
    layer_io = [(3, 64), (64, 64), (64, 128), (128, 128)]
    params = []
    for (cin, cout) in layer_io:
        key, kw, kb = jax.random.split(key, 3)
        fan_in = cin * 9
        scale = 1.0 / jnp.sqrt(fan_in)
        w = jax.random.uniform(kw, (3, 3, cin, cout), jnp.float32,
                               minval=-scale, maxval=scale)
        b = jax.random.uniform(kb, (cout,), jnp.float32,
                               minval=-scale, maxval=scale)
        params.append((w, b))
    return params


@jax.jit
def custom_cnn_forward(x_nchw, params):
    """Forward pass of CustomCNN. Accepts NCHW (PyTorch convention)."""
    x = jnp.transpose(x_nchw, (0, 2, 3, 1))      # NCHW -> NHWC
    y = custom_cnn_fused(x, params)              # all 4 conv+ReLU layers fused
    return jnp.transpose(y, (0, 3, 1, 2))        # NHWC -> NCHW


def _reference_forward(x_nchw, params):
    """Pure-JAX reference (XLA conv) for a correctness sanity check."""
    x = jnp.transpose(x_nchw, (0, 2, 3, 1))
    for (w, b) in params:
        y = jax.lax.conv_general_dilated(
            x, w, window_strides=(1, 1), padding="SAME",
            dimension_numbers=("NHWC", "HWIO", "NHWC"))
        x = jnp.maximum(y + b, 0.0)
    return jnp.transpose(x, (0, 3, 1, 2))


if __name__ == "__main__":
    key = jax.random.PRNGKey(0)
    key, kx = jax.random.split(key)

    # Small NCHW input consistent with Conv2d(3, ...) first layer.
    x = jax.random.normal(kx, (2, 3, 16, 16), jnp.float32)
    params = init_params(key)

    out = custom_cnn_forward(x, params)
    out = jax.block_until_ready(out)
    assert out.shape == (2, 128, 16, 16), out.shape

    ref = jax.block_until_ready(_reference_forward(x, params))
    assert jnp.allclose(out, ref, atol=1e-3, rtol=1e-3), \
        float(jnp.max(jnp.abs(out - ref)))

    print("KERNEL_OK")
</pallas_src>

<mosaic_0001>
module attributes {stable_mosaic.version = 11 : i64} {
  func.func @_cnn_fused_kernel(%arg0: i32, %arg1: memref<1x16x16x3xf32, #tpu.memory_space<vmem>>, %arg2: memref<27x64xf32, #tpu.memory_space<vmem>>, %arg3: memref<1x64xf32, #tpu.memory_space<vmem>>, %arg4: memref<576x64xf32, #tpu.memory_space<vmem>>, %arg5: memref<1x64xf32, #tpu.memory_space<vmem>>, %arg6: memref<576x128xf32, #tpu.memory_space<vmem>>, %arg7: memref<1x128xf32, #tpu.memory_space<vmem>>, %arg8: memref<1152x128xf32, #tpu.memory_space<vmem>>, %arg9: memref<1x128xf32, #tpu.memory_space<vmem>>, %arg10: memref<1x16x16x128xf32, #tpu.memory_space<vmem>>, %arg11: memref<18x18x3xf32, #tpu.memory_space<vmem>>, %arg12: memref<18x18x64xf32, #tpu.memory_space<vmem>>, %arg13: memref<18x18x128xf32, #tpu.memory_space<vmem>>, %arg14: memref<256x1152xf32, #tpu.memory_space<vmem>>) attributes {dimension_semantics = [#tpu.dimension_semantics<parallel>], iteration_bounds = array<i64: 2>, scalar_prefetch = 0 : i64, scratch_operands = 4 : i64, tpu.core_type = #tpu.core_type<tc>, window_params = [{transform_indices = @transform_0, window_bounds = array<i64: 1, 16, 16, 3>}, {pipeline_mode = #tpu.pipeline_mode<synchronous>, transform_indices = @transform_1, window_bounds = array<i64: 27, 64>}, {pipeline_mode = #tpu.pipeline_mode<synchronous>, transform_indices = @transform_2, window_bounds = array<i64: 1, 64>}, {pipeline_mode = #tpu.pipeline_mode<synchronous>, transform_indices = @transform_3, window_bounds = array<i64: 576, 64>}, {pipeline_mode = #tpu.pipeline_mode<synchronous>, transform_indices = @transform_4, window_bounds = array<i64: 1, 64>}, {pipeline_mode = #tpu.pipeline_mode<synchronous>, transform_indices = @transform_5, window_bounds = array<i64: 576, 128>}, {pipeline_mode = #tpu.pipeline_mode<synchronous>, transform_indices = @transform_6, window_bounds = array<i64: 1, 128>}, {pipeline_mode = #tpu.pipeline_mode<synchronous>, transform_indices = @transform_7, window_bounds = array<i64: 1152, 128>}, {pipeline_mode = #tpu.pipeline_mode<synchronous>, transform_indices = @transform_8, window_bounds = array<i64: 1, 128>}, {transform_indices = @transform_9, window_bounds = array<i64: 1, 16, 16, 128>}]} {
    %cst = arith.constant 0.000000e+00 : f32
    %0 = vector.broadcast %cst : f32 to vector<18x18x3xf32>
    %c0 = arith.constant 0 : index
    %c0_0 = arith.constant 0 : index
    %c0_1 = arith.constant 0 : index
    %1 = vector.load %arg11[%c0, %c0_0, %c0_1] : memref<18x18x3xf32, #tpu.memory_space<vmem>>, vector<18x18x3xf32>
    tpu.vector_store %arg11[%c0, %c0_0, %c0_1], %0 {strides = array<i32>} : memref<18x18x3xf32, #tpu.memory_space<vmem>>, vector<18x18x3xf32>,
    %cst_2 = arith.constant 0.000000e+00 : f32
    %2 = vector.broadcast %cst_2 : f32 to vector<18x18x64xf32>
    %c0_3 = arith.constant 0 : index
    %c0_4 = arith.constant 0 : index
    %c0_5 = arith.constant 0 : index
    %3 = vector.load %arg12[%c0_3, %c0_4, %c0_5] : memref<18x18x64xf32, #tpu.memory_space<vmem>>, vector<18x18x64xf32>
    tpu.vector_store %arg12[%c0_3, %c0_4, %c0_5], %2 {strides = array<i32>} : memref<18x18x64xf32, #tpu.memory_space<vmem>>, vector<18x18x64xf32>,
    %cst_6 = arith.constant 0.000000e+00 : f32
    %4 = vector.broadcast %cst_6 : f32 to vector<18x18x128xf32>
    %c0_7 = arith.constant 0 : index
    %c0_8 = arith.constant 0 : index
    %c0_9 = arith.constant 0 : index
    %5 = vector.load %arg13[%c0_7, %c0_8, %c0_9] : memref<18x18x128xf32, #tpu.memory_space<vmem>>, vector<18x18x128xf32>
    tpu.vector_store %arg13[%c0_7, %c0_8, %c0_9], %4 {strides = array<i32>} : memref<18x18x128xf32, #tpu.memory_space<vmem>>, vector<18x18x128xf32>,
    %c0_10 = arith.constant 0 : index
    %c0_11 = arith.constant 0 : index
    %c0_12 = arith.constant 0 : index
    %c0_13 = arith.constant 0 : index
    %6 = vector.load %arg1[%c0_10, %c0_11, %c0_12, %c0_13] : memref<1x16x16x3xf32, #tpu.memory_space<vmem>>, vector<1x16x16x3xf32>
    %7 = vector.shape_cast %6 : vector<1x16x16x3xf32> to vector<16x16x3xf32>
    %c1 = arith.constant 1 : index
    %c1_14 = arith.constant 1 : index
    %c0_15 = arith.constant 0 : index
    %8 = vector.load %arg11[%c1, %c1_14, %c0_15] : memref<18x18x3xf32, #tpu.memory_space<vmem>>, vector<16x16x3xf32>
    tpu.vector_store %arg11[%c1, %c1_14, %c0_15], %7 {strides = array<i32>} : memref<18x18x3xf32, #tpu.memory_space<vmem>>, vector<16x16x3xf32>,
    %c0_16 = arith.constant 0 : index
    %c0_17 = arith.constant 0 : index
    %c0_18 = arith.constant 0 : index
    %9 = vector.load %arg11[%c0_16, %c0_17, %c0_18] : memref<18x18x3xf32, #tpu.memory_space<vmem>>, vector<16x16x3xf32>
    %10 = vector.shape_cast %9 : vector<16x16x3xf32> to vector<256x3xf32>
    %c0_19 = arith.constant 0 : index
    %c0_20 = arith.constant 0 : index
    %11 = vector.load %arg14[%c0_19, %c0_20] : memref<256x1152xf32, #tpu.memory_space<vmem>>, vector<256x3xf32>
    tpu.vector_store %arg14[%c0_19, %c0_20], %10 {strides = array<i32>} : memref<256x1152xf32, #tpu.memory_space<vmem>>, vector<256x3xf32>,
    %c0_21 = arith.constant 0 : index
    %c1_22 = arith.constant 1 : index
    %c0_23 = arith.constant 0 : index
    %12 = vector.load %arg11[%c0_21, %c1_22, %c0_23] : memref<18x18x3xf32, #tpu.memory_space<vmem>>, vector<16x16x3xf32>
    %13 = vector.shape_cast %12 : vector<16x16x3xf32> to vector<256x3xf32>
    %c0_24 = arith.constant 0 : index
    %c3 = arith.constant 3 : index
    %14 = vector.load %arg14[%c0_24, %c3] : memref<256x1152xf32, #tpu.memory_space<vmem>>, vector<256x3xf32>
    tpu.vector_store %arg14[%c0_24, %c3], %13 {strides = array<i32>} : memref<256x1152xf32, #tpu.memory_space<vmem>>, vector<256x3xf32>,
    %c0_25 = arith.constant 0 : index
    %c2 = arith.constant 2 : index
    %c0_26 = arith.constant 0 : index
    %15 = vector.load %arg11[%c0_25, %c2, %c0_26] : memref<18x18x3xf32, #tpu.memory_space<vmem>>, vector<16x16x3xf32>
    %16 = vector.shape_cast %15 : vector<16x16x3xf32> to vector<256x3xf32>
    %c0_27 = arith.constant 0 : index
    %c6 = arith.constant 6 : index
    %17 = vector.load %arg14[%c0_27, %c6] : memref<256x1152xf32, #tpu.memory_space<vmem>>, vector<256x3xf32>
    tpu.vector_store %arg14[%c0_27, %c6], %16 {strides = array<i32>} : memref<256x1152xf32, #tpu.memory_space<vmem>>, vector<256x3xf32>,
    %c1_28 = arith.constant 1 : index
    %c0_29 = arith.constant 0 : index
    %c0_30 = arith.constant 0 : index
    %18 = vector.load %arg11[%c1_28, %c0_29, %c0_30] : memref<18x18x3xf32, #tpu.memory_space<vmem>>, vector<16x16x3xf32>
    %19 = vector.shape_cast %18 : vector<16x16x3xf32> to vector<256x3xf32>
    %c0_31 = arith.constant 0 : index
    %c9 = arith.constant 9 : index
    %20 = vector.load %arg14[%c0_31, %c9] : memref<256x1152xf32, #tpu.memory_space<vmem>>, vector<256x3xf32>
    tpu.vector_store %arg14[%c0_31, %c9], %19 {strides = array<i32>} : memref<256x1152xf32, #tpu.memory_space<vmem>>, vector<256x3xf32>,
    %c1_32 = arith.constant 1 : index
    %c1_33 = arith.constant 1 : index
    %c0_34 = arith.constant 0 : index
    %21 = vector.load %arg11[%c1_32, %c1_33, %c0_34] : memref<18x18x3xf32, #tpu.memory_space<vmem>>, vector<16x16x3xf32>
    %22 = vector.shape_cast %21 : vector<16x16x3xf32> to vector<256x3xf32>
    %c0_35 = arith.constant 0 : index
    %c12 = arith.constant 12 : index
    %23 = vector.load %arg14[%c0_35, %c12] : memref<256x1152xf32, #tpu.memory_space<vmem>>, vector<256x3xf32>
    tpu.vector_store %arg14[%c0_35, %c12], %22 {strides = array<i32>} : memref<256x1152xf32, #tpu.memory_space<vmem>>, vector<256x3xf32>,
    %c1_36 = arith.constant 1 : index
    %c2_37 = arith.constant 2 : index
    %c0_38 = arith.constant 0 : index
    %24 = vector.load %arg11[%c1_36, %c2_37, %c0_38] : memref<18x18x3xf32, #tpu.memory_space<vmem>>, vector<16x16x3xf32>
    %25 = vector.shape_cast %24 : vector<16x16x3xf32> to vector<256x3xf32>
    %c0_39 = arith.constant 0 : index
    %c15 = arith.constant 15 : index
    %26 = vector.load %arg14[%c0_39, %c15] : memref<256x1152xf32, #tpu.memory_space<vmem>>, vector<256x3xf32>
    tpu.vector_store %arg14[%c0_39, %c15], %25 {strides = array<i32>} : memref<256x1152xf32, #tpu.memory_space<vmem>>, vector<256x3xf32>,
    %c2_40 = arith.constant 2 : index
    %c0_41 = arith.constant 0 : index
    %c0_42 = arith.constant 0 : index
    %27 = vector.load %arg11[%c2_40, %c0_41, %c0_42] : memref<18x18x3xf32, #tpu.memory_space<vmem>>, vector<16x16x3xf32>
    %28 = vector.shape_cast %27 : vector<16x16x3xf32> to vector<256x3xf32>
    %c0_43 = arith.constant 0 : index
    %c18 = arith.constant 18 : index
    %29 = vector.load %arg14[%c0_43, %c18] : memref<256x1152xf32, #tpu.memory_space<vmem>>, vector<256x3xf32>
    tpu.vector_store %arg14[%c0_43, %c18], %28 {strides = array<i32>} : memref<256x1152xf32, #tpu.memory_space<vmem>>, vector<256x3xf32>,
    %c2_44 = arith.constant 2 : index
    %c1_45 = arith.constant 1 : index
    %c0_46 = arith.constant 0 : index
    %30 = vector.load %arg11[%c2_44, %c1_45, %c0_46] : memref<18x18x3xf32, #tpu.memory_space<vmem>>, vector<16x16x3xf32>
    %31 = vector.shape_cast %30 : vector<16x16x3xf32> to vector<256x3xf32>
    %c0_47 = arith.constant 0 : index
    %c21 = arith.constant 21 : index
    %32 = vector.load %arg14[%c0_47, %c21] : memref<256x1152xf32, #tpu.memory_space<vmem>>, vector<256x3xf32>
    tpu.vector_store %arg14[%c0_47, %c21], %31 {strides = array<i32>} : memref<256x1152xf32, #tpu.memory_space<vmem>>, vector<256x3xf32>,
    %c2_48 = arith.constant 2 : index
    %c2_49 = arith.constant 2 : index
    %c0_50 = arith.constant 0 : index
    %33 = vector.load %arg11[%c2_48, %c2_49, %c0_50] : memref<18x18x3xf32, #tpu.memory_space<vmem>>, vector<16x16x3xf32>
    %34 = vector.shape_cast %33 : vector<16x16x3xf32> to vector<256x3xf32>
    %c0_51 = arith.constant 0 : index
    %c24 = arith.constant 24 : index
    %35 = vector.load %arg14[%c0_51, %c24] : memref<256x1152xf32, #tpu.memory_space<vmem>>, vector<256x3xf32>
    tpu.vector_store %arg14[%c0_51, %c24], %34 {strides = array<i32>} : memref<256x1152xf32, #tpu.memory_space<vmem>>, vector<256x3xf32>,
    %c0_52 = arith.constant 0 : index
    %c0_53 = arith.constant 0 : index
    %36 = vector.load %arg14[%c0_52, %c0_53] : memref<256x1152xf32, #tpu.memory_space<vmem>>, vector<256x27xf32>
    %c0_54 = arith.constant 0 : index
    %c0_55 = arith.constant 0 : index
    %37 = vector.load %arg2[%c0_54, %c0_55] : memref<27x64xf32, #tpu.memory_space<vmem>>, vector<27x64xf32>
    %cst_56 = arith.constant dense<0.000000e+00> : vector<256x64xf32>
    %38 = tpu.matmul %36, %37, %cst_56 {dimension_numbers = #tpu.dot_dimension_numbers<[1], [0], [0], [1], [0, 0, 1, 1], [], []>} : vector<256x27xf32>, vector<27x64xf32>, vector<256x64xf32> -> vector<256x64xf32>
    %c0_57 = arith.constant 0 : index
    %c0_58 = arith.constant 0 : index
    %39 = vector.load %arg3[%c0_57, %c0_58] : memref<1x64xf32, #tpu.memory_space<vmem>>, vector<1x64xf32>
    %40 = vector.broadcast %39 : vector<1x64xf32> to vector<256x64xf32>
    %41 = arith.addf %38, %40 : vector<256x64xf32>
    %cst_59 = arith.constant 0.000000e+00 : f32
    %42 = vector.broadcast %cst_59 : f32 to vector<256x64xf32>
    %43 = arith.maximumf %41, %42 : vector<256x64xf32>
    %44 = vector.shape_cast %43 : vector<256x64xf32> to vector<16x16x64xf32>
    %c1_60 = arith.constant 1 : index
    %c1_61 = arith.constant 1 : index
    %c0_62 = arith.constant 0 : index
    %45 = vector.load %arg12[%c1_60, %c1_61, %c0_62] : memref<18x18x64xf32, #tpu.memory_space<vmem>>, vector<16x16x64xf32>
    tpu.vector_store %arg12[%c1_60, %c1_61, %c0_62], %44 {strides = array<i32>} : memref<18x18x64xf32, #tpu.memory_space<vmem>>, vector<16x16x64xf32>,
    %c0_63 = arith.constant 0 : index
    %c0_64 = arith.constant 0 : index
    %c0_65 = arith.constant 0 : index
    %46 = vector.load %arg12[%c0_63, %c0_64, %c0_65] : memref<18x18x64xf32, #tpu.memory_space<vmem>>, vector<16x16x64xf32>
    %47 = vector.shape_cast %46 : vector<16x16x64xf32> to vector<256x64xf32>
    %c0_66 = arith.constant 0 : index
    %c0_67 = arith.constant 0 : index
    %48 = vector.load %arg14[%c0_66, %c0_67] : memref<256x1152xf32, #tpu.memory_space<vmem>>, vector<256x64xf32>
    tpu.vector_store %arg14[%c0_66, %c0_67], %47 {strides = array<i32>} : memref<256x1152xf32, #tpu.memory_space<vmem>>, vector<256x64xf32>,
    %c0_68 = arith.constant 0 : index
    %c1_69 = arith.constant 1 : index
    %c0_70 = arith.constant 0 : index
    %49 = vector.load %arg12[%c0_68, %c1_69, %c0_70] : memref<18x18x64xf32, #tpu.memory_space<vmem>>, vector<16x16x64xf32>
    %50 = vector.shape_cast %49 : vector<16x16x64xf32> to vector<256x64xf32>
    %c0_71 = arith.constant 0 : index
    %c64 = arith.constant 64 : index
    %51 = vector.load %arg14[%c0_71, %c64] : memref<256x1152xf32, #tpu.memory_space<vmem>>, vector<256x64xf32>
    tpu.vector_store %arg14[%c0_71, %c64], %50 {strides = array<i32>} : memref<256x1152xf32, #tpu.memory_space<vmem>>, vector<256x64xf32>,
    %c0_72 = arith.constant 0 : index
    %c2_73 = arith.constant 2 : index
    %c0_74 = arith.constant 0 : index
    %52 = vector.load %arg12[%c0_72, %c2_73, %c0_74] : memref<18x18x64xf32, #tpu.memory_space<vmem>>, vector<16x16x64xf32>
    %53 = vector.shape_cast %52 : vector<16x16x64xf32> to vector<256x64xf32>
    %c0_75 = arith.constant 0 : index
    %c128 = arith.constant 128 : index
    %54 = vector.load %arg14[%c0_75, %c128] : memref<256x1152xf32, #tpu.memory_space<vmem>>, vector<256x64xf32>
    tpu.vector_store %arg14[%c0_75, %c128], %53 {strides = array<i32>} : memref<256x1152xf32, #tpu.memory_space<vmem>>, vector<256x64xf32>,
    %c1_76 = arith.constant 1 : index
    %c0_77 = arith.constant 0 : index
    %c0_78 = arith.constant 0 : index
    %55 = vector.load %arg12[%c1_76, %c0_77, %c0_78] : memref<18x18x64xf32, #tpu.memory_space<vmem>>, vector<16x16x64xf32>
    %56 = vector.shape_cast %55 : vector<16x16x64xf32> to vector<256x64xf32>
    %c0_79 = arith.constant 0 : index
    %c192 = arith.constant 192 : index
    %57 = vector.load %arg14[%c0_79, %c192] : memref<256x1152xf32, #tpu.memory_space<vmem>>, vector<256x64xf32>
    tpu.vector_store %arg14[%c0_79, %c192], %56 {strides = array<i32>} : memref<256x1152xf32, #tpu.memory_space<vmem>>, vector<256x64xf32>,
    %c1_80 = arith.constant 1 : index
    %c1_81 = arith.constant 1 : index
    %c0_82 = arith.constant 0 : index
    %58 = vector.load %arg12[%c1_80, %c1_81, %c0_82] : memref<18x18x64xf32, #tpu.memory_space<vmem>>, vector<16x16x64xf32>
    %59 = vector.shape_cast %58 : vector<16x16x64xf32> to vector<256x64xf32>
    %c0_83 = arith.constant 0 : index
    %c256 = arith.constant 256 : index
    %60 = vector.load %arg14[%c0_83, %c256] : memref<256x1152xf32, #tpu.memory_space<vmem>>, vector<256x64xf32>
    tpu.vector_store %arg14[%c0_83, %c256], %59 {strides = array<i32>} : memref<256x1152xf32, #tpu.memory_space<vmem>>, vector<256x64xf32>,
    %c1_84 = arith.constant 1 : index
    %c2_85 = arith.constant 2 : index
    %c0_86 = arith.constant 0 : index
    %61 = vector.load %arg12[%c1_84, %c2_85, %c0_86] : memref<18x18x64xf32, #tpu.memory_space<vmem>>, vector<16x16x64xf32>
    %62 = vector.shape_cast %61 : vector<16x16x64xf32> to vector<256x64xf32>
    %c0_87 = arith.constant 0 : index
    %c320 = arith.constant 320 : index
    %63 = vector.load %arg14[%c0_87, %c320] : memref<256x1152xf32, #tpu.memory_space<vmem>>, vector<256x64xf32>
    tpu.vector_store %arg14[%c0_87, %c320], %62 {strides = array<i32>} : memref<256x1152xf32, #tpu.memory_space<vmem>>, vector<256x64xf32>,
    %c2_88 = arith.constant 2 : index
    %c0_89 = arith.constant 0 : index
    %c0_90 = arith.constant 0 : index
    %64 = vector.load %arg12[%c2_88, %c0_89, %c0_90] : memref<18x18x64xf32, #tpu.memory_space<vmem>>, vector<16x16x64xf32>
    %65 = vector.shape_cast %64 : vector<16x16x64xf32> to vector<256x64xf32>
    %c0_91 = arith.constant 0 : index
    %c384 = arith.constant 384 : index
    %66 = vector.load %arg14[%c0_91, %c384] : memref<256x1152xf32, #tpu.memory_space<vmem>>, vector<256x64xf32>
    tpu.vector_store %arg14[%c0_91, %c384], %65 {strides = array<i32>} : memref<256x1152xf32, #tpu.memory_space<vmem>>, vector<256x64xf32>,
    %c2_92 = arith.constant 2 : index
    %c1_93 = arith.constant 1 : index
    %c0_94 = arith.constant 0 : index
    %67 = vector.load %arg12[%c2_92, %c1_93, %c0_94] : memref<18x18x64xf32, #tpu.memory_space<vmem>>, vector<16x16x64xf32>
    %68 = vector.shape_cast %67 : vector<16x16x64xf32> to vector<256x64xf32>
    %c0_95 = arith.constant 0 : index
    %c448 = arith.constant 448 : index
    %69 = vector.load %arg14[%c0_95, %c448] : memref<256x1152xf32, #tpu.memory_space<vmem>>, vector<256x64xf32>
    tpu.vector_store %arg14[%c0_95, %c448], %68 {strides = array<i32>} : memref<256x1152xf32, #tpu.memory_space<vmem>>, vector<256x64xf32>,
    %c2_96 = arith.constant 2 : index
    %c2_97 = arith.constant 2 : index
    %c0_98 = arith.constant 0 : index
    %70 = vector.load %arg12[%c2_96, %c2_97, %c0_98] : memref<18x18x64xf32, #tpu.memory_space<vmem>>, vector<16x16x64xf32>
    %71 = vector.shape_cast %70 : vector<16x16x64xf32> to vector<256x64xf32>
    %c0_99 = arith.constant 0 : index
    %c512 = arith.constant 512 : index
    %72 = vector.load %arg14[%c0_99, %c512] : memref<256x1152xf32, #tpu.memory_space<vmem>>, vector<256x64xf32>
    tpu.vector_store %arg14[%c0_99, %c512], %71 {strides = array<i32>} : memref<256x1152xf32, #tpu.memory_space<vmem>>, vector<256x64xf32>,
    %c0_100 = arith.constant 0 : index
    %c0_101 = arith.constant 0 : index
    %73 = vector.load %arg14[%c0_100, %c0_101] : memref<256x1152xf32, #tpu.memory_space<vmem>>, vector<256x576xf32>
    %c0_102 = arith.constant 0 : index
    %c0_103 = arith.constant 0 : index
    %74 = vector.load %arg4[%c0_102, %c0_103] : memref<576x64xf32, #tpu.memory_space<vmem>>, vector<576x64xf32>
    %cst_104 = arith.constant dense<0.000000e+00> : vector<256x64xf32>
    %75 = tpu.matmul %73, %74, %cst_104 {dimension_numbers = #tpu.dot_dimension_numbers<[1], [0], [0], [1], [0, 0, 1, 1], [], []>} : vector<256x576xf32>, vector<576x64xf32>, vector<256x64xf32> -> vector<256x64xf32>
    %c0_105 = arith.constant 0 : index
    %c0_106 = arith.constant 0 : index
    %76 = vector.load %arg5[%c0_105, %c0_106] : memref<1x64xf32, #tpu.memory_space<vmem>>, vector<1x64xf32>
    %77 = vector.broadcast %76 : vector<1x64xf32> to vector<256x64xf32>
    %78 = arith.addf %75, %77 : vector<256x64xf32>
    %cst_107 = arith.constant 0.000000e+00 : f32
    %79 = vector.broadcast %cst_107 : f32 to vector<256x64xf32>
    %80 = arith.maximumf %78, %79 : vector<256x64xf32>
    %81 = vector.shape_cast %80 : vector<256x64xf32> to vector<16x16x64xf32>
    %c1_108 = arith.constant 1 : index
    %c1_109 = arith.constant 1 : index
    %c0_110 = arith.constant 0 : index
    %82 = vector.load %arg12[%c1_108, %c1_109, %c0_110] : memref<18x18x64xf32, #tpu.memory_space<vmem>>, vector<16x16x64xf32>
    tpu.vector_store %arg12[%c1_108, %c1_109, %c0_110], %81 {strides = array<i32>} : memref<18x18x64xf32, #tpu.memory_space<vmem>>, vector<16x16x64xf32>,
    %c0_111 = arith.constant 0 : index
    %c0_112 = arith.constant 0 : index
    %c0_113 = arith.constant 0 : index
    %83 = vector.load %arg12[%c0_111, %c0_112, %c0_113] : memref<18x18x64xf32, #tpu.memory_space<vmem>>, vector<16x16x64xf32>
    %84 = vector.shape_cast %83 : vector<16x16x64xf32> to vector<256x64xf32>
    %c0_114 = arith.constant 0 : index
    %c0_115 = arith.constant 0 : index
    %85 = vector.load %arg14[%c0_114, %c0_115] : memref<256x1152xf32, #tpu.memory_space<vmem>>, vector<256x64xf32>
    tpu.vector_store %arg14[%c0_114, %c0_115], %84 {strides = array<i32>} : memref<256x1152xf32, #tpu.memory_space<vmem>>, vector<256x64xf32>,
    %c0_116 = arith.constant 0 : index
    %c1_117 = arith.constant 1 : index
    %c0_118 = arith.constant 0 : index
    %86 = vector.load %arg12[%c0_116, %c1_117, %c0_118] : memref<18x18x64xf32, #tpu.memory_space<vmem>>, vector<16x16x64xf32>
    %87 = vector.shape_cast %86 : vector<16x16x64xf32> to vector<256x64xf32>
    %c0_119 = arith.constant 0 : index
    %c64_120 = arith.constant 64 : index
    %88 = vector.load %arg14[%c0_119, %c64_120] : memref<256x1152xf32, #tpu.memory_space<vmem>>, vector<256x64xf32>
    tpu.vector_store %arg14[%c0_119, %c64_120], %87 {strides = array<i32>} : memref<256x1152xf32, #tpu.memory_space<vmem>>, vector<256x64xf32>,
    %c0_121 = arith.constant 0 : index
    %c2_122 = arith.constant 2 : index
    %c0_123 = arith.constant 0 : index
    %89 = vector.load %arg12[%c0_121, %c2_122, %c0_123] : memref<18x18x64xf32, #tpu.memory_space<vmem>>, vector<16x16x64xf32>
    %90 = vector.shape_cast %89 : vector<16x16x64xf32> to vector<256x64xf32>
    %c0_124 = arith.constant 0 : index
    %c128_125 = arith.constant 128 : index
    %91 = vector.load %arg14[%c0_124, %c128_125] : memref<256x1152xf32, #tpu.memory_space<vmem>>, vector<256x64xf32>
    tpu.vector_store %arg14[%c0_124, %c128_125], %90 {strides = array<i32>} : memref<256x1152xf32, #tpu.memory_space<vmem>>, vector<256x64xf32>,
    %c1_126 = arith.constant 1 : index
    %c0_127 = arith.constant 0 : index
    %c0_128 = arith.constant 0 : index
    %92 = vector.load %arg12[%c1_126, %c0_127, %c0_128] : memref<18x18x64xf32, #tpu.memory_space<vmem>>, vector<16x16x64xf32>
    %93 = vector.shape_cast %92 : vector<16x16x64xf32> to vector<256x64xf32>
    %c0_129 = arith.constant 0 : index
    %c192_130 = arith.constant 192 : index
    %94 = vector.load %arg14[%c0_129, %c192_130] : memref<256x1152xf32, #tpu.memory_space<vmem>>, vector<256x64xf32>
    tpu.vector_store %arg14[%c0_129, %c192_130], %93 {strides = array<i32>} : memref<256x1152xf32, #tpu.memory_space<vmem>>, vector<256x64xf32>,
    %c1_131 = arith.constant 1 : index
    %c1_132 = arith.constant 1 : index
    %c0_133 = arith.constant 0 : index
    %95 = vector.load %arg12[%c1_131, %c1_132, %c0_133] : memref<18x18x64xf32, #tpu.memory_space<vmem>>, vector<16x16x64xf32>
    %96 = vector.shape_cast %95 : vector<16x16x64xf32> to vector<256x64xf32>
    %c0_134 = arith.constant 0 : index
    %c256_135 = arith.constant 256 : index
    %97 = vector.load %arg14[%c0_134, %c256_135] : memref<256x1152xf32, #tpu.memory_space<vmem>>, vector<256x64xf32>
    tpu.vector_store %arg14[%c0_134, %c256_135], %96 {strides = array<i32>} : memref<256x1152xf32, #tpu.memory_space<vmem>>, vector<256x64xf32>,
    %c1_136 = arith.constant 1 : index
    %c2_137 = arith.constant 2 : index
    %c0_138 = arith.constant 0 : index
    %98 = vector.load %arg12[%c1_136, %c2_137, %c0_138] : memref<18x18x64xf32, #tpu.memory_space<vmem>>, vector<16x16x64xf32>
    %99 = vector.shape_cast %98 : vector<16x16x64xf32> to vector<256x64xf32>
    %c0_139 = arith.constant 0 : index
    %c320_140 = arith.constant 320 : index
    %100 = vector.load %arg14[%c0_139, %c320_140] : memref<256x1152xf32, #tpu.memory_space<vmem>>, vector<256x64xf32>
    tpu.vector_store %arg14[%c0_139, %c320_140], %99 {strides = array<i32>} : memref<256x1152xf32, #tpu.memory_space<vmem>>, vector<256x64xf32>,
    %c2_141 = arith.constant 2 : index
    %c0_142 = arith.constant 0 : index
    %c0_143 = arith.constant 0 : index
    %101 = vector.load %arg12[%c2_141, %c0_142, %c0_143] : memref<18x18x64xf32, #tpu.memory_space<vmem>>, vector<16x16x64xf32>
    %102 = vector.shape_cast %101 : vector<16x16x64xf32> to vector<256x64xf32>
    %c0_144 = arith.constant 0 : index
    %c384_145 = arith.constant 384 : index
    %103 = vector.load %arg14[%c0_144, %c384_145] : memref<256x1152xf32, #tpu.memory_space<vmem>>, vector<256x64xf32>
    tpu.vector_store %arg14[%c0_144, %c384_145], %102 {strides = array<i32>} : memref<256x1152xf32, #tpu.memory_space<vmem>>, vector<256x64xf32>,
    %c2_146 = arith.constant 2 : index
    %c1_147 = arith.constant 1 : index
    %c0_148 = arith.constant 0 : index
    %104 = vector.load %arg12[%c2_146, %c1_147, %c0_148] : memref<18x18x64xf32, #tpu.memory_space<vmem>>, vector<16x16x64xf32>
    %105 = vector.shape_cast %104 : vector<16x16x64xf32> to vector<256x64xf32>
    %c0_149 = arith.constant 0 : index
    %c448_150 = arith.constant 448 : index
    %106 = vector.load %arg14[%c0_149, %c448_150] : memref<256x1152xf32, #tpu.memory_space<vmem>>, vector<256x64xf32>
    tpu.vector_store %arg14[%c0_149, %c448_150], %105 {strides = array<i32>} : memref<256x1152xf32, #tpu.memory_space<vmem>>, vector<256x64xf32>,
    %c2_151 = arith.constant 2 : index
    %c2_152 = arith.constant 2 : index
    %c0_153 = arith.constant 0 : index
    %107 = vector.load %arg12[%c2_151, %c2_152, %c0_153] : memref<18x18x64xf32, #tpu.memory_space<vmem>>, vector<16x16x64xf32>
    %108 = vector.shape_cast %107 : vector<16x16x64xf32> to vector<256x64xf32>
    %c0_154 = arith.constant 0 : index
    %c512_155 = arith.constant 512 : index
    %109 = vector.load %arg14[%c0_154, %c512_155] : memref<256x1152xf32, #tpu.memory_space<vmem>>, vector<256x64xf32>
    tpu.vector_store %arg14[%c0_154, %c512_155], %108 {strides = array<i32>} : memref<256x1152xf32, #tpu.memory_space<vmem>>, vector<256x64xf32>,
    %c0_156 = arith.constant 0 : index
    %c0_157 = arith.constant 0 : index
    %110 = vector.load %arg14[%c0_156, %c0_157] : memref<256x1152xf32, #tpu.memory_space<vmem>>, vector<256x576xf32>
    %c0_158 = arith.constant 0 : index
    %c0_159 = arith.constant 0 : index
    %111 = vector.load %arg6[%c0_158, %c0_159] : memref<576x128xf32, #tpu.memory_space<vmem>>, vector<576x128xf32>
    %cst_160 = arith.constant dense<0.000000e+00> : vector<256x128xf32>
    %112 = tpu.matmul %110, %111, %cst_160 {dimension_numbers = #tpu.dot_dimension_numbers<[1], [0], [0], [1], [0, 0, 1, 1], [], []>} : vector<256x576xf32>, vector<576x128xf32>, vector<256x128xf32> -> vector<256x128xf32>
    %c0_161 = arith.constant 0 : index
    %c0_162 = arith.constant 0 : index
    %113 = vector.load %arg7[%c0_161, %c0_162] : memref<1x128xf32, #tpu.memory_space<vmem>>, vector<1x128xf32>
    %114 = vector.broadcast %113 : vector<1x128xf32> to vector<256x128xf32>
    %115 = arith.addf %112, %114 : vector<256x128xf32>
    %cst_163 = arith.constant 0.000000e+00 : f32
    %116 = vector.broadcast %cst_163 : f32 to vector<256x128xf32>
    %117 = arith.maximumf %115, %116 : vector<256x128xf32>
    %118 = vector.shape_cast %117 : vector<256x128xf32> to vector<16x16x128xf32>
    %c1_164 = arith.constant 1 : index
    %c1_165 = arith.constant 1 : index
    %c0_166 = arith.constant 0 : index
    %119 = vector.load %arg13[%c1_164, %c1_165, %c0_166] : memref<18x18x128xf32, #tpu.memory_space<vmem>>, vector<16x16x128xf32>
    tpu.vector_store %arg13[%c1_164, %c1_165, %c0_166], %118 {strides = array<i32>} : memref<18x18x128xf32, #tpu.memory_space<vmem>>, vector<16x16x128xf32>,
    %c0_167 = arith.constant 0 : index
    %c0_168 = arith.constant 0 : index
    %c0_169 = arith.constant 0 : index
    %120 = vector.load %arg13[%c0_167, %c0_168, %c0_169] : memref<18x18x128xf32, #tpu.memory_space<vmem>>, vector<16x16x128xf32>
    %121 = vector.shape_cast %120 : vector<16x16x128xf32> to vector<256x128xf32>
    %c0_170 = arith.constant 0 : index
    %c0_171 = arith.constant 0 : index
    %122 = vector.load %arg14[%c0_170, %c0_171] : memref<256x1152xf32, #tpu.memory_space<vmem>>, vector<256x128xf32>
    tpu.vector_store %arg14[%c0_170, %c0_171], %121 {strides = array<i32>} : memref<256x1152xf32, #tpu.memory_space<vmem>>, vector<256x128xf32>,
    %c0_172 = arith.constant 0 : index
    %c1_173 = arith.constant 1 : index
    %c0_174 = arith.constant 0 : index
    %123 = vector.load %arg13[%c0_172, %c1_173, %c0_174] : memref<18x18x128xf32, #tpu.memory_space<vmem>>, vector<16x16x128xf32>
    %124 = vector.shape_cast %123 : vector<16x16x128xf32> to vector<256x128xf32>
    %c0_175 = arith.constant 0 : index
    %c128_176 = arith.constant 128 : index
    %125 = vector.load %arg14[%c0_175, %c128_176] : memref<256x1152xf32, #tpu.memory_space<vmem>>, vector<256x128xf32>
    tpu.vector_store %arg14[%c0_175, %c128_176], %124 {strides = array<i32>} : memref<256x1152xf32, #tpu.memory_space<vmem>>, vector<256x128xf32>,
    %c0_177 = arith.constant 0 : index
    %c2_178 = arith.constant 2 : index
    %c0_179 = arith.constant 0 : index
    %126 = vector.load %arg13[%c0_177, %c2_178, %c0_179] : memref<18x18x128xf32, #tpu.memory_space<vmem>>, vector<16x16x128xf32>
    %127 = vector.shape_cast %126 : vector<16x16x128xf32> to vector<256x128xf32>
    %c0_180 = arith.constant 0 : index
    %c256_181 = arith.constant 256 : index
    %128 = vector.load %arg14[%c0_180, %c256_181] : memref<256x1152xf32, #tpu.memory_space<vmem>>, vector<256x128xf32>
    tpu.vector_store %arg14[%c0_180, %c256_181], %127 {strides = array<i32>} : memref<256x1152xf32, #tpu.memory_space<vmem>>, vector<256x128xf32>,
    %c1_182 = arith.constant 1 : index
    %c0_183 = arith.constant 0 : index
    %c0_184 = arith.constant 0 : index
    %129 = vector.load %arg13[%c1_182, %c0_183, %c0_184] : memref<18x18x128xf32, #tpu.memory_space<vmem>>, vector<16x16x128xf32>
    %130 = vector.shape_cast %129 : vector<16x16x128xf32> to vector<256x128xf32>
    %c0_185 = arith.constant 0 : index
    %c384_186 = arith.constant 384 : index
    %131 = vector.load %arg14[%c0_185, %c384_186] : memref<256x1152xf32, #tpu.memory_space<vmem>>, vector<256x128xf32>
    tpu.vector_store %arg14[%c0_185, %c384_186], %130 {strides = array<i32>} : memref<256x1152xf32, #tpu.memory_space<vmem>>, vector<256x128xf32>,
    %c1_187 = arith.constant 1 : index
    %c1_188 = arith.constant 1 : index
    %c0_189 = arith.constant 0 : index
    %132 = vector.load %arg13[%c1_187, %c1_188, %c0_189] : memref<18x18x128xf32, #tpu.memory_space<vmem>>, vector<16x16x128xf32>
    %133 = vector.shape_cast %132 : vector<16x16x128xf32> to vector<256x128xf32>
    %c0_190 = arith.constant 0 : index
    %c512_191 = arith.constant 512 : index
    %134 = vector.load %arg14[%c0_190, %c512_191] : memref<256x1152xf32, #tpu.memory_space<vmem>>, vector<256x128xf32>
    tpu.vector_store %arg14[%c0_190, %c512_191], %133 {strides = array<i32>} : memref<256x1152xf32, #tpu.memory_space<vmem>>, vector<256x128xf32>,
    %c1_192 = arith.constant 1 : index
    %c2_193 = arith.constant 2 : index
    %c0_194 = arith.constant 0 : index
    %135 = vector.load %arg13[%c1_192, %c2_193, %c0_194] : memref<18x18x128xf32, #tpu.memory_space<vmem>>, vector<16x16x128xf32>
    %136 = vector.shape_cast %135 : vector<16x16x128xf32> to vector<256x128xf32>
    %c0_195 = arith.constant 0 : index
    %c640 = arith.constant 640 : index
    %137 = vector.load %arg14[%c0_195, %c640] : memref<256x1152xf32, #tpu.memory_space<vmem>>, vector<256x128xf32>
    tpu.vector_store %arg14[%c0_195, %c640], %136 {strides = array<i32>} : memref<256x1152xf32, #tpu.memory_space<vmem>>, vector<256x128xf32>,
    %c2_196 = arith.constant 2 : index
    %c0_197 = arith.constant 0 : index
    %c0_198 = arith.constant 0 : index
    %138 = vector.load %arg13[%c2_196, %c0_197, %c0_198] : memref<18x18x128xf32, #tpu.memory_space<vmem>>, vector<16x16x128xf32>
    %139 = vector.shape_cast %138 : vector<16x16x128xf32> to vector<256x128xf32>
    %c0_199 = arith.constant 0 : index
    %c768 = arith.constant 768 : index
    %140 = vector.load %arg14[%c0_199, %c768] : memref<256x1152xf32, #tpu.memory_space<vmem>>, vector<256x128xf32>
    tpu.vector_store %arg14[%c0_199, %c768], %139 {strides = array<i32>} : memref<256x1152xf32, #tpu.memory_space<vmem>>, vector<256x128xf32>,
    %c2_200 = arith.constant 2 : index
    %c1_201 = arith.constant 1 : index
    %c0_202 = arith.constant 0 : index
    %141 = vector.load %arg13[%c2_200, %c1_201, %c0_202] : memref<18x18x128xf32, #tpu.memory_space<vmem>>, vector<16x16x128xf32>
    %142 = vector.shape_cast %141 : vector<16x16x128xf32> to vector<256x128xf32>
    %c0_203 = arith.constant 0 : index
    %c896 = arith.constant 896 : index
    %143 = vector.load %arg14[%c0_203, %c896] : memref<256x1152xf32, #tpu.memory_space<vmem>>, vector<256x128xf32>
    tpu.vector_store %arg14[%c0_203, %c896], %142 {strides = array<i32>} : memref<256x1152xf32, #tpu.memory_space<vmem>>, vector<256x128xf32>,
    %c2_204 = arith.constant 2 : index
    %c2_205 = arith.constant 2 : index
    %c0_206 = arith.constant 0 : index
    %144 = vector.load %arg13[%c2_204, %c2_205, %c0_206] : memref<18x18x128xf32, #tpu.memory_space<vmem>>, vector<16x16x128xf32>
    %145 = vector.shape_cast %144 : vector<16x16x128xf32> to vector<256x128xf32>
    %c0_207 = arith.constant 0 : index
    %c1024 = arith.constant 1024 : index
    %146 = vector.load %arg14[%c0_207, %c1024] : memref<256x1152xf32, #tpu.memory_space<vmem>>, vector<256x128xf32>
    tpu.vector_store %arg14[%c0_207, %c1024], %145 {strides = array<i32>} : memref<256x1152xf32, #tpu.memory_space<vmem>>, vector<256x128xf32>,
    %c0_208 = arith.constant 0 : index
    %c0_209 = arith.constant 0 : index
    %147 = vector.load %arg14[%c0_208, %c0_209] : memref<256x1152xf32, #tpu.memory_space<vmem>>, vector<256x1152xf32>
    %c0_210 = arith.constant 0 : index
    %c0_211 = arith.constant 0 : index
    %148 = vector.load %arg8[%c0_210, %c0_211] : memref<1152x128xf32, #tpu.memory_space<vmem>>, vector<1152x128xf32>
    %cst_212 = arith.constant dense<0.000000e+00> : vector<256x128xf32>
    %149 = tpu.matmul %147, %148, %cst_212 {dimension_numbers = #tpu.dot_dimension_numbers<[1], [0], [0], [1], [0, 0, 1, 1], [], []>} : vector<256x1152xf32>, vector<1152x128xf32>, vector<256x128xf32> -> vector<256x128xf32>
    %c0_213 = arith.constant 0 : index
    %c0_214 = arith.constant 0 : index
    %150 = vector.load %arg9[%c0_213, %c0_214] : memref<1x128xf32, #tpu.memory_space<vmem>>, vector<1x128xf32>
    %151 = vector.broadcast %150 : vector<1x128xf32> to vector<256x128xf32>
    %152 = arith.addf %149, %151 : vector<256x128xf32>
    %cst_215 = arith.constant 0.000000e+00 : f32
    %153 = vector.broadcast %cst_215 : f32 to vector<256x128xf32>
    %154 = arith.maximumf %152, %153 : vector<256x128xf32>
    %155 = vector.shape_cast %154 : vector<256x128xf32> to vector<16x16x128xf32>
    %c0_216 = arith.constant 0 : index
    %c0_217 = arith.constant 0 : index
    %c0_218 = arith.constant 0 : index
    %c0_219 = arith.constant 0 : index
    %156 = vector.load %arg10[%c0_216, %c0_217, %c0_218, %c0_219] : memref<1x16x16x128xf32, #tpu.memory_space<vmem>>, vector<1x16x16x128xf32>
    %157 = vector.shape_cast %156 : vector<1x16x16x128xf32> to vector<16x16x128xf32>
    %158 = vector.shape_cast %155 : vector<16x16x128xf32> to vector<1x16x16x128xf32>
    tpu.vector_store %arg10[%c0_216, %c0_217, %c0_218, %c0_219], %158 {strides = array<i32>} : memref<1x16x16x128xf32, #tpu.memory_space<vmem>>, vector<1x16x16x128xf32>,
    return
  }
  func.func @transform_0(%arg0: i32) -> (i32, i32, i32, i32) {
    %c0_i32 = arith.constant 0 : i32
    %c0_i32_0 = arith.constant 0 : i32
    %c0_i32_1 = arith.constant 0 : i32
    %c0_i32_2 = arith.constant 0 : i32
    return %arg0, %c0_i32, %c0_i32_0, %c0_i32_1 : i32, i32, i32, i32
  }
  func.func @transform_1(%arg0: i32) -> (i32, i32) {
    %c0_i32 = arith.constant 0 : i32
    %c0_i32_0 = arith.constant 0 : i32
    %c0_i32_1 = arith.constant 0 : i32
    return %c0_i32, %c0_i32_0 : i32, i32
  }
  func.func @transform_2(%arg0: i32) -> (i32, i32) {
    %c0_i32 = arith.constant 0 : i32
    %c0_i32_0 = arith.constant 0 : i32
    %c0_i32_1 = arith.constant 0 : i32
    return %c0_i32, %c0_i32_0 : i32, i32
  }
  func.func @transform_3(%arg0: i32) -> (i32, i32) {
    %c0_i32 = arith.constant 0 : i32
    %c0_i32_0 = arith.constant 0 : i32
    %c0_i32_1 = arith.constant 0 : i32
    return %c0_i32, %c0_i32_0 : i32, i32
  }
  func.func @transform_4(%arg0: i32) -> (i32, i32) {
    %c0_i32 = arith.constant 0 : i32
    %c0_i32_0 = arith.constant 0 : i32
    %c0_i32_1 = arith.constant 0 : i32
    return %c0_i32, %c0_i32_0 : i32, i32
  }
  func.func @transform_5(%arg0: i32) -> (i32, i32) {
    %c0_i32 = arith.constant 0 : i32
    %c0_i32_0 = arith.constant 0 : i32
    %c0_i32_1 = arith.constant 0 : i32
    return %c0_i32, %c0_i32_0 : i32, i32
  }
  func.func @transform_6(%arg0: i32) -> (i32, i32) {
    %c0_i32 = arith.constant 0 : i32
    %c0_i32_0 = arith.constant 0 : i32
    %c0_i32_1 = arith.constant 0 : i32
    return %c0_i32, %c0_i32_0 : i32, i32
  }
  func.func @transform_7(%arg0: i32) -> (i32, i32) {
    %c0_i32 = arith.constant 0 : i32
    %c0_i32_0 = arith.constant 0 : i32
    %c0_i32_1 = arith.constant 0 : i32
    return %c0_i32, %c0_i32_0 : i32, i32
  }
  func.func @transform_8(%arg0: i32) -> (i32, i32) {
    %c0_i32 = arith.constant 0 : i32
    %c0_i32_0 = arith.constant 0 : i32
    %c0_i32_1 = arith.constant 0 : i32
    return %c0_i32, %c0_i32_0 : i32, i32
  }
  func.func @transform_9(%arg0: i32) -> (i32, i32, i32, i32) {
    %c0_i32 = arith.constant 0 : i32
    %c0_i32_0 = arith.constant 0 : i32
    %c0_i32_1 = arith.constant 0 : i32
    %c0_i32_2 = arith.constant 0 : i32
    return %arg0, %c0_i32, %c0_i32_0, %c0_i32_1 : i32, i32, i32, i32
  }
}

</mosaic_0001>

<bundles_post_ra>
// kernel: custom_cnn_forward.1
= control target key start
LH: loop header
LB: loop body
LE: loop exit
PB: predicated region body
PF: predicated region fallthrough
CT: control target
= control target key end

     0   :  { %14 = vsyncpa [#allocation7], 0  ;;  %s14980_s0 = inlined_call_operand.vmem [shape: f32[2,16,16,3], index: 0, kind: input, shape index: {}]   ;;  %s14981_s1 = inlined_call_operand.vmem [shape: f32[27,64], index: 1, kind: input, shape index: {}]   ;;  %s14982_s2 = inlined_call_operand.vmem [shape: f32[1,64], index: 2, kind: input, shape index: {}]   ;;  %s14983_s3 = inlined_call_operand.vmem [shape: f32[576,64], index: 3, kind: input, shape index: {}]   ;;  %s14984_s4 = inlined_call_operand.vmem [shape: f32[1,64], index: 4, kind: input, shape index: {}]   ;;  %s14985_s5 = inlined_call_operand.hbm [shape: f32[576,128], index: 5, kind: input, shape index: {}]   ;;  %s14986_s6 = inlined_call_operand.vmem [shape: f32[1,128], index: 6, kind: input, shape index: {}]   ;;  %s14987_s7 = inlined_call_operand.hbm [shape: f32[1152,128], index: 7, kind: input, shape index: {}]   ;;  %s14988_s8 = inlined_call_operand.vmem [shape: f32[1,128], index: 8, kind: input, shape index: {}]   ;;  %s14989_s9 = inlined_call_operand.hbm [shape: f32[2,16,16,128], index: 9, kind: output, shape index: {}]  }
   0x1   :  { %15 = vsyncpa [#allocation10], 0 }
   0x2   :  { %16 = vsyncpa [#allocation8], 0 }
   0x3   :  { %18 = vsyncpa [#allocation8 + $0x1], 0  ;;  %s10259_s30 = smov 0   ;;  %s10261_s10 = smov 0  }
   0x4   :  { %s10263_s11 = smov 0   ;;  %s10265_s12 = smov 0  }
   0x5 LB: > { %s10280_s13 = sadd.s32 4294967295, %s10190_s12   ;;  %s9265_s14 = sadd.s32 4294967294, %s10190_s12   ;;  %s10190_s12 = sphi %s10265_s12, %s15024_s12   ;;  %s10186_s11 = sphi %s10263_s11, %s15023_s11   ;;  %s10182_s10 = sphi %s10261_s10, %s15022_s10   ;;  %s10178_s30 = sphi %s10259_s30, %s15021_s30  }
   0x6   : > { %s10284_s15 = sadd.s32 1, %s10190_s12   ;;  %s225_s16 = sadd.s32 1, %s10186_s11 }
   0x7   : > { %s222_s17 = ssub.s32 %s10190_s12, %s10284_s15  ;;  %p235_p0 = scmp.ne.s32.totalorder %s10186_s11, %s10182_s10 }
   0x8   : > { %p223_p1 = scmp.eq.s32.totalorder %s222_s17, 0  ;;  %p236_p2 = scmp.eq.s32.totalorder %s10280_s13, 1 }
   0x9   : > { %p241_p3 = scmp.ne.s32.totalorder %s10182_s10, %s10178_s30  ;;  %p242_p4 = scmp.eq.s32.totalorder %s9265_s14, 1 }
   0xa   : > { %s10295_s18 = scalar_select %p223_p1, %s10186_s11, %s225_s16  }
   0xb   : > { %p10297_p5 = por %p236_p2, %p235_p0  ;;  %p10301_p6 = por %p242_p4, %p241_p3 }
   0xc   : > { %p9266_p7 = scmp.ge.s32.totalorder %s10190_s12, 1  ;;  %p249_p8 = scmp.lt.s32.totalorder %s10190_s12, 3 }
   0xd   : > { %s14997_s20 = scalar_select %p10301_p6, 1, 0 }
   0xe   : > { %p14990_p9 = scmp.eq.s32.totalorder %s10280_s13, 0  ;;  %p10308_p10 = pnand %p9266_p7, %p249_p8 }
   0xf   : > { %s10192_s22 = smov [#allocation6]   ;;  %s10193_s25 = smov [#allocation9]  }
  0x10   : > { %s273_s23 = sshll.u32 %s10192_s22, 4  ;;  %p9886_p11 = pneg %p10308_p10  ;;  %s274_s23 = int_to_ptr.vmem [resolvable:$true] %s273_s23 }
  0x11   : > { %s289_s26 = sshll.u32 %s10193_s25, 4  ;;  %s10081_s27 = scalar_lea.vmem %s274_s23, 9216  ;;  %s290_s26 = int_to_ptr.vmem [resolvable:$true] %s289_s26 }
  0x12   : > { %p10316_p12 = pnand %p14990_p9, %p9886_p11  ;;  %p10082_p0 = scmp.ne.s32.totalorder %s274_s23, %s10081_s27 }
  0x13   : > { %p10089_p3 = scmp.lt.s32.totalorder %s274_s23, %s274_s23  ;;  %p10090_p4 = scmp.lt.s32.totalorder %s10081_s27, %s10081_s27 }
  0x14   : > { %p10072_p13 = pneg %p10316_p12 }
  0x15   : > { %p10091_p7 = por %p10090_p4, %p10089_p3 }
  0x16   : > { %p10084_p1 = pnand %p10082_p0, %p10072_p13 }
  0x18   : > { %p10085_p2 = pneg %p10084_p1 }
  0x1a   : > { %p10092_p8 = pnand %p10091_p7, %p10085_p2 }
  0x1c   : > { %10095 = shalt.err (!%p10092_p8)
}
  0x1d   : > { %s10194_s28 = smov 128   ;;  %s10195_s29 = smov 8  }
  0x1e   : > { %9889 = dma.hbm_to_vmem [thread:$0]  (!%p10316_p12), %s14985_s5, 9216, %s274_s23, [#allocation7], %s10194_s28, %s10194_s28, %s10195_s29  }
  0x1f   : > { %s10107_s17 = scalar_lea.vmem %s290_s26, 18432  ;;  %p10115_p9 = scmp.lt.s32.totalorder %s290_s26, %s290_s26 }
  0x20   : > { %p10108_p11 = scmp.ne.s32.totalorder %s290_s26, %s10107_s17  ;;  %p10116_p6 = scmp.lt.s32.totalorder %s10107_s17, %s10107_s17 }
  0x22   : > { %p10110_p0 = pnand %p10108_p11, %p10072_p13  ;;  %p10117_p3 = por %p10116_p6, %p10115_p9 }
  0x24   : > { %p10111_p1 = pneg %p10110_p0 }
  0x26   : > { %p10118_p2 = pnand %p10117_p3, %p10111_p1 }
  0x28   : > { %10121 = shalt.err (!%p10118_p2)
}
  0x29   : > { %9892 = dma.hbm_to_vmem [thread:$0]  (!%p10316_p12), %s14987_s7, 18432, %s290_s26, [#allocation10], %s10194_s28, %s10194_s28, %s10195_s29  }
  0x2a   : > { %316 = sbr.rel (%p10308_p10) target bundleno = 2310 (0x906), region = 56 }
  0x2f   : > { %p15000_p4 = scmp.eq.s32.totalorder %s10280_s13, 0 }
  0x31   : > { %10165 = dma.done.wait (%p15000_p4), [#allocation7], 9216   ;;  %p15001_p13 = pmov %p15000_p4 }
  0x32   : > { %p15002_p7 = pmov %p15000_p4 }
  0x33   : > { %10167 = vsyncadd (%p15001_p13), [#allocation7], 4294958080 }
  0x34   : > { %10169 = dma.done.wait (%p15002_p7), [#allocation10], 18432   ;;  %p15003_p6 = pmov %p15000_p4 }
  0x35   : > { %vm361_vm0 = vcmask 23552   ;;  %v10196_v0 = vmov 0.0   ;;  %vm364_vm1 = vcmask 17408   ;;  %p356_p9 = scmp.lt.s32.totalorder %s10280_s13, 1  ;;  %s10197_s28 = smov 6   ;;  %vm2341_vm2 = vcmask 1042432  }
  0x36   : > { %10171 = vsyncadd (%p15003_p6), [#allocation10], 4294948864  ;;  %362 = vst.msk [vmem:[#allocation2] sm:$0xff] %vm361_vm0, %v10196_v0  ;;  %4060 = vmatprep.subr.mxu1 %v10196_v0  ;;  %s10198_s29 = smov 3   ;;  %s10199_s14 = smov 9   ;;  %v2235_v34 = vld [vmem:[%s14981_s1 + $0x10] sm:$0xff] }
  0x37   : > { %363 = vst.msk [vmem:[#allocation2 + $0x8] sm:$0xff] %vm361_vm0, %v10196_v0  ;;  %366 = vst.msk [vmem:[#allocation2 + $0x18] sm:$0xff] %vm361_vm0, %v10196_v0  ;;  %s357_s21 = scalar_select %p356_p9, %s10280_s13, 1  ;;  %v2236_v33 = vld [vmem:[%s14981_s1 + $0x18] sm:$0x7]  ;;  %v2234_v37 = vld [vmem:[%s14981_s1 + $0x8] sm:$0xff] }
  0x38   : > { %367 = vst.msk [vmem:[#allocation2 + $0x20] sm:$0xff] %vm361_vm0, %v10196_v0  ;;  %369 = vst.msk [vmem:[#allocation2 + $0x30] sm:$0xff] %vm361_vm0, %v10196_v0  ;;  %s10200_s16 = smov 12   ;;  %s10201_s17 = smov 15   ;;  %9548 = vmatprep.subr.msk.mxu0 %vm2341_vm2, %v2236_v33  ;;  %vm417_vm3 = vcmask 523264   ;;  %v2233_v41 = vld [vmem:[%s14981_s1] sm:$0xff] }
  0x39   : > { %370 = vst.msk [vmem:[#allocation2 + $0x38] sm:$0xff] %vm361_vm0, %v10196_v0  ;;  %372 = vst.msk [vmem:[#allocation2 + $0x48] sm:$0xff] %vm361_vm0, %v10196_v0  ;;  %s9382_s23 = sshll.u32 %s357_s21, 8  ;;  %s10202_s21 = smov 18   ;;  %9549 = vmatpush3.msk.msra.mxu0 %vm2341_vm2, %v2236_v33  ;;  %vm816_vm4 = vcmask 48152   ;;  %vm1009_vm5 = vcmask 72752  }
  0x3a   : > { %373 = vst.msk [vmem:[#allocation2 + $0x50] sm:$0xff] %vm361_vm0, %v10196_v0  ;;  %375 = vst.msk [vmem:[#allocation2 + $0x60] sm:$0xff] %vm361_vm0, %v10196_v0  ;;  %s10518_s27 = scalar_lea.vmem %s14980_s0, %s9382_s23  ;;  %9550 = vmatprep.subr.mxu0 %v2235_v34  ;;  %s10203_s25 = smov 21   ;;  %vm1202_vm6 = vcmask 97352   ;;  %vm1395_vm7 = vcmask 121952   ;;  %vm1588_vm8 = vcmask 146552  }
  0x3b   : > { %376 = vst.msk [vmem:[#allocation2 + $0x68] sm:$0xff] %vm361_vm0, %v10196_v0  ;;  %378 = vst.msk [vmem:[#allocation2 + $0x78] sm:$0xff] %vm361_vm0, %v10196_v0  ;;  %v527_v1 = vld [vmem:[%s10518_s27] sm:$0xff]  ;;  %v528_v2 = vld [vmem:[%s10518_s27 + $0x8] sm:$0xff]  ;;  %9551 = vmatpush3.msra.mxu0 %v2235_v34  ;;  %s10204_s26 = smov 24   ;;  %vm1782_vm9 = vcmask 171152  }
  0x3c   : > { %379 = vst.msk [vmem:[#allocation2 + $0x80] sm:$0xff] %vm361_vm0, %v10196_v0  ;;  %381 = vst.msk [vmem:[#allocation2 + $0x90] sm:$0xff] %vm361_vm0, %v10196_v0  ;;  %v529_v3 = vld [vmem:[%s10518_s27 + $0x10] sm:$0xff]  ;;  %v530_v6 = vld [vmem:[%s10518_s27 + $0x18] sm:$0xff]  ;;  %9552 = vmatprep.subr.mxu0 %v2234_v37  ;;  %vm1975_vm10 = vcmask 195752   ;;  %vm2168_vm11 = vcmask 220352  }
  0x3d   : > { %382 = vst.msk [vmem:[#allocation2 + $0x98] sm:$0xff] %vm361_vm0, %v10196_v0  ;;  %384 = vst.msk [vmem:[#allocation2 + $0xa8] sm:$0xff] %vm361_vm0, %v10196_v0  ;;  %v531_v9 = vld [vmem:[%s10518_s27 + $0x20] sm:$0xff]  ;;  %v532_v10 = vld [vmem:[%s10518_s27 + $0x28] sm:$0xff]  ;;  %9553 = vmatpush3.msra.mxu0 %v2234_v37  ;;  %vm2244_vm12 = vcmask 220160   ;;  %vm420_vm13 = vcmask 517120  }
  0x3e   : > { %385 = vst.msk [vmem:[#allocation2 + $0xb0] sm:$0xff] %vm361_vm0, %v10196_v0  ;;  %387 = vst.msk [vmem:[#allocation2 + $0xc0] sm:$0xff] %vm361_vm0, %v10196_v0  ;;  %v849_v4 = vld [vmem:[#allocation2 + $0x2] sm:$0xff]  ;;  %v533_v11 = vld [vmem:[%s10518_s27 + $0x30] sm:$0xff]  ;;  %9554 = vmatprep.subr.mxu0 %v2233_v41  ;;  %vm2859_vm14 = vcmask 1048064  }
  0x3f   : > { %388 = vst.msk [vmem:[#allocation2 + $0xc8] sm:$0xff] %vm361_vm0, %v10196_v0  ;;  %390 = vst.msk [vmem:[#allocation2 + $0xd8] sm:$0xff] %vm361_vm0, %v10196_v0  ;;  %v656_v5 = vld [vmem:[#allocation2 + $0x1] sm:$0xff]  ;;  %913 = vrot.lane.b32.xlu1 %v849_v4, %s10197_s28  ;;  %v534_v12 = vld [vmem:[%s10518_s27 + $0x38] sm:$0xff]  ;;  %9555 = vmatpush3.msra.mxu0 %v2233_v41 }
  0x40   : > { %391 = vst.msk [vmem:[#allocation2 + $0xe0] sm:$0xff] %vm361_vm0, %v10196_v0  ;;  %393 = vst.msk [vmem:[#allocation2 + $0xf0] sm:$0xff] %vm361_vm0, %v10196_v0  ;;  %720 = vrot.lane.b32.xlu0 %v656_v5, %s10198_s29  ;;  %v592_v13 = vld [vmem:[#allocation2] sm:$0xff]  ;;  %v536_v15 = vld [vmem:[%s10518_s27 + $0x48] sm:$0xff]  ;;  %4285 = vmatprep.subr.mxu0 %v10196_v0 }
  0x41   : > { %394 = vst.msk [vmem:[#allocation2 + $0xf8] sm:$0xff] %vm361_vm0, %v10196_v0  ;;  %396 = vst.msk [vmem:[#allocation2 + $0x108] sm:$0xff] %vm361_vm0, %v10196_v0  ;;  %v535_v14 = vld [vmem:[%s10518_s27 + $0x40] sm:$0xff]  ;;  %v593_v16 = vld [vmem:[#allocation2 + $0x8] sm:$0xff] }
  0x42   : > { %397 = vst.msk [vmem:[#allocation2 + $0x110] sm:$0xff] %vm361_vm0, %v10196_v0  ;;  %399 = vst.msk [vmem:[#allocation2 + $0x120] sm:$0xff] %vm361_vm0, %v10196_v0  ;;  %v537_v31 = vld [vmem:[%s10518_s27 + $0x50] sm:$0xff]  ;;  %v538_v32 = vld [vmem:[%s10518_s27 + $0x58] sm:$0xff] }
  0x43   : > { %400 = vst.msk [vmem:[#allocation2 + $0x128] sm:$0xff] %vm361_vm0, %v10196_v0  ;;  %402 = vst.msk [vmem:[#allocation2 + $0x138] sm:$0xff] %vm361_vm0, %v10196_v0  ;;  %v539_v43 = vld [vmem:[%s10518_s27 + $0x60] sm:$0xff]  ;;  %v540_v44 = vld [vmem:[%s10518_s27 + $0x68] sm:$0xff] }
  0x44   : > { %403 = vst.msk [vmem:[#allocation2 + $0x140] sm:$0xff] %vm361_vm0, %v10196_v0  ;;  %405 = vst.msk [vmem:[#allocation2 + $0x150] sm:$0xff] %vm361_vm0, %v10196_v0  ;;  %v541_v51 = vld [vmem:[%s10518_s27 + $0x70] sm:$0xff]  ;;  %v542_v52 = vld [vmem:[%s10518_s27 + $0x78] sm:$0xff] }
  0x45   : > { %406 = vst.msk [vmem:[#allocation2 + $0x158] sm:$0xff] %vm361_vm0, %v10196_v0  ;;  %408 = vst.msk [vmem:[#allocation2 + $0x168] sm:$0xff] %vm361_vm0, %v10196_v0  ;;  %v543_v59 = vld [vmem:[%s10518_s27 + $0x80] sm:$0xff]  ;;  %v544_v60 = vld [vmem:[%s10518_s27 + $0x88] sm:$0xff] }
  0x46   : > { %409 = vst.msk [vmem:[#allocation2 + $0x170] sm:$0xff] %vm361_vm0, %v10196_v0  ;;  %411 = vst.msk [vmem:[#allocation2 + $0x180] sm:$0xff] %vm361_vm0, %v10196_v0 }
  0x47   : > { %412 = vst.msk [vmem:[#allocation2 + $0x188] sm:$0xff] %vm361_vm0, %v10196_v0  ;;  %414 = vst.msk [vmem:[#allocation2 + $0x198] sm:$0xff] %vm361_vm0, %v10196_v0 }
  0x48   : > { %415 = vst.msk [vmem:[#allocation2 + $0x1a0] sm:$0xff] %vm361_vm0, %v10196_v0  ;;  %473 = vst [vmem:[#allocation4] sm:$0xff] %v10196_v0 }
  0x49   : > { %474 = vst [vmem:[#allocation4 + $0x8] sm:$0xff] %v10196_v0  ;;  %475 = vst [vmem:[#allocation4 + $0x10] sm:$0x3] %v10196_v0 }
  0x4a   : > { %476 = vst [vmem:[#allocation4 + $0x18] sm:$0xff] %v10196_v0  ;;  %477 = vst [vmem:[#allocation4 + $0x20] sm:$0xff] %v10196_v0 }
  0x4b   : > { %478 = vst [vmem:[#allocation4 + $0x28] sm:$0x3] %v10196_v0  ;;  %479 = vst [vmem:[#allocation4 + $0x30] sm:$0xff] %v10196_v0 }
  0x4c   : > { %480 = vst [vmem:[#allocation4 + $0x38] sm:$0xff] %v10196_v0  ;;  %481 = vst [vmem:[#allocation4 + $0x40] sm:$0x3] %v10196_v0 }
  0x4d   : > { %482 = vst [vmem:[#allocation4 + $0x48] sm:$0xff] %v10196_v0  ;;  %483 = vst [vmem:[#allocation4 + $0x50] sm:$0xff] %v10196_v0 }
  0x4e   : > { %484 = vst [vmem:[#allocation4 + $0x58] sm:$0x3] %v10196_v0  ;;  %485 = vst [vmem:[#allocation4 + $0x60] sm:$0xff] %v10196_v0 }
  0x4f   : > { %486 = vst [vmem:[#allocation4 + $0x68] sm:$0xff] %v10196_v0  ;;  %487 = vst [vmem:[#allocation4 + $0x70] sm:$0x3] %v10196_v0 }
  0x50   : > { %488 = vst [vmem:[#allocation4 + $0x78] sm:$0xff] %v10196_v0  ;;  %489 = vst [vmem:[#allocation4 + $0x80] sm:$0xff] %v10196_v0 }
  0x51   : > { %490 = vst [vmem:[#allocation4 + $0x88] sm:$0x3] %v10196_v0  ;;  %491 = vst [vmem:[#allocation4 + $0x90] sm:$0xff] %v10196_v0 }
  0x52   : > { %492 = vst [vmem:[#allocation4 + $0x98] sm:$0xff] %v10196_v0  ;;  %493 = vst [vmem:[#allocation4 + $0xa0] sm:$0x3] %v10196_v0 }
  0x53   : > { %494 = vst [vmem:[#allocation4 + $0xa8] sm:$0xff] %v10196_v0  ;;  %495 = vst [vmem:[#allocation4 + $0xb0] sm:$0xff] %v10196_v0 }
  0x54   : > { %496 = vst [vmem:[#allocation4 + $0xb8] sm:$0x3] %v10196_v0  ;;  %497 = vst [vmem:[#allocation4 + $0xc0] sm:$0xff] %v10196_v0 }
  0x55   : > { %498 = vst [vmem:[#allocation4 + $0xc8] sm:$0xff] %v10196_v0  ;;  %499 = vst [vmem:[#allocation4 + $0xd0] sm:$0x3] %v10196_v0 }
  0x56   : > { %500 = vst [vmem:[#allocation4 + $0xd8] sm:$0xff] %v10196_v0  ;;  %501 = vst [vmem:[#allocation4 + $0xe0] sm:$0xff] %v10196_v0 }
  0x57   : > { %502 = vst [vmem:[#allocation4 + $0xe8] sm:$0x3] %v10196_v0  ;;  %503 = vst [vmem:[#allocation4 + $0xf0] sm:$0xff] %v10196_v0 }
  0x58   : > { %504 = vst [vmem:[#allocation4 + $0xf8] sm:$0xff] %v10196_v0  ;;  %505 = vst [vmem:[#allocation4 + $0x100] sm:$0x3] %v10196_v0 }
  0x59   : > { %506 = vst [vmem:[#allocation4 + $0x108] sm:$0xff] %v10196_v0  ;;  %507 = vst [vmem:[#allocation4 + $0x110] sm:$0xff] %v10196_v0 }
  0x5a   : > { %508 = vst [vmem:[#allocation4 + $0x118] sm:$0x3] %v10196_v0  ;;  %509 = vst [vmem:[#allocation4 + $0x120] sm:$0xff] %v10196_v0 }
  0x5b   : > { %510 = vst [vmem:[#allocation4 + $0x128] sm:$0xff] %v10196_v0  ;;  %511 = vst [vmem:[#allocation4 + $0x130] sm:$0x3] %v10196_v0 }
  0x5c   : > { %512 = vst [vmem:[#allocation4 + $0x138] sm:$0xff] %v10196_v0  ;;  %513 = vst [vmem:[#allocation4 + $0x140] sm:$0xff] %v10196_v0 }
  0x5d   : > { %514 = vst [vmem:[#allocation4 + $0x148] sm:$0x3] %v10196_v0  ;;  %515 = vst [vmem:[#allocation4 + $0x150] sm:$0xff] %v10196_v0 }
  0x5e   : > { %516 = vst [vmem:[#allocation4 + $0x158] sm:$0xff] %v10196_v0  ;;  %517 = vst [vmem:[#allocation4 + $0x160] sm:$0x3] %v10196_v0 }
  0x5f   : > { %518 = vst [vmem:[#allocation4 + $0x168] sm:$0xff] %v10196_v0  ;;  %519 = vst [vmem:[#allocation4 + $0x170] sm:$0xff] %v10196_v0 }
  0x60   : > { %520 = vst [vmem:[#allocation4 + $0x178] sm:$0x3] %v10196_v0  ;;  %521 = vst [vmem:[#allocation4 + $0x180] sm:$0xff] %v10196_v0 }
  0x61   : > { %522 = vst [vmem:[#allocation4 + $0x188] sm:$0xff] %v10196_v0  ;;  %523 = vst [vmem:[#allocation4 + $0x190] sm:$0x3] %v10196_v0 }
  0x62   : > { %524 = vst [vmem:[#allocation4 + $0x198] sm:$0xff] %v10196_v0  ;;  %525 = vst [vmem:[#allocation4 + $0x1a0] sm:$0xff] %v10196_v0 }
  0x63   : > { %526 = vst [vmem:[#allocation4 + $0x1a8] sm:$0x3] %v10196_v0  ;;  %365 = vst.msk [vmem:[#allocation2 + $0x10] sm:$0x3] %vm364_vm1, %v10196_v0 }
  0x64   : > { %368 = vst.msk [vmem:[#allocation2 + $0x28] sm:$0x3] %vm364_vm1, %v10196_v0  ;;  %371 = vst.msk [vmem:[#allocation2 + $0x40] sm:$0x3] %vm364_vm1, %v10196_v0 }
  0x65   : > { %374 = vst.msk [vmem:[#allocation2 + $0x58] sm:$0x3] %vm364_vm1, %v10196_v0  ;;  %377 = vst.msk [vmem:[#allocation2 + $0x70] sm:$0x3] %vm364_vm1, %v10196_v0 }
  0x66   : > { %380 = vst.msk [vmem:[#allocation2 + $0x88] sm:$0x3] %vm364_vm1, %v10196_v0  ;;  %383 = vst.msk [vmem:[#allocation2 + $0xa0] sm:$0x3] %vm364_vm1, %v10196_v0 }
  0x67   : > { %386 = vst.msk [vmem:[#allocation2 + $0xb8] sm:$0x3] %vm364_vm1, %v10196_v0  ;;  %389 = vst.msk [vmem:[#allocation2 + $0xd0] sm:$0x3] %vm364_vm1, %v10196_v0 }
  0x68   : > { %392 = vst.msk [vmem:[#allocation2 + $0xe8] sm:$0x3] %vm364_vm1, %v10196_v0  ;;  %395 = vst.msk [vmem:[#allocation2 + $0x100] sm:$0x3] %vm364_vm1, %v10196_v0 }
  0x69   : > { %398 = vst.msk [vmem:[#allocation2 + $0x118] sm:$0x3] %vm364_vm1, %v10196_v0  ;;  %401 = vst.msk [vmem:[#allocation2 + $0x130] sm:$0x3] %vm364_vm1, %v10196_v0 }
  0x6a   : > { %404 = vst.msk [vmem:[#allocation2 + $0x148] sm:$0x3] %vm364_vm1, %v10196_v0  ;;  %407 = vst.msk [vmem:[#allocation2 + $0x160] sm:$0x3] %vm364_vm1, %v10196_v0  ;;  %v850_v7 = vld [vmem:[#allocation2 + $0xa] sm:$0xff] }
  0x6b   : > { %410 = vst.msk [vmem:[#allocation2 + $0x178] sm:$0x3] %vm364_vm1, %v10196_v0  ;;  %413 = vst.msk [vmem:[#allocation2 + $0x190] sm:$0x3] %vm364_vm1, %v10196_v0  ;;  %v657_v8 = vld [vmem:[#allocation2 + $0x9] sm:$0xff]  ;;  %915 = vrot.lane.b32.xlu1 %v850_v7, %s10197_s28 }
  0x6c   : > { %416 = vst.msk [vmem:[#allocation2 + $0x1a8] sm:$0x3] %vm364_vm1, %v10196_v0  ;;  %722 = vrot.lane.b32.xlu0 %v657_v8, %s10198_s29 }
  0x6d   : > { %560 = vst.msk [vmem:[#allocation2 + $0x19] sm:$0xff] %vm361_vm0, %v527_v1  ;;  %561 = vst.msk [vmem:[#allocation2 + $0x21] sm:$0xff] %vm361_vm0, %v528_v2 }
  0x6e   : > { %562 = vst.msk [vmem:[#allocation2 + $0x31] sm:$0xff] %vm361_vm0, %v529_v3  ;;  %563 = vst.msk [vmem:[#allocation2 + $0x39] sm:$0xff] %vm361_vm0, %v530_v6 }
  0x6f   : > { %564 = vst.msk [vmem:[#allocation2 + $0x49] sm:$0xff] %vm361_vm0, %v531_v9  ;;  %565 = vst.msk [vmem:[#allocation2 + $0x51] sm:$0xff] %vm361_vm0, %v532_v10 }
  0x70   : > { %566 = vst.msk [vmem:[#allocation2 + $0x61] sm:$0xff] %vm361_vm0, %v533_v11  ;;  %567 = vst.msk [vmem:[#allocation2 + $0x69] sm:$0xff] %vm361_vm0, %v534_v12 }
  0x71   : > { %624 = vst.msk [vmem:[#allocation5] sm:$0xff] %vm361_vm0, %v592_v13  ;;  %568 = vst.msk [vmem:[#allocation2 + $0x79] sm:$0xff] %vm361_vm0, %v535_v14 }
  0x72   : > { %569 = vst.msk [vmem:[#allocation2 + $0x81] sm:$0xff] %vm361_vm0, %v536_v15  ;;  %625 = vst.msk [vmem:[#allocation5 + $0x48] sm:$0xff] %vm361_vm0, %v593_v16 }
  0x73   : > { %570 = vst.msk [vmem:[#allocation2 + $0x91] sm:$0xff] %vm361_vm0, %v537_v31  ;;  %571 = vst.msk [vmem:[#allocation2 + $0x99] sm:$0xff] %vm361_vm0, %v538_v32 }
  0x74   : > { %v1043_v17 = vld [vmem:[#allocation2 + $0x20] sm:$0xff]  ;;  %v1042_v18 = vld [vmem:[#allocation2 + $0x18] sm:$0xff]  ;;  %418 = vst.msk [vmem:[#allocation3] sm:$0xff] %vm417_vm3, %v10196_v0  ;;  %419 = vst.msk [vmem:[#allocation3 + $0x8] sm:$0xff] %vm417_vm3, %v10196_v0 }
  0x75   : > { %626 = vst.msk [vmem:[#allocation5 + $0x90] sm:$0xff] %vm361_vm0, %v1042_v18  ;;  %627 = vst.msk [vmem:[#allocation5 + $0xd8] sm:$0xff] %vm361_vm0, %v1043_v17  ;;  %1108 = vrot.lane.b32.xlu1 %v1043_v17, %s10199_s14  ;;  %1106 = vrot.lane.b32.xlu0 %v1042_v18, %s10199_s14  ;;  %v10550_v19 = vld [vmem:[#allocation2 + $0x38] sm:$0xff]  ;;  %v10552_v20 = vld [vmem:[#allocation2 + $0x30] sm:$0xff] }
  0x76   : > { %v10554_v21 = vld [vmem:[#allocation2 + $0x21] sm:$0xff]  ;;  %v10556_v22 = vld [vmem:[#allocation2 + $0x19] sm:$0xff]  ;;  %628 = vst.msk [vmem:[#allocation5 + $0x120] sm:$0xff] %vm361_vm0, %v10552_v20  ;;  %629 = vst.msk [vmem:[#allocation5 + $0x168] sm:$0xff] %vm361_vm0, %v10550_v19 }
  0x77   : > { %v10562_v23 = vld [vmem:[#allocation2 + $0x50] sm:$0xff]  ;;  %v10564_v24 = vld [vmem:[#allocation2 + $0x48] sm:$0xff]  ;;  %v10576_v26 = vld [vmem:[#allocation2 + $0x60] sm:$0xff]  ;;  %422 = vst.msk [vmem:[#allocation3 + $0x18] sm:$0xff] %vm417_vm3, %v10196_v0 }
  0x78   : > { %630 = vst.msk [vmem:[#allocation5 + $0x1b0] sm:$0xff] %vm361_vm0, %v10564_v24  ;;  %631 = vst.msk [vmem:[#allocation5 + $0x1f8] sm:$0xff] %vm361_vm0, %v10562_v23  ;;  %v10574_v25 = vld [vmem:[#allocation2 + $0x68] sm:$0xff]  ;;  %v10580_v28 = vld [vmem:[#allocation2 + $0x1a] sm:$0xff] }
  0x79   : > { %1301 = vrot.lane.b32.xlu1 %v10554_v21, %s10200_s16  ;;  %1299 = vrot.lane.b32.xlu0 %v10556_v22, %s10200_s16  ;;  %v10578_v27 = vld [vmem:[#allocation2 + $0x22] sm:$0xff]  ;;  %632 = vst.msk [vmem:[#allocation5 + $0x240] sm:$0xff] %vm361_vm0, %v10576_v26  ;;  %633 = vst.msk [vmem:[#allocation5 + $0x288] sm:$0xff] %vm361_vm0, %v10574_v25  ;;  %v10588_v30 = vld [vmem:[#allocation2 + $0x78] sm:$0xff] }
  0x7a   : > { %v10586_v29 = vld [vmem:[#allocation2 + $0x80] sm:$0xff]  ;;  %634 = vst.msk [vmem:[#allocation5 + $0x2d0] sm:$0xff] %vm361_vm0, %v10588_v30  ;;  %v10614_v36 = vld [vmem:[#allocation2 + $0x31] sm:$0xff]  ;;  %572 = vst.msk [vmem:[#allocation2 + $0xa9] sm:$0xff] %vm361_vm0, %v539_v43 }
  0x7b   : > { %635 = vst.msk [vmem:[#allocation5 + $0x318] sm:$0xff] %vm361_vm0, %v10586_v29  ;;  %v10612_v35 = vld [vmem:[#allocation2 + $0x39] sm:$0xff]  ;;  %v10625_v39 = vld [vmem:[#allocation2 + $0x90] sm:$0xff]  ;;  %573 = vst.msk [vmem:[#allocation2 + $0xb1] sm:$0xff] %vm361_vm0, %v540_v44 }
  0x7c   : > { %v10623_v38 = vld [vmem:[#allocation2 + $0x98] sm:$0xff]  ;;  %423 = vst.msk [vmem:[#allocation3 + $0x20] sm:$0xff] %vm417_vm3, %v10196_v0  ;;  %425 = vst.msk [vmem:[#allocation3 + $0x30] sm:$0xff] %vm417_vm3, %v10196_v0  ;;  %v1817_v48 = vld [vmem:[#allocation2 + $0x49] sm:$0xff] }
  0x7d   : > { %1494 = vrot.lane.b32.xlu1 %v10578_v27, %s10201_s17  ;;  %1492 = vrot.lane.b32.xlu0 %v10580_v28, %s10201_s17  ;;  %426 = vst.msk [vmem:[#allocation3 + $0x38] sm:$0xff] %vm417_vm3, %v10196_v0  ;;  %428 = vst.msk [vmem:[#allocation3 + $0x48] sm:$0xff] %vm417_vm3, %v10196_v0  ;;  %v2008_v40 = vld [vmem:[#allocation2 + $0x32] sm:$0xff]  ;;  %v2009_v42 = vld [vmem:[#allocation2 + $0x3a] sm:$0xff] }
  0x7e   : > { %429 = vst.msk [vmem:[#allocation3 + $0x50] sm:$0xff] %vm417_vm3, %v10196_v0  ;;  %431 = vst.msk [vmem:[#allocation3 + $0x60] sm:$0xff] %vm417_vm3, %v10196_v0  ;;  %v1818_v47 = vld [vmem:[#allocation2 + $0x51] sm:$0xff]  ;;  %v1820_v55 = vld [vmem:[#allocation2 + $0x69] sm:$0xff] }
  0x7f   : > { %432 = vst.msk [vmem:[#allocation3 + $0x68] sm:$0xff] %vm417_vm3, %v10196_v0  ;;  %434 = vst.msk [vmem:[#allocation3 + $0x78] sm:$0xff] %vm417_vm3, %v10196_v0  ;;  %v2010_v49 = vld [vmem:[#allocation2 + $0x4a] sm:$0xff]  ;;  %v2011_v50 = vld [vmem:[#allocation2 + $0x52] sm:$0xff] }
  0x80   : > { %435 = vst.msk [vmem:[#allocation3 + $0x80] sm:$0xff] %vm417_vm3, %v10196_v0  ;;  %437 = vst.msk [vmem:[#allocation3 + $0x90] sm:$0xff] %vm417_vm3, %v10196_v0  ;;  %v1819_v56 = vld [vmem:[#allocation2 + $0x61] sm:$0xff]  ;;  %v2013_v58 = vld [vmem:[#allocation2 + $0x6a] sm:$0xff] }
  0x81   : > { %1688 = vrot.lane.b32.xlu1 %v10550_v19, %s10202_s21  ;;  %1686 = vrot.lane.b32.xlu0 %v10552_v20, %s10202_s21  ;;  %438 = vst.msk [vmem:[#allocation3 + $0x98] sm:$0xff] %vm417_vm3, %v10196_v0  ;;  %440 = vst.msk [vmem:[#allocation3 + $0xa8] sm:$0xff] %vm417_vm3, %v10196_v0  ;;  %v10733_v46 = vld [vmem:[#allocation2 + $0xa8] sm:$0xff]  ;;  %v10813_v2 = vld [vmem:[#allocation2 + $0x79] sm:$0xff] }
  0x82   : > { %441 = vst.msk [vmem:[#allocation3 + $0xb0] sm:$0xff] %vm417_vm3, %v10196_v0  ;;  %443 = vst.msk [vmem:[#allocation3 + $0xc0] sm:$0xff] %vm417_vm3, %v10196_v0  ;;  %v10731_v45 = vld [vmem:[#allocation2 + $0xb0] sm:$0xff]  ;;  %v2012_v57 = vld [vmem:[#allocation2 + $0x62] sm:$0xff] }
  0x83   : > { %444 = vst.msk [vmem:[#allocation3 + $0xc8] sm:$0xff] %vm417_vm3, %v10196_v0  ;;  %446 = vst.msk [vmem:[#allocation3 + $0xd8] sm:$0xff] %vm417_vm3, %v10196_v0  ;;  %v10811_v1 = vld [vmem:[#allocation2 + $0x81] sm:$0xff]  ;;  %v545_v17 = vld [vmem:[%s10518_s27 + $0x90] sm:$0xff] }
  0x84   : > { %447 = vst.msk [vmem:[#allocation3 + $0xe0] sm:$0xff] %vm417_vm3, %v10196_v0  ;;  %449 = vst.msk [vmem:[#allocation3 + $0xf0] sm:$0xff] %vm417_vm3, %v10196_v0  ;;  %v10821_v5 = vld [vmem:[#allocation2 + $0x7a] sm:$0xff]  ;;  %v10828_v8 = vld [vmem:[#allocation2 + $0x82] sm:$0xff] }
  0x85   : > { %1881 = vrot.lane.b32.xlu1 %v10612_v35, %s10203_s25  ;;  %1879 = vrot.lane.b32.xlu0 %v10614_v36, %s10203_s25  ;;  %450 = vst.msk [vmem:[#allocation3 + $0xf8] sm:$0xff] %vm417_vm3, %v10196_v0  ;;  %452 = vst.msk [vmem:[#allocation3 + $0x108] sm:$0xff] %vm417_vm3, %v10196_v0  ;;  %v546_v18 = vld [vmem:[%s10518_s27 + $0x98] sm:$0xff] }
  0x86   : > { %453 = vst.msk [vmem:[#allocation3 + $0x110] sm:$0xff] %vm417_vm3, %v10196_v0  ;;  %455 = vst.msk [vmem:[#allocation3 + $0x120] sm:$0xff] %vm417_vm3, %v10196_v0  ;;  %v10887_v31 = vld [vmem:[#allocation2 + $0x92] sm:$0xff] }
  0x87   : > { %456 = vst.msk [vmem:[#allocation3 + $0x128] sm:$0xff] %vm417_vm3, %v10196_v0  ;;  %458 = vst.msk [vmem:[#allocation3 + $0x138] sm:$0xff] %vm417_vm3, %v10196_v0 }
  0x88   : > { %459 = vst.msk [vmem:[#allocation3 + $0x140] sm:$0xff] %vm417_vm3, %v10196_v0  ;;  %461 = vst.msk [vmem:[#allocation3 + $0x150] sm:$0xff] %vm417_vm3, %v10196_v0 }
  0x89   : > { %462 = vst.msk [vmem:[#allocation3 + $0x158] sm:$0xff] %vm417_vm3, %v10196_v0  ;;  %464 = vst.msk [vmem:[#allocation3 + $0x168] sm:$0xff] %vm417_vm3, %v10196_v0  ;;  %724 = vrot.lane.b32.xlu1 %v10556_v22, %s10198_s29  ;;  %2072 = vrot.lane.b32.xlu0 %v2008_v40, %s10204_s26 }
  0x8a   : > { %465 = vst.msk [vmem:[#allocation3 + $0x170] sm:$0xff] %vm417_vm3, %v10196_v0  ;;  %467 = vst.msk [vmem:[#allocation3 + $0x180] sm:$0xff] %vm417_vm3, %v10196_v0 }
  0x8b   : > { %468 = vst.msk [vmem:[#allocation3 + $0x188] sm:$0xff] %vm417_vm3, %v10196_v0  ;;  %470 = vst.msk [vmem:[#allocation3 + $0x198] sm:$0xff] %vm417_vm3, %v10196_v0 }
  0x8c   : > { %471 = vst.msk [vmem:[#allocation3 + $0x1a0] sm:$0xff] %vm417_vm3, %v10196_v0 }
  0x8d   : > { %636 = vst.msk [vmem:[#allocation5 + $0x360] sm:$0xff] %vm361_vm0, %v10625_v39  ;;  %637 = vst.msk [vmem:[#allocation5 + $0x3a8] sm:$0xff] %vm361_vm0, %v10623_v38  ;;  %726 = vrot.lane.b32.xlu1 %v10554_v21, %s10198_s29  ;;  %2074 = vrot.lane.b32.xlu0 %v2009_v42, %s10204_s26 }
  0x8e   : > { %638 = vst.msk [vmem:[#allocation5 + $0x3f0] sm:$0xff] %vm361_vm0, %v10733_v46  ;;  %639 = vst.msk [vmem:[#allocation5 + $0x438] sm:$0xff] %vm361_vm0, %v10731_v45 }
  0x8f   : > { %574 = vst.msk [vmem:[#allocation2 + $0xc1] sm:$0xff] %vm361_vm0, %v541_v51  ;;  %575 = vst.msk [vmem:[#allocation2 + $0xc9] sm:$0xff] %vm361_vm0, %v542_v52 }
  0x90   : > { %576 = vst.msk [vmem:[#allocation2 + $0xd9] sm:$0xff] %vm361_vm0, %v543_v59  ;;  %577 = vst.msk [vmem:[#allocation2 + $0xe1] sm:$0xff] %vm361_vm0, %v544_v60 }
  0x91   : > { %919 = vrot.lane.b32.xlu1 %v10578_v27, %s10197_s28  ;;  %917 = vrot.lane.b32.xlu0 %v10580_v28, %s10197_s28  ;;  %578 = vst.msk [vmem:[#allocation2 + $0xf1] sm:$0xff] %vm361_vm0, %v545_v17  ;;  %579 = vst.msk [vmem:[#allocation2 + $0xf9] sm:$0xff] %vm361_vm0, %v546_v18  ;;  %v10877_v27 = vld [vmem:[#allocation2 + $0x91] sm:$0xff] }
  0x95   : > { %1112 = vrot.lane.b32.xlu1 %v10550_v19, %s10199_s14  ;;  %1110 = vrot.lane.b32.xlu0 %v10552_v20, %s10199_s14 }
  0x96   : > { %v10765_v53 = vld [vmem:[#allocation2 + $0xc8] sm:$0xff]  ;;  %v10767_v54 = vld [vmem:[#allocation2 + $0xc0] sm:$0xff] }
  0x97   : > { %640 = vst.msk [vmem:[#allocation5 + $0x480] sm:$0xff] %vm361_vm0, %v10767_v54  ;;  %641 = vst.msk [vmem:[#allocation5 + $0x4c8] sm:$0xff] %vm361_vm0, %v10765_v53  ;;  %v10798_v63 = vld [vmem:[#allocation2 + $0xe0] sm:$0xff]  ;;  %v10800_v0 = vld [vmem:[#allocation2 + $0xd8] sm:$0xff] }
  0x98   : > { %642 = vst.msk [vmem:[#allocation5 + $0x510] sm:$0xff] %vm361_vm0, %v10800_v0  ;;  %643 = vst.msk [vmem:[#allocation5 + $0x558] sm:$0xff] %vm361_vm0, %v10798_v63  ;;  %v11016_v18 = vld [vmem:[#allocation2 + $0xc9] sm:$0xff] }
  0x99   : > { %1305 = vrot.lane.b32.xlu1 %v10612_v35, %s10200_s16  ;;  %1303 = vrot.lane.b32.xlu0 %v10614_v36, %s10200_s16 }
  0x9d   : > { %1498 = vrot.lane.b32.xlu1 %v2009_v42, %s10201_s17  ;;  %1496 = vrot.lane.b32.xlu0 %v2008_v40, %s10201_s17 }
  0xa1   : > { %1692 = vrot.lane.b32.xlu1 %v10562_v23, %s10202_s21  ;;  %1690 = vrot.lane.b32.xlu0 %v10564_v24, %s10202_s21 }
  0xa5   : > { %1885 = vrot.lane.b32.xlu1 %v1818_v47, %s10203_s25  ;;  %1883 = vrot.lane.b32.xlu0 %v1817_v48, %s10203_s25 }
  0xa9   : > { %728 = vrot.lane.b32.xlu1 %v10614_v36, %s10198_s29  ;;  %2076 = vrot.lane.b32.xlu0 %v2010_v49, %s10204_s26 }
  0xad   : > { %730 = vrot.lane.b32.xlu1 %v10612_v35, %s10198_s29  ;;  %2078 = vrot.lane.b32.xlu0 %v2011_v50, %s10204_s26  ;;  %v10896_v35 = vld [vmem:[#allocation2 + $0x9a] sm:$0xff] }
  0xb1   : > { %923 = vrot.lane.b32.xlu1 %v2009_v42, %s10197_s28  ;;  %921 = vrot.lane.b32.xlu0 %v2008_v40, %s10197_s28  ;;  %v914_v61 = vpop.permute.xlu1 %913 }
  0xb2   : > { %v721_v62 = vpop.permute.xlu0 %720 }
  0xb3   : > { %817 = vst.msk [vmem:[#allocation5] sm:$0xff] %vm816_vm4, %v721_v62 }
  0xb4   : > { %1010 = vst.msk [vmem:[#allocation5] sm:$0xff] %vm1009_vm5, %v914_v61  ;;  %v10957_v61 = vld [vmem:[#allocation2 + $0xaa] sm:$0xff] }
  0xb5   : > { %1116 = vrot.lane.b32.xlu1 %v10562_v23, %s10199_s14  ;;  %1114 = vrot.lane.b32.xlu0 %v10564_v24, %s10199_s14  ;;  %v10863_v23 = vld [vmem:[#allocation2 + $0xf8] sm:$0xff]  ;;  %v10865_v24 = vld [vmem:[#allocation2 + $0xf0] sm:$0xff] }
  0xb6   : > { %644 = vst.msk [vmem:[#allocation5 + $0x5a0] sm:$0xff] %vm361_vm0, %v10865_v24  ;;  %645 = vst.msk [vmem:[#allocation5 + $0x5e8] sm:$0xff] %vm361_vm0, %v10863_v23 }
  0xb9   : > { %1309 = vrot.lane.b32.xlu1 %v1818_v47, %s10200_s16  ;;  %1307 = vrot.lane.b32.xlu0 %v1817_v48, %s10200_s16 }
  0xbd   : > { %1502 = vrot.lane.b32.xlu1 %v2011_v50, %s10201_s17  ;;  %1500 = vrot.lane.b32.xlu0 %v2010_v49, %s10201_s17 }
  0xc1   : > { %1696 = vrot.lane.b32.xlu1 %v10574_v25, %s10202_s21  ;;  %1694 = vrot.lane.b32.xlu0 %v10576_v26, %s10202_s21 }
  0xc5   : > { %1889 = vrot.lane.b32.xlu1 %v1820_v55, %s10203_s25  ;;  %1887 = vrot.lane.b32.xlu0 %v1819_v56, %s10203_s25 }
  0xc9   : > { %732 = vrot.lane.b32.xlu1 %v1817_v48, %s10198_s29  ;;  %2080 = vrot.lane.b32.xlu0 %v2012_v57, %s10204_s26  ;;  %v547_v48 = vld [vmem:[%s10518_s27 + $0xa0] sm:$0xff] }
  0xca   : > { %580 = vst.msk [vmem:[#allocation2 + $0x109] sm:$0xff] %vm361_vm0, %v547_v48 }
  0xcd   : > { %734 = vrot.lane.b32.xlu1 %v1818_v47, %s10198_s29  ;;  %2082 = vrot.lane.b32.xlu0 %v2013_v58, %s10204_s26 }
  0xd1   : > { %927 = vrot.lane.b32.xlu1 %v2011_v50, %s10197_s28  ;;  %925 = vrot.lane.b32.xlu0 %v2010_v49, %s10197_s28  ;;  %v548_v49 = vld [vmem:[%s10518_s27 + $0xa8] sm:$0xff] }
  0xd2   : > { %581 = vst.msk [vmem:[#allocation2 + $0x111] sm:$0xff] %vm361_vm0, %v548_v49  ;;  %v11104_v49 = vld [vmem:[#allocation2 + $0xe1] sm:$0xff] }
  0xd5   : > { %1120 = vrot.lane.b32.xlu1 %v10574_v25, %s10199_s14  ;;  %1118 = vrot.lane.b32.xlu0 %v10576_v26, %s10199_s14  ;;  %v2635_v25 = vld [vmem:[#allocation3] sm:$0xff]  ;;  %v10875_v26 = vld [vmem:[#allocation2 + $0x99] sm:$0xff] }
  0xd9   : > { %1313 = vrot.lane.b32.xlu1 %v1820_v55, %s10200_s16  ;;  %1311 = vrot.lane.b32.xlu0 %v1819_v56, %s10200_s16  ;;  %v10934_v52 = vld [vmem:[#allocation2 + $0x110] sm:$0xff] }
  0xda   : > { %647 = vst.msk [vmem:[#allocation5 + $0x678] sm:$0xff] %vm361_vm0, %v10934_v52 }
  0xdd   : > { %1506 = vrot.lane.b32.xlu1 %v2013_v58, %s10201_s17  ;;  %1504 = vrot.lane.b32.xlu0 %v2012_v57, %s10201_s17  ;;  %v916_v3 = vpop.permute.xlu1 %915 }
  0xde   : > { %v723_v4 = vpop.permute.xlu0 %722 }
  0xdf   : > { %818 = vst.msk [vmem:[#allocation5 + $0x48] sm:$0xff] %vm816_vm4, %v723_v4 }
  0xe0   : > { %1011 = vst.msk [vmem:[#allocation5 + $0x48] sm:$0xff] %vm1009_vm5, %v916_v3  ;;  %v10966_v3 = vld [vmem:[#allocation2 + $0xb2] sm:$0xff] }
  0xe1   : > { %1700 = vrot.lane.b32.xlu1 %v10586_v29, %s10202_s21  ;;  %1698 = vrot.lane.b32.xlu0 %v10588_v30, %s10202_s21 }
  0xe5   : > { %1893 = vrot.lane.b32.xlu1 %v10811_v1, %s10203_s25  ;;  %1891 = vrot.lane.b32.xlu0 %v10813_v2, %s10203_s25 }
  0xe7   : > { %v1109_v6 = vpop.permute.xlu1 %1108  ;;  %v1107_v7 = vpop.permute.xlu0 %1106 }
  0xe8   : > { %1204 = vst.msk [vmem:[#allocation5 + $0x48] sm:$0xff] %vm1202_vm6, %v1109_v6  ;;  %1203 = vst.msk [vmem:[#allocation5] sm:$0xff] %vm1202_vm6, %v1107_v7 }
  0xe9   : > { %736 = vrot.lane.b32.xlu1 %v1819_v56, %s10198_s29  ;;  %2084 = vrot.lane.b32.xlu0 %v10821_v5, %s10204_s26  ;;  %v10946_v56 = vld [vmem:[#allocation2 + $0xb1] sm:$0xff] }
  0xeb   : > { %v1302_v9 = vpop.permute.xlu1 %1301  ;;  %v1300_v10 = vpop.permute.xlu0 %1299 }
  0xec   : > { %1397 = vst.msk [vmem:[#allocation5 + $0x48] sm:$0xff] %vm1395_vm7, %v1302_v9  ;;  %1396 = vst.msk [vmem:[#allocation5] sm:$0xff] %vm1395_vm7, %v1300_v10 }
  0xed   : > { %738 = vrot.lane.b32.xlu1 %v1820_v55, %s10198_s29  ;;  %2086 = vrot.lane.b32.xlu0 %v10828_v8, %s10204_s26  ;;  %v10936_v55 = vld [vmem:[#allocation2 + $0x108] sm:$0xff] }
  0xee   : > { %646 = vst.msk [vmem:[#allocation5 + $0x630] sm:$0xff] %vm361_vm0, %v10936_v55 }
  0xef   : > { %v1495_v11 = vpop.permute.xlu1 %1494  ;;  %v1493_v12 = vpop.permute.xlu0 %1492 }
  0xf0   : > { %1590 = vst.msk [vmem:[#allocation5 + $0x48] sm:$0xff] %vm1588_vm8, %v1495_v11  ;;  %1589 = vst.msk [vmem:[#allocation5] sm:$0xff] %vm1588_vm8, %v1493_v12  ;;  %v549_v12 = vld [vmem:[%s10518_s27 + $0xb0] sm:$0xff] }
  0xf1   : > { %931 = vrot.lane.b32.xlu1 %v2013_v58, %s10197_s28  ;;  %929 = vrot.lane.b32.xlu0 %v2012_v57, %s10197_s28  ;;  %v10948_v57 = vld [vmem:[#allocation2 + $0xa9] sm:$0xff]  ;;  %582 = vst.msk [vmem:[#allocation2 + $0x121] sm:$0xff] %vm361_vm0, %v549_v12 }
  0xf3   : > { %v1689_v13 = vpop.permute.xlu1 %1688  ;;  %v1687_v14 = vpop.permute.xlu0 %1686 }
  0xf4   : > { %1784 = vst.msk [vmem:[#allocation5 + $0x48] sm:$0xff] %vm1782_vm9, %v1689_v13  ;;  %1783 = vst.msk [vmem:[#allocation5] sm:$0xff] %vm1782_vm9, %v1687_v14  ;;  %v550_v13 = vld [vmem:[%s10518_s27 + $0xb8] sm:$0xff] }
  0xf5   : > { %1124 = vrot.lane.b32.xlu1 %v10586_v29, %s10199_s14  ;;  %1122 = vrot.lane.b32.xlu0 %v10588_v30, %s10199_s14  ;;  %583 = vst.msk [vmem:[#allocation2 + $0x129] sm:$0xff] %vm361_vm0, %v550_v13  ;;  %v11174_v13 = vld [vmem:[#allocation2 + $0xf9] sm:$0xff] }
  0xf7   : > { %v1882_v15 = vpop.permute.xlu1 %1881  ;;  %v1880_v16 = vpop.permute.xlu0 %1879 }
  0xf8   : > { %1977 = vst.msk [vmem:[#allocation5 + $0x48] sm:$0xff] %vm1975_vm10, %v1882_v15  ;;  %1976 = vst.msk [vmem:[#allocation5] sm:$0xff] %vm1975_vm10, %v1880_v16  ;;  %v11006_v17 = vld [vmem:[#allocation2 + $0x120] sm:$0xff] }
  0xf9   : > { %1317 = vrot.lane.b32.xlu1 %v10811_v1, %s10200_s16  ;;  %1315 = vrot.lane.b32.xlu0 %v10813_v2, %s10200_s16  ;;  %648 = vst.msk [vmem:[#allocation5 + $0x6c0] sm:$0xff] %vm361_vm0, %v11006_v17 }
  0xfb   : > { %v725_v19 = vpop.permute.xlu1 %724  ;;  %v2073_v20 = vpop.permute.xlu0 %2072 }
  0xfc   : > { %819 = vst.msk [vmem:[#allocation5 + $0x90] sm:$0xff] %vm816_vm4, %v725_v19  ;;  %v11004_v16 = vld [vmem:[#allocation2 + $0x128] sm:$0xff] }
  0xfd   : > { %2169 = vst.msk [vmem:[#allocation5] sm:$0xff] %vm2168_vm11, %v2073_v20  ;;  %1510 = vrot.lane.b32.xlu1 %v10828_v8, %s10201_s17  ;;  %1508 = vrot.lane.b32.xlu0 %v10821_v5, %s10201_s17  ;;  %v11018_v19 = vld [vmem:[#allocation2 + $0xc1] sm:$0xff] }
  0xfe   : > { %649 = vst.msk [vmem:[#allocation5 + $0x708] sm:$0xff] %vm361_vm0, %v11004_v16 }
  0xff   : > { %v727_v21 = vpop.permute.xlu1 %726  ;;  %v2075_v22 = vpop.permute.xlu0 %2074 }
 0x100   : > { %820 = vst.msk [vmem:[#allocation5 + $0xd8] sm:$0xff] %vm816_vm4, %v727_v21 }
 0x101   : > { %2170 = vst.msk [vmem:[#allocation5 + $0x48] sm:$0xff] %vm2168_vm11, %v2075_v22  ;;  %1704 = vrot.lane.b32.xlu1 %v10623_v38, %s10202_s21  ;;  %1702 = vrot.lane.b32.xlu0 %v10625_v39, %s10202_s21 }
 0x103   : > { %v920_v28 = vpop.permute.xlu1 %919  ;;  %v918_v29 = vpop.permute.xlu0 %917 }
 0x104   : > { %v2201_v30 = vld [vmem:[#allocation5] sm:$0xff]  ;;  %1013 = vst.msk [vmem:[#allocation5 + $0xd8] sm:$0xff] %vm1009_vm5, %v920_v28  ;;  %1012 = vst.msk [vmem:[#allocation5 + $0x90] sm:$0xff] %vm1009_vm5, %v918_v29  ;;  %v9950_v29 = vld [vmem:[#allocation4] sm:$0xff] }
 0x105   : > { %9556 = vmatprep.mubr.msk.f32.mxu0 %vm2244_vm12, %v2201_v30  ;;  %2667 = vst.msk [vmem:[#allocation5] sm:$0xff] %vm417_vm3, %v2635_v25  ;;  %1897 = vrot.lane.b32.xlu1 %v10875_v26, %s10203_s25  ;;  %v11027_v25 = vld [vmem:[#allocation2 + $0xc2] sm:$0xff]  ;;  %v11054_v30 = vld [vmem:[#allocation2 + $0xca] sm:$0xff] }
 0x106   : > { %1895 = vrot.lane.b32.xlu0 %v10877_v27, %s10203_s25  ;;  %424 = vst.msk [vmem:[#allocation3 + $0x28] sm:$0x3] %vm420_vm13, %v9950_v29  ;;  %421 = vst.msk [vmem:[#allocation3 + $0x10] sm:$0x3] %vm420_vm13, %v9950_v29 }
 0x107   : > { %v1113_v32 = vpop.permute.xlu1 %1112  ;;  %v1111_v33 = vpop.permute.xlu0 %1110  ;;  %427 = vst.msk [vmem:[#allocation3 + $0x40] sm:$0x3] %vm420_vm13, %v9950_v29  ;;  %430 = vst.msk [vmem:[#allocation3 + $0x58] sm:$0x3] %vm420_vm13, %v9950_v29 }
 0x108   : > { %v2202_v34 = vld [vmem:[#allocation5 + $0x48] sm:$0xff]  ;;  %1206 = vst.msk [vmem:[#allocation5 + $0xd8] sm:$0xff] %vm1202_vm6, %v1113_v32  ;;  %1205 = vst.msk [vmem:[#allocation5 + $0x90] sm:$0xff] %vm1202_vm6, %v1111_v33 }
 0x109   : > { %9557 = vmatmul.mubr.msk.f32.vlgmr.msra.gmra.mxu0 %vm2244_vm12, %v2202_v34  ;;  %740 = vrot.lane.b32.xlu1 %v10813_v2, %s10198_s29  ;;  %433 = vst.msk [vmem:[#allocation3 + $0x70] sm:$0x3] %vm420_vm13, %v9950_v29  ;;  %436 = vst.msk [vmem:[#allocation3 + $0x88] sm:$0x3] %vm420_vm13, %v9950_v29 }
 0x10a   : > { %2088 = vrot.lane.b32.xlu0 %v10887_v31, %s10204_s26  ;;  %439 = vst.msk [vmem:[#allocation3 + $0xa0] sm:$0x3] %vm420_vm13, %v9950_v29  ;;  %442 = vst.msk [vmem:[#allocation3 + $0xb8] sm:$0x3] %vm420_vm13, %v9950_v29 }
 0x10b   : > { %v1306_v36 = vpop.permute.xlu1 %1305  ;;  %v1304_v37 = vpop.permute.xlu0 %1303  ;;  %445 = vst.msk [vmem:[#allocation3 + $0xd0] sm:$0x3] %vm420_vm13, %v9950_v29  ;;  %448 = vst.msk [vmem:[#allocation3 + $0xe8] sm:$0x3] %vm420_vm13, %v9950_v29 }
 0x10c   : > { %1399 = vst.msk [vmem:[#allocation5 + $0xd8] sm:$0xff] %vm1395_vm7, %v1306_v36  ;;  %1398 = vst.msk [vmem:[#allocation5 + $0x90] sm:$0xff] %vm1395_vm7, %v1304_v37 }
 0x10d   : > { %742 = vrot.lane.b32.xlu1 %v10811_v1, %s10198_s29  ;;  %451 = vst.msk [vmem:[#allocation3 + $0x100] sm:$0x3] %vm420_vm13, %v9950_v29  ;;  %454 = vst.msk [vmem:[#allocation3 + $0x118] sm:$0x3] %vm420_vm13, %v9950_v29 }
 0x10e   : > { %2090 = vrot.lane.b32.xlu0 %v10896_v35, %s10204_s26  ;;  %457 = vst.msk [vmem:[#allocation3 + $0x130] sm:$0x3] %vm420_vm13, %v9950_v29  ;;  %460 = vst.msk [vmem:[#allocation3 + $0x148] sm:$0x3] %vm420_vm13, %v9950_v29 }
 0x10f   : > { %v1499_v40 = vpop.permute.xlu1 %1498  ;;  %v1497_v41 = vpop.permute.xlu0 %1496  ;;  %463 = vst.msk [vmem:[#allocation3 + $0x160] sm:$0x3] %vm420_vm13, %v9950_v29  ;;  %466 = vst.msk [vmem:[#allocation3 + $0x178] sm:$0x3] %vm420_vm13, %v9950_v29 }
 0x110   : > { %1592 = vst.msk [vmem:[#allocation5 + $0xd8] sm:$0xff] %vm1588_vm8, %v1499_v40  ;;  %1591 = vst.msk [vmem:[#allocation5 + $0x90] sm:$0xff] %vm1588_vm8, %v1497_v41  ;;  %v551_v41 = vld [vmem:[%s10518_s27 + $0xc0] sm:$0xff] }
 0x111   : > { %935 = vrot.lane.b32.xlu1 %v10828_v8, %s10197_s28  ;;  %469 = vst.msk [vmem:[#allocation3 + $0x190] sm:$0x3] %vm420_vm13, %v9950_v29  ;;  %472 = vst.msk [vmem:[#allocation3 + $0x1a8] sm:$0x3] %vm420_vm13, %v9950_v29 }
 0x112   : > { %933 = vrot.lane.b32.xlu0 %v10821_v5, %s10197_s28  ;;  %584 = vst.msk [vmem:[#allocation2 + $0x139] sm:$0xff] %vm361_vm0, %v551_v41  ;;  %v11244_v41 = vld [vmem:[#allocation2 + $0x111] sm:$0xff] }
 0x113   : > { %v1693_v42 = vpop.permute.xlu1 %1692  ;;  %v1691_v43 = vpop.permute.xlu0 %1690 }
 0x114   : > { %1786 = vst.msk [vmem:[#allocation5 + $0xd8] sm:$0xff] %vm1782_vm9, %v1693_v42  ;;  %1785 = vst.msk [vmem:[#allocation5 + $0x90] sm:$0xff] %vm1782_vm9, %v1691_v43  ;;  %v552_v42 = vld [vmem:[%s10518_s27 + $0xc8] sm:$0xff] }
 0x115   : > { %1128 = vrot.lane.b32.xlu1 %v10623_v38, %s10199_s14  ;;  %585 = vst.msk [vmem:[#allocation2 + $0x141] sm:$0xff] %vm361_vm0, %v552_v42  ;;  %v11246_v42 = vld [vmem:[#allocation2 + $0x109] sm:$0xff] }
 0x116   : > { %1126 = vrot.lane.b32.xlu0 %v10625_v39, %s10199_s14 }
 0x117   : > { %v1886_v44 = vpop.permute.xlu1 %1885  ;;  %v1884_v47 = vpop.permute.xlu0 %1883 }
 0x118   : > { %1979 = vst.msk [vmem:[#allocation5 + $0xd8] sm:$0xff] %vm1975_vm10, %v1886_v44  ;;  %1978 = vst.msk [vmem:[#allocation5 + $0x90] sm:$0xff] %vm1975_vm10, %v1884_v47 }
 0x119   : > { %1321 = vrot.lane.b32.xlu1 %v10875_v26, %s10200_s16  ;;  %v11094_v48 = vld [vmem:[#allocation2 + $0x138] sm:$0xff] }
 0x11a   : > { %1319 = vrot.lane.b32.xlu0 %v10877_v27, %s10200_s16  ;;  %650 = vst.msk [vmem:[#allocation5 + $0x750] sm:$0xff] %vm361_vm0, %v11094_v48 }
 0x11b   : > { %v729_v38 = vpop.permute.xlu1 %728  ;;  %v2077_v39 = vpop.permute.xlu0 %2076 }
 0x11c   : > { %821 = vst.msk [vmem:[#allocation5 + $0x120] sm:$0xff] %vm816_vm4, %v729_v38  ;;  %v11092_v47 = vld [vmem:[#allocation2 + $0x140] sm:$0xff] }
 0x11d   : > { %2171 = vst.msk [vmem:[#allocation5 + $0x90] sm:$0xff] %vm2168_vm11, %v2077_v39  ;;  %1514 = vrot.lane.b32.xlu1 %v10896_v35, %s10201_s17  ;;  %v11106_v38 = vld [vmem:[#allocation2 + $0xd9] sm:$0xff] }
 0x11e   : > { %1512 = vrot.lane.b32.xlu0 %v10887_v31, %s10201_s17  ;;  %651 = vst.msk [vmem:[#allocation5 + $0x798] sm:$0xff] %vm361_vm0, %v11092_v47 }
 0x11f   : > { %v731_v50 = vpop.permute.xlu1 %730  ;;  %v2079_v51 = vpop.permute.xlu0 %2078 }
 0x120   : > { %822 = vst.msk [vmem:[#allocation5 + $0x168] sm:$0xff] %vm816_vm4, %v731_v50 }
 0x121   : > { %2172 = vst.msk [vmem:[#allocation5 + $0xd8] sm:$0xff] %vm2168_vm11, %v2079_v51  ;;  %1708 = vrot.lane.b32.xlu1 %v10731_v45, %s10202_s21 }
 0x122   : > { %1706 = vrot.lane.b32.xlu0 %v10733_v46, %s10202_s21 }
 0x123   : > { %v924_v58 = vpop.permute.xlu1 %923  ;;  %v922_v59 = vpop.permute.xlu0 %921 }
 0x124   : > { %v2203_v60 = vld [vmem:[#allocation5 + $0x90] sm:$0xff]  ;;  %1015 = vst.msk [vmem:[#allocation5 + $0x168] sm:$0xff] %vm1009_vm5, %v924_v58  ;;  %1014 = vst.msk [vmem:[#allocation5 + $0x120] sm:$0xff] %vm1009_vm5, %v922_v59 }
 0x125   : > { %9559 = vmatprep.mubr.msk.f32.mxu0 %vm2244_vm12, %v2203_v60  ;;  %1901 = vrot.lane.b32.xlu1 %v10946_v56, %s10203_s25  ;;  %v11124_v60 = vld [vmem:[#allocation2 + $0xe2] sm:$0xff] }
 0x126   : > { %1899 = vrot.lane.b32.xlu0 %v10948_v57, %s10203_s25 }
 0x127   : > { %v1117_v62 = vpop.permute.xlu1 %1116  ;;  %v1115_v1 = vpop.permute.xlu0 %1114 }
 0x128   : > { %v2204_v2 = vld [vmem:[#allocation5 + $0xd8] sm:$0xff]  ;;  %1208 = vst.msk [vmem:[#allocation5 + $0x168] sm:$0xff] %vm1202_vm6, %v1117_v62  ;;  %1207 = vst.msk [vmem:[#allocation5 + $0x120] sm:$0xff] %vm1202_vm6, %v1115_v1 }
 0x129   : > { %9560 = vmatmul.mubr.msk.f32.gmra.mxu0 %vm2244_vm12, %v2204_v2  ;;  %744 = vrot.lane.b32.xlu1 %v10877_v27, %s10198_s29 }
 0x12a   : > { %2092 = vrot.lane.b32.xlu0 %v10957_v61, %s10204_s26 }
 0x12b   : > { %v1310_v4 = vpop.permute.xlu1 %1309  ;;  %v1308_v5 = vpop.permute.xlu0 %1307 }
 0x12c   : > { %1401 = vst.msk [vmem:[#allocation5 + $0x168] sm:$0xff] %vm1395_vm7, %v1310_v4  ;;  %1400 = vst.msk [vmem:[#allocation5 + $0x120] sm:$0xff] %vm1395_vm7, %v1308_v5 }
 0x12d   : > { %746 = vrot.lane.b32.xlu1 %v10875_v26, %s10198_s29 }
 0x12e   : > { %2094 = vrot.lane.b32.xlu0 %v10966_v3, %s10204_s26 }
 0x12f   : > { %v1503_v6 = vpop.permute.xlu1 %1502  ;;  %v1501_v7 = vpop.permute.xlu0 %1500 }
 0x130   : > { %1594 = vst.msk [vmem:[#allocation5 + $0x168] sm:$0xff] %vm1588_vm8, %v1503_v6  ;;  %1593 = vst.msk [vmem:[#allocation5 + $0x120] sm:$0xff] %vm1588_vm8, %v1501_v7  ;;  %v553_v7 = vld [vmem:[%s10518_s27 + $0xd0] sm:$0xff] }
 0x131   : > { %939 = vrot.lane.b32.xlu1 %v10896_v35, %s10197_s28  ;;  %586 = vst.msk [vmem:[#allocation2 + $0x151] sm:$0xff] %vm361_vm0, %v553_v7 }
 0x132   : > { %937 = vrot.lane.b32.xlu0 %v10887_v31, %s10197_s28 }
 0x133   : > { %v1697_v8 = vpop.permute.xlu1 %1696  ;;  %v1695_v9 = vpop.permute.xlu0 %1694 }
 0x134   : > { %1788 = vst.msk [vmem:[#allocation5 + $0x168] sm:$0xff] %vm1782_vm9, %v1697_v8  ;;  %1787 = vst.msk [vmem:[#allocation5 + $0x120] sm:$0xff] %vm1782_vm9, %v1695_v9  ;;  %v554_v8 = vld [vmem:[%s10518_s27 + $0xd8] sm:$0xff] }
 0x135   : > { %1132 = vrot.lane.b32.xlu1 %v10731_v45, %s10199_s14  ;;  %587 = vst.msk [vmem:[#allocation2 + $0x159] sm:$0xff] %vm361_vm0, %v554_v8 }
 0x136   : > { %1130 = vrot.lane.b32.xlu0 %v10733_v46, %s10199_s14 }
 0x137   : > { %v1890_v10 = vpop.permute.xlu1 %1889  ;;  %v1888_v11 = vpop.permute.xlu0 %1887 }
 0x138   : > { %1981 = vst.msk [vmem:[#allocation5 + $0x168] sm:$0xff] %vm1975_vm10, %v1890_v10  ;;  %1980 = vst.msk [vmem:[#allocation5 + $0x120] sm:$0xff] %vm1975_vm10, %v1888_v11  ;;  %v11164_v12 = vld [vmem:[#allocation2 + $0x150] sm:$0xff] }
 0x139   : > { %1325 = vrot.lane.b32.xlu1 %v10946_v56, %s10200_s16  ;;  %652 = vst.msk [vmem:[#allocation5 + $0x7e0] sm:$0xff] %vm361_vm0, %v11164_v12 }
 0x13a   : > { %1323 = vrot.lane.b32.xlu0 %v10948_v57, %s10200_s16 }
 0x13b   : > { %v733_v45 = vpop.permute.xlu1 %732  ;;  %v2081_v46 = vpop.permute.xlu0 %2080 }
 0x13c   : > { %823 = vst.msk [vmem:[#allocation5 + $0x1b0] sm:$0xff] %vm816_vm4, %v733_v45  ;;  %v11162_v11 = vld [vmem:[#allocation2 + $0x158] sm:$0xff] }
 0x13d   : > { %2173 = vst.msk [vmem:[#allocation5 + $0x120] sm:$0xff] %vm2168_vm11, %v2081_v46  ;;  %1518 = vrot.lane.b32.xlu1 %v10966_v3, %s10201_s17  ;;  %v11176_v45 = vld [vmem:[#allocation2 + $0xf1] sm:$0xff] }
 0x13e   : > { %1516 = vrot.lane.b32.xlu0 %v10957_v61, %s10201_s17  ;;  %653 = vst.msk [vmem:[#allocation5 + $0x828] sm:$0xff] %vm361_vm0, %v11162_v11 }
 0x13f   : > { %v735_v14 = vpop.permute.xlu1 %734  ;;  %v2083_v15 = vpop.permute.xlu0 %2082 }
 0x140   : > { %824 = vst.msk [vmem:[#allocation5 + $0x1f8] sm:$0xff] %vm816_vm4, %v735_v14 }
 0x141   : > { %2174 = vst.msk [vmem:[#allocation5 + $0x168] sm:$0xff] %vm2168_vm11, %v2083_v15  ;;  %1712 = vrot.lane.b32.xlu1 %v10765_v53, %s10202_s21 }
 0x142   : > { %1710 = vrot.lane.b32.xlu0 %v10767_v54, %s10202_s21 }
 0x143   : > { %v928_v20 = vpop.permute.xlu1 %927  ;;  %v926_v21 = vpop.permute.xlu0 %925 }
 0x144   : > { %v2205_v22 = vld [vmem:[#allocation5 + $0x120] sm:$0xff]  ;;  %1017 = vst.msk [vmem:[#allocation5 + $0x1f8] sm:$0xff] %vm1009_vm5, %v928_v20  ;;  %1016 = vst.msk [vmem:[#allocation5 + $0x1b0] sm:$0xff] %vm1009_vm5, %v926_v21 }
 0x145   : > { %9562 = vmatprep.mubr.msk.f32.mxu0 %vm2244_vm12, %v2205_v22  ;;  %1905 = vrot.lane.b32.xlu1 %v11016_v18, %s10203_s25  ;;  %v11194_v22 = vld [vmem:[#allocation2 + $0xfa] sm:$0xff] }
 0x146   : > { %1903 = vrot.lane.b32.xlu0 %v11018_v19, %s10203_s25 }
 0x147   : > { %v1121_v26 = vpop.permute.xlu1 %1120  ;;  %v1119_v27 = vpop.permute.xlu0 %1118 }
 0x148   : > { %v2206_v28 = vld [vmem:[#allocation5 + $0x168] sm:$0xff]  ;;  %1210 = vst.msk [vmem:[#allocation5 + $0x1f8] sm:$0xff] %vm1202_vm6, %v1121_v26  ;;  %1209 = vst.msk [vmem:[#allocation5 + $0x1b0] sm:$0xff] %vm1202_vm6, %v1119_v27 }
 0x149   : > { %9563 = vmatmul.mubr.msk.f32.gmra.mxu0 %vm2244_vm12, %v2206_v28  ;;  %748 = vrot.lane.b32.xlu1 %v10948_v57, %s10198_s29 }
 0x14a   : > { %2096 = vrot.lane.b32.xlu0 %v11027_v25, %s10204_s26 }
 0x14b   : > { %v1314_v31 = vpop.permute.xlu1 %1313  ;;  %v1312_v32 = vpop.permute.xlu0 %1311 }
 0x14c   : > { %1403 = vst.msk [vmem:[#allocation5 + $0x1f8] sm:$0xff] %vm1395_vm7, %v1314_v31  ;;  %1402 = vst.msk [vmem:[#allocation5 + $0x1b0] sm:$0xff] %vm1395_vm7, %v1312_v32 }
 0x14d   : > { %750 = vrot.lane.b32.xlu1 %v10946_v56, %s10198_s29  ;;  %v11115_v56 = vld [vmem:[#allocation2 + $0xda] sm:$0xff] }
 0x14e   : > { %2098 = vrot.lane.b32.xlu0 %v11054_v30, %s10204_s26 }
 0x14f   : > { %v1507_v33 = vpop.permute.xlu1 %1506  ;;  %v1505_v34 = vpop.permute.xlu0 %1504 }
 0x150   : > { %1596 = vst.msk [vmem:[#allocation5 + $0x1f8] sm:$0xff] %vm1588_vm8, %v1507_v33  ;;  %1595 = vst.msk [vmem:[#allocation5 + $0x1b0] sm:$0xff] %vm1588_vm8, %v1505_v34  ;;  %v555_v33 = vld [vmem:[%s10518_s27 + $0xe0] sm:$0xff]  ;;  %v556_v34 = vld [vmem:[%s10518_s27 + $0xe8] sm:$0xff] }
 0x151   : > { %943 = vrot.lane.b32.xlu1 %v10966_v3, %s10197_s28  ;;  %588 = vst.msk [vmem:[#allocation2 + $0x169] sm:$0xff] %vm361_vm0, %v555_v33  ;;  %589 = vst.msk [vmem:[#allocation2 + $0x171] sm:$0xff] %vm361_vm0, %v556_v34 }
 0x152   : > { %941 = vrot.lane.b32.xlu0 %v10957_v61, %s10197_s28 }
 0x153   : > { %v1701_v35 = vpop.permute.xlu1 %1700  ;;  %v1699_v36 = vpop.permute.xlu0 %1698 }
 0x154   : > { %1790 = vst.msk [vmem:[#allocation5 + $0x1f8] sm:$0xff] %vm1782_vm9, %v1701_v35  ;;  %1789 = vst.msk [vmem:[#allocation5 + $0x1b0] sm:$0xff] %vm1782_vm9, %v1699_v36 }
 0x155   : > { %1136 = vrot.lane.b32.xlu1 %v10765_v53, %s10199_s14 }
 0x156   : > { %1134 = vrot.lane.b32.xlu0 %v10767_v54, %s10199_s14 }
 0x157   : > { %v1894_v37 = vpop.permute.xlu1 %1893  ;;  %v1892_v40 = vpop.permute.xlu0 %1891 }
 0x158   : > { %1983 = vst.msk [vmem:[#allocation5 + $0x1f8] sm:$0xff] %vm1975_vm10, %v1894_v37  ;;  %1982 = vst.msk [vmem:[#allocation5 + $0x1b0] sm:$0xff] %vm1975_vm10, %v1892_v40  ;;  %v11232_v37 = vld [vmem:[#allocation2 + $0x170] sm:$0xff]  ;;  %v11234_v40 = vld [vmem:[#allocation2 + $0x168] sm:$0xff] }
 0x159   : > { %1329 = vrot.lane.b32.xlu1 %v11016_v18, %s10200_s16  ;;  %654 = vst.msk [vmem:[#allocation5 + $0x870] sm:$0xff] %vm361_vm0, %v11234_v40  ;;  %655 = vst.msk [vmem:[#allocation5 + $0x8b8] sm:$0xff] %vm361_vm0, %v11232_v37 }
 0x15a   : > { %1327 = vrot.lane.b32.xlu0 %v11018_v19, %s10200_s16 }
 0x15b   : > { %v737_v53 = vpop.permute.xlu1 %736  ;;  %v2085_v54 = vpop.permute.xlu0 %2084 }
 0x15c   : > { %825 = vst.msk [vmem:[#allocation5 + $0x240] sm:$0xff] %vm816_vm4, %v737_v53 }
 0x15d   : > { %2175 = vst.msk [vmem:[#allocation5 + $0x1b0] sm:$0xff] %vm2168_vm11, %v2085_v54  ;;  %1522 = vrot.lane.b32.xlu1 %v11054_v30, %s10201_s17 }
 0x15e   : > { %1520 = vrot.lane.b32.xlu0 %v11027_v25, %s10201_s17 }
 0x15f   : > { %v739_v43 = vpop.permute.xlu1 %738  ;;  %v2087_v44 = vpop.permute.xlu0 %2086 }
 0x160   : > { %826 = vst.msk [vmem:[#allocation5 + $0x288] sm:$0xff] %vm816_vm4, %v739_v43 }
 0x161   : > { %2176 = vst.msk [vmem:[#allocation5 + $0x1f8] sm:$0xff] %vm2168_vm11, %v2087_v44  ;;  %1716 = vrot.lane.b32.xlu1 %v10798_v63, %s10202_s21  ;;  %v11255_v44 = vld [vmem:[#allocation2 + $0x10a] sm:$0xff] }
 0x162   : > { %1714 = vrot.lane.b32.xlu0 %v10800_v0, %s10202_s21 }
 0x163   : > { %v932_v39 = vpop.permute.xlu1 %931  ;;  %v930_v50 = vpop.permute.xlu0 %929 }
 0x164   : > { %v2207_v51 = vld [vmem:[#allocation5 + $0x1b0] sm:$0xff]  ;;  %1019 = vst.msk [vmem:[#allocation5 + $0x288] sm:$0xff] %vm1009_vm5, %v932_v39  ;;  %1018 = vst.msk [vmem:[#allocation5 + $0x240] sm:$0xff] %vm1009_vm5, %v930_v50  ;;  %v11264_v50 = vld [vmem:[#allocation2 + $0x112] sm:$0xff] }
 0x165   : > { %9565 = vmatprep.mubr.msk.f32.mxu0 %vm2244_vm12, %v2207_v51  ;;  %1909 = vrot.lane.b32.xlu1 %v11104_v49, %s10203_s25 }
 0x166   : > { %1907 = vrot.lane.b32.xlu0 %v11106_v38, %s10203_s25 }
 0x167   : > { %v1125_v57 = vpop.permute.xlu1 %1124  ;;  %v1123_v58 = vpop.permute.xlu0 %1122 }
 0x168   : > { %v2208_v59 = vld [vmem:[#allocation5 + $0x1f8] sm:$0xff]  ;;  %1212 = vst.msk [vmem:[#allocation5 + $0x288] sm:$0xff] %vm1202_vm6, %v1125_v57  ;;  %1211 = vst.msk [vmem:[#allocation5 + $0x240] sm:$0xff] %vm1202_vm6, %v1123_v58 }
 0x169   : > { %9566 = vmatmul.mubr.msk.f32.gmra.mxu0 %vm2244_vm12, %v2208_v59  ;;  %752 = vrot.lane.b32.xlu1 %v11018_v19, %s10198_s29 }
 0x16a   : > { %2100 = vrot.lane.b32.xlu0 %v11115_v56, %s10204_s26 }
 0x16b   : > { %v1318_v61 = vpop.permute.xlu1 %1317  ;;  %v1316_v62 = vpop.permute.xlu0 %1315 }
 0x16c   : > { %1405 = vst.msk [vmem:[#allocation5 + $0x288] sm:$0xff] %vm1395_vm7, %v1318_v61  ;;  %1404 = vst.msk [vmem:[#allocation5 + $0x240] sm:$0xff] %vm1395_vm7, %v1316_v62 }
 0x16d   : > { %754 = vrot.lane.b32.xlu1 %v11016_v18, %s10198_s29  ;;  %v11185_v18 = vld [vmem:[#allocation2 + $0xf2] sm:$0xff] }
 0x16e   : > { %2102 = vrot.lane.b32.xlu0 %v11124_v60, %s10204_s26 }
 0x16f   : > { %v1511_v1 = vpop.permute.xlu1 %1510  ;;  %v1509_v2 = vpop.permute.xlu0 %1508 }
 0x170   : > { %1598 = vst.msk [vmem:[#allocation5 + $0x288] sm:$0xff] %vm1588_vm8, %v1511_v1  ;;  %1597 = vst.msk [vmem:[#allocation5 + $0x240] sm:$0xff] %vm1588_vm8, %v1509_v2  ;;  %v557_v1 = vld [vmem:[%s10518_s27 + $0xf0] sm:$0xff]  ;;  %v558_v2 = vld [vmem:[%s10518_s27 + $0xf8] sm:$0xff]  ;;  %s10206_s27 = smov [#allocation11]  }
 0x171   : > { %947 = vrot.lane.b32.xlu1 %v11054_v30, %s10197_s28  ;;  %590 = vst.msk [vmem:[#allocation2 + $0x181] sm:$0xff] %vm361_vm0, %v557_v1  ;;  %591 = vst.msk [vmem:[#allocation2 + $0x189] sm:$0xff] %vm361_vm0, %v558_v2 }
 0x172   : > { %945 = vrot.lane.b32.xlu0 %v11027_v25, %s10197_s28 }
 0x173   : > { %v1705_v3 = vpop.permute.xlu1 %1704  ;;  %v1703_v4 = vpop.permute.xlu0 %1702 }
 0x174   : > { %1792 = vst.msk [vmem:[#allocation5 + $0x288] sm:$0xff] %vm1782_vm9, %v1705_v3  ;;  %1791 = vst.msk [vmem:[#allocation5 + $0x240] sm:$0xff] %vm1782_vm9, %v1703_v4 }
 0x175   : > { %1140 = vrot.lane.b32.xlu1 %v10798_v63, %s10199_s14 }
 0x176   : > { %1138 = vrot.lane.b32.xlu0 %v10800_v0, %s10199_s14 }
 0x177   : > { %v1898_v5 = vpop.permute.xlu1 %1897 }
 0x178   : > { %v1896_v6 = vpop.permute.xlu0 %1895  ;;  %1985 = vst.msk [vmem:[#allocation5 + $0x288] sm:$0xff] %vm1975_vm10, %v1898_v5  ;;  %v11306_v5 = vld [vmem:[#allocation2 + $0x129] sm:$0xff] }
 0x179   : > { %1984 = vst.msk [vmem:[#allocation5 + $0x240] sm:$0xff] %vm1975_vm10, %v1896_v6  ;;  %1333 = vrot.lane.b32.xlu1 %v11104_v49, %s10200_s16  ;;  %v11308_v6 = vld [vmem:[#allocation2 + $0x121] sm:$0xff] }
 0x17a   : > { %1331 = vrot.lane.b32.xlu0 %v11106_v38, %s10200_s16 }
 0x17b   : > { %v741_v63 = vpop.permute.xlu1 %740 }
 0x17c   : > { %v2089_v0 = vpop.permute.xlu0 %2088  ;;  %827 = vst.msk [vmem:[#allocation5 + $0x2d0] sm:$0xff] %vm816_vm4, %v741_v63 }
 0x17d   : > { %2177 = vst.msk [vmem:[#allocation5 + $0x240] sm:$0xff] %vm2168_vm11, %v2089_v0  ;;  %1526 = vrot.lane.b32.xlu1 %v11124_v60, %s10201_s17  ;;  %v11320_v0 = vld [vmem:[%s14982_s2] ss:$0 sm:$0xff] }
 0x17e   : > { %1524 = vrot.lane.b32.xlu0 %v11115_v56, %s10201_s17 }
 0x17f   : > { %v743_v9 = vpop.permute.xlu1 %742 }
 0x180   : > { %v2091_v10 = vpop.permute.xlu0 %2090  ;;  %828 = vst.msk [vmem:[#allocation5 + $0x318] sm:$0xff] %vm816_vm4, %v743_v9  ;;  %v11322_v9 = vld [vmem:[#allocation2 + $0x122] sm:$0xff] }
 0x181   : > { %2178 = vst.msk [vmem:[#allocation5 + $0x288] sm:$0xff] %vm2168_vm11, %v2091_v10  ;;  %1720 = vrot.lane.b32.xlu1 %v10863_v23, %s10202_s21 }
 0x182   : > { %1718 = vrot.lane.b32.xlu0 %v10865_v24, %s10202_s21 }
 0x183   : > { %v936_v46 = vpop.permute.xlu1 %935 }
 0x184   : > { %v934_v14 = vpop.permute.xlu0 %933  ;;  %v2209_v15 = vld [vmem:[#allocation5 + $0x240] sm:$0xff]  ;;  %1021 = vst.msk [vmem:[#allocation5 + $0x318] sm:$0xff] %vm1009_vm5, %v936_v46 }
 0x185   : > { %1020 = vst.msk [vmem:[#allocation5 + $0x2d0] sm:$0xff] %vm1009_vm5, %v934_v14  ;;  %9568 = vmatprep.mubr.msk.f32.mxu0 %vm2244_vm12, %v2209_v15  ;;  %1913 = vrot.lane.b32.xlu1 %v11174_v13, %s10203_s25 }
 0x186   : > { %1911 = vrot.lane.b32.xlu0 %v11176_v45, %s10203_s25 }
 0x187   : > { %v1129_v19 = vpop.permute.xlu1 %1128 }
 0x188   : > { %v1127_v20 = vpop.permute.xlu0 %1126  ;;  %v2210_v21 = vld [vmem:[#allocation5 + $0x288] sm:$0xff]  ;;  %1214 = vst.msk [vmem:[#allocation5 + $0x318] sm:$0xff] %vm1202_vm6, %v1129_v19 }
 0x189   : > { %1213 = vst.msk [vmem:[#allocation5 + $0x2d0] sm:$0xff] %vm1202_vm6, %v1127_v20  ;;  %9569 = vmatmul.mubr.msk.f32.gmra.mxu0 %vm2244_vm12, %v2210_v21  ;;  %756 = vrot.lane.b32.xlu1 %v11106_v38, %s10198_s29 }
 0x18a   : > { %2104 = vrot.lane.b32.xlu0 %v11185_v18, %s10204_s26 }
 0x18b   : > { %v1322_v25 = vpop.permute.xlu1 %1321 }
 0x18c   : > { %v1320_v26 = vpop.permute.xlu0 %1319  ;;  %1407 = vst.msk [vmem:[#allocation5 + $0x318] sm:$0xff] %vm1395_vm7, %v1322_v25 }
 0x18d   : > { %1406 = vst.msk [vmem:[#allocation5 + $0x2d0] sm:$0xff] %vm1395_vm7, %v1320_v26  ;;  %758 = vrot.lane.b32.xlu1 %v11104_v49, %s10198_s29 }
 0x18e   : > { %2106 = vrot.lane.b32.xlu0 %v11194_v22, %s10204_s26 }
 0x18f   : > { %v1515_v27 = vpop.permute.xlu1 %1514 }
 0x190   : > { %v1513_v28 = vpop.permute.xlu0 %1512  ;;  %1600 = vst.msk [vmem:[#allocation5 + $0x318] sm:$0xff] %vm1588_vm8, %v1515_v27 }
 0x191   : > { %1599 = vst.msk [vmem:[#allocation5 + $0x2d0] sm:$0xff] %vm1588_vm8, %v1513_v28  ;;  %951 = vrot.lane.b32.xlu1 %v11124_v60, %s10197_s28 }
 0x192   : > { %949 = vrot.lane.b32.xlu0 %v11115_v56, %s10197_s28 }
 0x193   : > { %v1709_v29 = vpop.permute.xlu1 %1708 }
 0x194   : > { %v1707_v30 = vpop.permute.xlu0 %1706  ;;  %1794 = vst.msk [vmem:[#allocation5 + $0x318] sm:$0xff] %vm1782_vm9, %v1709_v29 }
 0x195   : > { %1793 = vst.msk [vmem:[#allocation5 + $0x2d0] sm:$0xff] %vm1782_vm9, %v1707_v30  ;;  %1144 = vrot.lane.b32.xlu1 %v10863_v23, %s10199_s14 }
 0x196   : > { %1142 = vrot.lane.b32.xlu0 %v10865_v24, %s10199_s14 }
 0x197   : > { %v1902_v31 = vpop.permute.xlu1 %1901 }
 0x198   : > { %v1900_v32 = vpop.permute.xlu0 %1899  ;;  %1987 = vst.msk [vmem:[#allocation5 + $0x318] sm:$0xff] %vm1975_vm10, %v1902_v31 }
 0x199   : > { %1986 = vst.msk [vmem:[#allocation5 + $0x2d0] sm:$0xff] %vm1975_vm10, %v1900_v32  ;;  %1337 = vrot.lane.b32.xlu1 %v11174_v13, %s10200_s16 }
 0x19a   : > { %1335 = vrot.lane.b32.xlu0 %v11176_v45, %s10200_s16 }
 0x19b   : > { %v745_v23 = vpop.permute.xlu1 %744 }
 0x19c   : > { %v2093_v24 = vpop.permute.xlu0 %2092  ;;  %829 = vst.msk [vmem:[#allocation5 + $0x360] sm:$0xff] %vm816_vm4, %v745_v23 }
 0x19d   : > { %2179 = vst.msk [vmem:[#allocation5 + $0x2d0] sm:$0xff] %vm2168_vm11, %v2093_v24  ;;  %1530 = vrot.lane.b32.xlu1 %v11194_v22, %s10201_s17 }
 0x19e   : > { %1528 = vrot.lane.b32.xlu0 %v11185_v18, %s10201_s17 }
 0x19f   : > { %v747_v35 = vpop.permute.xlu1 %746 }
 0x1a0   : > { %v2095_v36 = vpop.permute.xlu0 %2094  ;;  %830 = vst.msk [vmem:[#allocation5 + $0x3a8] sm:$0xff] %vm816_vm4, %v747_v35 }
 0x1a1   : > { %2180 = vst.msk [vmem:[#allocation5 + $0x318] sm:$0xff] %vm2168_vm11, %v2095_v36  ;;  %1724 = vrot.lane.b32.xlu1 %v10934_v52, %s10202_s21 }
 0x1a2   : > { %1722 = vrot.lane.b32.xlu0 %v10936_v55, %s10202_s21 }
 0x1a3   : > { %v940_v53 = vpop.permute.xlu1 %939 }
 0x1a4   : > { %v938_v54 = vpop.permute.xlu0 %937  ;;  %v2211_v43 = vld [vmem:[#allocation5 + $0x2d0] sm:$0xff]  ;;  %1023 = vst.msk [vmem:[#allocation5 + $0x3a8] sm:$0xff] %vm1009_vm5, %v940_v53 }
 0x1a5   : > { %1022 = vst.msk [vmem:[#allocation5 + $0x360] sm:$0xff] %vm1009_vm5, %v938_v54  ;;  %9571 = vmatprep.mubr.msk.f32.mxu0 %vm2244_vm12, %v2211_v43  ;;  %1917 = vrot.lane.b32.xlu1 %v11244_v41, %s10203_s25  ;;  %v11393_v53 = vld [vmem:[#allocation2 + $0x139] sm:$0xff] }
 0x1a6   : > { %1915 = vrot.lane.b32.xlu0 %v11246_v42, %s10203_s25 }
 0x1a7   : > { %v1133_v49 = vpop.permute.xlu1 %1132 }
 0x1a8   : > { %v1131_v38 = vpop.permute.xlu0 %1130  ;;  %v2212_v39 = vld [vmem:[#allocation5 + $0x318] sm:$0xff]  ;;  %1216 = vst.msk [vmem:[#allocation5 + $0x3a8] sm:$0xff] %vm1202_vm6, %v1133_v49  ;;  %v11402_v49 = vld [vmem:[#allocation2 + $0x13a] sm:$0xff] }
 0x1a9   : > { %1215 = vst.msk [vmem:[#allocation5 + $0x360] sm:$0xff] %vm1202_vm6, %v1131_v38  ;;  %9572 = vmatmul.mubr.msk.f32.gmra.mxu0 %vm2244_vm12, %v2212_v39  ;;  %760 = vrot.lane.b32.xlu1 %v11176_v45, %s10198_s29 }
 0x1aa   : > { %2108 = vrot.lane.b32.xlu0 %v11255_v44, %s10204_s26 }
 0x1ab   : > { %v1326_v51 = vpop.permute.xlu1 %1325 }
 0x1ac   : > { %v1324_v56 = vpop.permute.xlu0 %1323  ;;  %1409 = vst.msk [vmem:[#allocation5 + $0x3a8] sm:$0xff] %vm1395_vm7, %v1326_v51 }
 0x1ad   : > { %1408 = vst.msk [vmem:[#allocation5 + $0x360] sm:$0xff] %vm1395_vm7, %v1324_v56  ;;  %762 = vrot.lane.b32.xlu1 %v11174_v13, %s10198_s29 }
 0x1ae   : > { %2110 = vrot.lane.b32.xlu0 %v11264_v50, %s10204_s26 }
 0x1af   : > { %v1519_v57 = vpop.permute.xlu1 %1518 }
 0x1b0   : > { %v1517_v58 = vpop.permute.xlu0 %1516  ;;  %1602 = vst.msk [vmem:[#allocation5 + $0x3a8] sm:$0xff] %vm1588_vm8, %v1519_v57 }
 0x1b1   : > { %1601 = vst.msk [vmem:[#allocation5 + $0x360] sm:$0xff] %vm1588_vm8, %v1517_v58  ;;  %955 = vrot.lane.b32.xlu1 %v11194_v22, %s10197_s28  ;;  %v11412_v58 = vld [vmem:[#allocation2 + $0x142] sm:$0xff] }
 0x1b2   : > { %953 = vrot.lane.b32.xlu0 %v11185_v18, %s10197_s28  ;;  %v11332_v18 = vld [vmem:[#allocation2 + $0x12a] sm:$0xff] }
 0x1b3   : > { %v1713_v59 = vpop.permute.xlu1 %1712 }
 0x1b4   : > { %v1711_v60 = vpop.permute.xlu0 %1710  ;;  %1796 = vst.msk [vmem:[#allocation5 + $0x3a8] sm:$0xff] %vm1782_vm9, %v1713_v59 }
 0x1b5   : > { %1795 = vst.msk [vmem:[#allocation5 + $0x360] sm:$0xff] %vm1782_vm9, %v1711_v60  ;;  %1148 = vrot.lane.b32.xlu1 %v10934_v52, %s10199_s14 }
 0x1b6   : > { %1146 = vrot.lane.b32.xlu0 %v10936_v55, %s10199_s14 }
 0x1b7   : > { %v1906_v61 = vpop.permute.xlu1 %1905 }
 0x1b8   : > { %v1904_v62 = vpop.permute.xlu0 %1903  ;;  %1989 = vst.msk [vmem:[#allocation5 + $0x3a8] sm:$0xff] %vm1975_vm10, %v1906_v61 }
 0x1b9   : > { %1988 = vst.msk [vmem:[#allocation5 + $0x360] sm:$0xff] %vm1975_vm10, %v1904_v62  ;;  %1341 = vrot.lane.b32.xlu1 %v11244_v41, %s10200_s16 }
 0x1ba   : > { %1339 = vrot.lane.b32.xlu0 %v11246_v42, %s10200_s16 }
 0x1bb   : > { %v749_v52 = vpop.permute.xlu1 %748 }
 0x1bc   : > { %v2097_v55 = vpop.permute.xlu0 %2096  ;;  %831 = vst.msk [vmem:[#allocation5 + $0x3f0] sm:$0xff] %vm816_vm4, %v749_v52 }
 0x1bd   : > { %2181 = vst.msk [vmem:[#allocation5 + $0x360] sm:$0xff] %vm2168_vm11, %v2097_v55  ;;  %1534 = vrot.lane.b32.xlu1 %v11264_v50, %s10201_s17 }
 0x1be   : > { %1532 = vrot.lane.b32.xlu0 %v11255_v44, %s10201_s17 }
 0x1bf   : > { %v751_v3 = vpop.permute.xlu1 %750 }
 0x1c0   : > { %v2099_v4 = vpop.permute.xlu0 %2098  ;;  %832 = vst.msk [vmem:[#allocation5 + $0x438] sm:$0xff] %vm816_vm4, %v751_v3 }
 0x1c1   : > { %2182 = vst.msk [vmem:[#allocation5 + $0x3a8] sm:$0xff] %vm2168_vm11, %v2099_v4  ;;  %1728 = vrot.lane.b32.xlu1 %v11004_v16, %s10202_s21 }
 0x1c2   : > { %1726 = vrot.lane.b32.xlu0 %v11006_v17, %s10202_s21 }
 0x1c3   : > { %v944_v7 = vpop.permute.xlu1 %943 }
 0x1c4   : > { %v942_v8 = vpop.permute.xlu0 %941  ;;  %v2213_v63 = vld [vmem:[#allocation5 + $0x360] sm:$0xff]  ;;  %1025 = vst.msk [vmem:[#allocation5 + $0x438] sm:$0xff] %vm1009_vm5, %v944_v7 }
 0x1c5   : > { %1024 = vst.msk [vmem:[#allocation5 + $0x3f0] sm:$0xff] %vm1009_vm5, %v942_v8  ;;  %9574 = vmatprep.mubr.msk.f32.mxu0 %vm2244_vm12, %v2213_v63  ;;  %1921 = vrot.lane.b32.xlu1 %v11306_v5, %s10203_s25 }
 0x1c6   : > { %1919 = vrot.lane.b32.xlu0 %v11308_v6, %s10203_s25 }
 0x1c7   : > { %v1137_v10 = vpop.permute.xlu1 %1136 }
 0x1c8   : > { %v1135_v13 = vpop.permute.xlu0 %1134  ;;  %v2214_v45 = vld [vmem:[#allocation5 + $0x3a8] sm:$0xff]  ;;  %1218 = vst.msk [vmem:[#allocation5 + $0x438] sm:$0xff] %vm1202_vm6, %v1137_v10 }
 0x1c9   : > { %1217 = vst.msk [vmem:[#allocation5 + $0x3f0] sm:$0xff] %vm1202_vm6, %v1135_v13  ;;  %v9558_v46 = vpop.f32.mrf.mxu0  ;;  %9575 = vmatmul.mubr.msk.f32.gmra.mxu0 %vm2244_vm12, %v2214_v45  ;;  %764 = vrot.lane.b32.xlu1 %v11246_v42, %s10198_s29  ;;  %v11391_v42 = vld [vmem:[#allocation2 + $0x141] sm:$0xff] }
 0x1ca   : > { %v2417_v14 = vadd.f32 %v9558_v46, %v11320_v0  ;;  %2112 = vrot.lane.b32.xlu0 %v11322_v9, %s10204_s26 }
 0x1cb   : > { %v2411_v15 = vpop.f32.mrf.mxu0  ;;  %v1330_v21 = vpop.permute.xlu1 %1329 }
 0x1cc   : > { %v2571_v19 = vmax.f32 %v2417_v14, 0.0  ;;  %v2412_v20 = vadd.f32 %v11320_v0, %v2411_v15  ;;  %v1328_v22 = vpop.permute.xlu0 %1327  ;;  %1411 = vst.msk [vmem:[#allocation5 + $0x438] sm:$0xff] %vm1395_vm7, %v1330_v21 }
 0x1cd   : > { %1410 = vst.msk [vmem:[#allocation5 + $0x3f0] sm:$0xff] %vm1395_vm7, %v1328_v22  ;;  %766 = vrot.lane.b32.xlu1 %v11244_v41, %s10198_s29 }
 0x1ce   : > { %2604 = vst.msk [vmem:[#allocation3 + $0x21] sm:$0xff] %vm417_vm3, %v2571_v19  ;;  %v2570_v25 = vmax.f32 %v2412_v20, 0.0  ;;  %2114 = vrot.lane.b32.xlu0 %v11332_v18, %s10204_s26  ;;  %v11481_v19 = vld [vmem:[#allocation2 + $0x159] sm:$0xff]  ;;  %v11483_v20 = vld [vmem:[#allocation2 + $0x151] sm:$0xff] }
 0x1cf   : > { %v1523_v26 = vpop.permute.xlu1 %1522 }
 0x1d0   : > { %2603 = vst.msk [vmem:[#allocation3 + $0x19] sm:$0xff] %vm417_vm3, %v2570_v25  ;;  %v1521_v27 = vpop.permute.xlu0 %1520 }
 0x1d1   : > { %1604 = vst.msk [vmem:[#allocation5 + $0x438] sm:$0xff] %vm1588_vm8, %v1523_v26  ;;  %1603 = vst.msk [vmem:[#allocation5 + $0x3f0] sm:$0xff] %vm1588_vm8, %v1521_v27  ;;  %959 = vrot.lane.b32.xlu1 %v11264_v50, %s10197_s28  ;;  %v11492_v26 = vld [vmem:[#allocation2 + $0x152] sm:$0xff] }
 0x1d2   : > { %957 = vrot.lane.b32.xlu0 %v11255_v44, %s10197_s28 }
 0x1d3   : > { %v1717_v28 = vpop.permute.xlu1 %1716 }
 0x1d4   : > { %v1715_v29 = vpop.permute.xlu0 %1714  ;;  %1798 = vst.msk [vmem:[#allocation5 + $0x438] sm:$0xff] %vm1782_vm9, %v1717_v28 }
 0x1d5   : > { %1797 = vst.msk [vmem:[#allocation5 + $0x3f0] sm:$0xff] %vm1782_vm9, %v1715_v29  ;;  %v11351_v30 = vld [vmem:[#allocation3 + $0x22] sm:$0xff]  ;;  %1152 = vrot.lane.b32.xlu1 %v11004_v16, %s10199_s14 }
 0x1d6   : > { %v3149_v31 = vld [vmem:[#allocation3 + $0x21] sm:$0xff]  ;;  %1150 = vrot.lane.b32.xlu0 %v11006_v17, %s10199_s14  ;;  %2927 = vst.msk [vmem:[#allocation5 + $0xe0] sm:$0xff] %vm417_vm3, %v11351_v30 }
 0x1d7   : > { %3181 = vst.msk [vmem:[#allocation5 + $0x58] sm:$0xff] %vm417_vm3, %v3149_v31  ;;  %v11360_v32 = vld [vmem:[#allocation3 + $0x18] sm:$0xff]  ;;  %v11362_v33 = vld [vmem:[#allocation3 + $0x20] sm:$0xff]  ;;  %v1910_v34 = vpop.permute.xlu1 %1909 }
 0x1d8   : > { %v1908_v23 = vpop.permute.xlu0 %1907  ;;  %v11364_v24 = vld [vmem:[#allocation3 + $0x1a] sm:$0xff]  ;;  %2669 = vst.msk [vmem:[#allocation5 + $0x90] sm:$0xff] %vm417_vm3, %v11360_v32  ;;  %2670 = vst.msk [vmem:[#allocation5 + $0xd8] sm:$0xff] %vm417_vm3, %v11362_v33 }
 0x1d9   : > { %v3148_v16 = vld [vmem:[#allocation3 + $0x19] sm:$0xff]  ;;  %1991 = vst.msk [vmem:[#allocation5 + $0x438] sm:$0xff] %vm1975_vm10, %v1910_v34  ;;  %1990 = vst.msk [vmem:[#allocation5 + $0x3f0] sm:$0xff] %vm1975_vm10, %v1908_v23  ;;  %1345 = vrot.lane.b32.xlu1 %v11306_v5, %s10200_s16 }
 0x1da   : > { %2926 = vst.msk [vmem:[#allocation5 + $0x98] sm:$0xff] %vm417_vm3, %v11364_v24  ;;  %3180 = vst.msk [vmem:[#allocation5 + $0x10] sm:$0xff] %vm417_vm3, %v3148_v16  ;;  %1343 = vrot.lane.b32.xlu0 %v11308_v6, %s10200_s16  ;;  %v11502_v16 = vld [vmem:[#allocation2 + $0x15a] sm:$0xff] }
 0x1db   : > { %v753_v17 = vpop.permute.xlu1 %752 }
 0x1dc   : > { %v2101_v35 = vpop.permute.xlu0 %2100  ;;  %833 = vst.msk [vmem:[#allocation5 + $0x480] sm:$0xff] %vm816_vm4, %v753_v17 }
 0x1dd   : > { %2183 = vst.msk [vmem:[#allocation5 + $0x3f0] sm:$0xff] %vm2168_vm11, %v2101_v35  ;;  %1538 = vrot.lane.b32.xlu1 %v11332_v18, %s10201_s17 }
 0x1de   : > { %1536 = vrot.lane.b32.xlu0 %v11322_v9, %s10201_s17 }
 0x1df   : > { %v755_v36 = vpop.permute.xlu1 %754 }
 0x1e0   : > { %v2103_v41 = vpop.permute.xlu0 %2102  ;;  %834 = vst.msk [vmem:[#allocation5 + $0x4c8] sm:$0xff] %vm816_vm4, %v755_v36 }
 0x1e1   : > { %2184 = vst.msk [vmem:[#allocation5 + $0x438] sm:$0xff] %vm2168_vm11, %v2103_v41  ;;  %1732 = vrot.lane.b32.xlu1 %v11092_v47, %s10202_s21 }
 0x1e2   : > { %1730 = vrot.lane.b32.xlu0 %v11094_v48, %s10202_s21 }
 0x1e3   : > { %v948_v54 = vpop.permute.xlu1 %947 }
 0x1e4   : > { %v946_v43 = vpop.permute.xlu0 %945  ;;  %v2215_v44 = vld [vmem:[#allocation5 + $0x3f0] sm:$0xff]  ;;  %1027 = vst.msk [vmem:[#allocation5 + $0x4c8] sm:$0xff] %vm1009_vm5, %v948_v54 }
 0x1e5   : > { %1026 = vst.msk [vmem:[#allocation5 + $0x480] sm:$0xff] %vm1009_vm5, %v946_v43  ;;  %9577 = vmatprep.mubr.msk.f32.mxu0 %vm2244_vm12, %v2215_v44  ;;  %1925 = vrot.lane.b32.xlu1 %v11391_v42, %s10203_s25 }
 0x1e6   : > { %1923 = vrot.lane.b32.xlu0 %v11393_v53, %s10203_s25 }
 0x1e7   : > { %v1141_v38 = vpop.permute.xlu1 %1140 }
 0x1e8   : > { %v1139_v39 = vpop.permute.xlu0 %1138  ;;  %v2216_v50 = vld [vmem:[#allocation5 + $0x438] sm:$0xff]  ;;  %1220 = vst.msk [vmem:[#allocation5 + $0x4c8] sm:$0xff] %vm1202_vm6, %v1141_v38 }
 0x1e9   : > { %1219 = vst.msk [vmem:[#allocation5 + $0x480] sm:$0xff] %vm1202_vm6, %v1139_v39  ;;  %v9561_v51 = vpop.f32.mrf.mxu0  ;;  %9578 = vmatmul.mubr.msk.f32.gmra.mxu0 %vm2244_vm12, %v2216_v50  ;;  %768 = vrot.lane.b32.xlu1 %v11308_v6, %s10198_s29 }
 0x1ea   : > { %v2427_v56 = vadd.f32 %v9561_v51, %v11320_v0  ;;  %2116 = vrot.lane.b32.xlu0 %v11402_v49, %s10204_s26 }
 0x1eb   : > { %v2421_v57 = vpop.f32.mrf.mxu0  ;;  %v1334_v61 = vpop.permute.xlu1 %1333 }
 0x1ec   : > { %v2573_v59 = vmax.f32 %v2427_v56, 0.0  ;;  %v2422_v60 = vadd.f32 %v11320_v0, %v2421_v57  ;;  %v1332_v62 = vpop.permute.xlu0 %1331  ;;  %1413 = vst.msk [vmem:[#allocation5 + $0x4c8] sm:$0xff] %vm1395_vm7, %v1334_v61 }
 0x1ed   : > { %1412 = vst.msk [vmem:[#allocation5 + $0x480] sm:$0xff] %vm1395_vm7, %v1332_v62  ;;  %770 = vrot.lane.b32.xlu1 %v11306_v5, %s10198_s29 }
 0x1ee   : > { %2606 = vst.msk [vmem:[#allocation3 + $0x39] sm:$0xff] %vm417_vm3, %v2573_v59  ;;  %v2572_v1 = vmax.f32 %v2422_v60, 0.0  ;;  %2118 = vrot.lane.b32.xlu0 %v11412_v58, %s10204_s26 }
 0x1ef   : > { %v1527_v2 = vpop.permute.xlu1 %1526 }
 0x1f0   : > { %2605 = vst.msk [vmem:[#allocation3 + $0x31] sm:$0xff] %vm417_vm3, %v2572_v1  ;;  %v1525_v52 = vpop.permute.xlu0 %1524 }
 0x1f1   : > { %1606 = vst.msk [vmem:[#allocation5 + $0x4c8] sm:$0xff] %vm1588_vm8, %v1527_v2  ;;  %1605 = vst.msk [vmem:[#allocation5 + $0x480] sm:$0xff] %vm1588_vm8, %v1525_v52  ;;  %963 = vrot.lane.b32.xlu1 %v11332_v18, %s10197_s28  ;;  %v11571_v52 = vld [vmem:[#allocation2 + $0x171] sm:$0xff] }
 0x1f2   : > { %961 = vrot.lane.b32.xlu0 %v11322_v9, %s10197_s28 }
 0x1f3   : > { %v1721_v55 = vpop.permute.xlu1 %1720 }
 0x1f4   : > { %v1719_v3 = vpop.permute.xlu0 %1718  ;;  %1800 = vst.msk [vmem:[#allocation5 + $0x4c8] sm:$0xff] %vm1782_vm9, %v1721_v55  ;;  %v11573_v55 = vld [vmem:[#allocation2 + $0x169] sm:$0xff] }
 0x1f5   : > { %1799 = vst.msk [vmem:[#allocation5 + $0x480] sm:$0xff] %vm1782_vm9, %v1719_v3  ;;  %v11431_v4 = vld [vmem:[#allocation3 + $0x3a] sm:$0xff]  ;;  %1156 = vrot.lane.b32.xlu1 %v11092_v47, %s10199_s14 }
 0x1f6   : > { %v11433_v5 = vld [vmem:[#allocation3 + $0x39] sm:$0xff]  ;;  %1154 = vrot.lane.b32.xlu0 %v11094_v48, %s10199_s14  ;;  %2929 = vst.msk [vmem:[#allocation5 + $0x170] sm:$0xff] %vm417_vm3, %v11431_v4 }
 0x1f7   : > { %3183 = vst.msk [vmem:[#allocation5 + $0xe8] sm:$0xff] %vm417_vm3, %v11433_v5  ;;  %v3662_v6 = vld [vmem:[#allocation3 + $0x3a] sm:$0xff]  ;;  %v11443_v7 = vld [vmem:[#allocation3 + $0x30] sm:$0xff]  ;;  %v1914_v63 = vpop.permute.xlu1 %1913 }
 0x1f8   : > { %v11445_v8 = vld [vmem:[#allocation3 + $0x38] sm:$0xff]  ;;  %3694 = vst.msk [vmem:[#allocation5 + $0x68] sm:$0xff] %vm417_vm3, %v3662_v6  ;;  %v1912_v9 = vpop.permute.xlu0 %1911  ;;  %2671 = vst.msk [vmem:[#allocation5 + $0x120] sm:$0xff] %vm417_vm3, %v11443_v7  ;;  %v3405_v48 = vld [vmem:[#allocation3 + $0x30] sm:$0xff] }
 0x1f9   : > { %v11448_v10 = vld [vmem:[#allocation3 + $0x32] sm:$0xff]  ;;  %2672 = vst.msk [vmem:[#allocation5 + $0x168] sm:$0xff] %vm417_vm3, %v11445_v8  ;;  %3437 = vst.msk [vmem:[#allocation5 + $0x18] sm:$0xff] %vm417_vm3, %v3405_v48  ;;  %1349 = vrot.lane.b32.xlu1 %v11391_v42, %s10200_s16 }
 0x1fa   : > { %v11454_v47 = vld [vmem:[#allocation3 + $0x31] sm:$0xff]  ;;  %1993 = vst.msk [vmem:[#allocation5 + $0x4c8] sm:$0xff] %vm1975_vm10, %v1914_v63  ;;  %1992 = vst.msk [vmem:[#allocation5 + $0x480] sm:$0xff] %vm1975_vm10, %v1912_v9  ;;  %1347 = vrot.lane.b32.xlu0 %v11393_v53, %s10200_s16  ;;  %v11582_v9 = vld [vmem:[#allocation2 + $0x16a] sm:$0xff] }
 0x1fb   : > { %2928 = vst.msk [vmem:[#allocation5 + $0x128] sm:$0xff] %vm417_vm3, %v11448_v10  ;;  %3182 = vst.msk [vmem:[#allocation5 + $0xa0] sm:$0xff] %vm417_vm3, %v11454_v47  ;;  %v3406_v13 = vld [vmem:[#allocation3 + $0x38] sm:$0xff]  ;;  %v757_v46 = vpop.permute.xlu1 %756 }
 0x1fc   : > { %v3661_v45 = vld [vmem:[#allocation3 + $0x32] sm:$0xff]  ;;  %3438 = vst.msk [vmem:[#allocation5 + $0x60] sm:$0xff] %vm417_vm3, %v3406_v13  ;;  %v2105_v14 = vpop.permute.xlu0 %2104 }
 0x1fd   : > { %3693 = vst.msk [vmem:[#allocation5 + $0x20] sm:$0xff] %vm417_vm3, %v3661_v45  ;;  %1542 = vrot.lane.b32.xlu1 %v11412_v58, %s10201_s17 }
 0x1fe   : > { %835 = vst.msk [vmem:[#allocation5 + $0x510] sm:$0xff] %vm816_vm4, %v757_v46  ;;  %1540 = vrot.lane.b32.xlu0 %v11402_v49, %s10201_s17 }
 0x1ff   : > { %2185 = vst.msk [vmem:[#allocation5 + $0x480] sm:$0xff] %vm2168_vm11, %v2105_v14  ;;  %v759_v15 = vpop.permute.xlu1 %758 }
 0x200   : > { %v2107_v18 = vpop.permute.xlu0 %2106  ;;  %836 = vst.msk [vmem:[#allocation5 + $0x558] sm:$0xff] %vm816_vm4, %v759_v15  ;;  %v3900_v15 = vld [vmem:[%s14983_s3 + $0x78] sm:$0xff] }
 0x201   : > { %2186 = vst.msk [vmem:[#allocation5 + $0x4c8] sm:$0xff] %vm2168_vm11, %v2107_v18  ;;  %1736 = vrot.lane.b32.xlu1 %v11162_v11, %s10202_s21  ;;  %4061 = vmatpush1.msra.mxu1 %v3900_v15 }
 0x202   : > { %1734 = vrot.lane.b32.xlu0 %v11164_v12, %s10202_s21 }
 0x203   : > { %v952_v21 = vpop.permute.xlu1 %951 }
 0x204   : > { %v950_v22 = vpop.permute.xlu0 %949  ;;  %1029 = vst.msk [vmem:[#allocation5 + $0x558] sm:$0xff] %vm1009_vm5, %v952_v21  ;;  %v11595_v21 = vld [vmem:[#allocation2 + $0x172] sm:$0xff] }
 0x205   : > { %1028 = vst.msk [vmem:[#allocation5 + $0x510] sm:$0xff] %vm1009_vm5, %v950_v22  ;;  %1929 = vrot.lane.b32.xlu1 %v11481_v19, %s10203_s25 }
 0x206   : > { %v2217_v25 = vld [vmem:[#allocation5 + $0x480] sm:$0xff]  ;;  %1927 = vrot.lane.b32.xlu0 %v11483_v20, %s10203_s25 }
 0x207   : > { %9580 = vmatprep.mubr.msk.f32.mxu0 %vm2244_vm12, %v2217_v25  ;;  %v1145_v27 = vpop.permute.xlu1 %1144 }
 0x208   : > { %v1143_v28 = vpop.permute.xlu0 %1142  ;;  %v2218_v29 = vld [vmem:[#allocation5 + $0x4c8] sm:$0xff]  ;;  %1222 = vst.msk [vmem:[#allocation5 + $0x558] sm:$0xff] %vm1202_vm6, %v1145_v27 }
 0x209   : > { %1221 = vst.msk [vmem:[#allocation5 + $0x510] sm:$0xff] %vm1202_vm6, %v1143_v28  ;;  %v9564_v31 = vpop.f32.mrf.mxu0  ;;  %9581 = vmatmul.mubr.msk.f32.gmra.mxu0 %vm2244_vm12, %v2218_v29  ;;  %772 = vrot.lane.b32.xlu1 %v11393_v53, %s10198_s29  ;;  %v11598_v29 = vld [vmem:[#allocation4] sm:$0xff] }
 0x20a   : > { %v2437_v34 = vadd.f32 %v9564_v31, %v11320_v0  ;;  %2120 = vrot.lane.b32.xlu0 %v11492_v26, %s10204_s26  ;;  %4062 = vmatprep.subr.mxu1 %v11598_v29 }
 0x20b   : > { %v2431_v23 = vpop.f32.mrf.mxu0  ;;  %v1338_v36 = vpop.permute.xlu1 %1337 }
 0x20c   : > { %v2575_v17 = vmax.f32 %v2437_v34, 0.0  ;;  %v2432_v35 = vadd.f32 %v11320_v0, %v2431_v23  ;;  %v1336_v41 = vpop.permute.xlu0 %1335  ;;  %1415 = vst.msk [vmem:[#allocation5 + $0x558] sm:$0xff] %vm1395_vm7, %v1338_v36  ;;  %v3898_v34 = vld [vmem:[%s14983_s3 + $0x68] sm:$0xff] }
 0x20d   : > { %1414 = vst.msk [vmem:[#allocation5 + $0x510] sm:$0xff] %vm1395_vm7, %v1336_v41  ;;  %774 = vrot.lane.b32.xlu1 %v11391_v42, %s10198_s29 }
 0x20e   : > { %2608 = vst.msk [vmem:[#allocation3 + $0x51] sm:$0xff] %vm417_vm3, %v2575_v17  ;;  %v2574_v54 = vmax.f32 %v2432_v35, 0.0  ;;  %2122 = vrot.lane.b32.xlu0 %v11502_v16, %s10204_s26  ;;  %v3897_v35 = vld [vmem:[%s14983_s3 + $0x60] sm:$0xff] }
 0x20f   : > { %v1531_v53 = vpop.permute.xlu1 %1530 }
 0x210   : > { %2607 = vst.msk [vmem:[#allocation3 + $0x49] sm:$0xff] %vm417_vm3, %v2574_v54  ;;  %v1529_v43 = vpop.permute.xlu0 %1528 }
 0x211   : > { %1608 = vst.msk [vmem:[#allocation5 + $0x558] sm:$0xff] %vm1588_vm8, %v1531_v53  ;;  %1607 = vst.msk [vmem:[#allocation5 + $0x510] sm:$0xff] %vm1588_vm8, %v1529_v43  ;;  %967 = vrot.lane.b32.xlu1 %v11412_v58, %s10197_s28 }
 0x212   : > { %965 = vrot.lane.b32.xlu0 %v11402_v49, %s10197_s28 }
 0x213   : > { %v1725_v44 = vpop.permute.xlu1 %1724 }
 0x214   : > { %v1723_v38 = vpop.permute.xlu0 %1722  ;;  %1802 = vst.msk [vmem:[#allocation5 + $0x558] sm:$0xff] %vm1782_vm9, %v1725_v44 }
 0x215   : > { %1801 = vst.msk [vmem:[#allocation5 + $0x510] sm:$0xff] %vm1782_vm9, %v1723_v38  ;;  %v11521_v42 = vld [vmem:[#allocation3 + $0x52] sm:$0xff]  ;;  %1160 = vrot.lane.b32.xlu1 %v11162_v11, %s10199_s14 }
 0x216   : > { %v11523_v39 = vld [vmem:[#allocation3 + $0x51] sm:$0xff]  ;;  %1158 = vrot.lane.b32.xlu0 %v11164_v12, %s10199_s14  ;;  %2931 = vst.msk [vmem:[#allocation5 + $0x200] sm:$0xff] %vm417_vm3, %v11521_v42 }
 0x217   : > { %3185 = vst.msk [vmem:[#allocation5 + $0x178] sm:$0xff] %vm417_vm3, %v11523_v39  ;;  %v3664_v49 = vld [vmem:[#allocation3 + $0x52] sm:$0xff]  ;;  %v11533_v50 = vld [vmem:[#allocation3 + $0x48] sm:$0xff]  ;;  %v1918_v56 = vpop.permute.xlu1 %1917 }
 0x218   : > { %v11535_v51 = vld [vmem:[#allocation3 + $0x50] sm:$0xff]  ;;  %3696 = vst.msk [vmem:[#allocation5 + $0xf8] sm:$0xff] %vm417_vm3, %v3664_v49  ;;  %v1916_v57 = vpop.permute.xlu0 %1915  ;;  %2673 = vst.msk [vmem:[#allocation5 + $0x1b0] sm:$0xff] %vm417_vm3, %v11533_v50  ;;  %v3407_v12 = vld [vmem:[#allocation3 + $0x48] sm:$0xff] }
 0x219   : > { %v11538_v58 = vld [vmem:[#allocation3 + $0x4a] sm:$0xff]  ;;  %2674 = vst.msk [vmem:[#allocation5 + $0x1f8] sm:$0xff] %vm417_vm3, %v11535_v51  ;;  %3439 = vst.msk [vmem:[#allocation5 + $0xa8] sm:$0xff] %vm417_vm3, %v3407_v12  ;;  %1353 = vrot.lane.b32.xlu1 %v11481_v19, %s10200_s16 }
 0x21a   : > { %v11544_v11 = vld [vmem:[#allocation3 + $0x49] sm:$0xff]  ;;  %1995 = vst.msk [vmem:[#allocation5 + $0x558] sm:$0xff] %vm1975_vm10, %v1918_v56  ;;  %1994 = vst.msk [vmem:[#allocation5 + $0x510] sm:$0xff] %vm1975_vm10, %v1916_v57  ;;  %1351 = vrot.lane.b32.xlu0 %v11483_v20, %s10200_s16 }
 0x21b   : > { %2930 = vst.msk [vmem:[#allocation5 + $0x1b8] sm:$0xff] %vm417_vm3, %v11538_v58  ;;  %3184 = vst.msk [vmem:[#allocation5 + $0x130] sm:$0xff] %vm417_vm3, %v11544_v11  ;;  %v3663_v59 = vld [vmem:[#allocation3 + $0x4a] sm:$0xff]  ;;  %v761_v61 = vpop.permute.xlu1 %760 }
 0x21c   : > { %v3408_v60 = vld [vmem:[#allocation3 + $0x50] sm:$0xff]  ;;  %3695 = vst.msk [vmem:[#allocation5 + $0xb0] sm:$0xff] %vm417_vm3, %v3663_v59  ;;  %v2109_v62 = vpop.permute.xlu0 %2108 }
 0x21d   : > { %3440 = vst.msk [vmem:[#allocation5 + $0xf0] sm:$0xff] %vm417_vm3, %v3408_v60  ;;  %1546 = vrot.lane.b32.xlu1 %v11502_v16, %s10201_s17  ;;  %v3893_v59 = vld [vmem:[%s14983_s3 + $0x40] sm:$0xff] }
 0x21e   : > { %837 = vst.msk [vmem:[#allocation5 + $0x5a0] sm:$0xff] %vm816_vm4, %v761_v61  ;;  %1544 = vrot.lane.b32.xlu0 %v11492_v26, %s10201_s17 }
 0x21f   : > { %2187 = vst.msk [vmem:[#allocation5 + $0x510] sm:$0xff] %vm2168_vm11, %v2109_v62  ;;  %v763_v1 = vpop.permute.xlu1 %762 }
 0x220   : > { %v2111_v2 = vpop.permute.xlu0 %2110  ;;  %838 = vst.msk [vmem:[#allocation5 + $0x5e8] sm:$0xff] %vm816_vm4, %v763_v1  ;;  %v3892_v1 = vld [vmem:[%s14983_s3 + $0x38] sm:$0xff] }
 0x221   : > { %2188 = vst.msk [vmem:[#allocation5 + $0x558] sm:$0xff] %vm2168_vm11, %v2111_v2  ;;  %1740 = vrot.lane.b32.xlu1 %v11232_v37, %s10202_s21  ;;  %v11691_v2 = vld [vmem:[#allocation2 + $0x188] sm:$0xff] }
 0x222   : > { %1738 = vrot.lane.b32.xlu0 %v11234_v40, %s10202_s21 }
 0x223   : > { %v956_v3 = vpop.permute.xlu1 %955 }
 0x224   : > { %v954_v6 = vpop.permute.xlu0 %953  ;;  %1031 = vst.msk [vmem:[#allocation5 + $0x5e8] sm:$0xff] %vm1009_vm5, %v956_v3  ;;  %v11693_v3 = vld [vmem:[#allocation2 + $0x180] sm:$0xff] }
 0x225   : > { %1030 = vst.msk [vmem:[#allocation5 + $0x5a0] sm:$0xff] %vm1009_vm5, %v954_v6  ;;  %1933 = vrot.lane.b32.xlu1 %v11571_v52, %s10203_s25 }
 0x226   : > { %v2219_v63 = vld [vmem:[#allocation5 + $0x510] sm:$0xff]  ;;  %1931 = vrot.lane.b32.xlu0 %v11573_v55, %s10203_s25 }
 0x227   : > { %9583 = vmatprep.mubr.msk.f32.mxu0 %vm2244_vm12, %v2219_v63  ;;  %v1149_v48 = vpop.permute.xlu1 %1148 }
 0x228   : > { %v1147_v13 = vpop.permute.xlu0 %1146  ;;  %v2220_v45 = vld [vmem:[#allocation5 + $0x558] sm:$0xff]  ;;  %1224 = vst.msk [vmem:[#allocation5 + $0x5e8] sm:$0xff] %vm1202_vm6, %v1149_v48  ;;  %v3891_v48 = vld [vmem:[%s14983_s3 + $0x30] sm:$0xff] }
 0x229   : > { %1223 = vst.msk [vmem:[#allocation5 + $0x5a0] sm:$0xff] %vm1202_vm6, %v1147_v13  ;;  %v9567_v46 = vpop.f32.mrf.mxu0  ;;  %9584 = vmatmul.mubr.msk.f32.gmra.mxu0 %vm2244_vm12, %v2220_v45  ;;  %776 = vrot.lane.b32.xlu1 %v11483_v20, %s10198_s29  ;;  %v3899_v20 = vld [vmem:[%s14983_s3 + $0x70] sm:$0xff]  ;;  %v3890_v13 = vld [vmem:[%s14983_s3 + $0x28] sm:$0xff] }
 0x22a   : > { %v2447_v14 = vadd.f32 %v9567_v46, %v11320_v0  ;;  %2124 = vrot.lane.b32.xlu0 %v11582_v9, %s10204_s26  ;;  %4063 = vmatpush1.msra.mxu1 %v3899_v20  ;;  %v11709_v45 = vld [vmem:[#allocation2 + $0x189] sm:$0xff]  ;;  %v11711_v46 = vld [vmem:[#allocation2 + $0x181] sm:$0xff] }
 0x22b   : > { %v2441_v18 = vpop.f32.mrf.mxu0  ;;  %v1342_v27 = vpop.permute.xlu1 %1341  ;;  %4064 = vmatprep.subr.mxu1 %v11598_v29 }
 0x22c   : > { %v2577_v22 = vmax.f32 %v2447_v14, 0.0  ;;  %v2442_v25 = vadd.f32 %v11320_v0, %v2441_v18  ;;  %v1340_v28 = vpop.permute.xlu0 %1339  ;;  %1417 = vst.msk [vmem:[#allocation5 + $0x5e8] sm:$0xff] %vm1395_vm7, %v1342_v27  ;;  %4065 = vmatpush1.msra.mxu1 %v3898_v34 }
 0x22d   : > { %1416 = vst.msk [vmem:[#allocation5 + $0x5a0] sm:$0xff] %vm1395_vm7, %v1340_v28  ;;  %778 = vrot.lane.b32.xlu1 %v11481_v19, %s10198_s29  ;;  %4066 = vmatprep.subr.mxu1 %v11598_v29  ;;  %v3896_v19 = vld [vmem:[%s14983_s3 + $0x58] sm:$0xff] }
 0x22e   : > { %2610 = vst.msk [vmem:[#allocation3 + $0x69] sm:$0xff] %vm417_vm3, %v2577_v22  ;;  %v2576_v31 = vmax.f32 %v2442_v25, 0.0  ;;  %2126 = vrot.lane.b32.xlu0 %v11595_v21, %s10204_s26  ;;  %4067 = vmatpush1.msra.mxu1 %v3897_v35  ;;  %v3889_v22 = vld [vmem:[%s14983_s3 + $0x20] sm:$0xff] }
 0x22f   : > { %v1535_v23 = vpop.permute.xlu1 %1534  ;;  %4068 = vmatprep.subr.mxu1 %v11598_v29  ;;  %v11724_v25 = vld [vmem:[#allocation2 + $0x182] sm:$0xff] }
 0x230   : > { %2609 = vst.msk [vmem:[#allocation3 + $0x61] sm:$0xff] %vm417_vm3, %v2576_v31  ;;  %v1533_v17 = vpop.permute.xlu0 %1532  ;;  %4069 = vmatpush1.msra.mxu1 %v3896_v19  ;;  %v3888_v31 = vld [vmem:[%s14983_s3 + $0x18] sm:$0xff]  ;;  %v11742_v19 = vld [vmem:[#allocation2 + $0x18a] sm:$0xff] }
 0x231   : > { %1610 = vst.msk [vmem:[#allocation5 + $0x5e8] sm:$0xff] %vm1588_vm8, %v1535_v23  ;;  %1609 = vst.msk [vmem:[#allocation5 + $0x5a0] sm:$0xff] %vm1588_vm8, %v1533_v17  ;;  %971 = vrot.lane.b32.xlu1 %v11502_v16, %s10197_s28  ;;  %v3895_v16 = vld [vmem:[%s14983_s3 + $0x50] sm:$0xff]  ;;  %4070 = vmatprep.subr.mxu1 %v11598_v29 }
 0x232   : > { %969 = vrot.lane.b32.xlu0 %v11492_v26, %s10197_s28  ;;  %4071 = vmatpush1.msra.mxu1 %v3895_v16  ;;  %v3887_v17 = vld [vmem:[%s14983_s3 + $0x10] sm:$0xff] }
 0x233   : > { %v1729_v36 = vpop.permute.xlu1 %1728  ;;  %4072 = vmatprep.subr.mxu1 %v11598_v29 }
 0x234   : > { %v1727_v41 = vpop.permute.xlu0 %1726  ;;  %1804 = vst.msk [vmem:[#allocation5 + $0x5e8] sm:$0xff] %vm1782_vm9, %v1729_v36 }
 0x235   : > { %1803 = vst.msk [vmem:[#allocation5 + $0x5a0] sm:$0xff] %vm1782_vm9, %v1727_v41  ;;  %v11635_v54 = vld [vmem:[#allocation3 + $0x6a] sm:$0xff]  ;;  %1164 = vrot.lane.b32.xlu1 %v11232_v37, %s10199_s14 }
 0x236   : > { %1162 = vrot.lane.b32.xlu0 %v11234_v40, %s10199_s14  ;;  %2933 = vst.msk [vmem:[#allocation5 + $0x290] sm:$0xff] %vm417_vm3, %v11635_v54  ;;  %v11643_v26 = vld [vmem:[#allocation3 + $0x69] sm:$0xff]  ;;  %v3894_v40 = vld [vmem:[%s14983_s3 + $0x48] sm:$0xff] }
 0x237   : > { %v3666_v53 = vld [vmem:[#allocation3 + $0x6a] sm:$0xff]  ;;  %v11645_v43 = vld [vmem:[#allocation3 + $0x60] sm:$0xff]  ;;  %3187 = vst.msk [vmem:[#allocation5 + $0x208] sm:$0xff] %vm417_vm3, %v11643_v26  ;;  %v1922_v37 = vpop.permute.xlu1 %1921  ;;  %4073 = vmatpush1.msra.mxu1 %v3894_v40 }
 0x238   : > { %v11647_v44 = vld [vmem:[#allocation3 + $0x68] sm:$0xff]  ;;  %3698 = vst.msk [vmem:[#allocation5 + $0x188] sm:$0xff] %vm417_vm3, %v3666_v53  ;;  %v1920_v38 = vpop.permute.xlu0 %1919  ;;  %2675 = vst.msk [vmem:[#allocation5 + $0x240] sm:$0xff] %vm417_vm3, %v11645_v43  ;;  %v3409_v12 = vld [vmem:[#allocation3 + $0x60] sm:$0xff]  ;;  %4074 = vmatprep.subr.mxu1 %v11598_v29 }
 0x239   : > { %v11656_v49 = vld [vmem:[#allocation3 + $0x62] sm:$0xff]  ;;  %2676 = vst.msk [vmem:[#allocation5 + $0x288] sm:$0xff] %vm417_vm3, %v11647_v44  ;;  %1357 = vrot.lane.b32.xlu1 %v11571_v52, %s10200_s16  ;;  %3441 = vst.msk [vmem:[#allocation5 + $0x138] sm:$0xff] %vm417_vm3, %v3409_v12  ;;  %4075 = vmatpush1.msra.mxu1 %v3893_v59 }
 0x23a   : > { %v11662_v56 = vld [vmem:[#allocation3 + $0x61] sm:$0xff]  ;;  %1997 = vst.msk [vmem:[#allocation5 + $0x5e8] sm:$0xff] %vm1975_vm10, %v1922_v37  ;;  %1996 = vst.msk [vmem:[#allocation5 + $0x5a0] sm:$0xff] %vm1975_vm10, %v1920_v38  ;;  %1355 = vrot.lane.b32.xlu0 %v11573_v55, %s10200_s16  ;;  %4076 = vmatprep.subr.mxu1 %v11598_v29 }
 0x23b   : > { %2932 = vst.msk [vmem:[#allocation5 + $0x248] sm:$0xff] %vm417_vm3, %v11656_v49  ;;  %3186 = vst.msk [vmem:[#allocation5 + $0x1c0] sm:$0xff] %vm417_vm3, %v11662_v56  ;;  %v3665_v57 = vld [vmem:[#allocation3 + $0x62] sm:$0xff]  ;;  %v765_v61 = vpop.permute.xlu1 %764  ;;  %4077 = vmatpush1.msra.mxu1 %v3892_v1 }
 0x23c   : > { %3697 = vst.msk [vmem:[#allocation5 + $0x140] sm:$0xff] %vm417_vm3, %v3665_v57  ;;  %v3410_v60 = vld [vmem:[#allocation3 + $0x68] sm:$0xff]  ;;  %v2113_v62 = vpop.permute.xlu0 %2112  ;;  %4078 = vmatprep.subr.mxu1 %v11598_v29  ;;  %v3885_v57 = vld [vmem:[%s14983_s3] sm:$0xff] }
 0x23d   : > { %3442 = vst.msk [vmem:[#allocation5 + $0x180] sm:$0xff] %vm417_vm3, %v3410_v60  ;;  %1550 = vrot.lane.b32.xlu1 %v11595_v21, %s10201_s17  ;;  %4079 = vmatpush1.msra.mxu1 %v3891_v48 }
 0x23e   : > { %839 = vst.msk [vmem:[#allocation5 + $0x630] sm:$0xff] %vm816_vm4, %v765_v61  ;;  %1548 = vrot.lane.b32.xlu0 %v11582_v9, %s10201_s17  ;;  %4080 = vmatprep.subr.mxu1 %v11598_v29 }
 0x23f   : > { %2189 = vst.msk [vmem:[#allocation5 + $0x5a0] sm:$0xff] %vm2168_vm11, %v2113_v62  ;;  %v767_v6 = vpop.permute.xlu1 %766  ;;  %4081 = vmatpush1.msra.mxu1 %v3890_v13 }
 0x240   : > { %v2115_v63 = vpop.permute.xlu0 %2114  ;;  %840 = vst.msk [vmem:[#allocation5 + $0x678] sm:$0xff] %vm816_vm4, %v767_v6  ;;  %4082 = vmatprep.subr.mxu1 %v11598_v29 }
 0x241   : > { %2190 = vst.msk [vmem:[#allocation5 + $0x5e8] sm:$0xff] %vm2168_vm11, %v2115_v63  ;;  %1744 = vrot.lane.b32.xlu1 %v11691_v2, %s10202_s21  ;;  %4083 = vmatpush1.msra.mxu1 %v3889_v22 }
 0x242   : > { %1742 = vrot.lane.b32.xlu0 %v11693_v3, %s10202_s21  ;;  %4084 = vmatprep.subr.mxu1 %v11598_v29 }
 0x243   : > { %v960_v14 = vpop.permute.xlu1 %959  ;;  %4085 = vmatpush1.msra.mxu1 %v3888_v31 }
 0x244   : > { %v958_v15 = vpop.permute.xlu0 %957  ;;  %1033 = vst.msk [vmem:[#allocation5 + $0x678] sm:$0xff] %vm1009_vm5, %v960_v14  ;;  %4086 = vmatprep.subr.mxu1 %v11598_v29 }
 0x245   : > { %1032 = vst.msk [vmem:[#allocation5 + $0x630] sm:$0xff] %vm1009_vm5, %v958_v15  ;;  %1937 = vrot.lane.b32.xlu1 %v11709_v45, %s10203_s25  ;;  %4087 = vmatpush1.msra.mxu1 %v3887_v17  ;;  %v3913_v15 = vld [vmem:[%s14983_s3 + $0xe0] sm:$0xff]  ;;  %v3910_v17 = vld [vmem:[%s14983_s3 + $0xc8] sm:$0xff] }
 0x246   : > { %v2221_v18 = vld [vmem:[#allocation5 + $0x5a0] sm:$0xff]  ;;  %1935 = vrot.lane.b32.xlu0 %v11711_v46, %s10203_s25  ;;  %4088 = vmatprep.subr.mxu1 %v11598_v29 }
 0x247   : > { %9586 = vmatprep.mubr.msk.f32.mxu0 %vm2244_vm12, %v2221_v18  ;;  %v1153_v27 = vpop.permute.xlu1 %1152 }
 0x248   : > { %v1151_v28 = vpop.permute.xlu0 %1150  ;;  %v2222_v20 = vld [vmem:[#allocation5 + $0x5e8] sm:$0xff]  ;;  %1226 = vst.msk [vmem:[#allocation5 + $0x678] sm:$0xff] %vm1202_vm6, %v1153_v27 }
 0x249   : > { %1225 = vst.msk [vmem:[#allocation5 + $0x630] sm:$0xff] %vm1202_vm6, %v1151_v28  ;;  %v9570_v34 = vpop.f32.mrf.mxu0  ;;  %9587 = vmatmul.mubr.msk.f32.gmra.mxu0 %vm2244_vm12, %v2222_v20  ;;  %780 = vrot.lane.b32.xlu1 %v11573_v55, %s10198_s29  ;;  %v3886_v55 = vld [vmem:[%s14983_s3 + $0x8] sm:$0xff]  ;;  %v1652_v28 = vld [vmem:[#allocation2 + $0x198] sm:$0xff] }
 0x24a   : > { %v2457_v23 = vadd.f32 %v9570_v34, %v11320_v0  ;;  %2128 = vrot.lane.b32.xlu0 %v11724_v25, %s10204_s26  ;;  %4089 = vmatpush1.msra.mxu1 %v3886_v55  ;;  %v11834_v20 = vld [vmem:[#allocation3 + $0x2] sm:$0xff]  ;;  %v3909_v55 = vld [vmem:[%s14983_s3 + $0xc0] sm:$0xff] }
 0x24b   : > { %v2451_v35 = vpop.f32.mrf.mxu0  ;;  %v1346_v16 = vpop.permute.xlu1 %1345  ;;  %4090 = vmatprep.subr.mxu1 %v11598_v29  ;;  %2924 = vst.msk [vmem:[#allocation5 + $0x8] sm:$0xff] %vm417_vm3, %v11834_v20 }
 0x24c   : > { %v2579_v36 = vmax.f32 %v2457_v23, 0.0  ;;  %v2452_v41 = vadd.f32 %v11320_v0, %v2451_v35  ;;  %v1344_v53 = vpop.permute.xlu0 %1343  ;;  %1419 = vst.msk [vmem:[#allocation5 + $0x678] sm:$0xff] %vm1395_vm7, %v1346_v16  ;;  %4091 = vmatpush1.msra.mxu1 %v3885_v57  ;;  %v3911_v23 = vld [vmem:[%s14983_s3 + $0xd0] sm:$0xff]  ;;  %v1846_v35 = vld [vmem:[#allocation2 + $0x1a1] sm:$0xff] }
 0x24d   : > { %1418 = vst.msk [vmem:[#allocation5 + $0x630] sm:$0xff] %vm1395_vm7, %v1344_v53  ;;  %782 = vrot.lane.b32.xlu1 %v11571_v52, %s10198_s29  ;;  %v3916_v52 = vld [vmem:[%s14983_s3 + $0xf8] sm:$0xff]  ;;  %4092 = vmatprep.subr.mxu1 %v11598_v29 }
 0x24e   : > { %2612 = vst.msk [vmem:[#allocation3 + $0x81] sm:$0xff] %vm417_vm3, %v2579_v36  ;;  %v2578_v37 = vmax.f32 %v2452_v41, 0.0  ;;  %2130 = vrot.lane.b32.xlu0 %v11742_v19, %s10204_s26  ;;  %4093 = vmatpush2.msra.mxu1 %v3916_v52  ;;  %v2893_v36 = vld [vmem:[#allocation3 + $0xa] sm:$0xff] }
 0x24f   : > { %v1539_v38 = vpop.permute.xlu1 %1538  ;;  %4094 = vmatprep.subr.mxu1 %v11598_v29  ;;  %2925 = vst.msk [vmem:[#allocation5 + $0x50] sm:$0xff] %vm417_vm3, %v2893_v36 }
 0x250   : > { %2611 = vst.msk [vmem:[#allocation3 + $0x79] sm:$0xff] %vm417_vm3, %v2578_v37  ;;  %v1537_v40 = vpop.permute.xlu0 %1536  ;;  %v2039_v37 = vld [vmem:[#allocation2 + $0x1a2] sm:$0xff] }
 0x251   : > { %1612 = vst.msk [vmem:[#allocation5 + $0x678] sm:$0xff] %vm1588_vm8, %v1539_v38  ;;  %1611 = vst.msk [vmem:[#allocation5 + $0x630] sm:$0xff] %vm1588_vm8, %v1537_v40  ;;  %975 = vrot.lane.b32.xlu1 %v11595_v21, %s10197_s28  ;;  %v3915_v21 = vld [vmem:[%s14983_s3 + $0xf0] sm:$0xff]  ;;  %v2038_v38 = vld [vmem:[#allocation2 + $0x19a] sm:$0xff] }
 0x252   : > { %973 = vrot.lane.b32.xlu0 %v11582_v9, %s10197_s28  ;;  %4095 = vmatpush2.msra.mxu1 %v3915_v21  ;;  %s10126_s28 = sshll.u32 %s10206_s27, 4  ;;  %s10127_s28 = int_to_ptr.vmem [resolvable:$false] %s10126_s28 }
 0x253   : > { %v1733_v12 = vpop.permute.xlu1 %1732  ;;  %4096 = vmatprep.subr.mxu1 %v11598_v29 }
 0x254   : > { %v1731_v59 = vpop.permute.xlu0 %1730  ;;  %1806 = vst.msk [vmem:[#allocation5 + $0x678] sm:$0xff] %vm1782_vm9, %v1733_v12  ;;  %v3908_v12 = vld [vmem:[%s14983_s3 + $0xb8] sm:$0xff] }
 0x255   : > { %1805 = vst.msk [vmem:[#allocation5 + $0x630] sm:$0xff] %vm1782_vm9, %v1731_v59  ;;  %v11777_v60 = vld [vmem:[#allocation3 + $0x82] sm:$0xff]  ;;  %1168 = vrot.lane.b32.xlu1 %v11691_v2, %s10199_s14 }
 0x256   : > { %1166 = vrot.lane.b32.xlu0 %v11693_v3, %s10199_s14  ;;  %2935 = vst.msk [vmem:[#allocation5 + $0x320] sm:$0xff] %vm417_vm3, %v11777_v60  ;;  %v11785_v9 = vld [vmem:[#allocation3 + $0x81] sm:$0xff]  ;;  %v3914_v3 = vld [vmem:[%s14983_s3 + $0xe8] sm:$0xff]  ;;  %s353_s14 = sand.u32 1, %s10182_s10  }
 0x257   : > { %v3668_v61 = vld [vmem:[#allocation3 + $0x82] sm:$0xff]  ;;  %v11787_v62 = vld [vmem:[#allocation3 + $0x78] sm:$0xff]  ;;  %3189 = vst.msk [vmem:[#allocation5 + $0x298] sm:$0xff] %vm417_vm3, %v11785_v9  ;;  %v1926_v2 = vpop.permute.xlu1 %1925  ;;  %4097 = vmatpush2.msra.mxu1 %v3914_v3  ;;  %s9273_s22 = sshll.u32 %s353_s14, 8 }
 0x258   : > { %v11789_v1 = vld [vmem:[#allocation3 + $0x80] sm:$0xff]  ;;  %3700 = vst.msk [vmem:[#allocation5 + $0x218] sm:$0xff] %vm417_vm3, %v3668_v61  ;;  %v1924_v6 = vpop.permute.xlu0 %1923  ;;  %2677 = vst.msk [vmem:[#allocation5 + $0x2d0] sm:$0xff] %vm417_vm3, %v11787_v62  ;;  %v3411_v14 = vld [vmem:[#allocation3 + $0x78] sm:$0xff]  ;;  %4098 = vmatprep.subr.mxu1 %v11598_v29  ;;  %s14857_s29 = scalar_lea.vmem [#allocation11], %s9273_s22 }
 0x259   : > { %v11798_v63 = vld [vmem:[#allocation3 + $0x7a] sm:$0xff]  ;;  %2678 = vst.msk [vmem:[#allocation5 + $0x318] sm:$0xff] %vm417_vm3, %v11789_v1  ;;  %1361 = vrot.lane.b32.xlu1 %v11709_v45, %s10200_s16  ;;  %3443 = vst.msk [vmem:[#allocation5 + $0x1c8] sm:$0xff] %vm417_vm3, %v3411_v14  ;;  %4099 = vmatpush2.msra.mxu1 %v3913_v15  ;;  %v3912_v45 = vld [vmem:[%s14983_s3 + $0xd8] sm:$0xff] }
 0x25a   : > { %v11804_v48 = vld [vmem:[#allocation3 + $0x79] sm:$0xff]  ;;  %1999 = vst.msk [vmem:[#allocation5 + $0x678] sm:$0xff] %vm1975_vm10, %v1926_v2  ;;  %1998 = vst.msk [vmem:[#allocation5 + $0x630] sm:$0xff] %vm1975_vm10, %v1924_v6  ;;  %1359 = vrot.lane.b32.xlu0 %v11711_v46, %s10200_s16  ;;  %v1653_v46 = vld [vmem:[#allocation2 + $0x1a0] sm:$0xff]  ;;  %4100 = vmatprep.subr.mxu1 %v11598_v29  ;;  %s9181_s16 = sshll.u32 %s14857_s29, 4  ;;  %s14934_s16 = int_to_ptr.vmem [resolvable:$true] %s9181_s16 }
 0x25b   : > { %2934 = vst.msk [vmem:[#allocation5 + $0x2d8] sm:$0xff] %vm417_vm3, %v11798_v63  ;;  %3188 = vst.msk [vmem:[#allocation5 + $0x250] sm:$0xff] %vm417_vm3, %v11804_v48  ;;  %v3667_v13 = vld [vmem:[#allocation3 + $0x7a] sm:$0xff]  ;;  %v769_v22 = vpop.permute.xlu1 %768  ;;  %4101 = vmatpush2.msra.mxu1 %v3912_v45  ;;  %p10129_p11 = scmp.lt.s32.totalorder %s14934_s16, %s10127_s28 }
 0x25c   : > { %3699 = vst.msk [vmem:[#allocation5 + $0x1d0] sm:$0xff] %vm417_vm3, %v3667_v13  ;;  %v3412_v18 = vld [vmem:[#allocation3 + $0x80] sm:$0xff]  ;;  %v2117_v27 = vpop.permute.xlu0 %2116  ;;  %4102 = vmatprep.subr.mxu1 %v11598_v29  ;;  %v11877_v13 = vld [vmem:[%s14982_s2] ss:$0 sm:$0xff] }
 0x25d   : > { %3444 = vst.msk [vmem:[#allocation5 + $0x210] sm:$0xff] %vm417_vm3, %v3412_v18  ;;  %1554 = vrot.lane.b32.xlu1 %v11742_v19, %s10201_s17  ;;  %v1845_v19 = vld [vmem:[#allocation2 + $0x199] sm:$0xff]  ;;  %4103 = vmatpush2.msra.mxu1 %v3911_v23  ;;  %v3907_v61 = vld [vmem:[%s14983_s3 + $0xb0] sm:$0xff]  ;;  %v3906_v18 = vld [vmem:[%s14983_s3 + $0xa8] sm:$0xff] }
 0x25e   : > { %841 = vst.msk [vmem:[#allocation5 + $0x6c0] sm:$0xff] %vm816_vm4, %v769_v22  ;;  %1552 = vrot.lane.b32.xlu0 %v11724_v25, %s10201_s17  ;;  %v2636_v25 = vld [vmem:[#allocation3 + $0x8] sm:$0xff]  ;;  %4104 = vmatprep.subr.mxu1 %v11598_v29  ;;  %s10205_s17 = smov 64   ;;  %v2701_v23 = vld [vmem:[#allocation3 + $0x19] sm:$0xff] }
 0x25f   : > { %2191 = vst.msk [vmem:[#allocation5 + $0x630] sm:$0xff] %vm2168_vm11, %v2117_v27  ;;  %v771_v31 = vpop.permute.xlu1 %770  ;;  %4105 = vmatpush2.msra.mxu1 %v3910_v17  ;;  %v2699_v6 = vld [vmem:[#allocation3 + $0x1] sm:$0xff]  ;;  %v2700_v27 = vld [vmem:[#allocation3 + $0x9] sm:$0xff] }
 0x260   : > { %v2119_v34 = vpop.permute.xlu0 %2118  ;;  %842 = vst.msk [vmem:[#allocation5 + $0x708] sm:$0xff] %vm816_vm4, %v771_v31  ;;  %4106 = vmatprep.subr.mxu1 %v11598_v29 }
 0x261   : > { %2192 = vst.msk [vmem:[#allocation5 + $0x678] sm:$0xff] %vm2168_vm11, %v2119_v34  ;;  %1748 = vrot.lane.b32.xlu1 %v1653_v46, %s10202_s21  ;;  %4107 = vmatpush2.msra.mxu1 %v3909_v55 }
 0x262   : > { %1746 = vrot.lane.b32.xlu0 %v1652_v28, %s10202_s21  ;;  %2668 = vst.msk [vmem:[#allocation5 + $0x48] sm:$0xff] %vm417_vm3, %v2636_v25  ;;  %4108 = vmatprep.subr.mxu1 %v11598_v29  ;;  %v3905_v28 = vld [vmem:[%s14983_s3 + $0xa0] sm:$0xff]  ;;  %v3903_v25 = vld [vmem:[%s14983_s3 + $0x90] sm:$0xff]  ;;  %s10128_s21 = scalar_lea.vmem %s10127_s28, 8192 }
 0x263   : > { %v964_v41 = vpop.permute.xlu1 %963  ;;  %4109 = vmatpush2.msra.mxu1 %v3908_v12 }
 0x264   : > { %v962_v16 = vpop.permute.xlu0 %961  ;;  %1035 = vst.msk [vmem:[#allocation5 + $0x708] sm:$0xff] %vm1009_vm5, %v964_v41  ;;  %4110 = vmatprep.subr.mxu1 %v11598_v29  ;;  %v3902_v41 = vld [vmem:[%s14983_s3 + $0x88] sm:$0xff] }
 0x265   : > { %1034 = vst.msk [vmem:[#allocation5 + $0x6c0] sm:$0xff] %vm1009_vm5, %v962_v16  ;;  %1941 = vrot.lane.b32.xlu1 %v1846_v35, %s10203_s25  ;;  %4111 = vmatpush2.msra.mxu1 %v3907_v61 }
 0x266   : > { %v2223_v53 = vld [vmem:[#allocation5 + $0x630] sm:$0xff]  ;;  %1939 = vrot.lane.b32.xlu0 %v1845_v19, %s10203_s25  ;;  %4112 = vmatprep.subr.mxu1 %v11598_v29  ;;  %s9383_s25 = sshll.u32 %s10280_s13, 12  ;;  %s14940_s13 = scalar_lea.sflag [#allocation8], %s353_s14 }
 0x267   : > { %9589 = vmatprep.mubr.msk.f32.mxu0 %vm2244_vm12, %v2223_v53  ;;  %v1157_v40 = vpop.permute.xlu1 %1156  ;;  %4113 = vmatpush2.msra.mxu1 %v3906_v18  ;;  %v2706_v18 = vld [vmem:[#allocation3 + $0x51] sm:$0xff]  ;;  %s14932_s24 = scalar_lea.hbm %s14989_s9, %s9383_s25 }
 0x268   : > { %v1155_v57 = vpop.permute.xlu0 %1154  ;;  %v2224_v52 = vld [vmem:[#allocation5 + $0x678] sm:$0xff]  ;;  %1228 = vst.msk [vmem:[#allocation5 + $0x708] sm:$0xff] %vm1202_vm6, %v1157_v40  ;;  %4114 = vmatprep.subr.mxu1 %v11598_v29 }
 0x269   : > { %1227 = vst.msk [vmem:[#allocation5 + $0x6c0] sm:$0xff] %vm1202_vm6, %v1155_v57  ;;  %v9573_v59 = vpop.f32.mrf.mxu0  ;;  %9590 = vmatmul.mubr.msk.f32.gmra.mxu0 %vm2244_vm12, %v2224_v52  ;;  %2134 = vrot.lane.b32.xlu1 %v2039_v37, %s10204_s26  ;;  %v3901_v52 = vld [vmem:[%s14983_s3 + $0x80] sm:$0xff] }
 0x26a   : > { %v2467_v21 = vadd.f32 %v9573_v59, %v11320_v0  ;;  %2132 = vrot.lane.b32.xlu0 %v2038_v38, %s10204_s26  ;;  %4115 = vmatpush2.msra.mxu1 %v3905_v28  ;;  %v2702_v38 = vld [vmem:[#allocation3 + $0x21] sm:$0xff]  ;;  %s10122_s26 = scalar_lea.vmem %s14934_s16, 4096 }
 0x26b   : > { %v2461_v2 = vpop.f32.mrf.mxu0  ;;  %v1350_v0 = vpop.permute.xlu1 %1349  ;;  %4116 = vmatprep.subr.mxu1 %v11598_v29  ;;  %p10123_p10 = scmp.ne.s32.totalorder %s14934_s16, %s10122_s26  ;;  %p10130_p0 = scmp.lt.s32.totalorder %s10128_s21, %s10122_s26 }
 0x26c   : > { %v2581_v3 = vmax.f32 %v2467_v21, 0.0  ;;  %v2462_v14 = vadd.f32 %v11877_v13, %v2461_v2  ;;  %v1348_v15 = vpop.permute.xlu0 %1347  ;;  %1421 = vst.msk [vmem:[#allocation5 + $0x708] sm:$0xff] %vm1395_vm7, %v1350_v0  ;;  %v2704_v2 = vld [vmem:[#allocation3 + $0x39] sm:$0xff] }
 0x26d   : > { %1420 = vst.msk [vmem:[#allocation5 + $0x6c0] sm:$0xff] %vm1395_vm7, %v1348_v15  ;;  %2763 = vrot.lane.b32.xlu1 %v2699_v6, %s10205_s17  ;;  %p10124_p12 = pnand %p10123_p10, %p10297_p5  ;;  %p10131_p1 = por %p10130_p0, %p10129_p11 }
 0x26e   : > { %2614 = vst.msk [vmem:[#allocation3 + $0x99] sm:$0xff] %vm417_vm3, %v2581_v3  ;;  %v2580_v22 = vmax.f32 %v2462_v14, 0.0  ;;  %3020 = vrot.lane.b32.xlu0 %v11360_v32, %s10205_s17  ;;  %v3904_v32 = vld [vmem:[%s14983_s3 + $0x98] sm:$0xff] }
 0x26f   : > { %v1543_v45 = vpop.permute.xlu1 %1542  ;;  %4117 = vmatpush2.msra.mxu1 %v3904_v32  ;;  %v2707_v32 = vld [vmem:[#allocation3 + $0x61] sm:$0xff]  ;;  %p10125_p8 = pneg %p10124_p12 }
 0x270   : > { %2613 = vst.msk [vmem:[#allocation3 + $0x91] sm:$0xff] %vm417_vm3, %v2580_v22  ;;  %v1541_v46 = vpop.permute.xlu0 %1540  ;;  %4118 = vmatprep.subr.mxu1 %v11598_v29 }
 0x271   : > { %1614 = vst.msk [vmem:[#allocation5 + $0x708] sm:$0xff] %vm1588_vm8, %v1543_v45  ;;  %1613 = vst.msk [vmem:[#allocation5 + $0x6c0] sm:$0xff] %vm1588_vm8, %v1541_v46  ;;  %2765 = vrot.lane.b32.xlu1 %v2700_v27, %s10205_s17  ;;  %4119 = vmatpush2.msra.mxu1 %v3903_v25  ;;  %p10132_p3 = pnand %p10131_p1, %p10125_p8 }
 0x272   : > { %3022 = vrot.lane.b32.xlu0 %v11362_v33, %s10205_s17  ;;  %4120 = vmatprep.subr.mxu1 %v11598_v29 }
 0x273   : > { %v1737_v31 = vpop.permute.xlu1 %1736  ;;  %4121 = vmatpush2.msra.mxu1 %v3902_v41 }
 0x274   : > { %v1735_v34 = vpop.permute.xlu0 %1734  ;;  %1808 = vst.msk [vmem:[#allocation5 + $0x708] sm:$0xff] %vm1782_vm9, %v1737_v31  ;;  %4122 = vmatprep.subr.mxu1 %v11598_v29 }
 0x275   : > { %1807 = vst.msk [vmem:[#allocation5 + $0x6c0] sm:$0xff] %vm1782_vm9, %v1735_v34  ;;  %v11910_v33 = vld [vmem:[#allocation3 + $0x9a] sm:$0xff]  ;;  %2767 = vrot.lane.b32.xlu1 %v2701_v23, %s10205_s17  ;;  %4123 = vmatpush2.msra.mxu1 %v3901_v52  ;;  %v2708_v23 = vld [vmem:[#allocation3 + $0x69] sm:$0xff] }
 0x276   : > { %v11912_v17 = vld [vmem:[#allocation3 + $0x99] sm:$0xff]  ;;  %3024 = vrot.lane.b32.xlu0 %v11443_v7, %s10205_s17  ;;  %2937 = vst.msk [vmem:[#allocation5 + $0x3b0] sm:$0xff] %vm417_vm3, %v11910_v33 }
 0x277   : > { %3191 = vst.msk [vmem:[#allocation5 + $0x328] sm:$0xff] %vm417_vm3, %v11912_v17  ;;  %v3670_v35 = vld [vmem:[#allocation3 + $0x9a] sm:$0xff]  ;;  %v11921_v19 = vld [vmem:[#allocation3 + $0x90] sm:$0xff]  ;;  %v1930_v7 = vpop.permute.xlu1 %1929 }
 0x278   : > { %v11923_v36 = vld [vmem:[#allocation3 + $0x98] sm:$0xff]  ;;  %3702 = vst.msk [vmem:[#allocation5 + $0x2a8] sm:$0xff] %vm417_vm3, %v3670_v35  ;;  %v1928_v16 = vpop.permute.xlu0 %1927  ;;  %2679 = vst.msk [vmem:[#allocation5 + $0x360] sm:$0xff] %vm417_vm3, %v11921_v19  ;;  %v3413_v40 = vld [vmem:[#allocation3 + $0x90] sm:$0xff] }
 0x279   : > { %v11930_v53 = vld [vmem:[#allocation3 + $0x92] sm:$0xff]  ;;  %2680 = vst.msk [vmem:[#allocation5 + $0x3a8] sm:$0xff] %vm417_vm3, %v11923_v36  ;;  %2769 = vrot.lane.b32.xlu1 %v2702_v38, %s10205_s17  ;;  %3445 = vst.msk [vmem:[#allocation5 + $0x258] sm:$0xff] %vm417_vm3, %v3413_v40 }
 0x27a   : > { %v11936_v55 = vld [vmem:[#allocation3 + $0x91] sm:$0xff]  ;;  %2001 = vst.msk [vmem:[#allocation5 + $0x708] sm:$0xff] %vm1975_vm10, %v1930_v7  ;;  %2000 = vst.msk [vmem:[#allocation5 + $0x6c0] sm:$0xff] %vm1975_vm10, %v1928_v16  ;;  %3026 = vrot.lane.b32.xlu0 %v11445_v8, %s10205_s17 }
 0x27b   : > { %v3669_v37 = vld [vmem:[#allocation3 + $0x92] sm:$0xff]  ;;  %2936 = vst.msk [vmem:[#allocation5 + $0x368] sm:$0xff] %vm417_vm3, %v11930_v53  ;;  %3190 = vst.msk [vmem:[#allocation5 + $0x2e0] sm:$0xff] %vm417_vm3, %v11936_v55  ;;  %v773_v12 = vpop.permute.xlu1 %772 }
 0x27c   : > { %3701 = vst.msk [vmem:[#allocation5 + $0x260] sm:$0xff] %vm417_vm3, %v3669_v37  ;;  %v3414_v57 = vld [vmem:[#allocation3 + $0x98] sm:$0xff]  ;;  %v2121_v59 = vpop.permute.xlu0 %2120 }
 0x27d   : > { %3446 = vst.msk [vmem:[#allocation5 + $0x2a0] sm:$0xff] %vm417_vm3, %v3414_v57  ;;  %v2703_v8 = vld [vmem:[#allocation3 + $0x31] sm:$0xff] }
 0x27e   : > { %843 = vst.msk [vmem:[#allocation5 + $0x750] sm:$0xff] %vm816_vm4, %v773_v12  ;;  %3028 = vrot.lane.b32.xlu0 %v11533_v50, %s10205_s17  ;;  %2771 = vrot.lane.b32.xlu1 %v2703_v8, %s10205_s17  ;;  %v2705_v50 = vld [vmem:[#allocation3 + $0x49] sm:$0xff]  ;;  %v2710_v12 = vld [vmem:[#allocation3 + $0x81] sm:$0xff] }
 0x27f   : > { %2193 = vst.msk [vmem:[#allocation5 + $0x6c0] sm:$0xff] %vm2168_vm11, %v2121_v59  ;;  %v775_v21 = vpop.permute.xlu1 %774 }
 0x280   : > { %v2123_v61 = vpop.permute.xlu0 %2122  ;;  %844 = vst.msk [vmem:[#allocation5 + $0x798] sm:$0xff] %vm816_vm4, %v775_v21 }
 0x281   : > { %2194 = vst.msk [vmem:[#allocation5 + $0x708] sm:$0xff] %vm2168_vm11, %v2123_v61 }
 0x282   : > { %3030 = vrot.lane.b32.xlu0 %v11535_v51, %s10205_s17  ;;  %2773 = vrot.lane.b32.xlu1 %v2704_v2, %s10205_s17  ;;  %v2711_v2 = vld [vmem:[#allocation3 + $0x91] sm:$0xff] }
 0x283   : > { %v968_v29 = vpop.permute.xlu1 %967 }
 0x284   : > { %v966_v6 = vpop.permute.xlu0 %965  ;;  %1037 = vst.msk [vmem:[#allocation5 + $0x798] sm:$0xff] %vm1009_vm5, %v968_v29 }
 0x285   : > { %1036 = vst.msk [vmem:[#allocation5 + $0x750] sm:$0xff] %vm1009_vm5, %v966_v6 }
 0x286   : > { %v2225_v3 = vld [vmem:[#allocation5 + $0x6c0] sm:$0xff]  ;;  %3032 = vrot.lane.b32.xlu0 %v11645_v43, %s10205_s17  ;;  %2775 = vrot.lane.b32.xlu1 %v2705_v50, %s10205_s17 }
 0x287   : > { %9592 = vmatprep.mubr.msk.f32.mxu0 %vm2244_vm12, %v2225_v3  ;;  %v1161_v14 = vpop.permute.xlu1 %1160 }
 0x288   : > { %v1159_v0 = vpop.permute.xlu0 %1158  ;;  %v2226_v51 = vld [vmem:[#allocation5 + $0x708] sm:$0xff]  ;;  %1230 = vst.msk [vmem:[#allocation5 + $0x798] sm:$0xff] %vm1202_vm6, %v1161_v14 }
 0x289   : > { %1229 = vst.msk [vmem:[#allocation5 + $0x750] sm:$0xff] %vm1202_vm6, %v1159_v0  ;;  %v9576_v15 = vpop.f32.mrf.mxu0  ;;  %9593 = vmatmul.mubr.msk.f32.gmra.mxu0 %vm2244_vm12, %v2226_v51 }
 0x28a   : > { %v2477_v22 = vadd.f32 %v11877_v13, %v9576_v15  ;;  %3034 = vrot.lane.b32.xlu0 %v11647_v44, %s10205_s17  ;;  %2777 = vrot.lane.b32.xlu1 %v2706_v18, %s10205_s17 }
 0x28b   : > { %v2471_v43 = vpop.f32.mrf.mxu0  ;;  %v1354_v46 = vpop.permute.xlu1 %1353 }
 0x28c   : > { %v2583_v27 = vmax.f32 %v2477_v22, 0.0  ;;  %v2472_v45 = vadd.f32 %v11877_v13, %v2471_v43  ;;  %v1352_v28 = vpop.permute.xlu0 %1351  ;;  %1423 = vst.msk [vmem:[#allocation5 + $0x798] sm:$0xff] %vm1395_vm7, %v1354_v46 }
 0x28d   : > { %1422 = vst.msk [vmem:[#allocation5 + $0x750] sm:$0xff] %vm1395_vm7, %v1352_v28 }
 0x28e   : > { %2616 = vst.msk [vmem:[#allocation3 + $0xb1] sm:$0xff] %vm417_vm3, %v2583_v27  ;;  %v2582_v31 = vmax.f32 %v2472_v45, 0.0  ;;  %3036 = vrot.lane.b32.xlu0 %v11787_v62, %s10205_s17  ;;  %2779 = vrot.lane.b32.xlu1 %v2707_v32, %s10205_s17  ;;  %v2709_v62 = vld [vmem:[#allocation3 + $0x79] sm:$0xff] }
 0x28f   : > { %v1547_v44 = vpop.permute.xlu1 %1546 }
 0x290   : > { %2615 = vst.msk [vmem:[#allocation3 + $0xa9] sm:$0xff] %vm417_vm3, %v2582_v31  ;;  %v1545_v34 = vpop.permute.xlu0 %1544 }
 0x291   : > { %1616 = vst.msk [vmem:[#allocation5 + $0x798] sm:$0xff] %vm1588_vm8, %v1547_v44  ;;  %1615 = vst.msk [vmem:[#allocation5 + $0x750] sm:$0xff] %vm1588_vm8, %v1545_v34 }
 0x292   : > { %3038 = vrot.lane.b32.xlu0 %v11789_v1, %s10205_s17  ;;  %2781 = vrot.lane.b32.xlu1 %v2708_v23, %s10205_s17 }
 0x293   : > { %v1741_v25 = vpop.permute.xlu1 %1740 }
 0x294   : > { %v1739_v35 = vpop.permute.xlu0 %1738  ;;  %1810 = vst.msk [vmem:[#allocation5 + $0x798] sm:$0xff] %vm1782_vm9, %v1741_v25 }
 0x295   : > { %1809 = vst.msk [vmem:[#allocation5 + $0x750] sm:$0xff] %vm1782_vm9, %v1739_v35  ;;  %v11993_v41 = vld [vmem:[#allocation3 + $0xb2] sm:$0xff] }
 0x296   : > { %v11995_v7 = vld [vmem:[#allocation3 + $0xb1] sm:$0xff]  ;;  %3040 = vrot.lane.b32.xlu0 %v11921_v19, %s10205_s17  ;;  %2783 = vrot.lane.b32.xlu1 %v2709_v62, %s10205_s17  ;;  %2939 = vst.msk [vmem:[#allocation5 + $0x440] sm:$0xff] %vm417_vm3, %v11993_v41 }
 0x297   : > { %3193 = vst.msk [vmem:[#allocation5 + $0x3b8] sm:$0xff] %vm417_vm3, %v11995_v7  ;;  %v3672_v1 = vld [vmem:[#allocation3 + $0xb2] sm:$0xff]  ;;  %v2968_v16 = vld [vmem:[#allocation3 + $0xa8] sm:$0xff]  ;;  %v1934_v38 = vpop.permute.xlu1 %1933 }
 0x298   : > { %v2969_v37 = vld [vmem:[#allocation3 + $0xb0] sm:$0xff]  ;;  %3704 = vst.msk [vmem:[#allocation5 + $0x338] sm:$0xff] %vm417_vm3, %v3672_v1  ;;  %v1932_v40 = vpop.permute.xlu0 %1931  ;;  %2681 = vst.msk [vmem:[#allocation5 + $0x3f0] sm:$0xff] %vm417_vm3, %v2968_v16  ;;  %v3415_v59 = vld [vmem:[#allocation3 + $0xa8] sm:$0xff] }
 0x299   : > { %2682 = vst.msk [vmem:[#allocation5 + $0x438] sm:$0xff] %vm417_vm3, %v2969_v37  ;;  %v12007_v19 = vld [vmem:[#allocation3 + $0xaa] sm:$0xff]  ;;  %3447 = vst.msk [vmem:[#allocation5 + $0x2e8] sm:$0xff] %vm417_vm3, %v3415_v59 }
 0x29a   : > { %v12009_v57 = vld [vmem:[#allocation3 + $0xa9] sm:$0xff]  ;;  %2003 = vst.msk [vmem:[#allocation5 + $0x798] sm:$0xff] %vm1975_vm10, %v1934_v38  ;;  %2002 = vst.msk [vmem:[#allocation5 + $0x750] sm:$0xff] %vm1975_vm10, %v1932_v40  ;;  %3042 = vrot.lane.b32.xlu0 %v11923_v36, %s10205_s17  ;;  %2785 = vrot.lane.b32.xlu1 %v2710_v12, %s10205_s17  ;;  %v2712_v36 = vld [vmem:[#allocation3 + $0x99] sm:$0xff] }
 0x29b   : > { %v3671_v52 = vld [vmem:[#allocation3 + $0xaa] sm:$0xff]  ;;  %2938 = vst.msk [vmem:[#allocation5 + $0x3f8] sm:$0xff] %vm417_vm3, %v12007_v19  ;;  %3192 = vst.msk [vmem:[#allocation5 + $0x370] sm:$0xff] %vm417_vm3, %v12009_v57  ;;  %v777_v21 = vpop.permute.xlu1 %776 }
 0x29c   : > { %3703 = vst.msk [vmem:[#allocation5 + $0x2f0] sm:$0xff] %vm417_vm3, %v3671_v52  ;;  %v3416_v8 = vld [vmem:[#allocation3 + $0xb0] sm:$0xff]  ;;  %v2125_v61 = vpop.permute.xlu0 %2124 }
 0x29d   : > { %3448 = vst.msk [vmem:[#allocation5 + $0x330] sm:$0xff] %vm417_vm3, %v3416_v8  ;;  %v2713_v0 = vld [vmem:[#allocation3 + $0xa9] sm:$0xff]  ;;  %v2714_v43 = vld [vmem:[#allocation3 + $0xb1] sm:$0xff] }
 0x29e   : > { %845 = vst.msk [vmem:[#allocation5 + $0x7e0] sm:$0xff] %vm816_vm4, %v777_v21  ;;  %3044 = vrot.lane.b32.xlu0 %v2968_v16, %s10205_s17  ;;  %2787 = vrot.lane.b32.xlu1 %v2711_v2, %s10205_s17 }
 0x29f   : > { %2195 = vst.msk [vmem:[#allocation5 + $0x750] sm:$0xff] %vm2168_vm11, %v2125_v61  ;;  %v779_v29 = vpop.permute.xlu1 %778 }
 0x2a0   : > { %v2127_v6 = vpop.permute.xlu0 %2126  ;;  %846 = vst.msk [vmem:[#allocation5 + $0x828] sm:$0xff] %vm816_vm4, %v779_v29 }
 0x2a1   : > { %2196 = vst.msk [vmem:[#allocation5 + $0x798] sm:$0xff] %vm2168_vm11, %v2127_v6 }
 0x2a2   : > { %3046 = vrot.lane.b32.xlu0 %v2969_v37, %s10205_s17  ;;  %2789 = vrot.lane.b32.xlu1 %v2712_v36, %s10205_s17 }
 0x2a3   : > { %v972_v3 = vpop.permute.xlu1 %971 }
 0x2a4   : > { %v970_v50 = vpop.permute.xlu0 %969  ;;  %1039 = vst.msk [vmem:[#allocation5 + $0x828] sm:$0xff] %vm1009_vm5, %v972_v3 }
 0x2a5   : > { %1038 = vst.msk [vmem:[#allocation5 + $0x7e0] sm:$0xff] %vm1009_vm5, %v970_v50 }
 0x2a6   : > { %v2227_v14 = vld [vmem:[#allocation5 + $0x750] sm:$0xff]  ;;  %2791 = vrot.lane.b32.xlu1 %v2713_v0, %s10205_s17 }
 0x2a7   : > { %9595 = vmatprep.mubr.msk.f32.mxu0 %vm2244_vm12, %v2227_v14  ;;  %v1165_v51 = vpop.permute.xlu1 %1164 }
 0x2a8   : > { %v1163_v15 = vpop.permute.xlu0 %1162  ;;  %v2228_v18 = vld [vmem:[#allocation5 + $0x798] sm:$0xff]  ;;  %1232 = vst.msk [vmem:[#allocation5 + $0x828] sm:$0xff] %vm1202_vm6, %v1165_v51 }
 0x2a9   : > { %1231 = vst.msk [vmem:[#allocation5 + $0x7e0] sm:$0xff] %vm1202_vm6, %v1163_v15  ;;  %v9579_v22 = vpop.f32.mrf.mxu0  ;;  %9596 = vmatmul.mubr.msk.f32.gmra.mxu0 %vm2244_vm12, %v2228_v18 }
 0x2aa   : > { %v2487_v27 = vadd.f32 %v11877_v13, %v9579_v22  ;;  %2793 = vrot.lane.b32.xlu1 %v2714_v43, %s10205_s17 }
 0x2ab   : > { %v2481_v45 = vpop.f32.mrf.mxu0  ;;  %v1358_v32 = vpop.permute.xlu1 %1357 }
 0x2ac   : > { %v2585_v46 = vmax.f32 %v2487_v27, 0.0  ;;  %v2482_v28 = vadd.f32 %v11877_v13, %v2481_v45  ;;  %v1356_v31 = vpop.permute.xlu0 %1355  ;;  %1425 = vst.msk [vmem:[#allocation5 + $0x828] sm:$0xff] %vm1395_vm7, %v1358_v32 }
 0x2ad   : > { %1424 = vst.msk [vmem:[#allocation5 + $0x7e0] sm:$0xff] %vm1395_vm7, %v1356_v31 }
 0x2ae   : > { %2618 = vst.msk [vmem:[#allocation3 + $0xc9] sm:$0xff] %vm417_vm3, %v2585_v46  ;;  %v2584_v44 = vmax.f32 %v2482_v28, 0.0 }
 0x2af   : > { %v1551_v34 = vpop.permute.xlu1 %1550 }
 0x2b0   : > { %2617 = vst.msk [vmem:[#allocation3 + $0xc1] sm:$0xff] %vm417_vm3, %v2584_v44  ;;  %v1549_v23 = vpop.permute.xlu0 %1548 }
 0x2b1   : > { %1618 = vst.msk [vmem:[#allocation5 + $0x828] sm:$0xff] %vm1588_vm8, %v1551_v34  ;;  %1617 = vst.msk [vmem:[#allocation5 + $0x7e0] sm:$0xff] %vm1588_vm8, %v1549_v23 }
 0x2b3   : > { %v1745_v25 = vpop.permute.xlu1 %1744 }
 0x2b4   : > { %v1743_v35 = vpop.permute.xlu0 %1742  ;;  %1812 = vst.msk [vmem:[#allocation5 + $0x828] sm:$0xff] %vm1782_vm9, %v1745_v25 }
 0x2b5   : > { %1811 = vst.msk [vmem:[#allocation5 + $0x7e0] sm:$0xff] %vm1782_vm9, %v1743_v35  ;;  %v12049_v62 = vld [vmem:[#allocation3 + $0xca] sm:$0xff] }
 0x2b6   : > { %v12051_v1 = vld [vmem:[#allocation3 + $0xc9] sm:$0xff]  ;;  %2941 = vst.msk [vmem:[#allocation5 + $0x4d0] sm:$0xff] %vm417_vm3, %v12049_v62 }
 0x2b7   : > { %3195 = vst.msk [vmem:[#allocation5 + $0x448] sm:$0xff] %vm417_vm3, %v12051_v1  ;;  %v3674_v16 = vld [vmem:[#allocation3 + $0xca] sm:$0xff]  ;;  %v2970_v37 = vld [vmem:[#allocation3 + $0xc0] sm:$0xff]  ;;  %v1938_v52 = vpop.permute.xlu1 %1937 }
 0x2b8   : > { %v2715_v38 = vld [vmem:[#allocation3 + $0xc1] sm:$0xff]  ;;  %3706 = vst.msk [vmem:[#allocation5 + $0x3c8] sm:$0xff] %vm417_vm3, %v3674_v16  ;;  %v1936_v12 = vpop.permute.xlu0 %1935  ;;  %3048 = vrot.lane.b32.xlu0 %v2970_v37, %s10205_s17  ;;  %2683 = vst.msk [vmem:[#allocation5 + $0x480] sm:$0xff] %vm417_vm3, %v2970_v37  ;;  %v2716_v29 = vld [vmem:[#allocation3 + $0xc9] sm:$0xff] }
 0x2b9   : > { %v2971_v40 = vld [vmem:[#allocation3 + $0xc8] sm:$0xff]  ;;  %2795 = vrot.lane.b32.xlu1 %v2715_v38, %s10205_s17  ;;  %2005 = vst.msk [vmem:[#allocation5 + $0x828] sm:$0xff] %vm1975_vm10, %v1938_v52  ;;  %2004 = vst.msk [vmem:[#allocation5 + $0x7e0] sm:$0xff] %vm1975_vm10, %v1936_v12  ;;  %v3417_v61 = vld [vmem:[#allocation3 + $0xc0] sm:$0xff] }
 0x2ba   : > { %2684 = vst.msk [vmem:[#allocation5 + $0x4c8] sm:$0xff] %vm417_vm3, %v2971_v40  ;;  %v12062_v59 = vld [vmem:[#allocation3 + $0xc2] sm:$0xff]  ;;  %3449 = vst.msk [vmem:[#allocation5 + $0x378] sm:$0xff] %vm417_vm3, %v3417_v61 }
 0x2bb   : > { %v12064_v8 = vld [vmem:[#allocation3 + $0xc1] sm:$0xff]  ;;  %2940 = vst.msk [vmem:[#allocation5 + $0x488] sm:$0xff] %vm417_vm3, %v12062_v59  ;;  %v781_v6 = vpop.permute.xlu1 %780 }
 0x2bc   : > { %v3673_v21 = vld [vmem:[#allocation3 + $0xc2] sm:$0xff]  ;;  %3194 = vst.msk [vmem:[#allocation5 + $0x400] sm:$0xff] %vm417_vm3, %v12064_v8  ;;  %v2129_v36 = vpop.permute.xlu0 %2128  ;;  %3050 = vrot.lane.b32.xlu0 %v2971_v40, %s10205_s17 }
 0x2bd   : > { %3705 = vst.msk [vmem:[#allocation5 + $0x380] sm:$0xff] %vm417_vm3, %v3673_v21  ;;  %v3418_v2 = vld [vmem:[#allocation3 + $0xc8] sm:$0xff]  ;;  %2797 = vrot.lane.b32.xlu1 %v2716_v29, %s10205_s17 }
 0x2be   : > { %3450 = vst.msk [vmem:[#allocation5 + $0x3c0] sm:$0xff] %vm417_vm3, %v3418_v2 }
 0x2bf   : > { %847 = vst.msk [vmem:[#allocation5 + $0x870] sm:$0xff] %vm816_vm4, %v781_v6  ;;  %v783_v3 = vpop.permute.xlu1 %782 }
 0x2c0   : > { %2197 = vst.msk [vmem:[#allocation5 + $0x7e0] sm:$0xff] %vm2168_vm11, %v2129_v36  ;;  %v2131_v50 = vpop.permute.xlu0 %2130 }
 0x2c1   : > { %848 = vst.msk [vmem:[#allocation5 + $0x8b8] sm:$0xff] %vm816_vm4, %v783_v3 }
 0x2c2   : > { %2198 = vst.msk [vmem:[#allocation5 + $0x828] sm:$0xff] %vm2168_vm11, %v2131_v50 }
 0x2c3   : > { %v976_v14 = vpop.permute.xlu1 %975 }
 0x2c4   : > { %v974_v0 = vpop.permute.xlu0 %973  ;;  %1041 = vst.msk [vmem:[#allocation5 + $0x8b8] sm:$0xff] %vm1009_vm5, %v976_v14 }
 0x2c5   : > { %1040 = vst.msk [vmem:[#allocation5 + $0x870] sm:$0xff] %vm1009_vm5, %v974_v0 }
 0x2c7   : > { %v2229_v51 = vld [vmem:[#allocation5 + $0x7e0] sm:$0xff]  ;;  %v1169_v15 = vpop.permute.xlu1 %1168 }
 0x2c8   : > { %9598 = vmatprep.mubr.msk.f32.mxu0 %vm2244_vm12, %v2229_v51  ;;  %v1167_v18 = vpop.permute.xlu0 %1166  ;;  %1234 = vst.msk [vmem:[#allocation5 + $0x8b8] sm:$0xff] %vm1202_vm6, %v1169_v15 }
 0x2c9   : > { %v2230_v22 = vld [vmem:[#allocation5 + $0x828] sm:$0xff]  ;;  %1233 = vst.msk [vmem:[#allocation5 + $0x870] sm:$0xff] %vm1202_vm6, %v1167_v18  ;;  %v9582_v43 = vpop.f32.mrf.mxu0 }
 0x2ca   : > { %9599 = vmatmul.mubr.msk.f32.gmra.mxu0 %vm2244_vm12, %v2230_v22  ;;  %v2497_v27 = vadd.f32 %v11877_v13, %v9582_v43 }
 0x2cb   : > { %v2491_v45 = vpop.f32.mrf.mxu0  ;;  %v1362_v32 = vpop.permute.xlu1 %1361 }
 0x2cc   : > { %v2587_v46 = vmax.f32 %v2497_v27, 0.0  ;;  %v2492_v28 = vadd.f32 %v11877_v13, %v2491_v45  ;;  %v1360_v31 = vpop.permute.xlu0 %1359  ;;  %1427 = vst.msk [vmem:[#allocation5 + $0x8b8] sm:$0xff] %vm1395_vm7, %v1362_v32 }
 0x2cd   : > { %1426 = vst.msk [vmem:[#allocation5 + $0x870] sm:$0xff] %vm1395_vm7, %v1360_v31 }
 0x2ce   : > { %2620 = vst.msk [vmem:[#allocation3 + $0xe1] sm:$0xff] %vm417_vm3, %v2587_v46  ;;  %v2586_v44 = vmax.f32 %v2492_v28, 0.0 }
 0x2cf   : > { %v1555_v34 = vpop.permute.xlu1 %1554 }
 0x2d0   : > { %2619 = vst.msk [vmem:[#allocation3 + $0xd9] sm:$0xff] %vm417_vm3, %v2586_v44  ;;  %v1553_v23 = vpop.permute.xlu0 %1552 }
 0x2d1   : > { %1620 = vst.msk [vmem:[#allocation5 + $0x8b8] sm:$0xff] %vm1588_vm8, %v1555_v34  ;;  %1619 = vst.msk [vmem:[#allocation5 + $0x870] sm:$0xff] %vm1588_vm8, %v1553_v23 }
 0x2d3   : > { %v1749_v25 = vpop.permute.xlu1 %1748 }
 0x2d4   : > { %v1747_v35 = vpop.permute.xlu0 %1746  ;;  %1814 = vst.msk [vmem:[#allocation5 + $0x8b8] sm:$0xff] %vm1782_vm9, %v1749_v25 }
 0x2d5   : > { %1813 = vst.msk [vmem:[#allocation5 + $0x870] sm:$0xff] %vm1782_vm9, %v1747_v35  ;;  %v12097_v16 = vld [vmem:[#allocation3 + $0xe2] sm:$0xff] }
 0x2d6   : > { %v12099_v37 = vld [vmem:[#allocation3 + $0xe1] sm:$0xff]  ;;  %2943 = vst.msk [vmem:[#allocation5 + $0x560] sm:$0xff] %vm417_vm3, %v12097_v16 }
 0x2d7   : > { %v3676_v38 = vld [vmem:[#allocation3 + $0xe2] sm:$0xff]  ;;  %3197 = vst.msk [vmem:[#allocation5 + $0x4d8] sm:$0xff] %vm417_vm3, %v12099_v37  ;;  %v2972_v40 = vld [vmem:[#allocation3 + $0xd8] sm:$0xff]  ;;  %v1942_v21 = vpop.permute.xlu1 %1941 }
 0x2d8   : > { %v2717_v52 = vld [vmem:[#allocation3 + $0xd9] sm:$0xff]  ;;  %3708 = vst.msk [vmem:[#allocation5 + $0x458] sm:$0xff] %vm417_vm3, %v3676_v38  ;;  %v1940_v61 = vpop.permute.xlu0 %1939  ;;  %3052 = vrot.lane.b32.xlu0 %v2972_v40, %s10205_s17  ;;  %2685 = vst.msk [vmem:[#allocation5 + $0x510] sm:$0xff] %vm417_vm3, %v2972_v40  ;;  %v2718_v50 = vld [vmem:[#allocation3 + $0xe1] sm:$0xff] }
 0x2d9   : > { %v2973_v12 = vld [vmem:[#allocation3 + $0xe0] sm:$0xff]  ;;  %2799 = vrot.lane.b32.xlu1 %v2717_v52, %s10205_s17  ;;  %2007 = vst.msk [vmem:[#allocation5 + $0x8b8] sm:$0xff] %vm1975_vm10, %v1942_v21  ;;  %2006 = vst.msk [vmem:[#allocation5 + $0x870] sm:$0xff] %vm1975_vm10, %v1940_v61  ;;  %v3419_v36 = vld [vmem:[#allocation3 + $0xd8] sm:$0xff] }
 0x2da   : > { %2686 = vst.msk [vmem:[#allocation5 + $0x558] sm:$0xff] %vm417_vm3, %v2973_v12  ;;  %v12110_v2 = vld [vmem:[#allocation3 + $0xda] sm:$0xff]  ;;  %3451 = vst.msk [vmem:[#allocation5 + $0x408] sm:$0xff] %vm417_vm3, %v3419_v36 }
 0x2db   : > { %v12112_v29 = vld [vmem:[#allocation3 + $0xd9] sm:$0xff]  ;;  %2942 = vst.msk [vmem:[#allocation5 + $0x518] sm:$0xff] %vm417_vm3, %v12110_v2  ;;  %v2135_v14 = vpop.permute.xlu1 %2134 }
 0x2dc   : > { %v3675_v6 = vld [vmem:[#allocation3 + $0xda] sm:$0xff]  ;;  %3196 = vst.msk [vmem:[#allocation5 + $0x490] sm:$0xff] %vm417_vm3, %v12112_v29  ;;  %v2133_v0 = vpop.permute.xlu0 %2132  ;;  %3054 = vrot.lane.b32.xlu0 %v2973_v12, %s10205_s17 }
 0x2dd   : > { %3707 = vst.msk [vmem:[#allocation5 + $0x410] sm:$0xff] %vm417_vm3, %v3675_v6  ;;  %v3420_v3 = vld [vmem:[#allocation3 + $0xe0] sm:$0xff]  ;;  %2801 = vrot.lane.b32.xlu1 %v2718_v50, %s10205_s17 }
 0x2de   : > { %3452 = vst.msk [vmem:[#allocation5 + $0x450] sm:$0xff] %vm417_vm3, %v3420_v3 }
 0x2df   : > { %2200 = vst.msk [vmem:[#allocation5 + $0x8b8] sm:$0xff] %vm2168_vm11, %v2135_v14  ;;  %2199 = vst.msk [vmem:[#allocation5 + $0x870] sm:$0xff] %vm2168_vm11, %v2133_v0  ;;  %v2764_v51 = vpop.permute.xlu1 %2763 }
 0x2e0   : > { %v3021_v15 = vpop.permute.xlu0 %3020  ;;  %2860 = vst.msk [vmem:[#allocation5] sm:$0xff] %vm2859_vm14, %v2764_v51 }
 0x2e1   : > { %3116 = vst.msk [vmem:[#allocation5 + $0x8] sm:$0xff] %vm2859_vm14, %v3021_v15 }
 0x2e3   : > { %v2766_v18 = vpop.permute.xlu1 %2765 }
 0x2e4   : > { %v3023_v22 = vpop.permute.xlu0 %3022  ;;  %2861 = vst.msk [vmem:[#allocation5 + $0x48] sm:$0xff] %vm2859_vm14, %v2766_v18 }
 0x2e5   : > { %3117 = vst.msk [vmem:[#allocation5 + $0x50] sm:$0xff] %vm2859_vm14, %v3023_v22 }
 0x2e6   : > { %v2231_v43 = vld [vmem:[#allocation5 + $0x870] sm:$0xff]  ;;  %v2232_v27 = vld [vmem:[#allocation5 + $0x8b8] sm:$0xff] }
 0x2e7   : > { %9601 = vmatprep.mubr.msk.f32.mxu0 %vm2244_vm12, %v2231_v43  ;;  %v2768_v46 = vpop.permute.xlu1 %2767  ;;  %v3725_v32 = vld [vmem:[#allocation5] sm:$0xff] }
 0x2e8   : > { %9602 = vmatmul.mubr.msk.f32.gmra.mxu0 %vm2244_vm12, %v2232_v27  ;;  %v3025_v45 = vpop.permute.xlu0 %3024  ;;  %v3726_v28 = vld [vmem:[#allocation5 + $0x8] sm:$0xff]  ;;  %2862 = vst.msk [vmem:[#allocation5 + $0x90] sm:$0xff] %vm2859_vm14, %v2768_v46 }
 0x2e9   : > { %3118 = vst.msk [vmem:[#allocation5 + $0x98] sm:$0xff] %vm2859_vm14, %v3025_v45  ;;  %v9585_v31 = vpop.f32.mrf.mxu0  ;;  %4124 = vmatprep.mubr.f32.mxu1 %v3726_v28 }
 0x2ea   : > { %5087 = vst.msk [vmem:[#allocation5 + $0x8] sm:$0xff] %vm417_vm3, %v11834_v20  ;;  %v2507_v44 = vadd.f32 %v11877_v13, %v9585_v31  ;;  %4125 = vmatmul.mubr.f32.vlgmr.msra.gmra.mxu1 %v3725_v32 }
 0x2eb   : > { %v2501_v34 = vpop.f32.mrf.mxu0  ;;  %v2770_v38 = vpop.permute.xlu1 %2769  ;;  %v3730_v52 = vld [vmem:[#allocation5 + $0x48] sm:$0xff] }
 0x2ec   : > { %v2589_v23 = vmax.f32 %v2507_v44, 0.0  ;;  %v2502_v25 = vadd.f32 %v11877_v13, %v2501_v34  ;;  %v3027_v35 = vpop.permute.xlu0 %3026  ;;  %v3731_v40 = vld [vmem:[#allocation5 + $0x50] sm:$0xff]  ;;  %2863 = vst.msk [vmem:[#allocation5 + $0xd8] sm:$0xff] %vm2859_vm14, %v2770_v38 }
 0x2ed   : > { %3119 = vst.msk [vmem:[#allocation5 + $0xe0] sm:$0xff] %vm2859_vm14, %v3027_v35  ;;  %4129 = vmatprep.mubr.f32.mxu1 %v3731_v40 }
 0x2ee   : > { %2622 = vst.msk [vmem:[#allocation3 + $0xf9] sm:$0xff] %vm417_vm3, %v2589_v23  ;;  %v2588_v12 = vmax.f32 %v2502_v25, 0.0  ;;  %4130 = vmatmul.mubr.f32.gmra.mxu1 %v3730_v52 }
 0x2ef   : > { %v3735_v6 = vld [vmem:[#allocation5 + $0x90] sm:$0xff] }
 0x2f0   : > { %2621 = vst.msk [vmem:[#allocation3 + $0xf1] sm:$0xff] %vm417_vm3, %v2588_v12  ;;  %v3029_v20 = vpop.permute.xlu0 %3028  ;;  %v2772_v21 = vpop.permute.xlu1 %2771  ;;  %v3736_v61 = vld [vmem:[#allocation5 + $0x98] sm:$0xff] }
 0x2f1   : > { %3120 = vst.msk [vmem:[#allocation5 + $0x128] sm:$0xff] %vm2859_vm14, %v3029_v20  ;;  %2864 = vst.msk [vmem:[#allocation5 + $0x120] sm:$0xff] %vm2859_vm14, %v2772_v21  ;;  %4134 = vmatprep.mubr.f32.mxu1 %v3736_v61 }
 0x2f2   : > { %4135 = vmatmul.mubr.f32.gmra.mxu1 %v3735_v6 }
 0x2f3   : > { %v3740_v14 = vld [vmem:[#allocation5 + $0xd8] sm:$0xff] }
 0x2f4   : > { %v3031_v36 = vpop.permute.xlu0 %3030  ;;  %v2774_v3 = vpop.permute.xlu1 %2773  ;;  %v3741_v50 = vld [vmem:[#allocation5 + $0xe0] sm:$0xff] }
 0x2f5   : > { %3121 = vst.msk [vmem:[#allocation5 + $0x170] sm:$0xff] %vm2859_vm14, %v3031_v36  ;;  %2865 = vst.msk [vmem:[#allocation5 + $0x168] sm:$0xff] %vm2859_vm14, %v2774_v3  ;;  %4139 = vmatprep.mubr.f32.mxu1 %v3741_v50  ;;  %v12147_v0 = vld [vmem:[#allocation3 + $0xfa] sm:$0xff] }
 0x2f6   : > { %v12149_v51 = vld [vmem:[#allocation3 + $0xf9] sm:$0xff]  ;;  %4140 = vmatmul.mubr.f32.gmra.mxu1 %v3740_v14  ;;  %2945 = vst.msk [vmem:[#allocation5 + $0x5f0] sm:$0xff] %vm417_vm3, %v12147_v0 }
 0x2f7   : > { %v3678_v15 = vld [vmem:[#allocation3 + $0xfa] sm:$0xff]  ;;  %3199 = vst.msk [vmem:[#allocation5 + $0x568] sm:$0xff] %vm417_vm3, %v12149_v51  ;;  %v2974_v18 = vld [vmem:[#allocation3 + $0xf0] sm:$0xff] }
 0x2f8   : > { %v2719_v22 = vld [vmem:[#allocation3 + $0xf1] sm:$0xff]  ;;  %3710 = vst.msk [vmem:[#allocation5 + $0x4e8] sm:$0xff] %vm417_vm3, %v3678_v15  ;;  %3056 = vrot.lane.b32.xlu0 %v2974_v18, %s10205_s17  ;;  %v3033_v27 = vpop.permute.xlu0 %3032  ;;  %v2776_v45 = vpop.permute.xlu1 %2775  ;;  %v3746_v46 = vld [vmem:[#allocation5 + $0x128] sm:$0xff]  ;;  %v3745_v28 = vld [vmem:[#allocation5 + $0x120] sm:$0xff] }
 0x2f9   : > { %v2975_v43 = vld [vmem:[#allocation3 + $0xf8] sm:$0xff]  ;;  %2803 = vrot.lane.b32.xlu1 %v2719_v22, %s10205_s17  ;;  %2687 = vst.msk [vmem:[#allocation5 + $0x5a0] sm:$0xff] %vm417_vm3, %v2974_v18  ;;  %4144 = vmatprep.mubr.f32.mxu1 %v3746_v46  ;;  %v3421_v34 = vld [vmem:[#allocation3 + $0xf0] sm:$0xff] }
 0x2fa   : > { %2688 = vst.msk [vmem:[#allocation5 + $0x5e8] sm:$0xff] %vm417_vm3, %v2975_v43  ;;  %v12160_v32 = vld [vmem:[#allocation3 + $0xf2] sm:$0xff]  ;;  %4145 = vmatmul.mubr.f32.gmra.mxu1 %v3745_v28  ;;  %3453 = vst.msk [vmem:[#allocation5 + $0x498] sm:$0xff] %vm417_vm3, %v3421_v34 }
 0x2fb   : > { %3122 = vst.msk [vmem:[#allocation5 + $0x1b8] sm:$0xff] %vm2859_vm14, %v3033_v27  ;;  %2866 = vst.msk [vmem:[#allocation5 + $0x1b0] sm:$0xff] %vm2859_vm14, %v2776_v45  ;;  %v12166_v31 = vld [vmem:[#allocation3 + $0xf1] sm:$0xff]  ;;  %v2720_v25 = vld [vmem:[#allocation3 + $0xf9] sm:$0xff] }
 0x2fc   : > { %2944 = vst.msk [vmem:[#allocation5 + $0x5a8] sm:$0xff] %vm417_vm3, %v12160_v32  ;;  %v3677_v44 = vld [vmem:[#allocation3 + $0xf2] sm:$0xff]  ;;  %3198 = vst.msk [vmem:[#allocation5 + $0x520] sm:$0xff] %vm417_vm3, %v12166_v31  ;;  %3058 = vrot.lane.b32.xlu0 %v2975_v43, %s10205_s17  ;;  %v3035_v35 = vpop.permute.xlu0 %3034  ;;  %v2778_v38 = vpop.permute.xlu1 %2777  ;;  %v3750_v52 = vld [vmem:[#allocation5 + $0x168] sm:$0xff] }
 0x2fd   : > { %3709 = vst.msk [vmem:[#allocation5 + $0x4a0] sm:$0xff] %vm417_vm3, %v3677_v44  ;;  %v3422_v23 = vld [vmem:[#allocation3 + $0xf8] sm:$0xff]  ;;  %2805 = vrot.lane.b32.xlu1 %v2720_v25, %s10205_s17  ;;  %v3751_v40 = vld [vmem:[#allocation5 + $0x170] sm:$0xff] }
 0x2fe   : > { %3454 = vst.msk [vmem:[#allocation5 + $0x4e0] sm:$0xff] %vm417_vm3, %v3422_v23  ;;  %4149 = vmatprep.mubr.f32.mxu1 %v3751_v40 }
 0x2ff   : > { %3123 = vst.msk [vmem:[#allocation5 + $0x200] sm:$0xff] %vm2859_vm14, %v3035_v35  ;;  %2867 = vst.msk [vmem:[#allocation5 + $0x1f8] sm:$0xff] %vm2859_vm14, %v2778_v38  ;;  %4150 = vmatmul.mubr.f32.gmra.mxu1 %v3750_v52 }
 0x300   : > { %v3037_v12 = vpop.permute.xlu0 %3036  ;;  %v2780_v20 = vpop.permute.xlu1 %2779 }
 0x301   : > { %3124 = vst.msk [vmem:[#allocation5 + $0x248] sm:$0xff] %vm2859_vm14, %v3037_v12  ;;  %2868 = vst.msk [vmem:[#allocation5 + $0x240] sm:$0xff] %vm2859_vm14, %v2780_v20 }
 0x302   : > { %v3756_v21 = vld [vmem:[#allocation5 + $0x1b8] sm:$0xff]  ;;  %v3755_v61 = vld [vmem:[#allocation5 + $0x1b0] sm:$0xff] }
 0x303   : > { %4154 = vmatprep.mubr.f32.mxu1 %v3756_v21 }
 0x304   : > { %4155 = vmatmul.mubr.f32.gmra.mxu1 %v3755_v61  ;;  %v3039_v6 = vpop.permute.xlu0 %3038  ;;  %v2782_v36 = vpop.permute.xlu1 %2781 }
 0x305   : > { %3125 = vst.msk [vmem:[#allocation5 + $0x290] sm:$0xff] %vm2859_vm14, %v3039_v6  ;;  %2869 = vst.msk [vmem:[#allocation5 + $0x288] sm:$0xff] %vm2859_vm14, %v2782_v36 }
 0x306   : > { %v3761_v3 = vld [vmem:[#allocation5 + $0x200] sm:$0xff]  ;;  %v3760_v50 = vld [vmem:[#allocation5 + $0x1f8] sm:$0xff] }
 0x307   : > { %4159 = vmatprep.mubr.f32.mxu1 %v3761_v3 }
 0x308   : > { %4160 = vmatmul.mubr.f32.gmra.mxu1 %v3760_v50  ;;  %v3041_v14 = vpop.permute.xlu0 %3040  ;;  %v2784_v15 = vpop.permute.xlu1 %2783  ;;  %v3766_v18 = vld [vmem:[#allocation5 + $0x248] sm:$0xff]  ;;  %v3765_v22 = vld [vmem:[#allocation5 + $0x240] sm:$0xff] }
 0x309   : > { %3126 = vst.msk [vmem:[#allocation5 + $0x2d8] sm:$0xff] %vm2859_vm14, %v3041_v14  ;;  %2870 = vst.msk [vmem:[#allocation5 + $0x2d0] sm:$0xff] %vm2859_vm14, %v2784_v15  ;;  %v9588_v43 = vpop.f32.mrf.mxu0  ;;  %4164 = vmatprep.mubr.f32.mxu1 %v3766_v18 }
 0x30a   : > { %v2517_v27 = vadd.f32 %v11877_v13, %v9588_v43 }
 0x30b   : > { %v2511_v45 = vpop.f32.mrf.mxu0 }
 0x30c   : > { %4165 = vmatmul.mubr.f32.gmra.mxu1 %v3765_v22  ;;  %v2591_v46 = vmax.f32 %v2517_v27, 0.0  ;;  %v2512_v28 = vadd.f32 %v11877_v13, %v2511_v45  ;;  %v3043_v44 = vpop.permute.xlu0 %3042  ;;  %v2786_v34 = vpop.permute.xlu1 %2785  ;;  %v3771_v23 = vld [vmem:[#allocation5 + $0x290] sm:$0xff]  ;;  %v3770_v25 = vld [vmem:[#allocation5 + $0x288] sm:$0xff] }
 0x30d   : > { %3127 = vst.msk [vmem:[#allocation5 + $0x320] sm:$0xff] %vm2859_vm14, %v3043_v44  ;;  %2871 = vst.msk [vmem:[#allocation5 + $0x318] sm:$0xff] %vm2859_vm14, %v2786_v34  ;;  %4169 = vmatprep.mubr.f32.mxu1 %v3771_v23 }
 0x30e   : > { %2624 = vst.msk [vmem:[#allocation3 + $0x111] sm:$0xff] %vm417_vm3, %v2591_v46  ;;  %v2590_v35 = vmax.f32 %v2512_v28, 0.0 }
 0x310   : > { %4170 = vmatmul.mubr.f32.gmra.mxu1 %v3770_v25  ;;  %2623 = vst.msk [vmem:[#allocation3 + $0x109] sm:$0xff] %vm417_vm3, %v2590_v35  ;;  %v3045_v38 = vpop.permute.xlu0 %3044  ;;  %v2788_v40 = vpop.permute.xlu1 %2787  ;;  %v3776_v52 = vld [vmem:[#allocation5 + $0x2d8] sm:$0xff]  ;;  %v3775_v12 = vld [vmem:[#allocation5 + $0x2d0] sm:$0xff] }
 0x311   : > { %3128 = vst.msk [vmem:[#allocation5 + $0x368] sm:$0xff] %vm2859_vm14, %v3045_v38  ;;  %2872 = vst.msk [vmem:[#allocation5 + $0x360] sm:$0xff] %vm2859_vm14, %v2788_v40  ;;  %4174 = vmatprep.mubr.f32.mxu1 %v3776_v52 }
 0x314   : > { %4175 = vmatmul.mubr.f32.gmra.mxu1 %v3775_v12  ;;  %v3047_v20 = vpop.permute.xlu0 %3046  ;;  %v2790_v21 = vpop.permute.xlu1 %2789  ;;  %v3781_v61 = vld [vmem:[#allocation5 + $0x320] sm:$0xff]  ;;  %v3780_v6 = vld [vmem:[#allocation5 + $0x318] sm:$0xff] }
 0x315   : > { %3129 = vst.msk [vmem:[#allocation5 + $0x3b0] sm:$0xff] %vm2859_vm14, %v3047_v20  ;;  %2873 = vst.msk [vmem:[#allocation5 + $0x3a8] sm:$0xff] %vm2859_vm14, %v2790_v21  ;;  %4179 = vmatprep.mubr.f32.mxu1 %v3781_v61  ;;  %v12193_v36 = vld [vmem:[#allocation3 + $0x112] sm:$0xff] }
 0x316   : > { %v3680_v3 = vld [vmem:[#allocation3 + $0x112] sm:$0xff]  ;;  %2947 = vst.msk [vmem:[#allocation5 + $0x680] sm:$0xff] %vm417_vm3, %v12193_v36 }
 0x317   : > { %3712 = vst.msk [vmem:[#allocation5 + $0x578] sm:$0xff] %vm417_vm3, %v3680_v3  ;;  %v3169_v50 = vld [vmem:[#allocation3 + $0x111] sm:$0xff]  ;;  %v2976_v14 = vld [vmem:[#allocation3 + $0x108] sm:$0xff] }
 0x318   : > { %4180 = vmatmul.mubr.f32.gmra.mxu1 %v3780_v6  ;;  %v12198_v15 = vld [vmem:[#allocation3 + $0x109] sm:$0xff]  ;;  %3201 = vst.msk [vmem:[#allocation5 + $0x5f8] sm:$0xff] %vm417_vm3, %v3169_v50  ;;  %3060 = vrot.lane.b32.xlu0 %v2976_v14, %s10205_s17  ;;  %v2792_v22 = vpop.permute.xlu1 %2791  ;;  %v3785_v27 = vld [vmem:[#allocation5 + $0x360] sm:$0xff]  ;;  %2689 = vst.msk [vmem:[#allocation5 + $0x630] sm:$0xff] %vm417_vm3, %v2976_v14 }
 0x319   : > { %v2977_v18 = vld [vmem:[#allocation3 + $0x110] sm:$0xff]  ;;  %2807 = vrot.lane.b32.xlu1 %v12198_v15, %s10205_s17  ;;  %v3786_v43 = vld [vmem:[#allocation5 + $0x368] sm:$0xff]  ;;  %2874 = vst.msk [vmem:[#allocation5 + $0x3f0] sm:$0xff] %vm2859_vm14, %v2792_v22 }
 0x31a   : > { %2690 = vst.msk [vmem:[#allocation5 + $0x678] sm:$0xff] %vm417_vm3, %v2977_v18  ;;  %v12206_v45 = vld [vmem:[#allocation3 + $0x10a] sm:$0xff]  ;;  %4184 = vmatprep.mubr.f32.mxu1 %v3786_v43 }
 0x31b   : > { %2946 = vst.msk [vmem:[#allocation5 + $0x638] sm:$0xff] %vm417_vm3, %v12206_v45  ;;  %v3679_v46 = vld [vmem:[#allocation3 + $0x10a] sm:$0xff] }
 0x31c   : > { %v3168_v28 = vld [vmem:[#allocation3 + $0x109] sm:$0xff]  ;;  %4185 = vmatmul.mubr.f32.gmra.mxu1 %v3785_v27  ;;  %3711 = vst.msk [vmem:[#allocation5 + $0x530] sm:$0xff] %vm417_vm3, %v3679_v46  ;;  %v12214_v23 = vld [vmem:[#allocation3 + $0x111] sm:$0xff]  ;;  %3062 = vrot.lane.b32.xlu0 %v2977_v18, %s10205_s17  ;;  %v2794_v25 = vpop.permute.xlu1 %2793 }
 0x31d   : > { %v3423_v44 = vld [vmem:[#allocation3 + $0x108] sm:$0xff]  ;;  %3200 = vst.msk [vmem:[#allocation5 + $0x5b0] sm:$0xff] %vm417_vm3, %v3168_v28  ;;  %v3424_v34 = vld [vmem:[#allocation3 + $0x110] sm:$0xff]  ;;  %2809 = vrot.lane.b32.xlu1 %v12214_v23, %s10205_s17 }
 0x31e   : > { %3455 = vst.msk [vmem:[#allocation5 + $0x528] sm:$0xff] %vm417_vm3, %v3423_v44  ;;  %3456 = vst.msk [vmem:[#allocation5 + $0x570] sm:$0xff] %vm417_vm3, %v3424_v34  ;;  %v3791_v35 = vld [vmem:[#allocation5 + $0x3b0] sm:$0xff]  ;;  %v3790_v38 = vld [vmem:[#allocation5 + $0x3a8] sm:$0xff] }
 0x31f   : > { %2875 = vst.msk [vmem:[#allocation5 + $0x438] sm:$0xff] %vm2859_vm14, %v2794_v25  ;;  %4189 = vmatprep.mubr.f32.mxu1 %v3791_v35  ;;  %v3956_v35 = vld [vmem:[%s14983_s3 + $0x238] sm:$0xff] }
 0x320   : > { %4190 = vmatmul.mubr.f32.gmra.mxu1 %v3790_v38  ;;  %v3795_v22 = vld [vmem:[#allocation5 + $0x3f0] sm:$0xff]  ;;  %9604 = vmatprep.subr.mxu1 %v3956_v35 }
 0x321   : > { %9605 = vmatpush3.msra.mxu1 %v3956_v35 }
 0x329   : > { %v9591_v40 = vpop.f32.mrf.mxu0 }
 0x32a   : > { %v2527_v52 = vadd.f32 %v11877_v13, %v9591_v40  ;;  %v3049_v12 = vpop.permute.xlu0 %3048 }
 0x32b   : > { %v2796_v20 = vpop.permute.xlu1 %2795  ;;  %3130 = vst.msk [vmem:[#allocation5 + $0x3f8] sm:$0xff] %vm2859_vm14, %v3049_v12  ;;  %v2521_v21 = vpop.f32.mrf.mxu0 }
 0x32c   : > { %2876 = vst.msk [vmem:[#allocation5 + $0x480] sm:$0xff] %vm2859_vm14, %v2796_v20  ;;  %v2593_v61 = vmax.f32 %v2527_v52, 0.0  ;;  %v2522_v6 = vadd.f32 %v11877_v13, %v2521_v21  ;;  %v3800_v13 = vld [vmem:[#allocation5 + $0x438] sm:$0xff] }
 0x32e   : > { %2626 = vst.msk [vmem:[#allocation3 + $0x129] sm:$0xff] %vm417_vm3, %v2593_v61  ;;  %v2592_v3 = vmax.f32 %v2522_v6, 0.0  ;;  %v3051_v50 = vpop.permute.xlu0 %3050  ;;  %v3955_v61 = vld [vmem:[%s14983_s3 + $0x230] sm:$0xff] }
 0x32f   : > { %v2798_v14 = vpop.permute.xlu1 %2797  ;;  %3131 = vst.msk [vmem:[#allocation5 + $0x440] sm:$0xff] %vm2859_vm14, %v3051_v50  ;;  %9606 = vmatprep.subr.mxu1 %v3955_v61 }
 0x330   : > { %2877 = vst.msk [vmem:[#allocation5 + $0x4c8] sm:$0xff] %vm2859_vm14, %v2798_v14  ;;  %9607 = vmatpush3.msra.mxu1 %v3955_v61 }
 0x331   : > { %2625 = vst.msk [vmem:[#allocation3 + $0x121] sm:$0xff] %vm417_vm3, %v2592_v3  ;;  %v12264_v3 = vld [vmem:[%s14982_s2] ss:$0 sm:$0xff] }
 0x332   : > { %v3796_v18 = vld [vmem:[#allocation5 + $0x3f8] sm:$0xff] }
 0x333   : > { %4194 = vmatprep.mubr.f32.mxu1 %v3796_v18  ;;  %v3805_v35 = vld [vmem:[#allocation5 + $0x480] sm:$0xff] }
 0x334   : > { %4195 = vmatmul.mubr.f32.gmra.mxu1 %v3795_v22 }
 0x335   : > { %v12229_v43 = vld [vmem:[#allocation3 + $0x12a] sm:$0xff] }
 0x336   : > { %v3682_v27 = vld [vmem:[#allocation3 + $0x12a] sm:$0xff]  ;;  %v3801_v46 = vld [vmem:[#allocation5 + $0x440] sm:$0xff]  ;;  %2949 = vst.msk [vmem:[#allocation5 + $0x710] sm:$0xff] %vm417_vm3, %v12229_v43 }
 0x337   : > { %3714 = vst.msk [vmem:[#allocation5 + $0x608] sm:$0xff] %vm417_vm3, %v3682_v27  ;;  %v3171_v28 = vld [vmem:[#allocation3 + $0x129] sm:$0xff]  ;;  %4199 = vmatprep.mubr.f32.mxu1 %v3801_v46 }
 0x338   : > { %v2978_v44 = vld [vmem:[#allocation3 + $0x120] sm:$0xff]  ;;  %v2979_v25 = vld [vmem:[#allocation3 + $0x128] sm:$0xff]  ;;  %3203 = vst.msk [vmem:[#allocation5 + $0x688] sm:$0xff] %vm417_vm3, %v3171_v28  ;;  %4200 = vmatmul.mubr.f32.gmra.mxu1 %v3800_v13 }
 0x339   : > { %v12234_v34 = vld [vmem:[#allocation3 + $0x121] sm:$0xff]  ;;  %3064 = vrot.lane.b32.xlu0 %v2978_v44, %s10205_s17  ;;  %2691 = vst.msk [vmem:[#allocation5 + $0x6c0] sm:$0xff] %vm417_vm3, %v2978_v44  ;;  %2692 = vst.msk [vmem:[#allocation5 + $0x708] sm:$0xff] %vm417_vm3, %v2979_v25  ;;  %v12253_v21 = vld [vmem:[#allocation3 + $0x129] sm:$0xff] }
 0x33a   : > { %2811 = vrot.lane.b32.xlu1 %v12234_v34, %s10205_s17  ;;  %v12245_v38 = vld [vmem:[#allocation3 + $0x122] sm:$0xff] }
 0x33b   : > { %v3681_v40 = vld [vmem:[#allocation3 + $0x122] sm:$0xff]  ;;  %2948 = vst.msk [vmem:[#allocation5 + $0x6c8] sm:$0xff] %vm417_vm3, %v12245_v38 }
 0x33c   : > { %3713 = vst.msk [vmem:[#allocation5 + $0x5c0] sm:$0xff] %vm417_vm3, %v3681_v40  ;;  %v3170_v52 = vld [vmem:[#allocation3 + $0x121] sm:$0xff] }
 0x33d   : > { %v3425_v12 = vld [vmem:[#allocation3 + $0x120] sm:$0xff]  ;;  %v3426_v20 = vld [vmem:[#allocation3 + $0x128] sm:$0xff]  ;;  %3202 = vst.msk [vmem:[#allocation5 + $0x640] sm:$0xff] %vm417_vm3, %v3170_v52  ;;  %3066 = vrot.lane.b32.xlu0 %v2979_v25, %s10205_s17 }
 0x33e   : > { %3457 = vst.msk [vmem:[#allocation5 + $0x5b8] sm:$0xff] %vm417_vm3, %v3425_v12  ;;  %3458 = vst.msk [vmem:[#allocation5 + $0x600] sm:$0xff] %vm417_vm3, %v3426_v20  ;;  %2813 = vrot.lane.b32.xlu1 %v12253_v21, %s10205_s17  ;;  %v3810_v20 = vld [vmem:[#allocation5 + $0x4c8] sm:$0xff] }
 0x349   : > { %v9594_v6 = vpop.f32.mrf.mxu0 }
 0x34a   : > { %v2537_v50 = vadd.f32 %v12264_v3, %v9594_v6  ;;  %v3053_v14 = vpop.permute.xlu0 %3052 }
 0x34b   : > { %v2800_v18 = vpop.permute.xlu1 %2799  ;;  %3132 = vst.msk [vmem:[#allocation5 + $0x488] sm:$0xff] %vm2859_vm14, %v3053_v14  ;;  %v2531_v22 = vpop.f32.mrf.mxu0 }
 0x34c   : > { %2878 = vst.msk [vmem:[#allocation5 + $0x510] sm:$0xff] %vm2859_vm14, %v2800_v18  ;;  %v2595_v27 = vmax.f32 %v2537_v50, 0.0  ;;  %v2532_v46 = vadd.f32 %v12264_v3, %v2531_v22  ;;  %v3954_v18 = vld [vmem:[%s14983_s3 + $0x228] sm:$0xff] }
 0x34d   : > { %9608 = vmatprep.subr.mxu1 %v3954_v18 }
 0x34e   : > { %2628 = vst.msk [vmem:[#allocation3 + $0x141] sm:$0xff] %vm417_vm3, %v2595_v27  ;;  %v2594_v13 = vmax.f32 %v2532_v46, 0.0  ;;  %v3055_v28 = vpop.permute.xlu0 %3054  ;;  %9609 = vmatpush3.msra.mxu1 %v3954_v18 }
 0x34f   : > { %v2802_v44 = vpop.permute.xlu1 %2801  ;;  %3133 = vst.msk [vmem:[#allocation5 + $0x4d0] sm:$0xff] %vm2859_vm14, %v3055_v28 }
 0x350   : > { %2879 = vst.msk [vmem:[#allocation5 + $0x558] sm:$0xff] %vm2859_vm14, %v2802_v44 }
 0x351   : > { %2627 = vst.msk [vmem:[#allocation3 + $0x139] sm:$0xff] %vm417_vm3, %v2594_v13 }
 0x352   : > { %v3806_v25 = vld [vmem:[#allocation5 + $0x488] sm:$0xff] }
 0x353   : > { %4204 = vmatprep.mubr.f32.mxu1 %v3806_v25  ;;  %v3953_v25 = vld [vmem:[%s14983_s3 + $0x220] sm:$0xff] }
 0x354   : > { %4205 = vmatmul.mubr.f32.gmra.mxu1 %v3805_v35  ;;  %9610 = vmatprep.subr.mxu1 %v3953_v25 }
 0x355   : > { %v12274_v40 = vld [vmem:[#allocation3 + $0x142] sm:$0xff]  ;;  %9611 = vmatpush3.msra.mxu1 %v3953_v25 }
 0x356   : > { %v3684_v52 = vld [vmem:[#allocation3 + $0x142] sm:$0xff]  ;;  %v3811_v12 = vld [vmem:[#allocation5 + $0x4d0] sm:$0xff]  ;;  %2951 = vst.msk [vmem:[#allocation5 + $0x7a0] sm:$0xff] %vm417_vm3, %v12274_v40 }
 0x357   : > { %3716 = vst.msk [vmem:[#allocation5 + $0x698] sm:$0xff] %vm417_vm3, %v3684_v52  ;;  %v3173_v61 = vld [vmem:[#allocation3 + $0x141] sm:$0xff]  ;;  %4209 = vmatprep.mubr.f32.mxu1 %v3811_v12 }
 0x358   : > { %v2980_v6 = vld [vmem:[#allocation3 + $0x138] sm:$0xff]  ;;  %v2981_v14 = vld [vmem:[#allocation3 + $0x140] sm:$0xff]  ;;  %3205 = vst.msk [vmem:[#allocation5 + $0x718] sm:$0xff] %vm417_vm3, %v3173_v61  ;;  %4210 = vmatmul.mubr.f32.gmra.mxu1 %v3810_v20 }
 0x359   : > { %v12279_v50 = vld [vmem:[#allocation3 + $0x139] sm:$0xff]  ;;  %3068 = vrot.lane.b32.xlu0 %v2980_v6, %s10205_s17  ;;  %2693 = vst.msk [vmem:[#allocation5 + $0x750] sm:$0xff] %vm417_vm3, %v2980_v6  ;;  %2694 = vst.msk [vmem:[#allocation5 + $0x798] sm:$0xff] %vm417_vm3, %v2981_v14  ;;  %v12298_v44 = vld [vmem:[#allocation3 + $0x141] sm:$0xff] }
 0x35a   : > { %2815 = vrot.lane.b32.xlu1 %v12279_v50, %s10205_s17  ;;  %v12290_v22 = vld [vmem:[#allocation3 + $0x13a] sm:$0xff] }
 0x35b   : > { %v3683_v27 = vld [vmem:[#allocation3 + $0x13a] sm:$0xff]  ;;  %2950 = vst.msk [vmem:[#allocation5 + $0x758] sm:$0xff] %vm417_vm3, %v12290_v22 }
 0x35c   : > { %3715 = vst.msk [vmem:[#allocation5 + $0x650] sm:$0xff] %vm417_vm3, %v3683_v27  ;;  %v3172_v46 = vld [vmem:[#allocation3 + $0x139] sm:$0xff] }
 0x35d   : > { %v3427_v13 = vld [vmem:[#allocation3 + $0x138] sm:$0xff]  ;;  %v3428_v28 = vld [vmem:[#allocation3 + $0x140] sm:$0xff]  ;;  %3204 = vst.msk [vmem:[#allocation5 + $0x6d0] sm:$0xff] %vm417_vm3, %v3172_v46  ;;  %3070 = vrot.lane.b32.xlu0 %v2981_v14, %s10205_s17 }
 0x35e   : > { %3459 = vst.msk [vmem:[#allocation5 + $0x648] sm:$0xff] %vm417_vm3, %v3427_v13  ;;  %3460 = vst.msk [vmem:[#allocation5 + $0x690] sm:$0xff] %vm417_vm3, %v3428_v28  ;;  %2817 = vrot.lane.b32.xlu1 %v12298_v44, %s10205_s17  ;;  %v3815_v28 = vld [vmem:[#allocation5 + $0x510] sm:$0xff] }
 0x369   : > { %v9597_v35 = vpop.f32.mrf.mxu0 }
 0x36a   : > { %v2547_v52 = vadd.f32 %v12264_v3, %v9597_v35  ;;  %v3057_v12 = vpop.permute.xlu0 %3056 }
 0x36b   : > { %v2804_v20 = vpop.permute.xlu1 %2803  ;;  %3134 = vst.msk [vmem:[#allocation5 + $0x518] sm:$0xff] %vm2859_vm14, %v3057_v12  ;;  %v2541_v61 = vpop.f32.mrf.mxu0  ;;  %v3820_v12 = vld [vmem:[#allocation5 + $0x558] sm:$0xff] }
 0x36c   : > { %2880 = vst.msk [vmem:[#allocation5 + $0x5a0] sm:$0xff] %vm2859_vm14, %v2804_v20  ;;  %v2597_v6 = vmax.f32 %v2547_v52, 0.0  ;;  %v2542_v14 = vadd.f32 %v12264_v3, %v2541_v61 }
 0x36e   : > { %2630 = vst.msk [vmem:[#allocation3 + $0x159] sm:$0xff] %vm417_vm3, %v2597_v6  ;;  %v2596_v18 = vmax.f32 %v2542_v14, 0.0  ;;  %v3059_v27 = vpop.permute.xlu0 %3058  ;;  %v3952_v14 = vld [vmem:[%s14983_s3 + $0x218] sm:$0xff] }
 0x36f   : > { %v2806_v46 = vpop.permute.xlu1 %2805  ;;  %3135 = vst.msk [vmem:[#allocation5 + $0x560] sm:$0xff] %vm2859_vm14, %v3059_v27  ;;  %9612 = vmatprep.subr.mxu1 %v3952_v14 }
 0x370   : > { %2881 = vst.msk [vmem:[#allocation5 + $0x5e8] sm:$0xff] %vm2859_vm14, %v2806_v46  ;;  %9613 = vmatpush3.msra.mxu1 %v3952_v14  ;;  %v3929_v14 = vld [vmem:[%s14983_s3 + $0x160] sm:$0xff] }
 0x371   : > { %2629 = vst.msk [vmem:[#allocation3 + $0x151] sm:$0xff] %vm417_vm3, %v2596_v18 }
 0x372   : > { %v3816_v13 = vld [vmem:[#allocation5 + $0x518] sm:$0xff] }
 0x373   : > { %4214 = vmatprep.mubr.f32.mxu1 %v3816_v13 }
 0x374   : > { %4215 = vmatmul.mubr.f32.gmra.mxu1 %v3815_v28  ;;  %v3932_v28 = vld [vmem:[%s14983_s3 + $0x178] sm:$0xff] }
 0x375   : > { %v12314_v25 = vld [vmem:[#allocation3 + $0x15a] sm:$0xff]  ;;  %4286 = vmatpush1.msra.mxu0 %v3932_v28  ;;  %v3925_v28 = vld [vmem:[%s14983_s3 + $0x140] sm:$0xff] }
 0x376   : > { %v3175_v35 = vld [vmem:[#allocation3 + $0x159] sm:$0xff]  ;;  %2953 = vst.msk [vmem:[#allocation5 + $0x830] sm:$0xff] %vm417_vm3, %v12314_v25  ;;  %3718 = vst.msk [vmem:[#allocation5 + $0x728] sm:$0xff] %vm417_vm3, %v12314_v25 }
 0x377   : > { %v3821_v52 = vld [vmem:[#allocation5 + $0x560] sm:$0xff]  ;;  %3207 = vst.msk [vmem:[#allocation5 + $0x7a8] sm:$0xff] %vm417_vm3, %v3175_v35 }
 0x378   : > { %4219 = vmatprep.mubr.f32.mxu1 %v3821_v52  ;;  %v2982_v20 = vld [vmem:[#allocation3 + $0x150] sm:$0xff]  ;;  %v2983_v6 = vld [vmem:[#allocation3 + $0x158] sm:$0xff]  ;;  %v3931_v52 = vld [vmem:[%s14983_s3 + $0x170] sm:$0xff] }
 0x379   : > { %v12321_v61 = vld [vmem:[#allocation3 + $0x151] sm:$0xff]  ;;  %3072 = vrot.lane.b32.xlu0 %v2982_v20, %s10205_s17  ;;  %2695 = vst.msk [vmem:[#allocation5 + $0x7e0] sm:$0xff] %vm417_vm3, %v2982_v20  ;;  %2696 = vst.msk [vmem:[#allocation5 + $0x828] sm:$0xff] %vm417_vm3, %v2983_v6  ;;  %4220 = vmatmul.mubr.f32.gmra.mxu1 %v3820_v12  ;;  %v12343_v35 = vld [vmem:[#allocation3 + $0x159] sm:$0xff] }
 0x37a   : > { %15004 = vst [vmem:[#allocation15_spill] sm:$0xff] %v12321_v61  ;;  %2819 = vrot.lane.b32.xlu1 %v12321_v61, %s10205_s17  ;;  %v12331_v18 = vld [vmem:[#allocation3 + $0x152] sm:$0xff]  ;;  %15005 = vst [vmem:[#allocation16_spill] sm:$0xff] %v12343_v35 }
 0x37b   : > { %v3174_v27 = vld [vmem:[#allocation3 + $0x151] sm:$0xff]  ;;  %2952 = vst.msk [vmem:[#allocation5 + $0x7e8] sm:$0xff] %vm417_vm3, %v12331_v18  ;;  %3717 = vst.msk [vmem:[#allocation5 + $0x6e0] sm:$0xff] %vm417_vm3, %v12331_v18 }
 0x37c   : > { %3206 = vst.msk [vmem:[#allocation5 + $0x760] sm:$0xff] %vm417_vm3, %v3174_v27  ;;  %v3429_v46 = vld [vmem:[#allocation3 + $0x150] sm:$0xff]  ;;  %v3430_v13 = vld [vmem:[#allocation3 + $0x158] sm:$0xff]  ;;  %v3927_v27 = vld [vmem:[%s14983_s3 + $0x150] sm:$0xff] }
 0x37d   : > { %3461 = vst.msk [vmem:[#allocation5 + $0x6d8] sm:$0xff] %vm417_vm3, %v3429_v46  ;;  %3462 = vst.msk [vmem:[#allocation5 + $0x720] sm:$0xff] %vm417_vm3, %v3430_v13  ;;  %3074 = vrot.lane.b32.xlu0 %v2983_v6, %s10205_s17  ;;  %v12351_v12 = vld [vmem:[#allocation4] sm:$0xff]  ;;  %v3930_v20 = vld [vmem:[%s14983_s3 + $0x168] sm:$0xff] }
 0x37e   : > { %2821 = vrot.lane.b32.xlu1 %v12343_v35, %s10205_s17  ;;  %4287 = vmatprep.subr.mxu0 %v12351_v12  ;;  %v3928_v6 = vld [vmem:[%s14983_s3 + $0x158] sm:$0xff]  ;;  %v3926_v46 = vld [vmem:[%s14983_s3 + $0x148] sm:$0xff]  ;;  %v3951_v13 = vld [vmem:[%s14983_s3 + $0x210] sm:$0xff] }
 0x37f   : > { %4288 = vmatpush1.msra.mxu0 %v3931_v52  ;;  %9614 = vmatprep.subr.mxu1 %v3951_v13 }
 0x380   : > { %4289 = vmatprep.subr.mxu0 %v12351_v12  ;;  %9615 = vmatpush3.msra.mxu1 %v3951_v13 }
 0x381   : > { %4290 = vmatpush1.msra.mxu0 %v3930_v20  ;;  %v3924_v20 = vld [vmem:[%s14983_s3 + $0x138] sm:$0xff] }
 0x382   : > { %4291 = vmatprep.subr.mxu0 %v12351_v12 }
 0x383   : > { %4292 = vmatpush1.msra.mxu0 %v3929_v14 }
 0x384   : > { %4293 = vmatprep.subr.mxu0 %v12351_v12 }
 0x385   : > { %4294 = vmatpush1.msra.mxu0 %v3928_v6 }
 0x386   : > { %4295 = vmatprep.subr.mxu0 %v12351_v12 }
 0x387   : > { %4296 = vmatpush1.msra.mxu0 %v3927_v27 }
 0x388   : > { %4297 = vmatprep.subr.mxu0 %v12351_v12 }
 0x389   : > { %4298 = vmatpush1.msra.mxu0 %v3926_v46  ;;  %v3923_v46 = vld [vmem:[%s14983_s3 + $0x130] sm:$0xff] }
 0x38a   : > { %v9600_v52 = vpop.f32.mrf.mxu0  ;;  %4299 = vmatprep.subr.mxu0 %v12351_v12  ;;  %v3061_v6 = vpop.permute.xlu0 %3060 }
 0x38b   : > { %v2557_v14 = vadd.f32 %v12264_v3, %v9600_v52  ;;  %v2808_v27 = vpop.permute.xlu1 %2807  ;;  %4300 = vmatpush1.msra.mxu0 %v3925_v28  ;;  %3136 = vst.msk [vmem:[#allocation5 + $0x5a8] sm:$0xff] %vm2859_vm14, %v3061_v6  ;;  %v3922_v28 = vld [vmem:[%s14983_s3 + $0x128] sm:$0xff] }
 0x38c   : > { %2882 = vst.msk [vmem:[#allocation5 + $0x630] sm:$0xff] %vm2859_vm14, %v2808_v27  ;;  %v2551_v35 = vpop.f32.mrf.mxu0  ;;  %4301 = vmatprep.subr.mxu0 %v12351_v12 }
 0x38d   : > { %v2599_v13 = vmax.f32 %v2557_v14, 0.0  ;;  %v2552_v61 = vadd.f32 %v12264_v3, %v2551_v35  ;;  %4302 = vmatpush1.msra.mxu0 %v3924_v20  ;;  %v3921_v35 = vld [vmem:[%s14983_s3 + $0x120] sm:$0xff]  ;;  %v3825_v14 = vld [vmem:[#allocation5 + $0x5a0] sm:$0xff] }
 0x38e   : > { %4303 = vmatprep.subr.mxu0 %v12351_v12  ;;  %v3063_v6 = vpop.permute.xlu0 %3062 }
 0x38f   : > { %2632 = vst.msk [vmem:[#allocation3 + $0x171] sm:$0xff] %vm417_vm3, %v2599_v13  ;;  %v2598_v52 = vmax.f32 %v2552_v61, 0.0  ;;  %v2810_v27 = vpop.permute.xlu1 %2809  ;;  %4304 = vmatpush1.msra.mxu0 %v3923_v46  ;;  %v3920_v61 = vld [vmem:[%s14983_s3 + $0x118] sm:$0xff]  ;;  %v3919_v46 = vld [vmem:[%s14983_s3 + $0x110] sm:$0xff] }
 0x390   : > { %3137 = vst.msk [vmem:[#allocation5 + $0x5f0] sm:$0xff] %vm2859_vm14, %v3063_v6  ;;  %2883 = vst.msk [vmem:[#allocation5 + $0x678] sm:$0xff] %vm2859_vm14, %v2810_v27  ;;  %4305 = vmatprep.subr.mxu0 %v12351_v12  ;;  %v3918_v6 = vld [vmem:[%s14983_s3 + $0x108] sm:$0xff] }
 0x391   : > { %2631 = vst.msk [vmem:[#allocation3 + $0x169] sm:$0xff] %vm417_vm3, %v2598_v52  ;;  %4306 = vmatpush1.msra.mxu0 %v3922_v28  ;;  %v3830_v52 = vld [vmem:[#allocation5 + $0x5e8] sm:$0xff] }
 0x392   : > { %4307 = vmatprep.subr.mxu0 %v12351_v12  ;;  %v3826_v20 = vld [vmem:[#allocation5 + $0x5a8] sm:$0xff] }
 0x393   : > { %4308 = vmatpush1.msra.mxu0 %v3921_v35  ;;  %4224 = vmatprep.mubr.f32.mxu1 %v3826_v20 }
 0x394   : > { %4309 = vmatprep.subr.mxu0 %v12351_v12  ;;  %4225 = vmatmul.mubr.f32.gmra.mxu1 %v3825_v14 }
 0x395   : > { %4310 = vmatpush1.msra.mxu0 %v3920_v61 }
 0x396   : > { %4311 = vmatprep.subr.mxu0 %v12351_v12  ;;  %v12413_v13 = vld [vmem:[#allocation3 + $0x172] sm:$0xff] }
 0x397   : > { %v3831_v28 = vld [vmem:[#allocation5 + $0x5f0] sm:$0xff]  ;;  %4312 = vmatpush1.msra.mxu0 %v3919_v46  ;;  %2955 = vst.msk [vmem:[#allocation5 + $0x8c0] sm:$0xff] %vm417_vm3, %v12413_v13  ;;  %3720 = vst.msk [vmem:[#allocation5 + $0x7b8] sm:$0xff] %vm417_vm3, %v12413_v13 }
 0x398   : > { %v3177_v27 = vld [vmem:[#allocation3 + $0x171] sm:$0xff]  ;;  %4229 = vmatprep.mubr.f32.mxu1 %v3831_v28  ;;  %v2984_v35 = vld [vmem:[#allocation3 + $0x168] sm:$0xff]  ;;  %4313 = vmatprep.subr.mxu0 %v12351_v12 }
 0x399   : > { %v12422_v61 = vld [vmem:[#allocation3 + $0x169] sm:$0xff]  ;;  %3209 = vst.msk [vmem:[#allocation5 + $0x838] sm:$0xff] %vm417_vm3, %v3177_v27  ;;  %3076 = vrot.lane.b32.xlu0 %v2984_v35, %s10205_s17  ;;  %2697 = vst.msk [vmem:[#allocation5 + $0x870] sm:$0xff] %vm417_vm3, %v2984_v35  ;;  %v3950_v28 = vld [vmem:[%s14983_s3 + $0x208] sm:$0xff]  ;;  %4230 = vmatmul.mubr.f32.gmra.mxu1 %v3830_v52 }
 0x39a   : > { %15006 = vst [vmem:[#allocation17_spill] sm:$0xff] %v12422_v61  ;;  %v2985_v20 = vld [vmem:[#allocation3 + $0x170] sm:$0xff]  ;;  %2823 = vrot.lane.b32.xlu1 %v12422_v61, %s10205_s17  ;;  %4314 = vmatpush1.msra.mxu0 %v3918_v6  ;;  %v3431_v35 = vld [vmem:[#allocation3 + $0x168] sm:$0xff] }
 0x39b   : > { %2698 = vst.msk [vmem:[#allocation5 + $0x8b8] sm:$0xff] %vm417_vm3, %v2985_v20  ;;  %v12431_v14 = vld [vmem:[#allocation3 + $0x16a] sm:$0xff]  ;;  %4315 = vmatprep.subr.mxu0 %v12351_v12  ;;  %9616 = vmatprep.subr.mxu1 %v3950_v28  ;;  %3463 = vst.msk [vmem:[#allocation5 + $0x768] sm:$0xff] %vm417_vm3, %v3431_v35 }
 0x39c   : > { %v3917_v46 = vld [vmem:[%s14983_s3 + $0x100] sm:$0xff]  ;;  %2954 = vst.msk [vmem:[#allocation5 + $0x878] sm:$0xff] %vm417_vm3, %v12431_v14  ;;  %3719 = vst.msk [vmem:[#allocation5 + $0x770] sm:$0xff] %vm417_vm3, %v12431_v14  ;;  %v3948_v6 = vld [vmem:[%s14983_s3 + $0x1f8] sm:$0xff]  ;;  %9617 = vmatpush3.msra.mxu1 %v3950_v28 }
 0x39d   : > { %v3176_v27 = vld [vmem:[#allocation3 + $0x169] sm:$0xff]  ;;  %v12447_v52 = vld [vmem:[#allocation3 + $0x171] sm:$0xff]  ;;  %4316 = vmatpush1.msra.mxu0 %v3917_v46  ;;  %3078 = vrot.lane.b32.xlu0 %v2985_v20, %s10205_s17 }
 0x39e   : > { %v3432_v61 = vld [vmem:[#allocation3 + $0x170] sm:$0xff]  ;;  %3208 = vst.msk [vmem:[#allocation5 + $0x7f0] sm:$0xff] %vm417_vm3, %v3176_v27  ;;  %15007 = vst [vmem:[#allocation18_spill] sm:$0xff] %v12447_v52  ;;  %2825 = vrot.lane.b32.xlu1 %v12447_v52, %s10205_s17  ;;  %4317 = vmatprep.subr.mxu0 %v12351_v12  ;;  %v3947_v27 = vld [vmem:[%s14983_s3 + $0x1f0] sm:$0xff] }
 0x39f   : > { %3464 = vst.msk [vmem:[#allocation5 + $0x7b0] sm:$0xff] %vm417_vm3, %v3432_v61  ;;  %4318 = vmatpush2.msra.mxu0 %v3948_v6  ;;  %v3946_v61 = vld [vmem:[%s14983_s3 + $0x1e8] sm:$0xff]  ;;  %v3945_v20 = vld [vmem:[%s14983_s3 + $0x1e0] sm:$0xff]  ;;  %v3944_v46 = vld [vmem:[%s14983_s3 + $0x1d8] sm:$0xff] }
 0x3a0   : > { %4319 = vmatprep.subr.mxu0 %v12351_v12  ;;  %v3942_v6 = vld [vmem:[%s14983_s3 + $0x1c8] sm:$0xff] }
 0x3a1   : > { %4320 = vmatpush2.msra.mxu0 %v3947_v27 }
 0x3a2   : > { %3276 = vrot.lane.b32.xlu1 %v11364_v24, %s10205_s17  ;;  %4321 = vmatprep.subr.mxu0 %v12351_v12  ;;  %v3943_v24 = vld [vmem:[%s14983_s3 + $0x1d0] sm:$0xff] }
 0x3a3   : > { %4322 = vmatpush2.msra.mxu0 %v3946_v61 }
 0x3a4   : > { %4323 = vmatprep.subr.mxu0 %v12351_v12 }
 0x3a5   : > { %4324 = vmatpush2.msra.mxu0 %v3945_v20 }
 0x3a6   : > { %3278 = vrot.lane.b32.xlu1 %v11351_v30, %s10205_s17  ;;  %4325 = vmatprep.subr.mxu0 %v12351_v12  ;;  %v3949_v30 = vld [vmem:[%s14983_s3 + $0x200] sm:$0xff] }
 0x3a7   : > { %4326 = vmatpush2.msra.mxu0 %v3944_v46  ;;  %v3941_v46 = vld [vmem:[%s14983_s3 + $0x1c0] sm:$0xff]  ;;  %9618 = vmatprep.subr.mxu1 %v3949_v30 }
 0x3a8   : > { %v9603_v28 = vpop.f32.mrf.mxu0  ;;  %4327 = vmatprep.subr.mxu0 %v12351_v12  ;;  %9619 = vmatpush3.msra.mxu1 %v3949_v30 }
 0x3a9   : > { %v2567_v35 = vadd.f32 %v12264_v3, %v9603_v28  ;;  %4328 = vmatpush2.msra.mxu0 %v3943_v24  ;;  %9812 = vmatprep.subr.mxu1 %v12351_v12 }
 0x3aa   : > { %v2561_v27 = vpop.f32.mrf.mxu0  ;;  %3280 = vrot.lane.b32.xlu1 %v11448_v10, %s10205_s17  ;;  %4329 = vmatprep.subr.mxu0 %v12351_v12  ;;  %v12494_v28 = vpop.f32.mrf.mxu1 }
 0x3ab   : > { %v2601_v61 = vmax.f32 %v2567_v35, 0.0  ;;  %v2562_v20 = vadd.f32 %v12264_v3, %v2561_v27  ;;  %v3065_v52 = vpop.permute.xlu0 %3064  ;;  %4330 = vmatpush2.msra.mxu0 %v3942_v6  ;;  %v3940_v3 = vld [vmem:[%s14983_s3 + $0x1b8] sm:$0xff] }
 0x3ac   : > { %3138 = vst.msk [vmem:[#allocation5 + $0x638] sm:$0xff] %vm2859_vm14, %v3065_v52  ;;  %v2812_v24 = vpop.permute.xlu1 %2811  ;;  %4331 = vmatprep.subr.mxu0 %v12351_v12  ;;  %v4128_v35 = vpop.f32.mrf.mxu1  ;;  %v3939_v52 = vld [vmem:[%s14983_s3 + $0x1b0] sm:$0xff] }
 0x3ad   : > { %2634 = vst.msk [vmem:[#allocation3 + $0x189] sm:$0xff] %vm417_vm3, %v2601_v61  ;;  %v2600_v10 = vmax.f32 %v2562_v20, 0.0  ;;  %4332 = vmatpush2.msra.mxu0 %v3941_v46  ;;  %v3937_v20 = vld [vmem:[%s14983_s3 + $0x1a0] sm:$0xff] }
 0x3ae   : > { %2884 = vst.msk [vmem:[#allocation5 + $0x6c0] sm:$0xff] %vm2859_vm14, %v2812_v24  ;;  %3282 = vrot.lane.b32.xlu1 %v11431_v4, %s10205_s17  ;;  %4333 = vmatprep.subr.mxu0 %v12351_v12  ;;  %v12511_v6 = vpop.f32.mrf.mxu1  ;;  %v3938_v4 = vld [vmem:[%s14983_s3 + $0x1a8] sm:$0xff]  ;;  %v3835_v35 = vld [vmem:[#allocation5 + $0x630] sm:$0xff] }
 0x3af   : > { %2633 = vst.msk [vmem:[#allocation3 + $0x181] sm:$0xff] %vm417_vm3, %v2600_v10  ;;  %v3067_v27 = vpop.permute.xlu0 %3066  ;;  %4334 = vmatpush2.msra.mxu0 %v3940_v3 }
 0x3b0   : > { %3139 = vst.msk [vmem:[#allocation5 + $0x680] sm:$0xff] %vm2859_vm14, %v3067_v27  ;;  %v2814_v30 = vpop.permute.xlu1 %2813  ;;  %4335 = vmatprep.subr.mxu0 %v12351_v12  ;;  %v4133_v61 = vpop.f32.mrf.mxu1 }
 0x3b1   : > { %2885 = vst.msk [vmem:[#allocation5 + $0x708] sm:$0xff] %vm2859_vm14, %v2814_v30  ;;  %4336 = vmatpush2.msra.mxu0 %v3939_v52  ;;  %v3936_v30 = vld [vmem:[%s14983_s3 + $0x198] sm:$0xff] }
 0x3b2   : > { %3284 = vrot.lane.b32.xlu1 %v11538_v58, %s10205_s17  ;;  %4337 = vmatprep.subr.mxu0 %v12351_v12  ;;  %v12525_v46 = vpop.f32.mrf.mxu1 }
 0x3b3   : > { %v3836_v10 = vld [vmem:[#allocation5 + $0x638] sm:$0xff]  ;;  %4338 = vmatpush2.msra.mxu0 %v3938_v4 }
 0x3b4   : > { %v12527_v24 = vld [vmem:[#allocation3 + $0x18a] sm:$0xff]  ;;  %4234 = vmatprep.mubr.f32.mxu1 %v3836_v10  ;;  %4339 = vmatprep.subr.mxu0 %v12351_v12  ;;  %v4138_v58 = vpop.f32.mrf.mxu1 }
 0x3b5   : > { %v12529_v3 = vld [vmem:[#allocation3 + $0x189] sm:$0xff]  ;;  %3722 = vst.msk [vmem:[#allocation5 + $0x848] sm:$0xff] %vm417_vm3, %v12527_v24  ;;  %4235 = vmatmul.mubr.f32.gmra.mxu1 %v3835_v35  ;;  %4340 = vmatpush2.msra.mxu0 %v3937_v20  ;;  %v3840_v58 = vld [vmem:[#allocation5 + $0x678] sm:$0xff]  ;;  %v3935_v20 = vld [vmem:[%s14983_s3 + $0x190] sm:$0xff] }
 0x3b6   : > { %3211 = vst.msk [vmem:[#allocation5 + $0x8c8] sm:$0xff] %vm417_vm3, %v12529_v3  ;;  %3286 = vrot.lane.b32.xlu1 %v11521_v42, %s10205_s17  ;;  %v2986_v52 = vld [vmem:[#allocation3 + $0x180] sm:$0xff]  ;;  %v12548_v61 = vpop.f32.mrf.mxu1  ;;  %4341 = vmatprep.subr.mxu0 %v12351_v12  ;;  %v3434_v35 = vld [vmem:[#allocation3 + $0x188] sm:$0xff] }
 0x3b7   : > { %v12538_v27 = vld [vmem:[#allocation3 + $0x182] sm:$0xff]  ;;  %3080 = vrot.lane.b32.xlu0 %v2986_v52, %s10205_s17  ;;  %15008 = vst [vmem:[#allocation19_spill] sm:$0xff] %v12548_v61  ;;  %4342 = vmatpush2.msra.mxu0 %v3936_v30  ;;  %3466 = vst.msk [vmem:[#allocation5 + $0x840] sm:$0xff] %vm417_vm3, %v3434_v35  ;;  %v3934_v30 = vld [vmem:[%s14983_s3 + $0x188] sm:$0xff] }
 0x3b8   : > { %v12544_v4 = vld [vmem:[#allocation3 + $0x181] sm:$0xff]  ;;  %3721 = vst.msk [vmem:[#allocation5 + $0x800] sm:$0xff] %vm417_vm3, %v12538_v27  ;;  %v4143_v52 = vpop.f32.mrf.mxu1  ;;  %4343 = vmatprep.subr.mxu0 %v12351_v12 }
 0x3b9   : > { %v3841_v42 = vld [vmem:[#allocation5 + $0x680] sm:$0xff]  ;;  %3210 = vst.msk [vmem:[#allocation5 + $0x880] sm:$0xff] %vm417_vm3, %v12544_v4  ;;  %v2987_v61 = vld [vmem:[#allocation3 + $0x188] sm:$0xff]  ;;  %4344 = vmatpush2.msra.mxu0 %v3935_v20 }
 0x3ba   : > { %v3433_v10 = vld [vmem:[#allocation3 + $0x180] sm:$0xff]  ;;  %4239 = vmatprep.mubr.f32.mxu1 %v3841_v42  ;;  %3288 = vrot.lane.b32.xlu1 %v11656_v49, %s10205_s17  ;;  %v12565_v42 = vpop.f32.mrf.mxu1  ;;  %v3933_v49 = vld [vmem:[%s14983_s3 + $0x180] sm:$0xff] }
 0x3bb   : > { %3465 = vst.msk [vmem:[#allocation5 + $0x7f8] sm:$0xff] %vm417_vm3, %v3433_v10  ;;  %4240 = vmatmul.mubr.f32.gmra.mxu1 %v3840_v58  ;;  %3082 = vrot.lane.b32.xlu0 %v2987_v61, %s10205_s17 }
 0x3bc   : > { %4345 = vmatprep.subr.mxu0 %v12351_v12  ;;  %v4148_v10 = vpop.f32.mrf.mxu1 }
 0x3bd   : > { %4346 = vmatpush2.msra.mxu0 %v3934_v30 }
 0x3be   : > { %3290 = vrot.lane.b32.xlu1 %v11635_v54, %s10205_s17  ;;  %4347 = vmatprep.subr.mxu0 %v12351_v12 }
 0x3bf   : > { %3533 = vrot.lane.b32.xlu0 %v11454_v47, %s10205_s17  ;;  %v12576_v61 = vpop.f32.mrf.mxu1  ;;  %4348 = vmatpush2.msra.mxu0 %v3933_v49 }
 0x3c0   : > { %6222 = vmatprep.subr.mxu0 %v12351_v12 }
 0x3c1   : > { %v4153_v35 = vpop.f32.mrf.mxu1 }
 0x3c2   : > { %3292 = vrot.lane.b32.xlu1 %v11798_v63, %s10205_s17 }
 0x3c3   : > { %3535 = vrot.lane.b32.xlu0 %v11433_v5, %s10205_s17 }
 0x3c4   : > { %v12583_v54 = vpop.f32.mrf.mxu1 }
 0x3c6   : > { %3294 = vrot.lane.b32.xlu1 %v11777_v60, %s10205_s17  ;;  %v4158_v47 = vpop.f32.mrf.mxu1 }
 0x3c7   : > { %3537 = vrot.lane.b32.xlu0 %v11544_v11, %s10205_s17 }
 0x3c8   : > { %v12589_v58 = vpop.f32.mrf.mxu1 }
 0x3ca   : > { %3296 = vrot.lane.b32.xlu1 %v11930_v53, %s10205_s17  ;;  %v4163_v12 = vpop.f32.mrf.mxu1 }
 0x3cb   : > { %3539 = vrot.lane.b32.xlu0 %v11523_v39, %s10205_s17  ;;  %v3069_v63 = vpop.permute.xlu0 %3068 }
 0x3cc   : > { %v2816_v5 = vpop.permute.xlu1 %2815  ;;  %3140 = vst.msk [vmem:[#allocation5 + $0x6c8] sm:$0xff] %vm2859_vm14, %v3069_v63  ;;  %v12597_v60 = vpop.f32.mrf.mxu1  ;;  %v3691_v63 = vld [vmem:[#allocation3 + $0x19a] sm:$0xff] }
 0x3cd   : > { %2886 = vst.msk [vmem:[#allocation5 + $0x750] sm:$0xff] %vm2859_vm14, %v2816_v5  ;;  %v15012_v5 = vld [vmem:[#allocation18_spill] sm:$0xff] }
 0x3ce   : > { %3298 = vrot.lane.b32.xlu1 %v11910_v33, %s10205_s17  ;;  %v4168_v11 = vpop.f32.mrf.mxu1  ;;  %3723 = vst.msk [vmem:[#allocation5 + $0x890] sm:$0xff] %vm417_vm3, %v3691_v63 }
 0x3cf   : > { %3541 = vrot.lane.b32.xlu0 %v11662_v56, %s10205_s17  ;;  %v3071_v53 = vpop.permute.xlu0 %3070  ;;  %v3845_v56 = vld [vmem:[#allocation5 + $0x6c0] sm:$0xff] }
 0x3d0   : > { %v2818_v20 = vpop.permute.xlu1 %2817  ;;  %3141 = vst.msk [vmem:[#allocation5 + $0x710] sm:$0xff] %vm2859_vm14, %v3071_v53  ;;  %v12605_v39 = vpop.f32.mrf.mxu1  ;;  %v3436_v11 = vld [vmem:[#allocation3 + $0x1a0] sm:$0xff] }
 0x3d1   : > { %2887 = vst.msk [vmem:[#allocation5 + $0x798] sm:$0xff] %vm2859_vm14, %v2818_v20  ;;  %v3692_v53 = vld [vmem:[#allocation3 + $0x1a2] sm:$0xff] }
 0x3d2   : > { %3300 = vrot.lane.b32.xlu1 %v12007_v19, %s10205_s17  ;;  %v4173_v52 = vpop.f32.mrf.mxu1  ;;  %v3850_v19 = vld [vmem:[#allocation5 + $0x708] sm:$0xff]  ;;  %3468 = vst.msk [vmem:[#allocation5 + $0x8d0] sm:$0xff] %vm417_vm3, %v3436_v11  ;;  %3724 = vst.msk [vmem:[#allocation5 + $0x8d8] sm:$0xff] %vm417_vm3, %v3692_v53 }
 0x3d3   : > { %3543 = vrot.lane.b32.xlu0 %v11643_v26, %s10205_s17  ;;  %v3846_v33 = vld [vmem:[#allocation5 + $0x6c8] sm:$0xff] }
 0x3d4   : > { %v12611_v30 = vpop.f32.mrf.mxu1  ;;  %4244 = vmatprep.mubr.f32.mxu1 %v3846_v33 }
 0x3d5   : > { %4245 = vmatmul.mubr.f32.gmra.mxu1 %v3845_v56 }
 0x3d6   : > { %3302 = vrot.lane.b32.xlu1 %v11993_v41, %s10205_s17  ;;  %v4178_v49 = vpop.f32.mrf.mxu1 }
 0x3d7   : > { %3545 = vrot.lane.b32.xlu0 %v11804_v48, %s10205_s17  ;;  %v3851_v10 = vld [vmem:[#allocation5 + $0x710] sm:$0xff] }
 0x3d8   : > { %v12617_v35 = vpop.f32.mrf.mxu1  ;;  %4249 = vmatprep.mubr.f32.mxu1 %v3851_v10 }
 0x3d9   : > { %4250 = vmatmul.mubr.f32.gmra.mxu1 %v3850_v19  ;;  %v12734_v19 = vld [vmem:[#allocation5 + $0x890] sm:$0xff] }
 0x3da   : > { %3304 = vrot.lane.b32.xlu1 %v12062_v59, %s10205_s17  ;;  %v4183_v26 = vpop.f32.mrf.mxu1  ;;  %5885 = vst.msk [vmem:[#allocation5 + $0x890] sm:$0xff] %vm417_vm3, %v3691_v63  ;;  %v3769_v63 = vld [vmem:[#allocation5 + $0x260] sm:$0xff] }
 0x3db   : > { %3547 = vrot.lane.b32.xlu0 %v11785_v9, %s10205_s17  ;;  %v12739_v26 = vld [vmem:[#allocation5 + $0x8d8] sm:$0xff] }
 0x3dc   : > { %v12623_v47 = vpop.f32.mrf.mxu1  ;;  %5886 = vst.msk [vmem:[#allocation5 + $0x8d8] sm:$0xff] %vm417_vm3, %v3692_v53 }
 0x3de   : > { %3306 = vrot.lane.b32.xlu1 %v12049_v62, %s10205_s17  ;;  %v4188_v41 = vpop.f32.mrf.mxu1  ;;  %v3855_v62 = vld [vmem:[#allocation5 + $0x750] sm:$0xff] }
 0x3df   : > { %3549 = vrot.lane.b32.xlu0 %v11936_v55, %s10205_s17  ;;  %v3499_v41 = vld [vmem:[#allocation3 + $0x199] sm:$0xff] }
 0x3e0   : > { %v12629_v48 = vpop.f32.mrf.mxu1 }
 0x3e2   : > { %3308 = vrot.lane.b32.xlu1 %v12110_v2, %s10205_s17  ;;  %v4193_v59 = vpop.f32.mrf.mxu1 }
 0x3e3   : > { %3551 = vrot.lane.b32.xlu0 %v11912_v17, %s10205_s17 }
 0x3e6   : > { %3310 = vrot.lane.b32.xlu1 %v12097_v16, %s10205_s17 }
 0x3e7   : > { %3553 = vrot.lane.b32.xlu0 %v12009_v57, %s10205_s17 }
 0x3ea   : > { %3312 = vrot.lane.b32.xlu1 %v12160_v32, %s10205_s17 }
 0x3eb   : > { %3555 = vrot.lane.b32.xlu0 %v11995_v7, %s10205_s17  ;;  %v3073_v9 = vpop.permute.xlu0 %3072 }
 0x3ec   : > { %v2820_v55 = vpop.permute.xlu1 %2819  ;;  %3142 = vst.msk [vmem:[#allocation5 + $0x758] sm:$0xff] %vm2859_vm14, %v3073_v9 }
 0x3ed   : > { %2888 = vst.msk [vmem:[#allocation5 + $0x7e0] sm:$0xff] %vm2859_vm14, %v2820_v55 }
 0x3ee   : > { %3314 = vrot.lane.b32.xlu1 %v12147_v0, %s10205_s17  ;;  %v3860_v0 = vld [vmem:[#allocation5 + $0x798] sm:$0xff] }
 0x3ef   : > { %3557 = vrot.lane.b32.xlu0 %v12064_v8, %s10205_s17  ;;  %v3075_v17 = vpop.permute.xlu0 %3074 }
 0x3f0   : > { %v2822_v57 = vpop.permute.xlu1 %2821  ;;  %3143 = vst.msk [vmem:[#allocation5 + $0x7a0] sm:$0xff] %vm2859_vm14, %v3075_v17 }
 0x3f1   : > { %2889 = vst.msk [vmem:[#allocation5 + $0x828] sm:$0xff] %vm2859_vm14, %v2822_v57 }
 0x3f2   : > { %3316 = vrot.lane.b32.xlu1 %v12206_v45, %s10205_s17 }
 0x3f3   : > { %3559 = vrot.lane.b32.xlu0 %v12051_v1, %s10205_s17  ;;  %v3856_v7 = vld [vmem:[#allocation5 + $0x758] sm:$0xff] }
 0x3f4   : > { %4254 = vmatprep.mubr.f32.mxu1 %v3856_v7  ;;  %v12657_v16 = vpop.f32.mrf.mxu1  ;;  %v3865_v45 = vld [vmem:[#allocation5 + $0x7e0] sm:$0xff] }
 0x3f5   : > { %4255 = vmatmul.mubr.f32.gmra.mxu1 %v3855_v62  ;;  %v3500_v62 = vld [vmem:[#allocation3 + $0x1a1] sm:$0xff] }
 0x3f6   : > { %3318 = vrot.lane.b32.xlu1 %v12193_v36, %s10205_s17  ;;  %v4198_v8 = vpop.f32.mrf.mxu1 }
 0x3f7   : > { %3561 = vrot.lane.b32.xlu0 %v12112_v29, %s10205_s17  ;;  %v3861_v2 = vld [vmem:[#allocation5 + $0x7a0] sm:$0xff] }
 0x3f8   : > { %4259 = vmatprep.mubr.f32.mxu1 %v3861_v2  ;;  %v12663_v1 = vpop.f32.mrf.mxu1 }
 0x3f9   : > { %4260 = vmatmul.mubr.f32.gmra.mxu1 %v3860_v0 }
 0x3fa   : > { %3320 = vrot.lane.b32.xlu1 %v12245_v38, %s10205_s17  ;;  %v4203_v32 = vpop.f32.mrf.mxu1 }
 0x3fb   : > { %3563 = vrot.lane.b32.xlu0 %v12099_v37, %s10205_s17 }
 0x3fe   : > { %3322 = vrot.lane.b32.xlu1 %v12229_v43, %s10205_s17 }
 0x3ff   : > { %3565 = vrot.lane.b32.xlu0 %v12166_v31, %s10205_s17 }
 0x402   : > { %3324 = vrot.lane.b32.xlu1 %v12290_v22, %s10205_s17 }
 0x403   : > { %3567 = vrot.lane.b32.xlu0 %v12149_v51, %s10205_s17 }
 0x406   : > { %3326 = vrot.lane.b32.xlu1 %v12274_v40, %s10205_s17 }
 0x407   : > { %3569 = vrot.lane.b32.xlu0 %v12198_v15, %s10205_s17 }
 0x40a   : > { %3328 = vrot.lane.b32.xlu1 %v12331_v18, %s10205_s17 }
 0x40b   : > { %3571 = vrot.lane.b32.xlu0 %v12214_v23, %s10205_s17  ;;  %v3077_v37 = vpop.permute.xlu0 %3076 }
 0x40c   : > { %v2824_v29 = vpop.permute.xlu1 %2823  ;;  %3144 = vst.msk [vmem:[#allocation5 + $0x7e8] sm:$0xff] %vm2859_vm14, %v3077_v37  ;;  %v3734_v37 = vld [vmem:[#allocation5 + $0x68] sm:$0xff] }
 0x40d   : > { %2890 = vst.msk [vmem:[#allocation5 + $0x870] sm:$0xff] %vm2859_vm14, %v2824_v29 }
 0x40e   : > { %3330 = vrot.lane.b32.xlu1 %v12314_v25, %s10205_s17  ;;  %v15009_v25 = vld [vmem:[#allocation15_spill] sm:$0xff] }
 0x40f   : > { %3573 = vrot.lane.b32.xlu0 %v12234_v34, %s10205_s17  ;;  %v3079_v51 = vpop.permute.xlu0 %3078 }
 0x410   : > { %v2826_v31 = vpop.permute.xlu1 %2825  ;;  %3145 = vst.msk [vmem:[#allocation5 + $0x830] sm:$0xff] %vm2859_vm14, %v3079_v51  ;;  %v3739_v51 = vld [vmem:[#allocation5 + $0xb0] sm:$0xff] }
 0x411   : > { %2891 = vst.msk [vmem:[#allocation5 + $0x8b8] sm:$0xff] %vm2859_vm14, %v2826_v31 }
 0x412   : > { %3332 = vrot.lane.b32.xlu1 %v12431_v14, %s10205_s17 }
 0x413   : > { %3575 = vrot.lane.b32.xlu0 %v12253_v21, %s10205_s17  ;;  %v3866_v15 = vld [vmem:[#allocation5 + $0x7e8] sm:$0xff] }
 0x414   : > { %v3277_v36 = vpop.permute.xlu1 %3276  ;;  %4264 = vmatprep.mubr.f32.mxu1 %v3866_v15  ;;  %v12698_v23 = vpop.f32.mrf.mxu1  ;;  %v3870_v21 = vld [vmem:[#allocation5 + $0x828] sm:$0xff]  ;;  %v3875_v10 = vld [vmem:[#allocation5 + $0x870] sm:$0xff] }
 0x415   : > { %3372 = vst.msk [vmem:[#allocation5 + $0x10] sm:$0xff] %vm2859_vm14, %v3277_v36  ;;  %4265 = vmatmul.mubr.f32.gmra.mxu1 %v3865_v45 }
 0x416   : > { %3334 = vrot.lane.b32.xlu1 %v12413_v13, %s10205_s17  ;;  %v4208_v34 = vpop.f32.mrf.mxu1  ;;  %v15010_v13 = vld [vmem:[#allocation16_spill] sm:$0xff] }
 0x417   : > { %3577 = vrot.lane.b32.xlu0 %v12279_v50, %s10205_s17  ;;  %v3871_v38 = vld [vmem:[#allocation5 + $0x830] sm:$0xff] }
 0x418   : > { %v3279_v43 = vpop.permute.xlu1 %3278  ;;  %4269 = vmatprep.mubr.f32.mxu1 %v3871_v38  ;;  %v12705_v40 = vpop.f32.mrf.mxu1  ;;  %v3880_v17 = vld [vmem:[#allocation5 + $0x8b8] sm:$0xff]  ;;  %v3749_v38 = vld [vmem:[#allocation5 + $0x140] sm:$0xff] }
 0x419   : > { %3373 = vst.msk [vmem:[#allocation5 + $0x58] sm:$0xff] %vm2859_vm14, %v3279_v43  ;;  %4270 = vmatmul.mubr.f32.gmra.mxu1 %v3870_v21  ;;  %v3744_v43 = vld [vmem:[#allocation5 + $0xf8] sm:$0xff] }
 0x41a   : > { %3336 = vrot.lane.b32.xlu1 %v12538_v27, %s10205_s17  ;;  %v4213_v50 = vpop.f32.mrf.mxu1  ;;  %v3435_v27 = vld [vmem:[#allocation3 + $0x198] sm:$0xff] }
 0x41b   : > { %3579 = vrot.lane.b32.xlu0 %v12298_v44, %s10205_s17  ;;  %v15011_v44 = vld [vmem:[#allocation17_spill] sm:$0xff]  ;;  %3467 = vst.msk [vmem:[#allocation5 + $0x888] sm:$0xff] %vm417_vm3, %v3435_v27 }
 0x41c   : > { %v3281_v22 = vpop.permute.xlu1 %3280  ;;  %v3727_v0 = vld [vmem:[#allocation5 + $0x10] sm:$0xff] }
 0x41d   : > { %3374 = vst.msk [vmem:[#allocation5 + $0xa0] sm:$0xff] %vm2859_vm14, %v3281_v22 }
 0x41e   : > { %3338 = vrot.lane.b32.xlu1 %v12527_v24, %s10205_s17 }
 0x41f   : > { %3581 = vrot.lane.b32.xlu0 %v15009_v25, %s10205_s17  ;;  %v3754_v25 = vld [vmem:[#allocation5 + $0x188] sm:$0xff] }
 0x420   : > { %v3283_v18 = vpop.permute.xlu1 %3282  ;;  %v3732_v45 = vld [vmem:[#allocation5 + $0x58] sm:$0xff] }
 0x421   : > { %3375 = vst.msk [vmem:[#allocation5 + $0xe8] sm:$0xff] %vm2859_vm14, %v3283_v18 }
 0x423   : > { %3583 = vrot.lane.b32.xlu0 %v15010_v13, %s10205_s17  ;;  %v3759_v13 = vld [vmem:[#allocation5 + $0x1d0] sm:$0xff] }
 0x424   : > { %v3285_v14 = vpop.permute.xlu1 %3284  ;;  %v3737_v50 = vld [vmem:[#allocation5 + $0xa0] sm:$0xff] }
 0x425   : > { %3376 = vst.msk [vmem:[#allocation5 + $0x130] sm:$0xff] %vm2859_vm14, %v3285_v14 }
 0x427   : > { %3585 = vrot.lane.b32.xlu0 %v15011_v44, %s10205_s17 }
 0x428   : > { %v3287_v12 = vpop.permute.xlu1 %3286  ;;  %v3742_v27 = vld [vmem:[#allocation5 + $0xe8] sm:$0xff] }
 0x429   : > { %3377 = vst.msk [vmem:[#allocation5 + $0x178] sm:$0xff] %vm2859_vm14, %v3287_v12  ;;  %v3081_v24 = vpop.permute.xlu0 %3080  ;;  %v3764_v12 = vld [vmem:[#allocation5 + $0x218] sm:$0xff] }
 0x42a   : > { %3146 = vst.msk [vmem:[#allocation5 + $0x878] sm:$0xff] %vm2859_vm14, %v3081_v24 }
 0x42b   : > { %3587 = vrot.lane.b32.xlu0 %v15012_v5, %s10205_s17 }
 0x42c   : > { %v3289_v20 = vpop.permute.xlu1 %3288  ;;  %v3747_v53 = vld [vmem:[#allocation5 + $0x130] sm:$0xff] }
 0x42d   : > { %3378 = vst.msk [vmem:[#allocation5 + $0x1c0] sm:$0xff] %vm2859_vm14, %v3289_v20  ;;  %v3083_v52 = vpop.permute.xlu0 %3082  ;;  %v3774_v20 = vld [vmem:[#allocation5 + $0x2a8] sm:$0xff] }
 0x42e   : > { %3147 = vst.msk [vmem:[#allocation5 + $0x8c0] sm:$0xff] %vm2859_vm14, %v3083_v52 }
 0x42f   : > { %3589 = vrot.lane.b32.xlu0 %v12544_v4, %s10205_s17 }
 0x430   : > { %v3291_v33 = vpop.permute.xlu1 %3290 }
 0x431   : > { %3379 = vst.msk [vmem:[#allocation5 + $0x208] sm:$0xff] %vm2859_vm14, %v3291_v33  ;;  %v3534_v56 = vpop.permute.xlu0 %3533  ;;  %v3876_v49 = vld [vmem:[#allocation5 + $0x878] sm:$0xff]  ;;  %v3779_v33 = vld [vmem:[#allocation5 + $0x2f0] sm:$0xff] }
 0x432   : > { %3629 = vst.msk [vmem:[#allocation5 + $0x18] sm:$0xff] %vm2859_vm14, %v3534_v56  ;;  %4274 = vmatprep.mubr.f32.mxu1 %v3876_v49 }
 0x433   : > { %3591 = vrot.lane.b32.xlu0 %v12529_v3, %s10205_s17  ;;  %4275 = vmatmul.mubr.f32.gmra.mxu1 %v3875_v10  ;;  %v3729_v3 = vld [vmem:[#allocation5 + $0x20] sm:$0xff]  ;;  %v3752_v10 = vld [vmem:[#allocation5 + $0x178] sm:$0xff] }
 0x434   : > { %v3293_v4 = vpop.permute.xlu1 %3292  ;;  %v12744_v55 = vpop.f32.mrf.mxu1 }
 0x435   : > { %3380 = vst.msk [vmem:[#allocation5 + $0x250] sm:$0xff] %vm2859_vm14, %v3293_v4  ;;  %v3536_v59 = vpop.permute.xlu0 %3535  ;;  %v3881_v9 = vld [vmem:[#allocation5 + $0x8c0] sm:$0xff]  ;;  %v3784_v4 = vld [vmem:[#allocation5 + $0x338] sm:$0xff] }
 0x436   : > { %3630 = vst.msk [vmem:[#allocation5 + $0x60] sm:$0xff] %vm2859_vm14, %v3536_v59  ;;  %4279 = vmatprep.mubr.f32.mxu1 %v3881_v9  ;;  %v4218_v7 = vpop.f32.mrf.mxu1  ;;  %v3789_v59 = vld [vmem:[#allocation5 + $0x380] sm:$0xff] }
 0x437   : > { %3593 = vrot.lane.b32.xlu0 %v3499_v41, %s10205_s17  ;;  %4280 = vmatmul.mubr.f32.gmra.mxu1 %v3880_v17 }
 0x438   : > { %v3295_v57 = vpop.permute.xlu1 %3294  ;;  %9620 = vmatprep.mubr.msk.f32.mxu1 %vm417_vm3, %v3729_v3  ;;  %v3757_v3 = vld [vmem:[#allocation5 + $0x1c0] sm:$0xff] }
 0x439   : > { %3381 = vst.msk [vmem:[#allocation5 + $0x298] sm:$0xff] %vm2859_vm14, %v3295_v57  ;;  %v3538_v8 = vpop.permute.xlu0 %3537  ;;  %v3728_v2 = vld [vmem:[#allocation5 + $0x18] sm:$0xff]  ;;  %v12750_v32 = vpop.f32.mrf.mxu1  ;;  %v3794_v57 = vld [vmem:[#allocation5 + $0x3c8] sm:$0xff] }
 0x43a   : > { %3631 = vst.msk [vmem:[#allocation5 + $0xa8] sm:$0xff] %vm2859_vm14, %v3538_v8  ;;  %4349 = vmatprep.mubr.f32.mxu0 %v3728_v2 }
 0x43b   : > { %3595 = vrot.lane.b32.xlu0 %v3500_v62, %s10205_s17  ;;  %4350 = vmatmul.mubr.f32.vlgmr.msra.gmra.mxu0 %v3727_v0  ;;  %v4223_v31 = vpop.f32.mrf.mxu1  ;;  %v3799_v62 = vld [vmem:[#allocation5 + $0x410] sm:$0xff] }
 0x43c   : > { %9621 = vmatmul.mubr.msk.f32.vlgmr.msra.gmra.mxu1 %vm417_vm3, %v3734_v37  ;;  %v3297_v29 = vpop.permute.xlu1 %3296  ;;  %v3762_v37 = vld [vmem:[#allocation5 + $0x208] sm:$0xff] }
 0x43d   : > { %3382 = vst.msk [vmem:[#allocation5 + $0x2e0] sm:$0xff] %vm2859_vm14, %v3297_v29  ;;  %9623 = vmatprep.mubr.msk.f32.mxu1 %vm417_vm3, %v3739_v51  ;;  %v3540_v36 = vpop.permute.xlu0 %3539  ;;  %v3733_v15 = vld [vmem:[#allocation5 + $0x60] sm:$0xff]  ;;  %v3804_v29 = vld [vmem:[#allocation5 + $0x458] sm:$0xff] }
 0x43e   : > { %3632 = vst.msk [vmem:[#allocation5 + $0xf0] sm:$0xff] %vm2859_vm14, %v3540_v36  ;;  %4354 = vmatprep.mubr.f32.mxu0 %v3733_v15  ;;  %v3809_v36 = vld [vmem:[#allocation5 + $0x4a0] sm:$0xff] }
 0x43f   : > { %4355 = vmatmul.mubr.f32.gmra.mxu0 %v3732_v45 }
 0x440   : > { %9624 = vmatmul.mubr.msk.f32.gmra.mxu1 %vm417_vm3, %v3744_v43  ;;  %v3299_v34 = vpop.permute.xlu1 %3298  ;;  %v3767_v43 = vld [vmem:[#allocation5 + $0x250] sm:$0xff] }
 0x441   : > { %3383 = vst.msk [vmem:[#allocation5 + $0x328] sm:$0xff] %vm2859_vm14, %v3299_v34  ;;  %9626 = vmatprep.mubr.msk.f32.mxu1 %vm417_vm3, %v3749_v38  ;;  %v3542_v21 = vpop.permute.xlu0 %3541  ;;  %v3738_v22 = vld [vmem:[#allocation5 + $0xa8] sm:$0xff] }
 0x442   : > { %3633 = vst.msk [vmem:[#allocation5 + $0x138] sm:$0xff] %vm2859_vm14, %v3542_v21  ;;  %4359 = vmatprep.mubr.f32.mxu0 %v3738_v22  ;;  %v3814_v38 = vld [vmem:[#allocation5 + $0x4e8] sm:$0xff]  ;;  %v3819_v22 = vld [vmem:[#allocation5 + $0x530] sm:$0xff] }
 0x443   : > { %4360 = vmatmul.mubr.f32.gmra.mxu0 %v3737_v50 }
 0x444   : > { %9627 = vmatmul.mubr.msk.f32.gmra.mxu1 %vm417_vm3, %v3754_v25  ;;  %v3301_v18 = vpop.permute.xlu1 %3300 }
 0x445   : > { %3384 = vst.msk [vmem:[#allocation5 + $0x370] sm:$0xff] %vm2859_vm14, %v3301_v18  ;;  %9629 = vmatprep.mubr.msk.f32.mxu1 %vm417_vm3, %v3759_v13  ;;  %v3544_v14 = vpop.permute.xlu0 %3543  ;;  %v3743_v44 = vld [vmem:[#allocation5 + $0xf0] sm:$0xff]  ;;  %v3772_v13 = vld [vmem:[#allocation5 + $0x298] sm:$0xff] }
 0x446   : > { %3634 = vst.msk [vmem:[#allocation5 + $0x180] sm:$0xff] %vm2859_vm14, %v3544_v14  ;;  %4364 = vmatprep.mubr.f32.mxu0 %v3743_v44  ;;  %v3824_v14 = vld [vmem:[#allocation5 + $0x578] sm:$0xff] }
 0x447   : > { %4365 = vmatmul.mubr.f32.gmra.mxu0 %v3742_v27  ;;  %v3829_v27 = vld [vmem:[#allocation5 + $0x5c0] sm:$0xff] }
 0x448   : > { %9630 = vmatmul.mubr.msk.f32.gmra.mxu1 %vm417_vm3, %v3764_v12  ;;  %v3303_v24 = vpop.permute.xlu1 %3302 }
 0x449   : > { %3385 = vst.msk [vmem:[#allocation5 + $0x3b8] sm:$0xff] %vm2859_vm14, %v3303_v24  ;;  %9632 = vmatprep.mubr.msk.f32.mxu1 %vm417_vm3, %v3769_v63  ;;  %v3546_v5 = vpop.permute.xlu0 %3545  ;;  %v3748_v11 = vld [vmem:[#allocation5 + $0x138] sm:$0xff]  ;;  %v3777_v63 = vld [vmem:[#allocation5 + $0x2e0] sm:$0xff] }
 0x44a   : > { %3635 = vst.msk [vmem:[#allocation5 + $0x1c8] sm:$0xff] %vm2859_vm14, %v3546_v5  ;;  %4369 = vmatprep.mubr.f32.mxu0 %v3748_v11  ;;  %v3834_v5 = vld [vmem:[#allocation5 + $0x608] sm:$0xff] }
 0x44b   : > { %4370 = vmatmul.mubr.f32.gmra.mxu0 %v3747_v53  ;;  %v3839_v53 = vld [vmem:[#allocation5 + $0x650] sm:$0xff] }
 0x44c   : > { %9633 = vmatmul.mubr.msk.f32.gmra.mxu1 %vm417_vm3, %v3774_v20  ;;  %v3305_v52 = vpop.permute.xlu1 %3304 }
 0x44d   : > { %3386 = vst.msk [vmem:[#allocation5 + $0x400] sm:$0xff] %vm2859_vm14, %v3305_v52  ;;  %9635 = vmatprep.mubr.msk.f32.mxu1 %vm417_vm3, %v3779_v33  ;;  %v3548_v56 = vpop.permute.xlu0 %3547  ;;  %v3753_v49 = vld [vmem:[#allocation5 + $0x180] sm:$0xff]  ;;  %v3782_v33 = vld [vmem:[#allocation5 + $0x328] sm:$0xff] }
 0x44e   : > { %3636 = vst.msk [vmem:[#allocation5 + $0x210] sm:$0xff] %vm2859_vm14, %v3548_v56  ;;  %4374 = vmatprep.mubr.f32.mxu0 %v3753_v49  ;;  %v3844_v56 = vld [vmem:[#allocation5 + $0x698] sm:$0xff] }
 0x44f   : > { %4375 = vmatmul.mubr.f32.gmra.mxu0 %v3752_v10  ;;  %v3849_v10 = vld [vmem:[#allocation5 + $0x6e0] sm:$0xff] }
 0x450   : > { %9636 = vmatmul.mubr.msk.f32.gmra.mxu1 %vm417_vm3, %v3784_v4  ;;  %v3307_v41 = vpop.permute.xlu1 %3306 }
 0x451   : > { %3387 = vst.msk [vmem:[#allocation5 + $0x448] sm:$0xff] %vm2859_vm14, %v3307_v41  ;;  %9638 = vmatprep.mubr.msk.f32.mxu1 %vm417_vm3, %v3789_v59  ;;  %v3550_v9 = vpop.permute.xlu0 %3549  ;;  %v3758_v17 = vld [vmem:[#allocation5 + $0x1c8] sm:$0xff]  ;;  %v3787_v59 = vld [vmem:[#allocation5 + $0x370] sm:$0xff] }
 0x452   : > { %3637 = vst.msk [vmem:[#allocation5 + $0x258] sm:$0xff] %vm2859_vm14, %v3550_v9  ;;  %4379 = vmatprep.mubr.f32.mxu0 %v3758_v17  ;;  %v3854_v9 = vld [vmem:[#allocation5 + $0x728] sm:$0xff] }
 0x453   : > { %4380 = vmatmul.mubr.f32.gmra.mxu0 %v3757_v3  ;;  %v3859_v3 = vld [vmem:[#allocation5 + $0x770] sm:$0xff] }
 0x454   : > { %9639 = vmatmul.mubr.msk.f32.gmra.mxu1 %vm417_vm3, %v3794_v57  ;;  %v3309_v7 = vpop.permute.xlu1 %3308  ;;  %v12781_v0 = vpop.f32.mrf.mxu1 }
 0x455   : > { %3388 = vst.msk [vmem:[#allocation5 + $0x490] sm:$0xff] %vm2859_vm14, %v3309_v7  ;;  %9641 = vmatprep.mubr.msk.f32.mxu1 %vm417_vm3, %v3799_v62  ;;  %v3552_v8 = vpop.permute.xlu0 %3551  ;;  %v3763_v2 = vld [vmem:[#allocation5 + $0x210] sm:$0xff]  ;;  %v3792_v62 = vld [vmem:[#allocation5 + $0x3b8] sm:$0xff] }
 0x456   : > { %3638 = vst.msk [vmem:[#allocation5 + $0x2a0] sm:$0xff] %vm2859_vm14, %v3552_v8  ;;  %4384 = vmatprep.mubr.f32.mxu0 %v3763_v2  ;;  %v4228_v31 = vpop.f32.mrf.mxu1  ;;  %v3864_v8 = vld [vmem:[#allocation5 + $0x7b8] sm:$0xff] }
 0x457   : > { %4385 = vmatmul.mubr.f32.gmra.mxu0 %v3762_v37  ;;  %v3869_v37 = vld [vmem:[#allocation5 + $0x800] sm:$0xff] }
 0x458   : > { %9642 = vmatmul.mubr.msk.f32.gmra.mxu1 %vm417_vm3, %v3804_v29  ;;  %v3311_v51 = vpop.permute.xlu1 %3310  ;;  %v3797_v31 = vld [vmem:[#allocation5 + $0x400] sm:$0xff] }
 0x459   : > { %3389 = vst.msk [vmem:[#allocation5 + $0x4d8] sm:$0xff] %vm2859_vm14, %v3311_v51  ;;  %9644 = vmatprep.mubr.msk.f32.mxu1 %vm417_vm3, %v3809_v36  ;;  %v3554_v15 = vpop.permute.xlu0 %3553  ;;  %v3768_v45 = vld [vmem:[#allocation5 + $0x258] sm:$0xff]  ;;  %v12787_v34 = vpop.f32.mrf.mxu1  ;;  %v3874_v36 = vld [vmem:[#allocation5 + $0x848] sm:$0xff] }
 0x45a   : > { %3639 = vst.msk [vmem:[#allocation5 + $0x2e8] sm:$0xff] %vm2859_vm14, %v3554_v15  ;;  %4389 = vmatprep.mubr.f32.mxu0 %v3768_v45 }
 0x45b   : > { %4390 = vmatmul.mubr.f32.gmra.mxu0 %v3767_v43  ;;  %v4233_v50 = vpop.f32.mrf.mxu1 }
 0x45c   : > { %9645 = vmatmul.mubr.msk.f32.gmra.mxu1 %vm417_vm3, %v3814_v38  ;;  %v3313_v21 = vpop.permute.xlu1 %3312 }
 0x45d   : > { %3390 = vst.msk [vmem:[#allocation5 + $0x520] sm:$0xff] %vm2859_vm14, %v3313_v21  ;;  %9647 = vmatprep.mubr.msk.f32.mxu1 %vm417_vm3, %v3819_v22  ;;  %v3556_v25 = vpop.permute.xlu0 %3555  ;;  %v3773_v18 = vld [vmem:[#allocation5 + $0x2a0] sm:$0xff]  ;;  %v3802_v21 = vld [vmem:[#allocation5 + $0x448] sm:$0xff] }
 0x45e   : > { %3640 = vst.msk [vmem:[#allocation5 + $0x330] sm:$0xff] %vm2859_vm14, %v3556_v25  ;;  %4394 = vmatprep.mubr.f32.mxu0 %v3773_v18 }
 0x45f   : > { %4395 = vmatmul.mubr.f32.gmra.mxu0 %v3772_v13 }
 0x460   : > { %9648 = vmatmul.mubr.msk.f32.gmra.mxu1 %vm417_vm3, %v3824_v14  ;;  %v3315_v44 = vpop.permute.xlu1 %3314 }
 0x461   : > { %3391 = vst.msk [vmem:[#allocation5 + $0x568] sm:$0xff] %vm2859_vm14, %v3315_v44  ;;  %9650 = vmatprep.mubr.msk.f32.mxu1 %vm417_vm3, %v3829_v27  ;;  %v3558_v12 = vpop.permute.xlu0 %3557  ;;  %v3778_v24 = vld [vmem:[#allocation5 + $0x2e8] sm:$0xff] }
 0x462   : > { %3641 = vst.msk [vmem:[#allocation5 + $0x378] sm:$0xff] %vm2859_vm14, %v3558_v12  ;;  %4399 = vmatprep.mubr.f32.mxu0 %v3778_v24 }
 0x463   : > { %4400 = vmatmul.mubr.f32.gmra.mxu0 %v3777_v63 }
 0x464   : > { %9651 = vmatmul.mubr.msk.f32.gmra.mxu1 %vm417_vm3, %v3834_v5  ;;  %v3317_v11 = vpop.permute.xlu1 %3316 }
 0x465   : > { %3392 = vst.msk [vmem:[#allocation5 + $0x5b0] sm:$0xff] %vm2859_vm14, %v3317_v11  ;;  %9653 = vmatprep.mubr.msk.f32.mxu1 %vm417_vm3, %v3839_v53  ;;  %v3560_v20 = vpop.permute.xlu0 %3559  ;;  %v3783_v52 = vld [vmem:[#allocation5 + $0x330] sm:$0xff]  ;;  %v3817_v11 = vld [vmem:[#allocation5 + $0x520] sm:$0xff] }
 0x466   : > { %3642 = vst.msk [vmem:[#allocation5 + $0x3c0] sm:$0xff] %vm2859_vm14, %v3560_v20  ;;  %4404 = vmatprep.mubr.f32.mxu0 %v3783_v52  ;;  %v4863_v20 = vld [vmem:[#allocation3 + $0x1] sm:$0xff] }
 0x467   : > { %4405 = vmatmul.mubr.f32.gmra.mxu0 %v3782_v33  ;;  %4927 = vrot.lane.b32.xlu1 %v4863_v20, %s10205_s17 }
 0x468   : > { %9654 = vmatmul.mubr.msk.f32.gmra.mxu1 %vm417_vm3, %v3844_v56  ;;  %v3319_v49 = vpop.permute.xlu1 %3318  ;;  %v3822_v56 = vld [vmem:[#allocation5 + $0x568] sm:$0xff] }
 0x469   : > { %3393 = vst.msk [vmem:[#allocation5 + $0x5f8] sm:$0xff] %vm2859_vm14, %v3319_v49  ;;  %9656 = vmatprep.mubr.msk.f32.mxu1 %vm417_vm3, %v3849_v10  ;;  %v3562_v4 = vpop.permute.xlu0 %3561  ;;  %v3788_v41 = vld [vmem:[#allocation5 + $0x378] sm:$0xff]  ;;  %v4864_v10 = vld [vmem:[#allocation3 + $0x9] sm:$0xff] }
 0x46a   : > { %3643 = vst.msk [vmem:[#allocation5 + $0x408] sm:$0xff] %vm2859_vm14, %v3562_v4  ;;  %4409 = vmatprep.mubr.f32.mxu0 %v3788_v41 }
 0x46b   : > { %4410 = vmatmul.mubr.f32.gmra.mxu0 %v3787_v59  ;;  %4929 = vrot.lane.b32.xlu1 %v4864_v10, %s10205_s17 }
 0x46c   : > { %9657 = vmatmul.mubr.msk.f32.gmra.mxu1 %vm417_vm3, %v3854_v9  ;;  %v3321_v17 = vpop.permute.xlu1 %3320  ;;  %v3827_v59 = vld [vmem:[#allocation5 + $0x5b0] sm:$0xff]  ;;  %v6062_v9 = vld [vmem:[#allocation6 + $0x78] sm:$0xff] }
 0x46d   : > { %3394 = vst.msk [vmem:[#allocation5 + $0x640] sm:$0xff] %vm2859_vm14, %v3321_v17  ;;  %9659 = vmatprep.mubr.msk.f32.mxu1 %vm417_vm3, %v3859_v3  ;;  %v3564_v57 = vpop.permute.xlu0 %3563  ;;  %v3793_v7 = vld [vmem:[#allocation5 + $0x3c0] sm:$0xff]  ;;  %6223 = vmatpush1.msra.mxu0 %v6062_v9 }
 0x46e   : > { %3644 = vst.msk [vmem:[#allocation5 + $0x450] sm:$0xff] %vm2859_vm14, %v3564_v57  ;;  %4414 = vmatprep.mubr.f32.mxu0 %v3793_v7  ;;  %v12837_v7 = vld [vmem:[#allocation4] sm:$0xff] }
 0x46f   : > { %4415 = vmatmul.mubr.f32.gmra.mxu0 %v3792_v62  ;;  %6224 = vmatprep.subr.mxu0 %v12837_v7 }
 0x470   : > { %9660 = vmatmul.mubr.msk.f32.gmra.mxu1 %vm417_vm3, %v3864_v8  ;;  %v3323_v2 = vpop.permute.xlu1 %3322  ;;  %v3832_v62 = vld [vmem:[#allocation5 + $0x5f8] sm:$0xff]  ;;  %v6061_v8 = vld [vmem:[#allocation6 + $0x70] sm:$0xff] }
 0x471   : > { %3395 = vst.msk [vmem:[#allocation5 + $0x688] sm:$0xff] %vm2859_vm14, %v3323_v2  ;;  %9662 = vmatprep.mubr.msk.f32.mxu1 %vm417_vm3, %v3869_v37  ;;  %v3566_v29 = vpop.permute.xlu0 %3565  ;;  %v3798_v51 = vld [vmem:[#allocation5 + $0x408] sm:$0xff]  ;;  %6225 = vmatpush1.msra.mxu0 %v6061_v8 }
 0x472   : > { %3645 = vst.msk [vmem:[#allocation5 + $0x498] sm:$0xff] %vm2859_vm14, %v3566_v29  ;;  %4419 = vmatprep.mubr.f32.mxu0 %v3798_v51  ;;  %6226 = vmatprep.subr.mxu0 %v12837_v7  ;;  %v6052_v8 = vld [vmem:[#allocation6 + $0x28] sm:$0xff] }
 0x473   : > { %4420 = vmatmul.mubr.f32.gmra.mxu0 %v3797_v31  ;;  %v6060_v31 = vld [vmem:[#allocation6 + $0x68] sm:$0xff] }
 0x474   : > { %9663 = vmatmul.mubr.msk.f32.gmra.mxu1 %vm417_vm3, %v3874_v36  ;;  %v3325_v15 = vpop.permute.xlu1 %3324  ;;  %v3837_v51 = vld [vmem:[#allocation5 + $0x640] sm:$0xff]  ;;  %6227 = vmatpush1.msra.mxu0 %v6060_v31 }
 0x475   : > { %3396 = vst.msk [vmem:[#allocation5 + $0x6d0] sm:$0xff] %vm2859_vm14, %v3325_v15  ;;  %v3568_v45 = vpop.permute.xlu0 %3567  ;;  %v3803_v43 = vld [vmem:[#allocation5 + $0x450] sm:$0xff]  ;;  %9665 = vmatprep.mubr.msk.f32.mxu1 %vm417_vm3, %v12734_v19  ;;  %v12818_v38 = vpop.f32.mrf.mxu1  ;;  %6228 = vmatprep.subr.mxu0 %v12837_v7 }
 0x476   : > { %3646 = vst.msk [vmem:[#allocation5 + $0x4e0] sm:$0xff] %vm2859_vm14, %v3568_v45  ;;  %4424 = vmatprep.mubr.f32.mxu0 %v3803_v43  ;;  %v3807_v19 = vld [vmem:[#allocation5 + $0x490] sm:$0xff] }
 0x477   : > { %4425 = vmatmul.mubr.f32.gmra.mxu0 %v3802_v21  ;;  %v4238_v50 = vpop.f32.mrf.mxu1  ;;  %v6059_v21 = vld [vmem:[#allocation6 + $0x60] sm:$0xff] }
 0x478   : > { %v3327_v22 = vpop.permute.xlu1 %3326  ;;  %9666 = vmatmul.mubr.msk.f32.gmra.mxu1 %vm417_vm3, %v12739_v26  ;;  %v3812_v26 = vld [vmem:[#allocation5 + $0x4d8] sm:$0xff]  ;;  %v3842_v43 = vld [vmem:[#allocation5 + $0x688] sm:$0xff]  ;;  %6229 = vmatpush1.msra.mxu0 %v6059_v21  ;;  %v6049_v21 = vld [vmem:[#allocation6 + $0x10] sm:$0xff] }
 0x479   : > { %3397 = vst.msk [vmem:[#allocation5 + $0x718] sm:$0xff] %vm2859_vm14, %v3327_v22  ;;  %v3570_v25 = vpop.permute.xlu0 %3569  ;;  %v3808_v18 = vld [vmem:[#allocation5 + $0x498] sm:$0xff]  ;;  %6230 = vmatprep.subr.mxu0 %v12837_v7 }
 0x47a   : > { %3647 = vst.msk [vmem:[#allocation5 + $0x528] sm:$0xff] %vm2859_vm14, %v3570_v25  ;;  %4429 = vmatprep.mubr.f32.mxu0 %v3808_v18 }
 0x47b   : > { %v12824_v13 = vpop.f32.mrf.mxu1  ;;  %4430 = vmatmul.mubr.f32.gmra.mxu0 %v3807_v19 }
 0x47c   : > { %v3329_v14 = vpop.permute.xlu1 %3328  ;;  %v3847_v19 = vld [vmem:[#allocation5 + $0x6d0] sm:$0xff] }
 0x47d   : > { %v4243_v44 = vpop.f32.mrf.mxu1  ;;  %3398 = vst.msk [vmem:[#allocation5 + $0x760] sm:$0xff] %vm2859_vm14, %v3329_v14  ;;  %v3572_v27 = vpop.permute.xlu0 %3571  ;;  %v3813_v12 = vld [vmem:[#allocation5 + $0x4e0] sm:$0xff]  ;;  %v6058_v14 = vld [vmem:[#allocation6 + $0x58] sm:$0xff] }
 0x47e   : > { %3648 = vst.msk [vmem:[#allocation5 + $0x570] sm:$0xff] %vm2859_vm14, %v3572_v27  ;;  %4434 = vmatprep.mubr.f32.mxu0 %v3813_v12  ;;  %6231 = vmatpush1.msra.mxu0 %v6058_v14  ;;  %v6076_v14 = vld [vmem:[#allocation6 + $0xe8] sm:$0xff] }
 0x47f   : > { %4435 = vmatmul.mubr.f32.gmra.mxu0 %v3812_v26  ;;  %6232 = vmatprep.subr.mxu0 %v12837_v7 }
 0x480   : > { %v3331_v24 = vpop.permute.xlu1 %3330  ;;  %v3852_v26 = vld [vmem:[#allocation5 + $0x718] sm:$0xff] }
 0x481   : > { %3399 = vst.msk [vmem:[#allocation5 + $0x7a8] sm:$0xff] %vm2859_vm14, %v3331_v24  ;;  %v3574_v63 = vpop.permute.xlu0 %3573  ;;  %v3818_v5 = vld [vmem:[#allocation5 + $0x528] sm:$0xff]  ;;  %v6057_v24 = vld [vmem:[#allocation6 + $0x50] sm:$0xff] }
 0x482   : > { %3649 = vst.msk [vmem:[#allocation5 + $0x5b8] sm:$0xff] %vm2859_vm14, %v3574_v63  ;;  %4439 = vmatprep.mubr.f32.mxu0 %v3818_v5  ;;  %6233 = vmatpush1.msra.mxu0 %v6057_v24  ;;  %v6074_v24 = vld [vmem:[#allocation6 + $0xd8] sm:$0xff] }
 0x483   : > { %4440 = vmatmul.mubr.f32.gmra.mxu0 %v3817_v11  ;;  %6234 = vmatprep.subr.mxu0 %v12837_v7 }
 0x484   : > { %v3333_v53 = vpop.permute.xlu1 %3332  ;;  %v3857_v11 = vld [vmem:[#allocation5 + $0x760] sm:$0xff] }
 0x485   : > { %3400 = vst.msk [vmem:[#allocation5 + $0x7f0] sm:$0xff] %vm2859_vm14, %v3333_v53  ;;  %v3576_v52 = vpop.permute.xlu0 %3575  ;;  %v3823_v33 = vld [vmem:[#allocation5 + $0x570] sm:$0xff]  ;;  %v6056_v53 = vld [vmem:[#allocation6 + $0x48] sm:$0xff] }
 0x486   : > { %3650 = vst.msk [vmem:[#allocation5 + $0x600] sm:$0xff] %vm2859_vm14, %v3576_v52  ;;  %4444 = vmatprep.mubr.f32.mxu0 %v3823_v33  ;;  %6235 = vmatpush1.msra.mxu0 %v6056_v53  ;;  %v6071_v53 = vld [vmem:[#allocation6 + $0xc0] sm:$0xff] }
 0x487   : > { %4445 = vmatmul.mubr.f32.gmra.mxu0 %v3822_v56  ;;  %6236 = vmatprep.subr.mxu0 %v12837_v7  ;;  %v6055_v56 = vld [vmem:[#allocation6 + $0x40] sm:$0xff] }
 0x488   : > { %v3335_v49 = vpop.permute.xlu1 %3334  ;;  %v3862_v33 = vld [vmem:[#allocation5 + $0x7a8] sm:$0xff]  ;;  %6237 = vmatpush1.msra.mxu0 %v6055_v56 }
 0x489   : > { %3401 = vst.msk [vmem:[#allocation5 + $0x838] sm:$0xff] %vm2859_vm14, %v3335_v49  ;;  %v3578_v4 = vpop.permute.xlu0 %3577  ;;  %v3828_v41 = vld [vmem:[#allocation5 + $0x5b8] sm:$0xff]  ;;  %6238 = vmatprep.subr.mxu0 %v12837_v7 }
 0x48a   : > { %3651 = vst.msk [vmem:[#allocation5 + $0x648] sm:$0xff] %vm2859_vm14, %v3578_v4  ;;  %4449 = vmatprep.mubr.f32.mxu0 %v3828_v41  ;;  %v6054_v41 = vld [vmem:[#allocation6 + $0x38] sm:$0xff] }
 0x48b   : > { %4450 = vmatmul.mubr.f32.gmra.mxu0 %v3827_v59 }
 0x48c   : > { %v3337_v17 = vpop.permute.xlu1 %3336  ;;  %v3867_v4 = vld [vmem:[#allocation5 + $0x7f0] sm:$0xff]  ;;  %6239 = vmatpush1.msra.mxu0 %v6054_v41 }
 0x48d   : > { %3402 = vst.msk [vmem:[#allocation5 + $0x880] sm:$0xff] %vm2859_vm14, %v3337_v17  ;;  %v3580_v3 = vpop.permute.xlu0 %3579  ;;  %v3833_v57 = vld [vmem:[#allocation5 + $0x600] sm:$0xff]  ;;  %6240 = vmatprep.subr.mxu0 %v12837_v7  ;;  %v12896_v41 = vld [vmem:[%s14984_s4] ss:$0 sm:$0xff] }
 0x48e   : > { %3652 = vst.msk [vmem:[#allocation5 + $0x690] sm:$0xff] %vm2859_vm14, %v3580_v3  ;;  %4454 = vmatprep.mubr.f32.mxu0 %v3833_v57  ;;  %v6053_v3 = vld [vmem:[#allocation6 + $0x30] sm:$0xff] }
 0x48f   : > { %4455 = vmatmul.mubr.f32.gmra.mxu0 %v3832_v62 }
 0x490   : > { %v3339_v2 = vpop.permute.xlu1 %3338  ;;  %v3872_v17 = vld [vmem:[#allocation5 + $0x838] sm:$0xff]  ;;  %6241 = vmatpush1.msra.mxu0 %v6053_v3  ;;  %v4799_v3 = vld [vmem:[#allocation3] sm:$0xff] }
 0x491   : > { %3403 = vst.msk [vmem:[#allocation5 + $0x8c8] sm:$0xff] %vm2859_vm14, %v3339_v2  ;;  %v3582_v37 = vpop.permute.xlu0 %3581  ;;  %v3838_v29 = vld [vmem:[#allocation5 + $0x648] sm:$0xff]  ;;  %6242 = vmatprep.subr.mxu0 %v12837_v7 }
 0x492   : > { %3653 = vst.msk [vmem:[#allocation5 + $0x6d8] sm:$0xff] %vm2859_vm14, %v3582_v37  ;;  %4459 = vmatprep.mubr.f32.mxu0 %v3838_v29  ;;  %6243 = vmatpush1.msra.mxu0 %v6052_v8 }
 0x493   : > { %4460 = vmatmul.mubr.f32.gmra.mxu0 %v3837_v51  ;;  %6244 = vmatprep.subr.mxu0 %v12837_v7  ;;  %v6051_v51 = vld [vmem:[#allocation6 + $0x20] sm:$0xff]  ;;  %4831 = vst.msk [vmem:[#allocation5] sm:$0xff] %vm417_vm3, %v4799_v3 }
 0x494   : > { %v3877_v62 = vld [vmem:[#allocation5 + $0x880] sm:$0xff]  ;;  %6245 = vmatpush1.msra.mxu0 %v6051_v51  ;;  %v4132_v51 = vadd.f32 %v12896_v41, %v12511_v6 }
 0x495   : > { %v3584_v36 = vpop.permute.xlu0 %3583  ;;  %v3843_v15 = vld [vmem:[#allocation5 + $0x690] sm:$0xff]  ;;  %v12846_v45 = vpop.f32.mrf.mxu1  ;;  %6246 = vmatprep.subr.mxu0 %v12837_v7 }
 0x496   : > { %3654 = vst.msk [vmem:[#allocation5 + $0x720] sm:$0xff] %vm2859_vm14, %v3584_v36  ;;  %4464 = vmatprep.mubr.f32.mxu0 %v3843_v15  ;;  %v6050_v15 = vld [vmem:[#allocation6 + $0x18] sm:$0xff] }
 0x497   : > { %4465 = vmatmul.mubr.f32.gmra.mxu0 %v3842_v43  ;;  %v4248_v22 = vpop.f32.mrf.mxu1 }
 0x498   : > { %v3882_v29 = vld [vmem:[#allocation5 + $0x8c8] sm:$0xff]  ;;  %6247 = vmatpush1.msra.mxu0 %v6050_v15 }
 0x499   : > { %v3586_v50 = vpop.permute.xlu0 %3585  ;;  %v3848_v25 = vld [vmem:[#allocation5 + $0x6d8] sm:$0xff]  ;;  %v12850_v18 = vpop.f32.mrf.mxu1  ;;  %6248 = vmatprep.subr.mxu0 %v12837_v7  ;;  %v6048_v22 = vld [vmem:[#allocation6 + $0x8] sm:$0xff] }
 0x49a   : > { %3655 = vst.msk [vmem:[#allocation5 + $0x768] sm:$0xff] %vm2859_vm14, %v3586_v50  ;;  %4469 = vmatprep.mubr.f32.mxu0 %v3848_v25  ;;  %6249 = vmatpush1.msra.mxu0 %v6049_v21  ;;  %v6047_v50 = vld [vmem:[#allocation6] sm:$0xff]  ;;  %v6078_v25 = vld [vmem:[#allocation6 + $0xf8] sm:$0xff]  ;;  %v4800_v15 = vld [vmem:[#allocation3 + $0x8] sm:$0xff] }
 0x49b   : > { %4470 = vmatmul.mubr.f32.gmra.mxu0 %v3847_v19  ;;  %v4253_v44 = vpop.f32.mrf.mxu1  ;;  %6250 = vmatprep.subr.mxu0 %v12837_v7  ;;  %v6077_v19 = vld [vmem:[#allocation6 + $0xf0] sm:$0xff]  ;;  %4832 = vst.msk [vmem:[#allocation5 + $0x48] sm:$0xff] %vm417_vm3, %v4800_v15 }
 0x49c   : > { %6251 = vmatpush1.msra.mxu0 %v6048_v22 }
 0x49d   : > { %v3588_v27 = vpop.permute.xlu0 %3587  ;;  %v3853_v12 = vld [vmem:[#allocation5 + $0x720] sm:$0xff]  ;;  %6252 = vmatprep.subr.mxu0 %v12837_v7 }
 0x49e   : > { %3656 = vst.msk [vmem:[#allocation5 + $0x7b0] sm:$0xff] %vm2859_vm14, %v3588_v27  ;;  %4474 = vmatprep.mubr.f32.mxu0 %v3853_v12  ;;  %6253 = vmatpush1.msra.mxu0 %v6047_v50  ;;  %v6075_v27 = vld [vmem:[#allocation6 + $0xe0] sm:$0xff] }
 0x49f   : > { %4475 = vmatmul.mubr.f32.gmra.mxu0 %v3852_v26  ;;  %6254 = vmatprep.subr.mxu0 %v12837_v7 }
 0x4a0   : > { %6255 = vmatpush2.msra.mxu0 %v6078_v25  ;;  %v5056_v25 = vld [vmem:[#allocation3 + $0xa] sm:$0xff] }
 0x4a1   : > { %v3590_v63 = vpop.permute.xlu0 %3589  ;;  %v3858_v5 = vld [vmem:[#allocation5 + $0x768] sm:$0xff]  ;;  %6256 = vmatprep.subr.mxu0 %v12837_v7  ;;  %5088 = vst.msk [vmem:[#allocation5 + $0x50] sm:$0xff] %vm417_vm3, %v5056_v25 }
 0x4a2   : > { %3657 = vst.msk [vmem:[#allocation5 + $0x7f8] sm:$0xff] %vm2859_vm14, %v3590_v63  ;;  %4479 = vmatprep.mubr.f32.mxu0 %v3858_v5  ;;  %6257 = vmatpush2.msra.mxu0 %v6077_v19  ;;  %v6073_v5 = vld [vmem:[#allocation6 + $0xd0] sm:$0xff] }
 0x4a3   : > { %4480 = vmatmul.mubr.f32.gmra.mxu0 %v3857_v11  ;;  %6258 = vmatprep.subr.mxu0 %v12837_v7  ;;  %v6072_v11 = vld [vmem:[#allocation6 + $0xc8] sm:$0xff] }
 0x4a4   : > { %6259 = vmatpush2.msra.mxu0 %v6076_v14 }
 0x4a5   : > { %v3592_v20 = vpop.permute.xlu0 %3591  ;;  %v3863_v52 = vld [vmem:[#allocation5 + $0x7b0] sm:$0xff]  ;;  %6260 = vmatprep.subr.mxu0 %v12837_v7 }
 0x4a6   : > { %3658 = vst.msk [vmem:[#allocation5 + $0x840] sm:$0xff] %vm2859_vm14, %v3592_v20  ;;  %4484 = vmatprep.mubr.f32.mxu0 %v3863_v52  ;;  %6261 = vmatpush2.msra.mxu0 %v6075_v27  ;;  %v6070_v20 = vld [vmem:[#allocation6 + $0xb8] sm:$0xff]  ;;  %v6069_v52 = vld [vmem:[#allocation6 + $0xb0] sm:$0xff] }
 0x4a7   : > { %4485 = vmatmul.mubr.f32.gmra.mxu0 %v3862_v33  ;;  %6262 = vmatprep.subr.mxu0 %v12837_v7  ;;  %v6068_v33 = vld [vmem:[#allocation6 + $0xa8] sm:$0xff] }
 0x4a8   : > { %6263 = vmatpush2.msra.mxu0 %v6074_v24 }
 0x4a9   : > { %v3594_v49 = vpop.permute.xlu0 %3593  ;;  %v3868_v10 = vld [vmem:[#allocation5 + $0x7f8] sm:$0xff]  ;;  %6264 = vmatprep.subr.mxu0 %v12837_v7 }
 0x4aa   : > { %3659 = vst.msk [vmem:[#allocation5 + $0x888] sm:$0xff] %vm2859_vm14, %v3594_v49  ;;  %4489 = vmatprep.mubr.f32.mxu0 %v3868_v10  ;;  %6265 = vmatpush2.msra.mxu0 %v6073_v5  ;;  %v6067_v10 = vld [vmem:[#allocation6 + $0xa0] sm:$0xff] }
 0x4ab   : > { %4490 = vmatmul.mubr.f32.gmra.mxu0 %v3867_v4  ;;  %6266 = vmatprep.subr.mxu0 %v12837_v7 }
 0x4ac   : > { %6267 = vmatpush2.msra.mxu0 %v6072_v11 }
 0x4ad   : > { %v3596_v59 = vpop.permute.xlu0 %3595  ;;  %v3873_v9 = vld [vmem:[#allocation5 + $0x840] sm:$0xff]  ;;  %6268 = vmatprep.subr.mxu0 %v12837_v7 }
 0x4ae   : > { %3660 = vst.msk [vmem:[#allocation5 + $0x8d0] sm:$0xff] %vm2859_vm14, %v3596_v59  ;;  %4494 = vmatprep.mubr.f32.mxu0 %v3873_v9  ;;  %6269 = vmatpush2.msra.mxu0 %v6071_v53 }
 0x4af   : > { %4495 = vmatmul.mubr.f32.gmra.mxu0 %v3872_v17  ;;  %6270 = vmatprep.subr.mxu0 %v12837_v7  ;;  %v4127_v17 = vadd.f32 %v12896_v41, %v12494_v28  ;;  %v6064_v28 = vld [vmem:[#allocation6 + $0x88] sm:$0xff] }
 0x4b0   : > { %6271 = vmatpush2.msra.mxu0 %v6070_v20 }
 0x4b1   : > { %v3878_v57 = vld [vmem:[#allocation5 + $0x888] sm:$0xff]  ;;  %6272 = vmatprep.subr.mxu0 %v12837_v7 }
 0x4b2   : > { %4499 = vmatprep.mubr.f32.mxu0 %v3878_v57  ;;  %6273 = vmatpush2.msra.mxu0 %v6069_v52  ;;  %v6066_v57 = vld [vmem:[#allocation6 + $0x98] sm:$0xff] }
 0x4b3   : > { %4500 = vmatmul.mubr.f32.gmra.mxu0 %v3877_v62  ;;  %6274 = vmatprep.subr.mxu0 %v12837_v7 }
 0x4b4   : > { %6275 = vmatpush2.msra.mxu0 %v6068_v33  ;;  %v15013_v33 = vld [vmem:[#allocation19_spill] sm:$0xff] }
 0x4b5   : > { %v3883_v2 = vld [vmem:[#allocation5 + $0x8d0] sm:$0xff]  ;;  %v12864_v37 = vpop.f32.mrf.mxu1  ;;  %6276 = vmatprep.subr.mxu0 %v12837_v7 }
 0x4b6   : > { %4504 = vmatprep.mubr.f32.mxu0 %v3883_v2  ;;  %6277 = vmatpush2.msra.mxu0 %v6067_v10 }
 0x4b7   : > { %4505 = vmatmul.mubr.f32.gmra.mxu0 %v3882_v29  ;;  %v4258_v31 = vpop.f32.mrf.mxu1  ;;  %6278 = vmatprep.subr.mxu0 %v12837_v7 }
 0x4b8   : > { %6279 = vmatpush2.msra.mxu0 %v6066_v57 }
 0x4b9   : > { %v12867_v36 = vpop.f32.mrf.mxu1  ;;  %6280 = vmatprep.subr.mxu0 %v12837_v7 }
 0x4bb   : > { %v4263_v43 = vpop.f32.mrf.mxu1 }
 0x4bc   : > { %v6065_v43 = vld [vmem:[#allocation6 + $0x90] sm:$0xff] }
 0x4bd   : > { %6281 = vmatpush2.msra.mxu0 %v6065_v43  ;;  %v6093_v43 = vld [vmem:[#allocation6 + $0x170] sm:$0xff] }
 0x4be   : > { %6282 = vmatprep.subr.mxu0 %v12837_v7 }
 0x4bf   : > { %6283 = vmatpush2.msra.mxu0 %v6064_v28 }
 0x4c0   : > { %6284 = vmatprep.subr.mxu0 %v12837_v7 }
 0x4d5   : > { %v12876_v44 = vpop.f32.mrf.mxu1 }
 0x4d7   : > { %v4268_v12 = vpop.f32.mrf.mxu1 }
 0x4d8   : > { %v4137_v12 = vadd.f32 %v12896_v41, %v12525_v46 }
 0x4d9   : > { %v12879_v26 = vpop.f32.mrf.mxu1  ;;  %v4928_v9 = vpop.permute.xlu1 %4927 }
 0x4da   : > { %5023 = vst.msk [vmem:[#allocation5] sm:$0xff] %vm2859_vm14, %v4928_v9  ;;  %v6094_v9 = vld [vmem:[#allocation6 + $0x178] sm:$0xff] }
 0x4db   : > { %v4273_v63 = vpop.f32.mrf.mxu1  ;;  %9844 = vmatpush1.msra.mxu1 %v6094_v9 }
 0x4dc   : > { %v6063_v63 = vld [vmem:[#allocation6 + $0x80] sm:$0xff]  ;;  %9813 = vmatprep.subr.mxu1 %v12837_v7 }
 0x4dd   : > { %v4930_v50 = vpop.permute.xlu1 %4929  ;;  %6285 = vmatpush2.msra.mxu0 %v6063_v63  ;;  %9845 = vmatpush1.msra.mxu1 %v6093_v43 }
 0x4de   : > { %5024 = vst.msk [vmem:[#allocation5 + $0x48] sm:$0xff] %vm2859_vm14, %v4930_v50  ;;  %6447 = vmatprep.subr.mxu0 %v12837_v7  ;;  %9814 = vmatprep.subr.mxu1 %v12837_v7 }
 0x4e1   : > { %v12917_v10 = vld [vmem:[#allocation5] sm:$0xff] }
 0x4e2   : > { %6994 = vst [vmem:[#allocation5] sm:$0xff] %v12837_v7 }
 0x4e5   : > { %v12927_v15 = vld [vmem:[#allocation5 + $0x48] sm:$0xff] }
 0x4e6   : > { %6995 = vst [vmem:[#allocation5 + $0x48] sm:$0xff] %v12837_v7 }
 0x4f3   : > { %v12887_v56 = vpop.f32.mrf.mxu1 }
 0x4f5   : > { %v4278_v49 = vpop.f32.mrf.mxu1 }
 0x4f6   : > { %v4142_v49 = vadd.f32 %v12896_v41, %v15013_v33 }
 0x4f7   : > { %v12890_v4 = vpop.f32.mrf.mxu1 }
 0x4f9   : > { %v4283_v59 = vpop.f32.mrf.mxu1 }
 0x4fb   : > { %v4351_v62 = vpop.f32.mrf.mxu0 }
 0x4fc   : > { %v4352_v8 = vadd.f32 %v4351_v62, %v4127_v17  ;;  %v9622_v2 = vpop.f32.mrf.mxu1 }
 0x4fd   : > { %v4353_v29 = vpop.f32.mrf.mxu0 }
 0x4fe   : > { %v4576_v31 = vpop.f32.mrf.mxu1 }
 0x4ff   : > { %v4577_v21 = vadd.f32 %v4576_v31, %v4352_v8  ;;  %v4356_v22 = vpop.f32.mrf.mxu0  ;;  %v4147_v8 = vadd.f32 %v12896_v41, %v12565_v42 }
 0x500   : > { %v4357_v19 = vadd.f32 %v4356_v22, %v4132_v51  ;;  %v9625_v6 = vpop.f32.mrf.mxu1 }
 0x501   : > { %v4735_v14 = vmax.f32 %v4577_v21, 0.0  ;;  %v4358_v27 = vpop.f32.mrf.mxu0 }
 0x502   : > { %v4582_v24 = vadd.f32 %v9622_v2, %v4357_v19  ;;  %v4586_v20 = vpop.f32.mrf.mxu1 }
 0x503   : > { %4767 = vst.msk [vmem:[#allocation3 + $0x19] sm:$0xff] %vm417_vm3, %v4735_v14  ;;  %v4361_v5 = vpop.f32.mrf.mxu0 }
 0x504   : > { %v4736_v11 = vmax.f32 %v4582_v24, 0.0  ;;  %v4362_v53 = vadd.f32 %v4361_v5, %v4137_v12  ;;  %v9628_v57 = vpop.f32.mrf.mxu1 }
 0x505   : > { %v4363_v52 = vpop.f32.mrf.mxu0 }
 0x506   : > { %4768 = vst.msk [vmem:[#allocation3 + $0x21] sm:$0xff] %vm417_vm3, %v4736_v11  ;;  %v4587_v46 = vadd.f32 %v4586_v20, %v4362_v53  ;;  %v4596_v42 = vpop.f32.mrf.mxu1 }
 0x507   : > { %v4366_v59 = vpop.f32.mrf.mxu0 }
 0x508   : > { %v4737_v17 = vmax.f32 %v4587_v46, 0.0  ;;  %v4367_v3 = vadd.f32 %v4366_v59, %v4142_v49  ;;  %v9631_v53 = vpop.f32.mrf.mxu1  ;;  %v4157_v46 = vadd.f32 %v12896_v41, %v12583_v54 }
 0x509   : > { %v4368_v62 = vpop.f32.mrf.mxu0 }
 0x50a   : > { %4769 = vst.msk [vmem:[#allocation3 + $0x31] sm:$0xff] %vm417_vm3, %v4737_v17  ;;  %v4592_v2 = vadd.f32 %v9625_v6, %v4367_v3  ;;  %v5119_v29 = vld [vmem:[#allocation3 + $0x18] sm:$0xff]  ;;  %v4152_v6 = vadd.f32 %v12896_v41, %v12576_v61  ;;  %v6092_v61 = vld [vmem:[#allocation6 + $0x168] sm:$0xff]  ;;  %v6091_v3 = vld [vmem:[#allocation6 + $0x160] sm:$0xff]  ;;  %v4606_v54 = vpop.f32.mrf.mxu1 }
 0x50b   : > { %v4865_v51 = vld [vmem:[#allocation3 + $0x19] sm:$0xff]  ;;  %5183 = vrot.lane.b32.xlu0 %v5119_v29, %s10205_s17  ;;  %v4371_v31 = vpop.f32.mrf.mxu0  ;;  %4833 = vst.msk [vmem:[#allocation5 + $0x90] sm:$0xff] %vm417_vm3, %v5119_v29  ;;  %9846 = vmatpush1.msra.mxu1 %v6092_v61 }
 0x50c   : > { %4931 = vrot.lane.b32.xlu1 %v4865_v51, %s10205_s17  ;;  %v5311_v28 = vld [vmem:[#allocation3 + $0x19] sm:$0xff]  ;;  %v4738_v21 = vmax.f32 %v4592_v2, 0.0  ;;  %v4372_v22 = vadd.f32 %v4371_v31, %v4147_v8  ;;  %9815 = vmatprep.subr.mxu1 %v12837_v7  ;;  %v4162_v31 = vadd.f32 %v12896_v41, %v12589_v58 }
 0x50d   : > { %5343 = vst.msk [vmem:[#allocation5 + $0x10] sm:$0xff] %vm417_vm3, %v5311_v28  ;;  %v4373_v50 = vpop.f32.mrf.mxu0  ;;  %v5120_v25 = vld [vmem:[#allocation3 + $0x20] sm:$0xff]  ;;  %9847 = vmatpush1.msra.mxu1 %v6091_v3 }
 0x50e   : > { %v4866_v19 = vld [vmem:[#allocation3 + $0x21] sm:$0xff]  ;;  %4770 = vst.msk [vmem:[#allocation3 + $0x39] sm:$0xff] %vm417_vm3, %v4738_v21  ;;  %v4597_v27 = vadd.f32 %v4596_v42, %v4372_v22  ;;  %4834 = vst.msk [vmem:[#allocation5 + $0xd8] sm:$0xff] %vm417_vm3, %v5120_v25  ;;  %9816 = vmatprep.subr.mxu1 %v12837_v7  ;;  %v6090_v21 = vld [vmem:[#allocation6 + $0x158] sm:$0xff] }
 0x50f   : > { %v12931_v14 = vld [vmem:[#allocation3 + $0x1a] sm:$0xff]  ;;  %v12940_v12 = vld [vmem:[#allocation3 + $0x22] sm:$0xff]  ;;  %5185 = vrot.lane.b32.xlu0 %v5120_v25, %s10205_s17  ;;  %v4376_v63 = vpop.f32.mrf.mxu0  ;;  %9848 = vmatpush1.msra.mxu1 %v6090_v21 }
 0x510   : > { %5089 = vst.msk [vmem:[#allocation5 + $0x98] sm:$0xff] %vm417_vm3, %v12931_v14  ;;  %v5312_v24 = vld [vmem:[#allocation3 + $0x21] sm:$0xff]  ;;  %4933 = vrot.lane.b32.xlu1 %v4866_v19, %s10205_s17  ;;  %5090 = vst.msk [vmem:[#allocation5 + $0xe0] sm:$0xff] %vm417_vm3, %v12940_v12  ;;  %v4739_v5 = vmax.f32 %v4597_v27, 0.0  ;;  %v4377_v11 = vadd.f32 %v4376_v63, %v4152_v6  ;;  %v9634_v27 = vpop.f32.mrf.mxu1  ;;  %9817 = vmatprep.subr.mxu1 %v12837_v7 }
 0x511   : > { %5344 = vst.msk [vmem:[#allocation5 + $0x58] sm:$0xff] %vm417_vm3, %v5312_v24  ;;  %v4378_v20 = vpop.f32.mrf.mxu0  ;;  %v5121_v52 = vld [vmem:[#allocation3 + $0x30] sm:$0xff] }
 0x512   : > { %v4867_v33 = vld [vmem:[#allocation3 + $0x31] sm:$0xff]  ;;  %4771 = vst.msk [vmem:[#allocation3 + $0x49] sm:$0xff] %vm417_vm3, %v4739_v5  ;;  %v4602_v59 = vadd.f32 %v9628_v57, %v4377_v11  ;;  %4835 = vst.msk [vmem:[#allocation5 + $0x120] sm:$0xff] %vm417_vm3, %v5121_v52  ;;  %v4167_v11 = vadd.f32 %v12896_v41, %v12597_v60  ;;  %v4616_v60 = vpop.f32.mrf.mxu1 }
 0x513   : > { %v5567_v49 = vld [vmem:[#allocation3 + $0x30] sm:$0xff]  ;;  %5187 = vrot.lane.b32.xlu0 %v5121_v52, %s10205_s17  ;;  %v4381_v17 = vpop.f32.mrf.mxu0 }
 0x514   : > { %5599 = vst.msk [vmem:[#allocation5 + $0x18] sm:$0xff] %vm417_vm3, %v5567_v49  ;;  %v5313_v9 = vld [vmem:[#allocation3 + $0x31] sm:$0xff]  ;;  %4935 = vrot.lane.b32.xlu1 %v4867_v33, %s10205_s17  ;;  %v4740_v62 = vmax.f32 %v4602_v59, 0.0  ;;  %v4382_v8 = vadd.f32 %v4381_v17, %v4157_v46 }
 0x515   : > { %5345 = vst.msk [vmem:[#allocation5 + $0xa0] sm:$0xff] %vm417_vm3, %v5313_v9  ;;  %v4383_v2 = vpop.f32.mrf.mxu0  ;;  %v5122_v29 = vld [vmem:[#allocation3 + $0x38] sm:$0xff]  ;;  %v6089_v49 = vld [vmem:[#allocation6 + $0x150] sm:$0xff] }
 0x516   : > { %v4868_v57 = vld [vmem:[#allocation3 + $0x39] sm:$0xff]  ;;  %4772 = vst.msk [vmem:[#allocation3 + $0x51] sm:$0xff] %vm417_vm3, %v4740_v62  ;;  %v4607_v43 = vadd.f32 %v4606_v54, %v4382_v8  ;;  %4836 = vst.msk [vmem:[#allocation5 + $0x168] sm:$0xff] %vm417_vm3, %v5122_v29  ;;  %9849 = vmatpush1.msra.mxu1 %v6089_v49  ;;  %v4172_v62 = vadd.f32 %v12896_v41, %v12605_v39  ;;  %v6088_v39 = vld [vmem:[#allocation6 + $0x148] sm:$0xff] }
 0x517   : > { %v12956_v51 = vld [vmem:[#allocation3 + $0x32] sm:$0xff]  ;;  %v12965_v28 = vld [vmem:[#allocation3 + $0x3a] sm:$0xff]  ;;  %5189 = vrot.lane.b32.xlu0 %v5122_v29, %s10205_s17  ;;  %v4386_v42 = vpop.f32.mrf.mxu0  ;;  %9818 = vmatprep.subr.mxu1 %v12837_v7 }
 0x518   : > { %5091 = vst.msk [vmem:[#allocation5 + $0x128] sm:$0xff] %vm417_vm3, %v12956_v51  ;;  %v5568_v22 = vld [vmem:[#allocation3 + $0x38] sm:$0xff]  ;;  %4937 = vrot.lane.b32.xlu1 %v4868_v57, %s10205_s17  ;;  %5092 = vst.msk [vmem:[#allocation5 + $0x170] sm:$0xff] %vm417_vm3, %v12965_v28  ;;  %v4741_v19 = vmax.f32 %v4607_v43, 0.0  ;;  %v4387_v6 = vadd.f32 %v4386_v42, %v4162_v31  ;;  %9850 = vmatpush1.msra.mxu1 %v6088_v39  ;;  %v9637_v42 = vpop.f32.mrf.mxu1 }
 0x519   : > { %5600 = vst.msk [vmem:[#allocation5 + $0x60] sm:$0xff] %vm417_vm3, %v5568_v22  ;;  %v5314_v58 = vld [vmem:[#allocation3 + $0x39] sm:$0xff]  ;;  %v4388_v24 = vpop.f32.mrf.mxu0  ;;  %v5123_v63 = vld [vmem:[#allocation3 + $0x48] sm:$0xff]  ;;  %9819 = vmatprep.subr.mxu1 %v12837_v7 }
 0x51a   : > { %v5823_v50 = vld [vmem:[#allocation3 + $0x32] sm:$0xff]  ;;  %v5824_v25 = vld [vmem:[#allocation3 + $0x3a] sm:$0xff]  ;;  %5346 = vst.msk [vmem:[#allocation5 + $0xe8] sm:$0xff] %vm417_vm3, %v5314_v58  ;;  %v4869_v61 = vld [vmem:[#allocation3 + $0x49] sm:$0xff]  ;;  %v4612_v20 = vadd.f32 %v9631_v53, %v4387_v6  ;;  %v4177_v6 = vadd.f32 %v12896_v41, %v12611_v30  ;;  %v4626_v30 = vpop.f32.mrf.mxu1 }
 0x51b   : > { %5855 = vst.msk [vmem:[#allocation5 + $0x20] sm:$0xff] %vm417_vm3, %v5823_v50  ;;  %5856 = vst.msk [vmem:[#allocation5 + $0x68] sm:$0xff] %vm417_vm3, %v5824_v25  ;;  %v5569_v5 = vld [vmem:[#allocation3 + $0x48] sm:$0xff]  ;;  %5191 = vrot.lane.b32.xlu0 %v5123_v63, %s10205_s17  ;;  %v4391_v33 = vpop.f32.mrf.mxu0 }
 0x51c   : > { %4773 = vst.msk [vmem:[#allocation3 + $0x61] sm:$0xff] %vm417_vm3, %v4741_v19  ;;  %4837 = vst.msk [vmem:[#allocation5 + $0x1b0] sm:$0xff] %vm417_vm3, %v5123_v63  ;;  %v5315_v52 = vld [vmem:[#allocation3 + $0x49] sm:$0xff]  ;;  %4939 = vrot.lane.b32.xlu1 %v4869_v61, %s10205_s17  ;;  %v4742_v46 = vmax.f32 %v4612_v20, 0.0  ;;  %v4392_v59 = vadd.f32 %v4391_v33, %v4167_v11  ;;  %v9640_v39 = vpop.f32.mrf.mxu1 }
 0x51d   : > { %5601 = vst.msk [vmem:[#allocation5 + $0xa8] sm:$0xff] %vm417_vm3, %v5569_v5  ;;  %5347 = vst.msk [vmem:[#allocation5 + $0x130] sm:$0xff] %vm417_vm3, %v5315_v52  ;;  %v4393_v9 = vpop.f32.mrf.mxu0  ;;  %v5124_v17 = vld [vmem:[#allocation3 + $0x50] sm:$0xff]  ;;  %v6087_v5 = vld [vmem:[#allocation6 + $0x140] sm:$0xff] }
 0x51e   : > { %v4870_v53 = vld [vmem:[#allocation3 + $0x51] sm:$0xff]  ;;  %4774 = vst.msk [vmem:[#allocation3 + $0x69] sm:$0xff] %vm417_vm3, %v4742_v46  ;;  %v4617_v8 = vadd.f32 %v4616_v60, %v4392_v59  ;;  %4838 = vst.msk [vmem:[#allocation5 + $0x1f8] sm:$0xff] %vm417_vm3, %v5124_v17  ;;  %9851 = vmatpush1.msra.mxu1 %v6087_v5  ;;  %v4182_v46 = vadd.f32 %v12896_v41, %v12617_v35 }
 0x51f   : > { %v12984_v3 = vld [vmem:[#allocation3 + $0x4a] sm:$0xff]  ;;  %v12993_v54 = vld [vmem:[#allocation3 + $0x52] sm:$0xff]  ;;  %5193 = vrot.lane.b32.xlu0 %v5124_v17, %s10205_s17  ;;  %v4396_v29 = vpop.f32.mrf.mxu0  ;;  %9820 = vmatprep.subr.mxu1 %v12837_v7 }
 0x520   : > { %5093 = vst.msk [vmem:[#allocation5 + $0x1b8] sm:$0xff] %vm417_vm3, %v12984_v3  ;;  %v5570_v2 = vld [vmem:[#allocation3 + $0x50] sm:$0xff]  ;;  %4941 = vrot.lane.b32.xlu1 %v4870_v53, %s10205_s17  ;;  %5094 = vst.msk [vmem:[#allocation5 + $0x200] sm:$0xff] %vm417_vm3, %v12993_v54  ;;  %v4743_v31 = vmax.f32 %v4617_v8, 0.0  ;;  %v4397_v43 = vadd.f32 %v4396_v29, %v4172_v62  ;;  %v6086_v9 = vld [vmem:[#allocation6 + $0x138] sm:$0xff] }
 0x521   : > { %5602 = vst.msk [vmem:[#allocation5 + $0xf0] sm:$0xff] %vm417_vm3, %v5570_v2  ;;  %v5316_v57 = vld [vmem:[#allocation3 + $0x51] sm:$0xff]  ;;  %v4398_v58 = vpop.f32.mrf.mxu0  ;;  %9852 = vmatpush1.msra.mxu1 %v6086_v9 }
 0x522   : > { %5348 = vst.msk [vmem:[#allocation5 + $0x178] sm:$0xff] %vm417_vm3, %v5316_v57  ;;  %v5825_v21 = vld [vmem:[#allocation3 + $0x4a] sm:$0xff]  ;;  %v5826_v22 = vld [vmem:[#allocation3 + $0x52] sm:$0xff]  ;;  %4775 = vst.msk [vmem:[#allocation3 + $0x79] sm:$0xff] %vm417_vm3, %v4743_v31  ;;  %v4622_v24 = vadd.f32 %v9634_v27, %v4397_v43  ;;  %9821 = vmatprep.subr.mxu1 %v12837_v7 }
 0x523   : > { %v5125_v50 = vld [vmem:[#allocation3 + $0x60] sm:$0xff]  ;;  %5857 = vst.msk [vmem:[#allocation5 + $0xb0] sm:$0xff] %vm417_vm3, %v5825_v21  ;;  %5858 = vst.msk [vmem:[#allocation5 + $0xf8] sm:$0xff] %vm417_vm3, %v5826_v22  ;;  %v4401_v61 = vpop.f32.mrf.mxu0  ;;  %v4187_v22 = vadd.f32 %v12896_v41, %v12623_v47  ;;  %v4636_v47 = vpop.f32.mrf.mxu1 }
 0x524   : > { %v4871_v25 = vld [vmem:[#allocation3 + $0x61] sm:$0xff]  ;;  %4839 = vst.msk [vmem:[#allocation5 + $0x240] sm:$0xff] %vm417_vm3, %v5125_v50  ;;  %5195 = vrot.lane.b32.xlu0 %v5125_v50, %s10205_s17  ;;  %v4744_v11 = vmax.f32 %v4622_v24, 0.0  ;;  %v4402_v20 = vadd.f32 %v4401_v61, %v4177_v6 }
 0x525   : > { %v5571_v19 = vld [vmem:[#allocation3 + $0x60] sm:$0xff]  ;;  %4943 = vrot.lane.b32.xlu1 %v4871_v25, %s10205_s17  ;;  %v4403_v52 = vpop.f32.mrf.mxu0  ;;  %v5126_v33 = vld [vmem:[#allocation3 + $0x68] sm:$0xff] }
 0x526   : > { %5603 = vst.msk [vmem:[#allocation5 + $0x138] sm:$0xff] %vm417_vm3, %v5571_v19  ;;  %v5317_v63 = vld [vmem:[#allocation3 + $0x61] sm:$0xff]  ;;  %v4872_v27 = vld [vmem:[#allocation3 + $0x69] sm:$0xff]  ;;  %4776 = vst.msk [vmem:[#allocation3 + $0x81] sm:$0xff] %vm417_vm3, %v4744_v11  ;;  %v4627_v59 = vadd.f32 %v4626_v30, %v4402_v20  ;;  %v4192_v11 = vadd.f32 %v12896_v41, %v12629_v48 }
 0x527   : > { %5349 = vst.msk [vmem:[#allocation5 + $0x1c0] sm:$0xff] %vm417_vm3, %v5317_v63  ;;  %v13012_v49 = vld [vmem:[#allocation3 + $0x62] sm:$0xff]  ;;  %4840 = vst.msk [vmem:[#allocation5 + $0x288] sm:$0xff] %vm417_vm3, %v5126_v33  ;;  %v13021_v60 = vld [vmem:[#allocation3 + $0x6a] sm:$0xff]  ;;  %v4406_v53 = vpop.f32.mrf.mxu0 }
 0x528   : > { %5095 = vst.msk [vmem:[#allocation5 + $0x248] sm:$0xff] %vm417_vm3, %v13012_v49  ;;  %v5572_v17 = vld [vmem:[#allocation3 + $0x68] sm:$0xff]  ;;  %5197 = vrot.lane.b32.xlu0 %v5126_v33, %s10205_s17  ;;  %5096 = vst.msk [vmem:[#allocation5 + $0x290] sm:$0xff] %vm417_vm3, %v13021_v60  ;;  %v4745_v2 = vmax.f32 %v4627_v59, 0.0  ;;  %v4407_v29 = vadd.f32 %v4406_v53, %v4182_v46  ;;  %v6085_v19 = vld [vmem:[#allocation6 + $0x130] sm:$0xff]  ;;  %v9643_v53 = vpop.f32.mrf.mxu1 }
 0x529   : > { %4945 = vrot.lane.b32.xlu1 %v4872_v27, %s10205_s17  ;;  %5604 = vst.msk [vmem:[#allocation5 + $0x180] sm:$0xff] %vm417_vm3, %v5572_v17  ;;  %v5318_v35 = vld [vmem:[#allocation3 + $0x69] sm:$0xff]  ;;  %v4408_v57 = vpop.f32.mrf.mxu0  ;;  %v5127_v31 = vld [vmem:[#allocation3 + $0x78] sm:$0xff]  ;;  %9853 = vmatpush1.msra.mxu1 %v6085_v19 }
 0x52a   : > { %v5827_v62 = vld [vmem:[#allocation3 + $0x62] sm:$0xff]  ;;  %v5828_v8 = vld [vmem:[#allocation3 + $0x6a] sm:$0xff]  ;;  %5350 = vst.msk [vmem:[#allocation5 + $0x208] sm:$0xff] %vm417_vm3, %v5318_v35  ;;  %v4873_v43 = vld [vmem:[#allocation3 + $0x79] sm:$0xff]  ;;  %v4632_v58 = vadd.f32 %v9637_v42, %v4407_v29  ;;  %9822 = vmatprep.subr.mxu1 %v12837_v7  ;;  %v4197_v29 = vadd.f32 %v12896_v41, %v12657_v16  ;;  %v4646_v16 = vpop.f32.mrf.mxu1 }
 0x52b   : > { %5859 = vst.msk [vmem:[#allocation5 + $0x140] sm:$0xff] %vm417_vm3, %v5827_v62  ;;  %5860 = vst.msk [vmem:[#allocation5 + $0x188] sm:$0xff] %vm417_vm3, %v5828_v8  ;;  %v5573_v21 = vld [vmem:[#allocation3 + $0x78] sm:$0xff]  ;;  %v4411_v25 = vpop.f32.mrf.mxu0  ;;  %v6084_v48 = vld [vmem:[#allocation6 + $0x128] sm:$0xff] }
 0x52c   : > { %4777 = vst.msk [vmem:[#allocation3 + $0x91] sm:$0xff] %vm417_vm3, %v4745_v2  ;;  %4841 = vst.msk [vmem:[#allocation5 + $0x2d0] sm:$0xff] %vm417_vm3, %v5127_v31  ;;  %v5319_v50 = vld [vmem:[#allocation3 + $0x79] sm:$0xff]  ;;  %5199 = vrot.lane.b32.xlu0 %v5127_v31, %s10205_s17  ;;  %v4746_v6 = vmax.f32 %v4632_v58, 0.0  ;;  %v4412_v24 = vadd.f32 %v4411_v25, %v4187_v22  ;;  %9854 = vmatpush1.msra.mxu1 %v6084_v48  ;;  %v9646_v48 = vpop.f32.mrf.mxu1 }
 0x52d   : > { %5605 = vst.msk [vmem:[#allocation5 + $0x1c8] sm:$0xff] %vm417_vm3, %v5573_v21  ;;  %4947 = vrot.lane.b32.xlu1 %v4873_v43, %s10205_s17  ;;  %5351 = vst.msk [vmem:[#allocation5 + $0x250] sm:$0xff] %vm417_vm3, %v5319_v50  ;;  %v4413_v63 = vpop.f32.mrf.mxu0  ;;  %v5128_v61 = vld [vmem:[#allocation3 + $0x80] sm:$0xff]  ;;  %9823 = vmatprep.subr.mxu1 %v12837_v7 }
 0x52e   : > { %v4874_v42 = vld [vmem:[#allocation3 + $0x81] sm:$0xff]  ;;  %4778 = vst.msk [vmem:[#allocation3 + $0x99] sm:$0xff] %vm417_vm3, %v4746_v6  ;;  %v4637_v20 = vadd.f32 %v4636_v47, %v4412_v24  ;;  %4842 = vst.msk [vmem:[#allocation5 + $0x318] sm:$0xff] %vm417_vm3, %v5128_v61  ;;  %v4202_v6 = vadd.f32 %v12896_v41, %v12663_v1  ;;  %v6082_v63 = vld [vmem:[#allocation6 + $0x118] sm:$0xff] }
 0x52f   : > { %v13040_v5 = vld [vmem:[#allocation3 + $0x7a] sm:$0xff]  ;;  %v13049_v30 = vld [vmem:[#allocation3 + $0x82] sm:$0xff]  ;;  %v4416_v33 = vpop.f32.mrf.mxu0 }
 0x530   : > { %5097 = vst.msk [vmem:[#allocation5 + $0x2d8] sm:$0xff] %vm417_vm3, %v13040_v5  ;;  %v5574_v52 = vld [vmem:[#allocation3 + $0x80] sm:$0xff]  ;;  %5201 = vrot.lane.b32.xlu0 %v5128_v61, %s10205_s17  ;;  %5098 = vst.msk [vmem:[#allocation5 + $0x320] sm:$0xff] %vm417_vm3, %v13049_v30  ;;  %v4747_v46 = vmax.f32 %v4637_v20, 0.0  ;;  %v4417_v59 = vadd.f32 %v4416_v33, %v4192_v11 }
 0x531   : > { %4949 = vrot.lane.b32.xlu1 %v4874_v42, %s10205_s17  ;;  %5606 = vst.msk [vmem:[#allocation5 + $0x210] sm:$0xff] %vm417_vm3, %v5574_v52  ;;  %v5320_v27 = vld [vmem:[#allocation3 + $0x81] sm:$0xff]  ;;  %v4418_v35 = vpop.f32.mrf.mxu0 }
 0x532   : > { %5352 = vst.msk [vmem:[#allocation5 + $0x298] sm:$0xff] %vm417_vm3, %v5320_v27  ;;  %v5829_v9 = vld [vmem:[#allocation3 + $0x7a] sm:$0xff]  ;;  %v5830_v17 = vld [vmem:[#allocation3 + $0x82] sm:$0xff]  ;;  %4779 = vst.msk [vmem:[#allocation3 + $0xa9] sm:$0xff] %vm417_vm3, %v4747_v46  ;;  %v4642_v57 = vadd.f32 %v9640_v39, %v4417_v59 }
 0x533   : > { %v5129_v62 = vld [vmem:[#allocation3 + $0x90] sm:$0xff]  ;;  %5861 = vst.msk [vmem:[#allocation5 + $0x1d0] sm:$0xff] %vm417_vm3, %v5829_v9  ;;  %5862 = vst.msk [vmem:[#allocation5 + $0x218] sm:$0xff] %vm417_vm3, %v5830_v17  ;;  %v4421_v43 = vpop.f32.mrf.mxu0  ;;  %v6083_v21 = vld [vmem:[#allocation6 + $0x120] sm:$0xff]  ;;  %v4207_v17 = vadd.f32 %v12896_v41, %v12698_v23  ;;  %v4656_v23 = vpop.f32.mrf.mxu1 }
 0x534   : > { %v4875_v8 = vld [vmem:[#allocation3 + $0x91] sm:$0xff]  ;;  %4843 = vst.msk [vmem:[#allocation5 + $0x360] sm:$0xff] %vm417_vm3, %v5129_v62  ;;  %5203 = vrot.lane.b32.xlu0 %v5129_v62, %s10205_s17  ;;  %v4748_v22 = vmax.f32 %v4642_v57, 0.0  ;;  %v4422_v58 = vadd.f32 %v4421_v43, %v4197_v29  ;;  %9855 = vmatpush1.msra.mxu1 %v6083_v21 }
 0x535   : > { %v5575_v2 = vld [vmem:[#allocation3 + $0x90] sm:$0xff]  ;;  %4951 = vrot.lane.b32.xlu1 %v4875_v8, %s10205_s17  ;;  %v4423_v50 = vpop.f32.mrf.mxu0  ;;  %v5130_v25 = vld [vmem:[#allocation3 + $0x98] sm:$0xff]  ;;  %9824 = vmatprep.subr.mxu1 %v12837_v7 }
 0x536   : > { %5607 = vst.msk [vmem:[#allocation5 + $0x258] sm:$0xff] %vm417_vm3, %v5575_v2  ;;  %v5321_v31 = vld [vmem:[#allocation3 + $0x91] sm:$0xff]  ;;  %v4876_v39 = vld [vmem:[#allocation3 + $0x99] sm:$0xff]  ;;  %4780 = vst.msk [vmem:[#allocation3 + $0xb1] sm:$0xff] %vm417_vm3, %v4748_v22  ;;  %v4647_v24 = vadd.f32 %v4646_v16, %v4422_v58  ;;  %9856 = vmatpush1.msra.mxu1 %v6082_v63  ;;  %v4212_v22 = vadd.f32 %v12896_v41, %v12705_v40 }
 0x537   : > { %5353 = vst.msk [vmem:[#allocation5 + $0x2e0] sm:$0xff] %vm417_vm3, %v5321_v31  ;;  %v13068_v19 = vld [vmem:[#allocation3 + $0x92] sm:$0xff]  ;;  %4844 = vst.msk [vmem:[#allocation5 + $0x3a8] sm:$0xff] %vm417_vm3, %v5130_v25  ;;  %v13077_v47 = vld [vmem:[#allocation3 + $0x9a] sm:$0xff]  ;;  %v4426_v42 = vpop.f32.mrf.mxu0  ;;  %9825 = vmatprep.subr.mxu1 %v12837_v7 }
 0x538   : > { %5099 = vst.msk [vmem:[#allocation5 + $0x368] sm:$0xff] %vm417_vm3, %v13068_v19  ;;  %v5576_v61 = vld [vmem:[#allocation3 + $0x98] sm:$0xff]  ;;  %5205 = vrot.lane.b32.xlu0 %v5130_v25, %s10205_s17  ;;  %5100 = vst.msk [vmem:[#allocation5 + $0x3b0] sm:$0xff] %vm417_vm3, %v13077_v47  ;;  %v4749_v52 = vmax.f32 %v4647_v24, 0.0  ;;  %v4427_v33 = vadd.f32 %v4426_v42, %v4202_v6  ;;  %v6081_v2 = vld [vmem:[#allocation6 + $0x110] sm:$0xff]  ;;  %v9649_v42 = vpop.f32.mrf.mxu1 }
 0x539   : > { %4953 = vrot.lane.b32.xlu1 %v4876_v39, %s10205_s17  ;;  %5608 = vst.msk [vmem:[#allocation5 + $0x2a0] sm:$0xff] %vm417_vm3, %v5576_v61  ;;  %v5322_v1 = vld [vmem:[#allocation3 + $0x99] sm:$0xff]  ;;  %v4428_v27 = vpop.f32.mrf.mxu0  ;;  %v5131_v46 = vld [vmem:[#allocation3 + $0xa8] sm:$0xff]  ;;  %9857 = vmatpush1.msra.mxu1 %v6081_v2  ;;  %v13098_v21 = vld [vmem:[#allocation4] sm:$0xff] }
 0x53a   : > { %v5831_v11 = vld [vmem:[#allocation3 + $0x92] sm:$0xff]  ;;  %v5832_v20 = vld [vmem:[#allocation3 + $0x9a] sm:$0xff]  ;;  %5354 = vst.msk [vmem:[#allocation5 + $0x328] sm:$0xff] %vm417_vm3, %v5322_v1  ;;  %v4877_v59 = vld [vmem:[#allocation3 + $0xa9] sm:$0xff]  ;;  %v4652_v35 = vadd.f32 %v9643_v53, %v4427_v33  ;;  %9826 = vmatprep.subr.mxu1 %v13098_v21  ;;  %v4217_v33 = vadd.f32 %v12896_v41, %v12744_v55  ;;  %v4666_v55 = vpop.f32.mrf.mxu1 }
 0x53b   : > { %5863 = vst.msk [vmem:[#allocation5 + $0x260] sm:$0xff] %vm417_vm3, %v5831_v11  ;;  %5864 = vst.msk [vmem:[#allocation5 + $0x2a8] sm:$0xff] %vm417_vm3, %v5832_v20  ;;  %v5577_v9 = vld [vmem:[#allocation3 + $0xa8] sm:$0xff]  ;;  %v4431_v8 = vpop.f32.mrf.mxu0 }
 0x53c   : > { %4781 = vst.msk [vmem:[#allocation3 + $0xc1] sm:$0xff] %vm417_vm3, %v4749_v52  ;;  %4845 = vst.msk [vmem:[#allocation5 + $0x3f0] sm:$0xff] %vm417_vm3, %v5131_v46  ;;  %v5323_v62 = vld [vmem:[#allocation3 + $0xa9] sm:$0xff]  ;;  %5207 = vrot.lane.b32.xlu0 %v5131_v46, %s10205_s17  ;;  %v4750_v7 = vmax.f32 %v4652_v35, 0.0  ;;  %v4432_v29 = vadd.f32 %v4431_v8, %v4207_v17 }
 0x53d   : > { %5609 = vst.msk [vmem:[#allocation5 + $0x2e8] sm:$0xff] %vm417_vm3, %v5577_v9  ;;  %4955 = vrot.lane.b32.xlu1 %v4877_v59, %s10205_s17  ;;  %5355 = vst.msk [vmem:[#allocation5 + $0x370] sm:$0xff] %vm417_vm3, %v5323_v62  ;;  %v4433_v57 = vpop.f32.mrf.mxu0  ;;  %v5132_v31 = vld [vmem:[#allocation3 + $0xb0] sm:$0xff]  ;;  %v6080_v40 = vld [vmem:[#allocation6 + $0x108] sm:$0xff] }
 0x53e   : > { %v4878_v53 = vld [vmem:[#allocation3 + $0xb1] sm:$0xff]  ;;  %4782 = vst.msk [vmem:[#allocation3 + $0xc9] sm:$0xff] %vm417_vm3, %v4750_v7  ;;  %v4657_v58 = vadd.f32 %v4656_v23, %v4432_v29  ;;  %4846 = vst.msk [vmem:[#allocation5 + $0x438] sm:$0xff] %vm417_vm3, %v5132_v31  ;;  %9858 = vmatpush1.msra.mxu1 %v6080_v40  ;;  %v6079_v9 = vld [vmem:[#allocation6 + $0x100] sm:$0xff]  ;;  %v4222_v7 = vadd.f32 %v12896_v41, %v12750_v32  ;;  %v9652_v40 = vpop.f32.mrf.mxu1 }
 0x53f   : > { %v13096_v43 = vld [vmem:[#allocation3 + $0xaa] sm:$0xff]  ;;  %v13107_v16 = vld [vmem:[#allocation3 + $0xb2] sm:$0xff]  ;;  %v4436_v25 = vpop.f32.mrf.mxu0  ;;  %9827 = vmatprep.subr.mxu1 %v13098_v21 }
 0x540   : > { %5101 = vst.msk [vmem:[#allocation5 + $0x3f8] sm:$0xff] %vm417_vm3, %v13096_v43  ;;  %v5578_v50 = vld [vmem:[#allocation3 + $0xb0] sm:$0xff]  ;;  %5209 = vrot.lane.b32.xlu0 %v5132_v31, %s10205_s17  ;;  %5102 = vst.msk [vmem:[#allocation5 + $0x440] sm:$0xff] %vm417_vm3, %v13107_v16  ;;  %v4751_v6 = vmax.f32 %v4657_v58, 0.0  ;;  %v4437_v24 = vadd.f32 %v4436_v25, %v4212_v22  ;;  %9859 = vmatpush1.msra.mxu1 %v6079_v9  ;;  %v6110_v57 = vld [vmem:[#allocation6 + $0x1f8] sm:$0xff] }
 0x541   : > { %4957 = vrot.lane.b32.xlu1 %v4878_v53, %s10205_s17  ;;  %5610 = vst.msk [vmem:[#allocation5 + $0x330] sm:$0xff] %vm417_vm3, %v5578_v50  ;;  %v5324_v39 = vld [vmem:[#allocation3 + $0xb1] sm:$0xff]  ;;  %v4438_v1 = vpop.f32.mrf.mxu0  ;;  %9828 = vmatprep.subr.mxu1 %v13098_v21 }
 0x542   : > { %5356 = vst.msk [vmem:[#allocation5 + $0x3b8] sm:$0xff] %vm417_vm3, %v5324_v39  ;;  %v5833_v63 = vld [vmem:[#allocation3 + $0xaa] sm:$0xff]  ;;  %v5834_v61 = vld [vmem:[#allocation3 + $0xb2] sm:$0xff]  ;;  %4783 = vst.msk [vmem:[#allocation3 + $0xd9] sm:$0xff] %vm417_vm3, %v4751_v6  ;;  %v4662_v27 = vadd.f32 %v9646_v48, %v4437_v24  ;;  %9860 = vmatpush2.msra.mxu1 %v6110_v57 }
 0x543   : > { %v5133_v11 = vld [vmem:[#allocation3 + $0xc0] sm:$0xff]  ;;  %5865 = vst.msk [vmem:[#allocation5 + $0x2f0] sm:$0xff] %vm417_vm3, %v5833_v63  ;;  %5866 = vst.msk [vmem:[#allocation5 + $0x338] sm:$0xff] %vm417_vm3, %v5834_v61  ;;  %v4441_v59 = vpop.f32.mrf.mxu0  ;;  %9829 = vmatprep.subr.mxu1 %v13098_v21  ;;  %v4227_v61 = vadd.f32 %v12896_v41, %v12781_v0  ;;  %v4676_v0 = vpop.f32.mrf.mxu1 }
 0x544   : > { %v4879_v20 = vld [vmem:[#allocation3 + $0xc1] sm:$0xff]  ;;  %4847 = vst.msk [vmem:[#allocation5 + $0x480] sm:$0xff] %vm417_vm3, %v5133_v11  ;;  %5211 = vrot.lane.b32.xlu0 %v5133_v11, %s10205_s17  ;;  %v4752_v17 = vmax.f32 %v4662_v27, 0.0  ;;  %v4442_v35 = vadd.f32 %v4441_v59, %v4217_v33 }
 0x545   : > { %v5579_v52 = vld [vmem:[#allocation3 + $0xc0] sm:$0xff]  ;;  %4959 = vrot.lane.b32.xlu1 %v4879_v20, %s10205_s17  ;;  %v4443_v62 = vpop.f32.mrf.mxu0  ;;  %v5134_v8 = vld [vmem:[#allocation3 + $0xc8] sm:$0xff] }
 0x546   : > { %5611 = vst.msk [vmem:[#allocation5 + $0x378] sm:$0xff] %vm417_vm3, %v5579_v52  ;;  %v5325_v46 = vld [vmem:[#allocation3 + $0xc1] sm:$0xff]  ;;  %v4880_v48 = vld [vmem:[#allocation3 + $0xc9] sm:$0xff]  ;;  %4784 = vst.msk [vmem:[#allocation3 + $0xe1] sm:$0xff] %vm417_vm3, %v4752_v17  ;;  %v4667_v29 = vadd.f32 %v4666_v55, %v4442_v35  ;;  %v4232_v17 = vadd.f32 %v12896_v41, %v12787_v34 }
 0x547   : > { %5357 = vst.msk [vmem:[#allocation5 + $0x400] sm:$0xff] %vm417_vm3, %v5325_v46  ;;  %v13126_v2 = vld [vmem:[#allocation3 + $0xc2] sm:$0xff]  ;;  %4848 = vst.msk [vmem:[#allocation5 + $0x4c8] sm:$0xff] %vm417_vm3, %v5134_v8  ;;  %v13135_v23 = vld [vmem:[#allocation3 + $0xca] sm:$0xff]  ;;  %v4446_v53 = vpop.f32.mrf.mxu0 }
 0x548   : > { %5103 = vst.msk [vmem:[#allocation5 + $0x488] sm:$0xff] %vm417_vm3, %v13126_v2  ;;  %v5580_v31 = vld [vmem:[#allocation3 + $0xc8] sm:$0xff]  ;;  %5213 = vrot.lane.b32.xlu0 %v5134_v8, %s10205_s17  ;;  %5104 = vst.msk [vmem:[#allocation5 + $0x4d0] sm:$0xff] %vm417_vm3, %v13135_v23  ;;  %v4753_v50 = vmax.f32 %v4667_v29, 0.0  ;;  %v4447_v25 = vadd.f32 %v4446_v53, %v4222_v7  ;;  %v13153_v52 = vld [vmem:[#allocation6 + $0x1f0] sm:$0xff]  ;;  %v9655_v53 = vpop.f32.mrf.mxu1 }
 0x549   : > { %4961 = vrot.lane.b32.xlu1 %v4880_v48, %s10205_s17  ;;  %5612 = vst.msk [vmem:[#allocation5 + $0x3c0] sm:$0xff] %vm417_vm3, %v5580_v31  ;;  %v5326_v32 = vld [vmem:[#allocation3 + $0xc9] sm:$0xff]  ;;  %v4448_v39 = vpop.f32.mrf.mxu0  ;;  %v5135_v6 = vld [vmem:[#allocation3 + $0xd8] sm:$0xff]  ;;  %9861 = vmatpush2.msra.mxu1 %v13153_v52 }
 0x54a   : > { %v5835_v22 = vld [vmem:[#allocation3 + $0xc2] sm:$0xff]  ;;  %v5836_v58 = vld [vmem:[#allocation3 + $0xca] sm:$0xff]  ;;  %5358 = vst.msk [vmem:[#allocation5 + $0x448] sm:$0xff] %vm417_vm3, %v5326_v32  ;;  %v4881_v24 = vld [vmem:[#allocation3 + $0xd9] sm:$0xff]  ;;  %v4672_v1 = vadd.f32 %v9649_v42, %v4447_v25  ;;  %9830 = vmatprep.subr.mxu1 %v13098_v21 }
 0x54b   : > { %5867 = vst.msk [vmem:[#allocation5 + $0x380] sm:$0xff] %vm417_vm3, %v5835_v22  ;;  %5868 = vst.msk [vmem:[#allocation5 + $0x3c8] sm:$0xff] %vm417_vm3, %v5836_v58  ;;  %v5581_v63 = vld [vmem:[#allocation3 + $0xd8] sm:$0xff]  ;;  %v4451_v20 = vpop.f32.mrf.mxu0  ;;  %v13172_v34 = vld [vmem:[#allocation6 + $0x1e8] sm:$0xff] }
 0x54c   : > { %4785 = vst.msk [vmem:[#allocation3 + $0xf1] sm:$0xff] %vm417_vm3, %v4753_v50  ;;  %4849 = vst.msk [vmem:[#allocation5 + $0x510] sm:$0xff] %vm417_vm3, %v5135_v6  ;;  %v5327_v11 = vld [vmem:[#allocation3 + $0xd9] sm:$0xff]  ;;  %5215 = vrot.lane.b32.xlu0 %v5135_v6, %s10205_s17  ;;  %v4754_v33 = vmax.f32 %v4672_v1, 0.0  ;;  %v4452_v27 = vadd.f32 %v4451_v20, %v4227_v61  ;;  %9862 = vmatpush2.msra.mxu1 %v13172_v34  ;;  %v4237_v50 = vadd.f32 %v12896_v41, %v12818_v38 }
 0x54d   : > { %5613 = vst.msk [vmem:[#allocation5 + $0x408] sm:$0xff] %vm417_vm3, %v5581_v63  ;;  %4963 = vrot.lane.b32.xlu1 %v4881_v24, %s10205_s17  ;;  %5359 = vst.msk [vmem:[#allocation5 + $0x490] sm:$0xff] %vm417_vm3, %v5327_v11  ;;  %v4453_v42 = vpop.f32.mrf.mxu0  ;;  %v5136_v46 = vld [vmem:[#allocation3 + $0xe0] sm:$0xff]  ;;  %9831 = vmatprep.subr.mxu1 %v13098_v21 }
 0x54e   : > { %v4882_v59 = vld [vmem:[#allocation3 + $0xe1] sm:$0xff]  ;;  %4786 = vst.msk [vmem:[#allocation3 + $0xf9] sm:$0xff] %vm417_vm3, %v4754_v33  ;;  %v4677_v35 = vadd.f32 %v4676_v0, %v4452_v27  ;;  %4850 = vst.msk [vmem:[#allocation5 + $0x558] sm:$0xff] %vm417_vm3, %v5136_v46  ;;  %v4242_v27 = vadd.f32 %v12896_v41, %v12824_v13 }
 0x54f   : > { %v13157_v9 = vld [vmem:[#allocation3 + $0xda] sm:$0xff]  ;;  %v13166_v55 = vld [vmem:[#allocation3 + $0xe2] sm:$0xff]  ;;  %v4456_v8 = vpop.f32.mrf.mxu0 }
 0x550   : > { %5105 = vst.msk [vmem:[#allocation5 + $0x518] sm:$0xff] %vm417_vm3, %v13157_v9  ;;  %v5582_v62 = vld [vmem:[#allocation3 + $0xe0] sm:$0xff]  ;;  %5217 = vrot.lane.b32.xlu0 %v5136_v46, %s10205_s17  ;;  %5106 = vst.msk [vmem:[#allocation5 + $0x560] sm:$0xff] %vm417_vm3, %v13166_v55  ;;  %v4755_v7 = vmax.f32 %v4677_v35, 0.0  ;;  %v4457_v29 = vadd.f32 %v4456_v8, %v4232_v17  ;;  %v13202_v46 = vld [vmem:[#allocation6 + $0x1d8] sm:$0xff] }
 0x551   : > { %4965 = vrot.lane.b32.xlu1 %v4882_v59, %s10205_s17  ;;  %5614 = vst.msk [vmem:[#allocation5 + $0x450] sm:$0xff] %vm417_vm3, %v5582_v62  ;;  %v5328_v48 = vld [vmem:[#allocation3 + $0xe1] sm:$0xff]  ;;  %v4458_v32 = vpop.f32.mrf.mxu0 }
 0x552   : > { %5360 = vst.msk [vmem:[#allocation5 + $0x4d8] sm:$0xff] %vm417_vm3, %v5328_v48  ;;  %v5837_v57 = vld [vmem:[#allocation3 + $0xda] sm:$0xff]  ;;  %v5838_v31 = vld [vmem:[#allocation3 + $0xe2] sm:$0xff]  ;;  %4787 = vst.msk [vmem:[#allocation3 + $0x109] sm:$0xff] %vm417_vm3, %v4755_v7  ;;  %v4682_v25 = vadd.f32 %v9652_v40, %v4457_v29  ;;  %v4686_v40 = vpop.f32.mrf.mxu1 }
 0x553   : > { %v5137_v22 = vld [vmem:[#allocation3 + $0xf0] sm:$0xff]  ;;  %5869 = vst.msk [vmem:[#allocation5 + $0x410] sm:$0xff] %vm417_vm3, %v5837_v57  ;;  %5870 = vst.msk [vmem:[#allocation5 + $0x458] sm:$0xff] %vm417_vm3, %v5838_v31  ;;  %v4461_v24 = vpop.f32.mrf.mxu0  ;;  %v13186_v63 = vld [vmem:[#allocation6 + $0x1e0] sm:$0xff] }
 0x554   : > { %v4883_v58 = vld [vmem:[#allocation3 + $0xf1] sm:$0xff]  ;;  %4851 = vst.msk [vmem:[#allocation5 + $0x5a0] sm:$0xff] %vm417_vm3, %v5137_v22  ;;  %5219 = vrot.lane.b32.xlu0 %v5137_v22, %s10205_s17  ;;  %v4756_v61 = vmax.f32 %v4682_v25, 0.0  ;;  %v4462_v38 = vadd.f32 %v4461_v24, %v4237_v50  ;;  %9863 = vmatpush2.msra.mxu1 %v13186_v63  ;;  %v9658_v48 = vpop.f32.mrf.mxu1  ;;  %v13217_v31 = vld [vmem:[%s14984_s4] ss:$0 sm:$0xff] }
 0x555   : > { %v5583_v39 = vld [vmem:[#allocation3 + $0xf0] sm:$0xff]  ;;  %4967 = vrot.lane.b32.xlu1 %v4883_v58, %s10205_s17  ;;  %v4463_v1 = vpop.f32.mrf.mxu0  ;;  %v5138_v11 = vld [vmem:[#allocation3 + $0xf8] sm:$0xff]  ;;  %9832 = vmatprep.subr.mxu1 %v13098_v21  ;;  %v4247_v32 = vadd.f32 %v13217_v31, %v12846_v45 }
 0x556   : > { %v5329_v6 = vld [vmem:[#allocation3 + $0xf1] sm:$0xff]  ;;  %5615 = vst.msk [vmem:[#allocation5 + $0x498] sm:$0xff] %vm417_vm3, %v5583_v39  ;;  %v4884_v20 = vld [vmem:[#allocation3 + $0xf9] sm:$0xff]  ;;  %4788 = vst.msk [vmem:[#allocation3 + $0x111] sm:$0xff] %vm417_vm3, %v4756_v61  ;;  %v4687_v0 = vadd.f32 %v4686_v40, %v4462_v38  ;;  %9864 = vmatpush2.msra.mxu1 %v13202_v46  ;;  %v4252_v1 = vadd.f32 %v13217_v31, %v12850_v18 }
 0x557   : > { %5361 = vst.msk [vmem:[#allocation5 + $0x520] sm:$0xff] %vm417_vm3, %v5329_v6  ;;  %v13191_v33 = vld [vmem:[#allocation3 + $0xf2] sm:$0xff]  ;;  %4852 = vst.msk [vmem:[#allocation5 + $0x5e8] sm:$0xff] %vm417_vm3, %v5138_v11  ;;  %v13200_v42 = vld [vmem:[#allocation3 + $0xfa] sm:$0xff]  ;;  %v4466_v59 = vpop.f32.mrf.mxu0  ;;  %9833 = vmatprep.subr.mxu1 %v13098_v21 }
 0x558   : > { %5107 = vst.msk [vmem:[#allocation5 + $0x5a8] sm:$0xff] %vm417_vm3, %v13191_v33  ;;  %5221 = vrot.lane.b32.xlu0 %v5138_v11, %s10205_s17  ;;  %5108 = vst.msk [vmem:[#allocation5 + $0x5f0] sm:$0xff] %vm417_vm3, %v13200_v42  ;;  %v5839_v13 = vld [vmem:[#allocation3 + $0xf2] sm:$0xff]  ;;  %v4757_v35 = vmax.f32 %v4687_v0, 0.0  ;;  %v4467_v62 = vadd.f32 %v4466_v59, %v4242_v27  ;;  %v5840_v8 = vld [vmem:[#allocation3 + $0xfa] sm:$0xff] }
 0x559   : > { %4969 = vrot.lane.b32.xlu1 %v4884_v20, %s10205_s17  ;;  %v5584_v41 = vld [vmem:[#allocation3 + $0xf8] sm:$0xff]  ;;  %5871 = vst.msk [vmem:[#allocation5 + $0x4a0] sm:$0xff] %vm417_vm3, %v5839_v13  ;;  %v4468_v7 = vpop.f32.mrf.mxu0  ;;  %v5139_v29 = vld [vmem:[#allocation3 + $0x108] sm:$0xff]  ;;  %5872 = vst.msk [vmem:[#allocation5 + $0x4e8] sm:$0xff] %vm417_vm3, %v5840_v8 }
 0x55a   : > { %v5330_v17 = vld [vmem:[#allocation3 + $0xf9] sm:$0xff]  ;;  %5616 = vst.msk [vmem:[#allocation5 + $0x4e0] sm:$0xff] %vm417_vm3, %v5584_v41  ;;  %v4885_v57 = vld [vmem:[#allocation3 + $0x109] sm:$0xff]  ;;  %4789 = vst.msk [vmem:[#allocation3 + $0x121] sm:$0xff] %vm417_vm3, %v4757_v35  ;;  %v4692_v22 = vadd.f32 %v9655_v53, %v4467_v62  ;;  %v4696_v53 = vpop.f32.mrf.mxu1 }
 0x55b   : > { %5362 = vst.msk [vmem:[#allocation5 + $0x568] sm:$0xff] %vm417_vm3, %v5330_v17  ;;  %4853 = vst.msk [vmem:[#allocation5 + $0x630] sm:$0xff] %vm417_vm3, %v5139_v29  ;;  %v5585_v58 = vld [vmem:[#allocation3 + $0x108] sm:$0xff]  ;;  %v4471_v25 = vpop.f32.mrf.mxu0  ;;  %v13225_v39 = vld [vmem:[#allocation6 + $0x1d0] sm:$0xff] }
 0x55c   : > { %v5331_v50 = vld [vmem:[#allocation3 + $0x109] sm:$0xff]  ;;  %5223 = vrot.lane.b32.xlu0 %v5139_v29, %s10205_s17  ;;  %5617 = vst.msk [vmem:[#allocation5 + $0x528] sm:$0xff] %vm417_vm3, %v5585_v58  ;;  %v4758_v6 = vmax.f32 %v4692_v22, 0.0  ;;  %v4472_v45 = vadd.f32 %v4471_v25, %v4247_v32  ;;  %9865 = vmatpush2.msra.mxu1 %v13225_v39  ;;  %v9661_v62 = vpop.f32.mrf.mxu1  ;;  %v13259_v25 = vld [vmem:[#allocation6 + $0x1c0] sm:$0xff] }
 0x55d   : > { %4971 = vrot.lane.b32.xlu1 %v4885_v57, %s10205_s17  ;;  %5363 = vst.msk [vmem:[#allocation5 + $0x5b0] sm:$0xff] %vm417_vm3, %v5331_v50  ;;  %v4473_v24 = vpop.f32.mrf.mxu0  ;;  %v5140_v61 = vld [vmem:[#allocation3 + $0x110] sm:$0xff]  ;;  %9834 = vmatprep.subr.mxu1 %v13098_v21  ;;  %v13245_v0 = vld [vmem:[#allocation6 + $0x1c8] sm:$0xff]  ;;  %v4257_v57 = vadd.f32 %v13217_v31, %v12864_v37 }
 0x55e   : > { %v4886_v38 = vld [vmem:[#allocation3 + $0x111] sm:$0xff]  ;;  %4790 = vst.msk [vmem:[#allocation3 + $0x129] sm:$0xff] %vm417_vm3, %v4758_v6  ;;  %v4697_v11 = vadd.f32 %v4696_v53, %v4472_v45  ;;  %4854 = vst.msk [vmem:[#allocation5 + $0x678] sm:$0xff] %vm417_vm3, %v5140_v61  ;;  %9866 = vmatpush2.msra.mxu1 %v13245_v0 }
 0x55f   : > { %v13230_v40 = vld [vmem:[#allocation3 + $0x10a] sm:$0xff]  ;;  %v13239_v20 = vld [vmem:[#allocation3 + $0x112] sm:$0xff]  ;;  %v4476_v27 = vpop.f32.mrf.mxu0  ;;  %9835 = vmatprep.subr.mxu1 %v13098_v21 }
 0x560   : > { %5109 = vst.msk [vmem:[#allocation5 + $0x638] sm:$0xff] %vm417_vm3, %v13230_v40  ;;  %5225 = vrot.lane.b32.xlu0 %v5140_v61, %s10205_s17  ;;  %5110 = vst.msk [vmem:[#allocation5 + $0x680] sm:$0xff] %vm417_vm3, %v13239_v20  ;;  %v5841_v18 = vld [vmem:[#allocation3 + $0x10a] sm:$0xff]  ;;  %v5842_v59 = vld [vmem:[#allocation3 + $0x112] sm:$0xff]  ;;  %v4759_v13 = vmax.f32 %v4697_v11, 0.0  ;;  %v4477_v41 = vadd.f32 %v4476_v27, %v4252_v1  ;;  %9867 = vmatpush2.msra.mxu1 %v13259_v25 }
 0x561   : > { %4973 = vrot.lane.b32.xlu1 %v4886_v38, %s10205_s17  ;;  %5873 = vst.msk [vmem:[#allocation5 + $0x530] sm:$0xff] %vm417_vm3, %v5841_v18  ;;  %5874 = vst.msk [vmem:[#allocation5 + $0x578] sm:$0xff] %vm417_vm3, %v5842_v59  ;;  %v5586_v17 = vld [vmem:[#allocation3 + $0x110] sm:$0xff]  ;;  %v4478_v8 = vpop.f32.mrf.mxu0  ;;  %v5141_v7 = vld [vmem:[#allocation3 + $0x120] sm:$0xff]  ;;  %9836 = vmatprep.subr.mxu1 %v13098_v21  ;;  %v4262_v38 = vadd.f32 %v13217_v31, %v12867_v36 }
 0x562   : > { %v5332_v35 = vld [vmem:[#allocation3 + $0x111] sm:$0xff]  ;;  %v4887_v29 = vld [vmem:[#allocation3 + $0x121] sm:$0xff]  ;;  %5618 = vst.msk [vmem:[#allocation5 + $0x570] sm:$0xff] %vm417_vm3, %v5586_v17  ;;  %4791 = vst.msk [vmem:[#allocation3 + $0x139] sm:$0xff] %vm417_vm3, %v4759_v13  ;;  %v4702_v32 = vadd.f32 %v9658_v48, %v4477_v41  ;;  %v4706_v48 = vpop.f32.mrf.mxu1 }
 0x563   : > { %5364 = vst.msk [vmem:[#allocation5 + $0x5f8] sm:$0xff] %vm417_vm3, %v5332_v35  ;;  %4855 = vst.msk [vmem:[#allocation5 + $0x6c0] sm:$0xff] %vm417_vm3, %v5141_v7  ;;  %v5587_v22 = vld [vmem:[#allocation3 + $0x120] sm:$0xff]  ;;  %v4481_v50 = vpop.f32.mrf.mxu0  ;;  %v13279_v36 = vld [vmem:[#allocation6 + $0x1b8] sm:$0xff] }
 0x564   : > { %v5333_v58 = vld [vmem:[#allocation3 + $0x121] sm:$0xff]  ;;  %5227 = vrot.lane.b32.xlu0 %v5141_v7, %s10205_s17  ;;  %5619 = vst.msk [vmem:[#allocation5 + $0x5b8] sm:$0xff] %vm417_vm3, %v5587_v22  ;;  %v4760_v6 = vmax.f32 %v4702_v32, 0.0  ;;  %v4482_v37 = vadd.f32 %v4481_v50, %v4257_v57  ;;  %9868 = vmatpush2.msra.mxu1 %v13279_v36  ;;  %v9664_v8 = vpop.f32.mrf.mxu1  ;;  %v4267_v22 = vadd.f32 %v13217_v31, %v12876_v44 }
 0x565   : > { %4975 = vrot.lane.b32.xlu1 %v4887_v29, %s10205_s17  ;;  %5365 = vst.msk [vmem:[#allocation5 + $0x640] sm:$0xff] %vm417_vm3, %v5333_v58  ;;  %v4483_v45 = vpop.f32.mrf.mxu0  ;;  %v5142_v53 = vld [vmem:[#allocation3 + $0x128] sm:$0xff]  ;;  %9837 = vmatprep.subr.mxu1 %v13098_v21 }
 0x566   : > { %v4888_v24 = vld [vmem:[#allocation3 + $0x129] sm:$0xff]  ;;  %4792 = vst.msk [vmem:[#allocation3 + $0x141] sm:$0xff] %vm417_vm3, %v4760_v6  ;;  %v4707_v1 = vadd.f32 %v4706_v48, %v4482_v37  ;;  %v4716_v44 = vpop.f32.mrf.mxu1 }
 0x567   : > { %v4824_v61 = vld [vmem:[#allocation3 + $0x128] sm:$0xff]  ;;  %v4486_v18 = vpop.f32.mrf.mxu0  ;;  %v13292_v37 = vld [vmem:[#allocation6 + $0x1b0] sm:$0xff] }
 0x568   : > { %4856 = vst.msk [vmem:[#allocation5 + $0x708] sm:$0xff] %vm417_vm3, %v4824_v61  ;;  %v13269_v11 = vld [vmem:[#allocation3 + $0x122] sm:$0xff]  ;;  %v13271_v27 = vld [vmem:[#allocation3 + $0x12a] sm:$0xff]  ;;  %5229 = vrot.lane.b32.xlu0 %v5142_v53, %s10205_s17  ;;  %v4761_v59 = vmax.f32 %v4707_v1, 0.0  ;;  %v4487_v13 = vadd.f32 %v4486_v18, %v4262_v38  ;;  %9869 = vmatpush2.msra.mxu1 %v13292_v37  ;;  %v4272_v18 = vadd.f32 %v13217_v31, %v12879_v26 }
 0x569   : > { %4977 = vrot.lane.b32.xlu1 %v4888_v24, %s10205_s17  ;;  %5111 = vst.msk [vmem:[#allocation5 + $0x6c8] sm:$0xff] %vm417_vm3, %v13269_v11  ;;  %5112 = vst.msk [vmem:[#allocation5 + $0x710] sm:$0xff] %vm417_vm3, %v13271_v27  ;;  %v5843_v41 = vld [vmem:[#allocation3 + $0x122] sm:$0xff]  ;;  %v5844_v17 = vld [vmem:[#allocation3 + $0x12a] sm:$0xff]  ;;  %v4488_v7 = vpop.f32.mrf.mxu0  ;;  %9838 = vmatprep.subr.mxu1 %v13098_v21 }
 0x56a   : > { %v5588_v35 = vld [vmem:[#allocation3 + $0x128] sm:$0xff]  ;;  %v5143_v29 = vld [vmem:[#allocation3 + $0x138] sm:$0xff]  ;;  %5875 = vst.msk [vmem:[#allocation5 + $0x5c0] sm:$0xff] %vm417_vm3, %v5843_v41  ;;  %5876 = vst.msk [vmem:[#allocation5 + $0x608] sm:$0xff] %vm417_vm3, %v5844_v17  ;;  %v4712_v58 = vadd.f32 %v9661_v62, %v4487_v13 }
 0x56b   : > { %v4889_v57 = vld [vmem:[#allocation3 + $0x139] sm:$0xff]  ;;  %5620 = vst.msk [vmem:[#allocation5 + $0x600] sm:$0xff] %vm417_vm3, %v5588_v35  ;;  %4793 = vst.msk [vmem:[#allocation3 + $0x151] sm:$0xff] %vm417_vm3, %v4761_v59  ;;  %v5334_v50 = vld [vmem:[#allocation3 + $0x129] sm:$0xff]  ;;  %v4491_v6 = vpop.f32.mrf.mxu0 }
 0x56c   : > { %v4825_v32 = vld [vmem:[#allocation3 + $0x138] sm:$0xff]  ;;  %5231 = vrot.lane.b32.xlu0 %v5143_v29, %s10205_s17  ;;  %5366 = vst.msk [vmem:[#allocation5 + $0x688] sm:$0xff] %vm417_vm3, %v5334_v50  ;;  %v4762_v53 = vmax.f32 %v4712_v58, 0.0  ;;  %v4492_v24 = vadd.f32 %v4491_v6, %v4267_v22  ;;  %v13313_v26 = vld [vmem:[#allocation6 + $0x1a8] sm:$0xff]  ;;  %v9667_v58 = vpop.f32.mrf.mxu1 }
 0x56d   : > { %4857 = vst.msk [vmem:[#allocation5 + $0x750] sm:$0xff] %vm417_vm3, %v4825_v32  ;;  %4979 = vrot.lane.b32.xlu1 %v4889_v57, %s10205_s17  ;;  %v5589_v48 = vld [vmem:[#allocation3 + $0x138] sm:$0xff]  ;;  %v4493_v62 = vpop.f32.mrf.mxu0  ;;  %v5144_v61 = vld [vmem:[#allocation3 + $0x140] sm:$0xff]  ;;  %9870 = vmatpush2.msra.mxu1 %v13313_v26 }
 0x56e   : > { %v5335_v45 = vld [vmem:[#allocation3 + $0x139] sm:$0xff]  ;;  %5621 = vst.msk [vmem:[#allocation5 + $0x648] sm:$0xff] %vm417_vm3, %v5589_v48  ;;  %v4890_v38 = vld [vmem:[#allocation3 + $0x141] sm:$0xff]  ;;  %4794 = vst.msk [vmem:[#allocation3 + $0x159] sm:$0xff] %vm417_vm3, %v4762_v53  ;;  %v4717_v59 = vadd.f32 %v4716_v44, %v4492_v24  ;;  %9839 = vmatprep.subr.mxu1 %v13098_v21 }
 0x56f   : > { %5367 = vst.msk [vmem:[#allocation5 + $0x6d0] sm:$0xff] %vm417_vm3, %v5335_v45  ;;  %v4826_v1 = vld [vmem:[#allocation3 + $0x140] sm:$0xff]  ;;  %v4496_v17 = vpop.f32.mrf.mxu0  ;;  %v4277_v45 = vadd.f32 %v13217_v31, %v12887_v56  ;;  %v4726_v56 = vpop.f32.mrf.mxu1 }
 0x570   : > { %4858 = vst.msk [vmem:[#allocation5 + $0x798] sm:$0xff] %vm417_vm3, %v4826_v1  ;;  %v13303_v13 = vld [vmem:[#allocation3 + $0x13a] sm:$0xff]  ;;  %v13305_v41 = vld [vmem:[#allocation3 + $0x142] sm:$0xff]  ;;  %5233 = vrot.lane.b32.xlu0 %v5144_v61, %s10205_s17  ;;  %v4763_v29 = vmax.f32 %v4717_v59, 0.0  ;;  %v4497_v57 = vadd.f32 %v4496_v17, %v4272_v18 }
 0x571   : > { %4981 = vrot.lane.b32.xlu1 %v4890_v38, %s10205_s17  ;;  %5113 = vst.msk [vmem:[#allocation5 + $0x758] sm:$0xff] %vm417_vm3, %v13303_v13  ;;  %5114 = vst.msk [vmem:[#allocation5 + $0x7a0] sm:$0xff] %vm417_vm3, %v13305_v41  ;;  %v5845_v35 = vld [vmem:[#allocation3 + $0x13a] sm:$0xff]  ;;  %v5846_v7 = vld [vmem:[#allocation3 + $0x142] sm:$0xff]  ;;  %v4498_v22 = vpop.f32.mrf.mxu0 }
 0x572   : > { %5877 = vst.msk [vmem:[#allocation5 + $0x650] sm:$0xff] %vm417_vm3, %v5845_v35  ;;  %5878 = vst.msk [vmem:[#allocation5 + $0x698] sm:$0xff] %vm417_vm3, %v5846_v7  ;;  %v5590_v32 = vld [vmem:[#allocation3 + $0x140] sm:$0xff]  ;;  %v5145_v50 = vld [vmem:[#allocation3 + $0x150] sm:$0xff]  ;;  %v4722_v53 = vadd.f32 %v9664_v8, %v4497_v57  ;;  %v4282_v7 = vadd.f32 %v13217_v31, %v12890_v4 }
 0x573   : > { %v4891_v6 = vld [vmem:[#allocation3 + $0x151] sm:$0xff]  ;;  %5622 = vst.msk [vmem:[#allocation5 + $0x690] sm:$0xff] %vm417_vm3, %v5590_v32  ;;  %4795 = vst.msk [vmem:[#allocation3 + $0x169] sm:$0xff] %vm417_vm3, %v4763_v29  ;;  %v5336_v24 = vld [vmem:[#allocation3 + $0x141] sm:$0xff]  ;;  %v4501_v44 = vpop.f32.mrf.mxu0 }
 0x574   : > { %v4827_v48 = vld [vmem:[#allocation3 + $0x150] sm:$0xff]  ;;  %5235 = vrot.lane.b32.xlu0 %v5145_v50, %s10205_s17  ;;  %v13326_v62 = vld [vmem:[#allocation6 + $0x1a0] sm:$0xff]  ;;  %5368 = vst.msk [vmem:[#allocation5 + $0x718] sm:$0xff] %vm417_vm3, %v5336_v24  ;;  %v4764_v1 = vmax.f32 %v4722_v53, 0.0  ;;  %v4502_v18 = vadd.f32 %v4501_v44, %v4277_v45 }
 0x575   : > { %4859 = vst.msk [vmem:[#allocation5 + $0x7e0] sm:$0xff] %vm417_vm3, %v4827_v48  ;;  %4983 = vrot.lane.b32.xlu1 %v4891_v6, %s10205_s17  ;;  %v5591_v61 = vld [vmem:[#allocation3 + $0x150] sm:$0xff]  ;;  %9871 = vmatpush2.msra.mxu1 %v13326_v62  ;;  %v4503_v8 = vpop.f32.mrf.mxu0  ;;  %v5146_v59 = vld [vmem:[#allocation3 + $0x158] sm:$0xff] }
 0x576   : > { %v5337_v38 = vld [vmem:[#allocation3 + $0x151] sm:$0xff]  ;;  %5623 = vst.msk [vmem:[#allocation5 + $0x6d8] sm:$0xff] %vm417_vm3, %v5591_v61  ;;  %v4892_v17 = vld [vmem:[#allocation3 + $0x159] sm:$0xff]  ;;  %9840 = vmatprep.subr.mxu1 %v13098_v21  ;;  %4796 = vst.msk [vmem:[#allocation3 + $0x171] sm:$0xff] %vm417_vm3, %v4764_v1  ;;  %v4727_v29 = vadd.f32 %v4726_v56, %v4502_v18 }
 0x577   : > { %5369 = vst.msk [vmem:[#allocation5 + $0x760] sm:$0xff] %vm417_vm3, %v5337_v38  ;;  %v4828_v35 = vld [vmem:[#allocation3 + $0x158] sm:$0xff]  ;;  %v4506_v22 = vpop.f32.mrf.mxu0 }
 0x578   : > { %4860 = vst.msk [vmem:[#allocation5 + $0x828] sm:$0xff] %vm417_vm3, %v4828_v35  ;;  %v13337_v57 = vld [vmem:[#allocation3 + $0x152] sm:$0xff]  ;;  %v13339_v32 = vld [vmem:[#allocation3 + $0x15a] sm:$0xff]  ;;  %5237 = vrot.lane.b32.xlu0 %v5146_v59, %s10205_s17  ;;  %v4765_v4 = vmax.f32 %v4727_v29, 0.0  ;;  %v4507_v31 = vadd.f32 %v4506_v22, %v4282_v7 }
 0x579   : > { %4985 = vrot.lane.b32.xlu1 %v4892_v17, %s10205_s17  ;;  %5115 = vst.msk [vmem:[#allocation5 + $0x7e8] sm:$0xff] %vm417_vm3, %v13337_v57  ;;  %5116 = vst.msk [vmem:[#allocation5 + $0x830] sm:$0xff] %vm417_vm3, %v13339_v32  ;;  %v5847_v50 = vld [vmem:[#allocation3 + $0x152] sm:$0xff]  ;;  %v5848_v6 = vld [vmem:[#allocation3 + $0x15a] sm:$0xff]  ;;  %v4508_v45 = vpop.f32.mrf.mxu0 }
 0x57a   : > { %v5592_v48 = vld [vmem:[#allocation3 + $0x158] sm:$0xff]  ;;  %v5147_v53 = vld [vmem:[#allocation3 + $0x168] sm:$0xff]  ;;  %5879 = vst.msk [vmem:[#allocation5 + $0x6e0] sm:$0xff] %vm417_vm3, %v5847_v50  ;;  %5880 = vst.msk [vmem:[#allocation5 + $0x728] sm:$0xff] %vm417_vm3, %v5848_v6  ;;  %v4732_v61 = vadd.f32 %v9667_v58, %v4507_v31 }
 0x57b   : > { %v4893_v24 = vld [vmem:[#allocation3 + $0x169] sm:$0xff]  ;;  %5624 = vst.msk [vmem:[#allocation5 + $0x720] sm:$0xff] %vm417_vm3, %v5592_v48  ;;  %4797 = vst.msk [vmem:[#allocation3 + $0x181] sm:$0xff] %vm417_vm3, %v4765_v4  ;;  %v5338_v38 = vld [vmem:[#allocation3 + $0x159] sm:$0xff] }
 0x57c   : > { %v4829_v44 = vld [vmem:[#allocation3 + $0x168] sm:$0xff]  ;;  %5239 = vrot.lane.b32.xlu0 %v5147_v53, %s10205_s17  ;;  %5370 = vst.msk [vmem:[#allocation5 + $0x7a8] sm:$0xff] %vm417_vm3, %v5338_v38  ;;  %v4766_v56 = vmax.f32 %v4732_v61, 0.0  ;;  %v13367_v29 = vld [vmem:[#allocation6 + $0x198] sm:$0xff]  ;;  %v13378_v48 = vld [vmem:[#allocation6 + $0x190] sm:$0xff] }
 0x57d   : > { %4861 = vst.msk [vmem:[#allocation5 + $0x870] sm:$0xff] %vm417_vm3, %v4829_v44  ;;  %v5593_v1 = vld [vmem:[#allocation3 + $0x168] sm:$0xff]  ;;  %4987 = vrot.lane.b32.xlu1 %v4893_v24, %s10205_s17  ;;  %v5184_v8 = vpop.permute.xlu0 %5183  ;;  %v5148_v17 = vld [vmem:[#allocation3 + $0x170] sm:$0xff]  ;;  %9872 = vmatpush2.msra.mxu1 %v13367_v29 }
 0x57e   : > { %5625 = vst.msk [vmem:[#allocation5 + $0x768] sm:$0xff] %vm417_vm3, %v5593_v1  ;;  %v5339_v18 = vld [vmem:[#allocation3 + $0x169] sm:$0xff]  ;;  %v4932_v59 = vpop.permute.xlu1 %4931  ;;  %v4894_v58 = vld [vmem:[#allocation3 + $0x171] sm:$0xff]  ;;  %4798 = vst.msk [vmem:[#allocation3 + $0x189] sm:$0xff] %vm417_vm3, %v4766_v56  ;;  %9841 = vmatprep.subr.mxu1 %v13098_v21 }
 0x57f   : > { %5371 = vst.msk [vmem:[#allocation5 + $0x7f0] sm:$0xff] %vm417_vm3, %v5339_v18  ;;  %v4830_v35 = vld [vmem:[#allocation3 + $0x170] sm:$0xff]  ;;  %9873 = vmatpush2.msra.mxu1 %v13378_v48  ;;  %v13391_v61 = vld [vmem:[#allocation6 + $0x188] sm:$0xff] }
 0x580   : > { %5279 = vst.msk [vmem:[#allocation5 + $0x8] sm:$0xff] %vm2859_vm14, %v5184_v8  ;;  %5025 = vst.msk [vmem:[#allocation5 + $0x90] sm:$0xff] %vm2859_vm14, %v4932_v59  ;;  %v13361_v7 = vld [vmem:[#allocation3 + $0x16a] sm:$0xff]  ;;  %5241 = vrot.lane.b32.xlu0 %v5148_v17, %s10205_s17  ;;  %v13369_v22 = vld [vmem:[#allocation3 + $0x172] sm:$0xff]  ;;  %9842 = vmatprep.subr.mxu1 %v13098_v21 }
 0x581   : > { %4862 = vst.msk [vmem:[#allocation5 + $0x8b8] sm:$0xff] %vm417_vm3, %v4830_v35  ;;  %4989 = vrot.lane.b32.xlu1 %v4894_v58, %s10205_s17  ;;  %5117 = vst.msk [vmem:[#allocation5 + $0x878] sm:$0xff] %vm417_vm3, %v13361_v7  ;;  %v5594_v4 = vld [vmem:[#allocation3 + $0x170] sm:$0xff]  ;;  %v5186_v31 = vpop.permute.xlu0 %5185  ;;  %9874 = vmatpush2.msra.mxu1 %v13391_v61  ;;  %v7027_v59 = vld [vmem:[#allocation4 + $0x9] sm:$0xff] }
 0x582   : > { %5881 = vst.msk [vmem:[#allocation5 + $0x770] sm:$0xff] %vm417_vm3, %v13361_v7  ;;  %5118 = vst.msk [vmem:[#allocation5 + $0x8c0] sm:$0xff] %vm417_vm3, %v13369_v22  ;;  %v4934_v50 = vpop.permute.xlu1 %4933  ;;  %v5149_v6 = vld [vmem:[#allocation3 + $0x180] sm:$0xff]  ;;  %v5340_v45 = vld [vmem:[#allocation3 + $0x171] sm:$0xff]  ;;  %9843 = vmatprep.subr.mxu1 %v13098_v21 }
 0x583   : > { %5882 = vst.msk [vmem:[#allocation5 + $0x7b8] sm:$0xff] %vm417_vm3, %v13369_v22  ;;  %5626 = vst.msk [vmem:[#allocation5 + $0x7b0] sm:$0xff] %vm417_vm3, %v5594_v4  ;;  %v5595_v53 = vld [vmem:[#allocation3 + $0x180] sm:$0xff]  ;;  %v7026_v44 = vld [vmem:[#allocation4 + $0x1] sm:$0xff] }
 0x584   : > { %5280 = vst.msk [vmem:[#allocation5 + $0x50] sm:$0xff] %vm2859_vm14, %v5186_v31  ;;  %5026 = vst.msk [vmem:[#allocation5 + $0xd8] sm:$0xff] %vm2859_vm14, %v4934_v50  ;;  %v5341_v24 = vld [vmem:[#allocation3 + $0x181] sm:$0xff]  ;;  %5243 = vrot.lane.b32.xlu0 %v5149_v6, %s10205_s17  ;;  %v9958_v17 = vld [vmem:[#allocation6 + $0x178] sm:$0xff] }
 0x585   : > { %5372 = vst.msk [vmem:[#allocation5 + $0x838] sm:$0xff] %vm417_vm3, %v5340_v45  ;;  %5439 = vrot.lane.b32.xlu1 %v12931_v14, %s10205_s17  ;;  %5627 = vst.msk [vmem:[#allocation5 + $0x7f8] sm:$0xff] %vm417_vm3, %v5595_v53  ;;  %v5188_v38 = vpop.permute.xlu0 %5187  ;;  %v5150_v56 = vld [vmem:[#allocation3 + $0x188] sm:$0xff]  ;;  %v13410_v58 = vld [vmem:[#allocation6 + $0x180] sm:$0xff] }
 0x586   : > { %5373 = vst.msk [vmem:[#allocation5 + $0x880] sm:$0xff] %vm417_vm3, %v5341_v24  ;;  %v4936_v1 = vpop.permute.xlu1 %4935  ;;  %v13397_v14 = vld [vmem:[#allocation3 + $0x182] sm:$0xff]  ;;  %v13399_v8 = vld [vmem:[#allocation3 + $0x18a] sm:$0xff]  ;;  %9875 = vmatpush2.msra.mxu1 %v13410_v58 }
 0x587   : > { %v5888_v18 = vld [vmem:[#allocation5 + $0x8] sm:$0xff]  ;;  %5281 = vst.msk [vmem:[#allocation5 + $0x98] sm:$0xff] %vm2859_vm14, %v5188_v38  ;;  %5027 = vst.msk [vmem:[#allocation5 + $0x120] sm:$0xff] %vm2859_vm14, %v4936_v1  ;;  %v9960_v6 = vld [vmem:[#allocation3 + $0x31] sm:$0xff]  ;;  %7978 = vmatprep.subr.mxu1 %v13098_v21 }
 0x588   : > { %6286 = vmatprep.mubr.f32.mxu0 %v5888_v18  ;;  %7058 = vst [vmem:[#allocation5 + $0x8] sm:$0xff] %v7026_v44  ;;  %5245 = vrot.lane.b32.xlu0 %v5150_v56, %s10205_s17  ;;  %5883 = vst.msk [vmem:[#allocation5 + $0x800] sm:$0xff] %vm417_vm3, %v13397_v14  ;;  %v5596_v35 = vld [vmem:[#allocation3 + $0x188] sm:$0xff]  ;;  %v9962_v38 = vld [vmem:[#allocation3 + $0x39] sm:$0xff] }
 0x589   : > { %6287 = vmatmul.mubr.f32.vlgmr.msra.gmra.mxu0 %v12917_v10  ;;  %5884 = vst.msk [vmem:[#allocation5 + $0x848] sm:$0xff] %vm417_vm3, %v13399_v8  ;;  %5441 = vrot.lane.b32.xlu1 %v12940_v12, %s10205_s17  ;;  %v5342_v4 = vld [vmem:[#allocation3 + $0x189] sm:$0xff]  ;;  %v5190_v31 = vpop.permute.xlu0 %5189  ;;  %5628 = vst.msk [vmem:[#allocation5 + $0x840] sm:$0xff] %vm417_vm3, %v5596_v35 }
 0x58a   : > { %6448 = vmatpush1.msra.mxu0 %v9958_v17  ;;  %v4938_v10 = vpop.permute.xlu1 %4937  ;;  %5374 = vst.msk [vmem:[#allocation5 + $0x8c8] sm:$0xff] %vm417_vm3, %v5342_v4  ;;  %v9959_v12 = vld [vmem:[#allocation6 + $0x170] sm:$0xff]  ;;  %v9961_v44 = vld [vmem:[#allocation6 + $0x168] sm:$0xff]  ;;  %v9964_v17 = vld [vmem:[#allocation6 + $0x158] sm:$0xff] }
 0x58b   : > { %v5893_v50 = vld [vmem:[#allocation5 + $0x50] sm:$0xff]  ;;  %6449 = vmatprep.subr.mxu0 %v13098_v21  ;;  %5282 = vst.msk [vmem:[#allocation5 + $0xe0] sm:$0xff] %vm2859_vm14, %v5190_v31  ;;  %5028 = vst.msk [vmem:[#allocation5 + $0x168] sm:$0xff] %vm2859_vm14, %v4938_v10 }
 0x58c   : > { %6291 = vmatprep.mubr.f32.mxu0 %v5893_v50  ;;  %7059 = vst [vmem:[#allocation5 + $0x50] sm:$0xff] %v7027_v59  ;;  %6450 = vmatpush1.msra.mxu0 %v9959_v12  ;;  %v5902_v59 = vld [vmem:[#allocation5 + $0xd8] sm:$0xff]  ;;  %v9965_v35 = vld [vmem:[#allocation3 + $0x49] sm:$0xff] }
 0x58d   : > { %6292 = vmatmul.mubr.f32.gmra.mxu0 %v12927_v15  ;;  %5695 = vrot.lane.b32.xlu0 %v9960_v6, %s10205_s17  ;;  %v5192_v45 = vpop.permute.xlu0 %5191  ;;  %v5897_v15 = vld [vmem:[#allocation5 + $0x90] sm:$0xff] }
 0x58e   : > { %5443 = vrot.lane.b32.xlu1 %v12956_v51, %s10205_s17  ;;  %6451 = vmatprep.subr.mxu0 %v13098_v21  ;;  %v4940_v53 = vpop.permute.xlu1 %4939  ;;  %v5898_v24 = vld [vmem:[#allocation5 + $0x98] sm:$0xff]  ;;  %5283 = vst.msk [vmem:[#allocation5 + $0x128] sm:$0xff] %vm2859_vm14, %v5192_v45  ;;  %v9963_v51 = vld [vmem:[#allocation6 + $0x160] sm:$0xff]  ;;  %v9966_v10 = vld [vmem:[#allocation6 + $0x150] sm:$0xff] }
 0x58f   : > { %6452 = vmatpush1.msra.mxu0 %v9961_v44  ;;  %5029 = vst.msk [vmem:[#allocation5 + $0x1b0] sm:$0xff] %vm2859_vm14, %v4940_v53  ;;  %6296 = vmatprep.mubr.f32.mxu0 %v5898_v24  ;;  %v5907_v50 = vld [vmem:[#allocation5 + $0x120] sm:$0xff]  ;;  %v9967_v12 = vld [vmem:[#allocation3 + $0x51] sm:$0xff] }
 0x590   : > { %6453 = vmatprep.subr.mxu0 %v13098_v21  ;;  %v9969_v44 = vld [vmem:[#allocation6 + $0x140] sm:$0xff] }
 0x591   : > { %5697 = vrot.lane.b32.xlu0 %v9962_v38, %s10205_s17  ;;  %6297 = vmatmul.mubr.f32.gmra.mxu0 %v5897_v15  ;;  %v5194_v1 = vpop.permute.xlu0 %5193  ;;  %v9970_v15 = vld [vmem:[#allocation3 + $0x61] sm:$0xff] }
 0x592   : > { %5445 = vrot.lane.b32.xlu1 %v12965_v28, %s10205_s17  ;;  %6454 = vmatpush1.msra.mxu0 %v9963_v51  ;;  %v4942_v18 = vpop.permute.xlu1 %4941  ;;  %v5903_v56 = vld [vmem:[#allocation5 + $0xe0] sm:$0xff]  ;;  %5284 = vst.msk [vmem:[#allocation5 + $0x170] sm:$0xff] %vm2859_vm14, %v5194_v1  ;;  %v5912_v24 = vld [vmem:[#allocation5 + $0x168] sm:$0xff]  ;;  %v9971_v1 = vld [vmem:[#allocation6 + $0x138] sm:$0xff] }
 0x593   : > { %6455 = vmatprep.subr.mxu0 %v13098_v21  ;;  %5030 = vst.msk [vmem:[#allocation5 + $0x1f8] sm:$0xff] %vm2859_vm14, %v4942_v18  ;;  %6301 = vmatprep.mubr.f32.mxu0 %v5903_v56  ;;  %v13452_v56 = vld [vmem:[#allocation4] sm:$0xff] }
 0x594   : > { %6456 = vmatpush1.msra.mxu0 %v9964_v17 }
 0x595   : > { %5699 = vrot.lane.b32.xlu0 %v9965_v35, %s10205_s17  ;;  %6302 = vmatmul.mubr.f32.gmra.mxu0 %v5902_v59  ;;  %v5908_v31 = vld [vmem:[#allocation5 + $0x128] sm:$0xff] }
 0x596   : > { %5447 = vrot.lane.b32.xlu1 %v12984_v3, %s10205_s17  ;;  %6457 = vmatprep.subr.mxu0 %v13098_v21  ;;  %v5196_v28 = vpop.permute.xlu0 %5195  ;;  %v9968_v3 = vld [vmem:[#allocation6 + $0x148] sm:$0xff]  ;;  %v5917_v18 = vld [vmem:[#allocation5 + $0x1b0] sm:$0xff] }
 0x597   : > { %v4944_v4 = vpop.permute.xlu1 %4943  ;;  %6458 = vmatpush1.msra.mxu0 %v9966_v10  ;;  %5285 = vst.msk [vmem:[#allocation5 + $0x1b8] sm:$0xff] %vm2859_vm14, %v5196_v28  ;;  %6306 = vmatprep.mubr.f32.mxu0 %v5908_v31  ;;  %v9973_v59 = vld [vmem:[#allocation3 + $0x69] sm:$0xff]  ;;  %v9976_v31 = vld [vmem:[#allocation3 + $0x79] sm:$0xff] }
 0x598   : > { %5031 = vst.msk [vmem:[#allocation5 + $0x240] sm:$0xff] %vm2859_vm14, %v4944_v4  ;;  %6459 = vmatprep.subr.mxu0 %v13098_v21  ;;  %v9975_v4 = vld [vmem:[#allocation6 + $0x128] sm:$0xff] }
 0x599   : > { %5701 = vrot.lane.b32.xlu0 %v9967_v12, %s10205_s17  ;;  %6307 = vmatmul.mubr.f32.gmra.mxu0 %v5907_v50  ;;  %v5913_v53 = vld [vmem:[#allocation5 + $0x170] sm:$0xff]  ;;  %v9977_v12 = vld [vmem:[#allocation6 + $0x120] sm:$0xff] }
 0x59a   : > { %5449 = vrot.lane.b32.xlu1 %v12993_v54, %s10205_s17  ;;  %6460 = vmatpush1.msra.mxu0 %v9968_v3  ;;  %v5198_v6 = vpop.permute.xlu0 %5197  ;;  %v5922_v28 = vld [vmem:[#allocation5 + $0x1f8] sm:$0xff] }
 0x59b   : > { %v4946_v45 = vpop.permute.xlu1 %4945  ;;  %6461 = vmatprep.subr.mxu0 %v13098_v21  ;;  %5286 = vst.msk [vmem:[#allocation5 + $0x200] sm:$0xff] %vm2859_vm14, %v5198_v6  ;;  %6311 = vmatprep.mubr.f32.mxu0 %v5913_v53  ;;  %v9978_v6 = vld [vmem:[#allocation3 + $0x81] sm:$0xff] }
 0x59c   : > { %5032 = vst.msk [vmem:[#allocation5 + $0x288] sm:$0xff] %vm2859_vm14, %v4946_v45  ;;  %6462 = vmatpush1.msra.mxu0 %v9969_v44 }
 0x59d   : > { %5703 = vrot.lane.b32.xlu0 %v9970_v15, %s10205_s17  ;;  %6312 = vmatmul.mubr.f32.gmra.mxu0 %v5912_v24  ;;  %v9980_v15 = vld [vmem:[#allocation6 + $0x110] sm:$0xff] }
 0x59e   : > { %5451 = vrot.lane.b32.xlu1 %v13012_v49, %s10205_s17  ;;  %6463 = vmatprep.subr.mxu0 %v13098_v21  ;;  %v5200_v54 = vpop.permute.xlu0 %5199  ;;  %v5918_v51 = vld [vmem:[#allocation5 + $0x1b8] sm:$0xff]  ;;  %v9974_v49 = vld [vmem:[#allocation6 + $0x130] sm:$0xff] }
 0x59f   : > { %v4948_v38 = vpop.permute.xlu1 %4947  ;;  %6464 = vmatpush1.msra.mxu0 %v9971_v1  ;;  %5287 = vst.msk [vmem:[#allocation5 + $0x248] sm:$0xff] %vm2859_vm14, %v5200_v54  ;;  %6316 = vmatprep.mubr.f32.mxu0 %v5918_v51  ;;  %v5927_v3 = vld [vmem:[#allocation5 + $0x240] sm:$0xff]  ;;  %v9981_v54 = vld [vmem:[#allocation3 + $0x91] sm:$0xff]  ;;  %v9982_v1 = vld [vmem:[#allocation6 + $0x108] sm:$0xff] }
 0x5a0   : > { %5033 = vst.msk [vmem:[#allocation5 + $0x2d0] sm:$0xff] %vm2859_vm14, %v4948_v38  ;;  %6465 = vmatprep.subr.mxu0 %v13452_v56 }
 0x5a1   : > { %5705 = vrot.lane.b32.xlu0 %v9973_v59, %s10205_s17  ;;  %6317 = vmatmul.mubr.f32.gmra.mxu0 %v5917_v18  ;;  %v9983_v59 = vld [vmem:[#allocation3 + $0x99] sm:$0xff] }
 0x5a2   : > { %5453 = vrot.lane.b32.xlu1 %v13021_v60, %s10205_s17  ;;  %6466 = vmatpush1.msra.mxu0 %v9974_v49  ;;  %v5202_v21 = vpop.permute.xlu0 %5201  ;;  %v5923_v35 = vld [vmem:[#allocation5 + $0x200] sm:$0xff] }
 0x5a3   : > { %v4950_v17 = vpop.permute.xlu1 %4949  ;;  %6467 = vmatprep.subr.mxu0 %v13452_v56  ;;  %5288 = vst.msk [vmem:[#allocation5 + $0x290] sm:$0xff] %vm2859_vm14, %v5202_v21  ;;  %6321 = vmatprep.mubr.f32.mxu0 %v5923_v35  ;;  %v5932_v44 = vld [vmem:[#allocation5 + $0x288] sm:$0xff] }
 0x5a4   : > { %5034 = vst.msk [vmem:[#allocation5 + $0x318] sm:$0xff] %vm2859_vm14, %v4950_v17  ;;  %6468 = vmatpush1.msra.mxu0 %v9975_v4  ;;  %v9986_v4 = vld [vmem:[#allocation3 + $0xa9] sm:$0xff] }
 0x5a5   : > { %5707 = vrot.lane.b32.xlu0 %v9976_v31, %s10205_s17  ;;  %6322 = vmatmul.mubr.f32.gmra.mxu0 %v5922_v28  ;;  %v9985_v28 = vld [vmem:[#allocation6 + $0x1f8] sm:$0xff] }
 0x5a6   : > { %5455 = vrot.lane.b32.xlu1 %v13040_v5, %s10205_s17  ;;  %6469 = vmatprep.subr.mxu0 %v13452_v56  ;;  %v5204_v60 = vpop.permute.xlu0 %5203  ;;  %v5928_v50 = vld [vmem:[#allocation5 + $0x248] sm:$0xff]  ;;  %v9979_v5 = vld [vmem:[#allocation6 + $0x118] sm:$0xff] }
 0x5a7   : > { %v4952_v10 = vpop.permute.xlu1 %4951  ;;  %6470 = vmatpush1.msra.mxu0 %v9977_v12  ;;  %5289 = vst.msk [vmem:[#allocation5 + $0x2d8] sm:$0xff] %vm2859_vm14, %v5204_v60  ;;  %6326 = vmatprep.mubr.f32.mxu0 %v5928_v50  ;;  %v5937_v18 = vld [vmem:[#allocation5 + $0x2d0] sm:$0xff] }
 0x5a8   : > { %5035 = vst.msk [vmem:[#allocation5 + $0x360] sm:$0xff] %vm2859_vm14, %v4952_v10  ;;  %6471 = vmatprep.subr.mxu0 %v13452_v56  ;;  %v9987_v50 = vld [vmem:[#allocation3 + $0xb1] sm:$0xff] }
 0x5a9   : > { %5709 = vrot.lane.b32.xlu0 %v9978_v6, %s10205_s17  ;;  %6327 = vmatmul.mubr.f32.gmra.mxu0 %v5927_v3  ;;  %v9988_v6 = vld [vmem:[#allocation3 + $0xc1] sm:$0xff] }
 0x5aa   : > { %5457 = vrot.lane.b32.xlu1 %v13049_v30, %s10205_s17  ;;  %6472 = vmatpush1.msra.mxu0 %v9979_v5  ;;  %v5206_v45 = vpop.permute.xlu0 %5205  ;;  %v5933_v24 = vld [vmem:[#allocation5 + $0x290] sm:$0xff] }
 0x5ab   : > { %v4954_v53 = vpop.permute.xlu1 %4953  ;;  %6473 = vmatprep.subr.mxu0 %v13452_v56  ;;  %5290 = vst.msk [vmem:[#allocation5 + $0x320] sm:$0xff] %vm2859_vm14, %v5206_v45  ;;  %6331 = vmatprep.mubr.f32.mxu0 %v5933_v24  ;;  %v5942_v35 = vld [vmem:[#allocation5 + $0x318] sm:$0xff]  ;;  %v9989_v45 = vld [vmem:[#allocation3 + $0xc9] sm:$0xff] }
 0x5ac   : > { %5036 = vst.msk [vmem:[#allocation5 + $0x3a8] sm:$0xff] %vm2859_vm14, %v4954_v53  ;;  %6474 = vmatpush1.msra.mxu0 %v9980_v15 }
 0x5ad   : > { %5711 = vrot.lane.b32.xlu0 %v9981_v54, %s10205_s17  ;;  %6332 = vmatmul.mubr.f32.gmra.mxu0 %v5932_v44  ;;  %v9990_v44 = vld [vmem:[#allocation3 + $0xd9] sm:$0xff]  ;;  %v9991_v54 = vld [vmem:[#allocation3 + $0xe1] sm:$0xff] }
 0x5ae   : > { %5459 = vrot.lane.b32.xlu1 %v13068_v19, %s10205_s17  ;;  %6475 = vmatprep.subr.mxu0 %v13452_v56  ;;  %v5208_v30 = vpop.permute.xlu0 %5207  ;;  %v5938_v51 = vld [vmem:[#allocation5 + $0x2d8] sm:$0xff]  ;;  %v9984_v19 = vld [vmem:[#allocation6 + $0x100] sm:$0xff] }
 0x5af   : > { %v4956_v38 = vpop.permute.xlu1 %4955  ;;  %6476 = vmatpush1.msra.mxu0 %v9982_v1  ;;  %5291 = vst.msk [vmem:[#allocation5 + $0x368] sm:$0xff] %vm2859_vm14, %v5208_v30  ;;  %6336 = vmatprep.mubr.f32.mxu0 %v5938_v51  ;;  %v5947_v10 = vld [vmem:[#allocation5 + $0x360] sm:$0xff] }
 0x5b0   : > { %5037 = vst.msk [vmem:[#allocation5 + $0x3f0] sm:$0xff] %vm2859_vm14, %v4956_v38  ;;  %6477 = vmatprep.subr.mxu0 %v13452_v56  ;;  %v5647_v38 = vld [vmem:[#allocation3 + $0xf1] sm:$0xff] }
 0x5b1   : > { %5713 = vrot.lane.b32.xlu0 %v9983_v59, %s10205_s17  ;;  %6337 = vmatmul.mubr.f32.gmra.mxu0 %v5937_v18  ;;  %v5648_v18 = vld [vmem:[#allocation3 + $0xf9] sm:$0xff] }
 0x5b2   : > { %5461 = vrot.lane.b32.xlu1 %v13077_v47, %s10205_s17  ;;  %6478 = vmatpush1.msra.mxu0 %v9984_v19  ;;  %v5210_v49 = vpop.permute.xlu0 %5209  ;;  %v5943_v17 = vld [vmem:[#allocation5 + $0x320] sm:$0xff]  ;;  %v5649_v19 = vld [vmem:[#allocation3 + $0x109] sm:$0xff] }
 0x5b3   : > { %v4958_v21 = vpop.permute.xlu1 %4957  ;;  %6479 = vmatprep.subr.mxu0 %v13452_v56  ;;  %5292 = vst.msk [vmem:[#allocation5 + $0x3b0] sm:$0xff] %vm2859_vm14, %v5210_v49  ;;  %6341 = vmatprep.mubr.f32.mxu0 %v5943_v17  ;;  %v5952_v3 = vld [vmem:[#allocation5 + $0x3a8] sm:$0xff]  ;;  %v5650_v17 = vld [vmem:[#allocation3 + $0x111] sm:$0xff] }
 0x5b4   : > { %5038 = vst.msk [vmem:[#allocation5 + $0x438] sm:$0xff] %vm2859_vm14, %v4958_v21  ;;  %6480 = vmatpush2.msra.mxu0 %v9985_v28  ;;  %v13564_v28 = vld [vmem:[#allocation6 + $0x238] sm:$0xff] }
 0x5b5   : > { %5715 = vrot.lane.b32.xlu0 %v9986_v4, %s10205_s17  ;;  %6342 = vmatmul.mubr.f32.gmra.mxu0 %v5942_v35  ;;  %v5651_v4 = vld [vmem:[#allocation3 + $0x121] sm:$0xff] }
 0x5b6   : > { %5463 = vrot.lane.b32.xlu1 %v13096_v43, %s10205_s17  ;;  %6481 = vmatprep.subr.mxu0 %v13452_v56  ;;  %v5212_v47 = vpop.permute.xlu0 %5211  ;;  %v5948_v60 = vld [vmem:[#allocation5 + $0x368] sm:$0xff] }
 0x5b7   : > { %v4960_v31 = vpop.permute.xlu1 %4959  ;;  %6482 = vmatpush2.msra.mxu0 %v13153_v52  ;;  %5293 = vst.msk [vmem:[#allocation5 + $0x3f8] sm:$0xff] %vm2859_vm14, %v5212_v47  ;;  %6346 = vmatprep.mubr.f32.mxu0 %v5948_v60  ;;  %v5652_v60 = vld [vmem:[#allocation3 + $0x129] sm:$0xff] }
 0x5b8   : > { %5039 = vst.msk [vmem:[#allocation5 + $0x480] sm:$0xff] %vm2859_vm14, %v4960_v31  ;;  %6483 = vmatprep.subr.mxu0 %v13452_v56 }
 0x5b9   : > { %5717 = vrot.lane.b32.xlu0 %v9987_v50, %s10205_s17  ;;  %6347 = vmatmul.mubr.f32.gmra.mxu0 %v5947_v10 }
 0x5ba   : > { %5465 = vrot.lane.b32.xlu1 %v13107_v16, %s10205_s17  ;;  %6484 = vmatpush2.msra.mxu0 %v13172_v34  ;;  %v5214_v43 = vpop.permute.xlu0 %5213  ;;  %v5953_v52 = vld [vmem:[#allocation5 + $0x3b0] sm:$0xff] }
 0x5bb   : > { %v4962_v12 = vpop.permute.xlu1 %4961  ;;  %6485 = vmatprep.subr.mxu0 %v13452_v56  ;;  %5294 = vst.msk [vmem:[#allocation5 + $0x440] sm:$0xff] %vm2859_vm14, %v5214_v43  ;;  %6351 = vmatprep.mubr.f32.mxu0 %v5953_v52  ;;  %v5962_v24 = vld [vmem:[#allocation5 + $0x438] sm:$0xff] }
 0x5bc   : > { %5040 = vst.msk [vmem:[#allocation5 + $0x4c8] sm:$0xff] %vm2859_vm14, %v4962_v12  ;;  %6486 = vmatpush2.msra.mxu0 %v13186_v63  ;;  %v5957_v63 = vld [vmem:[#allocation5 + $0x3f0] sm:$0xff]  ;;  %v5653_v43 = vld [vmem:[#allocation3 + $0x139] sm:$0xff] }
 0x5bd   : > { %5719 = vrot.lane.b32.xlu0 %v9988_v6, %s10205_s17  ;;  %6352 = vmatmul.mubr.f32.gmra.mxu0 %v5952_v3 }
 0x5be   : > { %5467 = vrot.lane.b32.xlu1 %v13126_v2, %s10205_s17  ;;  %6487 = vmatprep.subr.mxu0 %v13452_v56  ;;  %v5216_v16 = vpop.permute.xlu0 %5215  ;;  %v5958_v5 = vld [vmem:[#allocation5 + $0x3f8] sm:$0xff] }
 0x5bf   : > { %v4964_v34 = vpop.permute.xlu1 %4963  ;;  %6488 = vmatpush2.msra.mxu0 %v13202_v46  ;;  %5295 = vst.msk [vmem:[#allocation5 + $0x488] sm:$0xff] %vm2859_vm14, %v5216_v16  ;;  %6356 = vmatprep.mubr.f32.mxu0 %v5958_v5 }
 0x5c0   : > { %5041 = vst.msk [vmem:[#allocation5 + $0x510] sm:$0xff] %vm2859_vm14, %v4964_v34  ;;  %6489 = vmatprep.subr.mxu0 %v13452_v56 }
 0x5c1   : > { %5721 = vrot.lane.b32.xlu0 %v9989_v45, %s10205_s17  ;;  %6357 = vmatmul.mubr.f32.gmra.mxu0 %v5957_v63 }
 0x5c2   : > { %5469 = vrot.lane.b32.xlu1 %v13135_v23, %s10205_s17  ;;  %6490 = vmatpush2.msra.mxu0 %v13225_v39  ;;  %v5218_v2 = vpop.permute.xlu0 %5217  ;;  %v5963_v46 = vld [vmem:[#allocation5 + $0x440] sm:$0xff] }
 0x5c3   : > { %v4966_v53 = vpop.permute.xlu1 %4965  ;;  %6491 = vmatprep.subr.mxu0 %v13452_v56  ;;  %5296 = vst.msk [vmem:[#allocation5 + $0x4d0] sm:$0xff] %vm2859_vm14, %v5218_v2  ;;  %6361 = vmatprep.mubr.f32.mxu0 %v5963_v46  ;;  %v5972_v51 = vld [vmem:[#allocation5 + $0x4c8] sm:$0xff] }
 0x5c4   : > { %5042 = vst.msk [vmem:[#allocation5 + $0x558] sm:$0xff] %vm2859_vm14, %v4966_v53  ;;  %6492 = vmatpush2.msra.mxu0 %v13245_v0  ;;  %v5967_v0 = vld [vmem:[#allocation5 + $0x480] sm:$0xff] }
 0x5c5   : > { %5723 = vrot.lane.b32.xlu0 %v9990_v44, %s10205_s17  ;;  %6362 = vmatmul.mubr.f32.gmra.mxu0 %v5962_v24 }
 0x5c6   : > { %5471 = vrot.lane.b32.xlu1 %v13157_v9, %s10205_s17  ;;  %6493 = vmatprep.subr.mxu0 %v13452_v56  ;;  %v5220_v23 = vpop.permute.xlu0 %5219  ;;  %v5968_v15 = vld [vmem:[#allocation5 + $0x488] sm:$0xff] }
 0x5c7   : > { %v4968_v39 = vpop.permute.xlu1 %4967  ;;  %6494 = vmatpush2.msra.mxu0 %v13259_v25  ;;  %5297 = vst.msk [vmem:[#allocation5 + $0x518] sm:$0xff] %vm2859_vm14, %v5220_v23  ;;  %6366 = vmatprep.mubr.f32.mxu0 %v5968_v15 }
 0x5c8   : > { %5043 = vst.msk [vmem:[#allocation5 + $0x5a0] sm:$0xff] %vm2859_vm14, %v4968_v39  ;;  %6495 = vmatprep.subr.mxu0 %v13452_v56 }
 0x5c9   : > { %5725 = vrot.lane.b32.xlu0 %v9991_v54, %s10205_s17  ;;  %6367 = vmatmul.mubr.f32.gmra.mxu0 %v5967_v0  ;;  %v5597_v0 = vld [vmem:[#allocation3 + $0x198] sm:$0xff] }
 0x5ca   : > { %5473 = vrot.lane.b32.xlu1 %v13166_v55, %s10205_s17  ;;  %6496 = vmatpush2.msra.mxu0 %v13279_v36  ;;  %v5222_v9 = vpop.permute.xlu0 %5221  ;;  %v5973_v25 = vld [vmem:[#allocation5 + $0x4d0] sm:$0xff]  ;;  %5629 = vst.msk [vmem:[#allocation5 + $0x888] sm:$0xff] %vm417_vm3, %v5597_v0  ;;  %v7842_v0 = vld [vmem:[#allocation9 + $0x78] sm:$0xff] }
 0x5cb   : > { %v4970_v30 = vpop.permute.xlu1 %4969  ;;  %6497 = vmatprep.subr.mxu0 %v13452_v56  ;;  %5298 = vst.msk [vmem:[#allocation5 + $0x560] sm:$0xff] %vm2859_vm14, %v5222_v9  ;;  %6371 = vmatprep.mubr.f32.mxu0 %v5973_v25  ;;  %v5982_v49 = vld [vmem:[#allocation5 + $0x558] sm:$0xff] }
 0x5cc   : > { %5044 = vst.msk [vmem:[#allocation5 + $0x5e8] sm:$0xff] %vm2859_vm14, %v4970_v30  ;;  %6498 = vmatpush2.msra.mxu0 %v13292_v37  ;;  %v5977_v37 = vld [vmem:[#allocation5 + $0x510] sm:$0xff] }
 0x5cd   : > { %5727 = vrot.lane.b32.xlu0 %v5647_v38, %s10205_s17  ;;  %6372 = vmatmul.mubr.f32.gmra.mxu0 %v5972_v51  ;;  %v5658_v30 = vld [vmem:[#allocation3 + $0x171] sm:$0xff] }
 0x5ce   : > { %5475 = vrot.lane.b32.xlu1 %v13191_v33, %s10205_s17  ;;  %6499 = vmatprep.subr.mxu0 %v13452_v56  ;;  %v5224_v55 = vpop.permute.xlu0 %5223  ;;  %v5978_v1 = vld [vmem:[#allocation5 + $0x518] sm:$0xff] }
 0x5cf   : > { %v4972_v36 = vpop.permute.xlu1 %4971  ;;  %6500 = vmatpush2.msra.mxu0 %v13313_v26  ;;  %5299 = vst.msk [vmem:[#allocation5 + $0x5a8] sm:$0xff] %vm2859_vm14, %v5224_v55  ;;  %6376 = vmatprep.mubr.f32.mxu0 %v5978_v1 }
 0x5d0   : > { %5045 = vst.msk [vmem:[#allocation5 + $0x630] sm:$0xff] %vm2859_vm14, %v4972_v36  ;;  %6501 = vmatprep.subr.mxu0 %v13452_v56  ;;  %v5659_v36 = vld [vmem:[#allocation3 + $0x181] sm:$0xff] }
 0x5d1   : > { %5729 = vrot.lane.b32.xlu0 %v5648_v18, %s10205_s17  ;;  %6377 = vmatmul.mubr.f32.gmra.mxu0 %v5977_v37  ;;  %v7090_v18 = vld [vmem:[#allocation4 + $0x2] sm:$0xff] }
 0x5d2   : > { %5477 = vrot.lane.b32.xlu1 %v13200_v42, %s10205_s17  ;;  %6502 = vmatpush2.msra.mxu0 %v13326_v62  ;;  %v5226_v33 = vpop.permute.xlu0 %5225  ;;  %v5983_v26 = vld [vmem:[#allocation5 + $0x560] sm:$0xff] }
 0x5d3   : > { %v4974_v59 = vpop.permute.xlu1 %4973  ;;  %6503 = vmatprep.subr.mxu0 %v13452_v56  ;;  %5300 = vst.msk [vmem:[#allocation5 + $0x5f0] sm:$0xff] %vm2859_vm14, %v5226_v33  ;;  %6381 = vmatprep.mubr.f32.mxu0 %v5983_v26  ;;  %v5992_v47 = vld [vmem:[#allocation5 + $0x5e8] sm:$0xff] }
 0x5d4   : > { %5046 = vst.msk [vmem:[#allocation5 + $0x678] sm:$0xff] %vm2859_vm14, %v4974_v59  ;;  %6504 = vmatpush2.msra.mxu0 %v13367_v29  ;;  %v5987_v29 = vld [vmem:[#allocation5 + $0x5a0] sm:$0xff]  ;;  %v5660_v26 = vld [vmem:[#allocation3 + $0x189] sm:$0xff] }
 0x5d5   : > { %5731 = vrot.lane.b32.xlu0 %v5649_v19, %s10205_s17  ;;  %6382 = vmatmul.mubr.f32.gmra.mxu0 %v5982_v49  ;;  %v5661_v49 = vld [vmem:[#allocation3 + $0x199] sm:$0xff] }
 0x5d6   : > { %5479 = vrot.lane.b32.xlu1 %v13230_v40, %s10205_s17  ;;  %6505 = vmatprep.subr.mxu0 %v13452_v56  ;;  %v5228_v42 = vpop.permute.xlu0 %5227  ;;  %v5988_v21 = vld [vmem:[#allocation5 + $0x5a8] sm:$0xff] }
 0x5d7   : > { %v4976_v62 = vpop.permute.xlu1 %4975  ;;  %6506 = vmatpush2.msra.mxu0 %v13378_v48  ;;  %5301 = vst.msk [vmem:[#allocation5 + $0x638] sm:$0xff] %vm2859_vm14, %v5228_v42  ;;  %6386 = vmatprep.mubr.f32.mxu0 %v5988_v21  ;;  %v5997_v10 = vld [vmem:[#allocation5 + $0x630] sm:$0xff] }
 0x5d8   : > { %5047 = vst.msk [vmem:[#allocation5 + $0x6c0] sm:$0xff] %vm2859_vm14, %v4976_v62  ;;  %6507 = vmatprep.subr.mxu0 %v13452_v56 }
 0x5d9   : > { %5733 = vrot.lane.b32.xlu0 %v5650_v17, %s10205_s17  ;;  %6387 = vmatmul.mubr.f32.gmra.mxu0 %v5987_v29 }
 0x5da   : > { %5481 = vrot.lane.b32.xlu1 %v13239_v20, %s10205_s17  ;;  %6508 = vmatpush2.msra.mxu0 %v13391_v61  ;;  %v5230_v40 = vpop.permute.xlu0 %5229  ;;  %v5993_v48 = vld [vmem:[#allocation5 + $0x5f0] sm:$0xff] }
 0x5db   : > { %v4978_v35 = vpop.permute.xlu1 %4977  ;;  %6509 = vmatprep.subr.mxu0 %v13452_v56  ;;  %5302 = vst.msk [vmem:[#allocation5 + $0x680] sm:$0xff] %vm2859_vm14, %v5230_v40  ;;  %6391 = vmatprep.mubr.f32.mxu0 %v5993_v48  ;;  %v6002_v12 = vld [vmem:[#allocation5 + $0x678] sm:$0xff]  ;;  %v5662_v40 = vld [vmem:[#allocation3 + $0x1a1] sm:$0xff] }
 0x5dc   : > { %5048 = vst.msk [vmem:[#allocation5 + $0x708] sm:$0xff] %vm2859_vm14, %v4978_v35  ;;  %6510 = vmatpush2.msra.mxu0 %v13410_v58 }
 0x5dd   : > { %5735 = vrot.lane.b32.xlu0 %v5651_v4, %s10205_s17  ;;  %6392 = vmatmul.mubr.f32.gmra.mxu0 %v5992_v47  ;;  %v6117_v4 = vld [vmem:[#allocation6 + $0x230] sm:$0xff]  ;;  %v6116_v47 = vld [vmem:[#allocation6 + $0x228] sm:$0xff] }
 0x5de   : > { %5483 = vrot.lane.b32.xlu1 %v13269_v11, %s10205_s17  ;;  %9668 = vmatprep.subr.mxu0 %v13564_v28  ;;  %v5232_v20 = vpop.permute.xlu0 %5231  ;;  %v5998_v31 = vld [vmem:[#allocation5 + $0x638] sm:$0xff] }
 0x5df   : > { %v4980_v61 = vpop.permute.xlu1 %4979  ;;  %5303 = vst.msk [vmem:[#allocation5 + $0x6c8] sm:$0xff] %vm2859_vm14, %v5232_v20  ;;  %6396 = vmatprep.mubr.f32.mxu0 %v5998_v31  ;;  %v6007_v16 = vld [vmem:[#allocation5 + $0x6c0] sm:$0xff] }
 0x5e0   : > { %5049 = vst.msk [vmem:[#allocation5 + $0x750] sm:$0xff] %vm2859_vm14, %v4980_v61 }
 0x5e1   : > { %5737 = vrot.lane.b32.xlu0 %v5652_v60, %s10205_s17  ;;  %6397 = vmatmul.mubr.f32.gmra.mxu0 %v5997_v10  ;;  %v6115_v60 = vld [vmem:[#allocation6 + $0x220] sm:$0xff]  ;;  %v6114_v10 = vld [vmem:[#allocation6 + $0x218] sm:$0xff] }
 0x5e2   : > { %5485 = vrot.lane.b32.xlu1 %v13271_v27, %s10205_s17  ;;  %v5234_v58 = vpop.permute.xlu0 %5233  ;;  %v6003_v50 = vld [vmem:[#allocation5 + $0x680] sm:$0xff] }
 0x5e3   : > { %v4982_v11 = vpop.permute.xlu1 %4981  ;;  %5304 = vst.msk [vmem:[#allocation5 + $0x710] sm:$0xff] %vm2859_vm14, %v5234_v58  ;;  %6401 = vmatprep.mubr.f32.mxu0 %v6003_v50  ;;  %v5654_v27 = vld [vmem:[#allocation3 + $0x141] sm:$0xff] }
 0x5e4   : > { %5050 = vst.msk [vmem:[#allocation5 + $0x798] sm:$0xff] %vm2859_vm14, %v4982_v11  ;;  %v6012_v45 = vld [vmem:[#allocation5 + $0x708] sm:$0xff] }
 0x5e5   : > { %5739 = vrot.lane.b32.xlu0 %v5653_v43, %s10205_s17  ;;  %6402 = vmatmul.mubr.f32.gmra.mxu0 %v6002_v12  ;;  %v6113_v43 = vld [vmem:[#allocation6 + $0x210] sm:$0xff]  ;;  %v6112_v12 = vld [vmem:[#allocation6 + $0x208] sm:$0xff] }
 0x5e6   : > { %5487 = vrot.lane.b32.xlu1 %v13303_v13, %s10205_s17  ;;  %v5236_v52 = vpop.permute.xlu0 %5235  ;;  %v6008_v6 = vld [vmem:[#allocation5 + $0x6c8] sm:$0xff]  ;;  %v5655_v13 = vld [vmem:[#allocation3 + $0x151] sm:$0xff] }
 0x5e7   : > { %v4984_v3 = vpop.permute.xlu1 %4983  ;;  %5305 = vst.msk [vmem:[#allocation5 + $0x758] sm:$0xff] %vm2859_vm14, %v5236_v52  ;;  %6406 = vmatprep.mubr.f32.mxu0 %v6008_v6  ;;  %v6017_v24 = vld [vmem:[#allocation5 + $0x750] sm:$0xff] }
 0x5e8   : > { %5051 = vst.msk [vmem:[#allocation5 + $0x7e0] sm:$0xff] %vm2859_vm14, %v4984_v3 }
 0x5e9   : > { %5741 = vrot.lane.b32.xlu0 %v5654_v27, %s10205_s17  ;;  %6407 = vmatmul.mubr.f32.gmra.mxu0 %v6007_v16  ;;  %v6111_v16 = vld [vmem:[#allocation6 + $0x200] sm:$0xff] }
 0x5ea   : > { %5489 = vrot.lane.b32.xlu1 %v13305_v41, %s10205_s17  ;;  %v5238_v34 = vpop.permute.xlu0 %5237  ;;  %v6013_v63 = vld [vmem:[#allocation5 + $0x710] sm:$0xff]  ;;  %v5656_v41 = vld [vmem:[#allocation3 + $0x159] sm:$0xff] }
 0x5eb   : > { %v4986_v5 = vpop.permute.xlu1 %4985  ;;  %5306 = vst.msk [vmem:[#allocation5 + $0x7a0] sm:$0xff] %vm2859_vm14, %v5238_v34  ;;  %6411 = vmatprep.mubr.f32.mxu0 %v6013_v63  ;;  %v6022_v15 = vld [vmem:[#allocation5 + $0x798] sm:$0xff] }
 0x5ec   : > { %5052 = vst.msk [vmem:[#allocation5 + $0x828] sm:$0xff] %vm2859_vm14, %v4986_v5 }
 0x5ed   : > { %5743 = vrot.lane.b32.xlu0 %v5655_v13, %s10205_s17  ;;  %6412 = vmatmul.mubr.f32.gmra.mxu0 %v6012_v45 }
 0x5ee   : > { %5491 = vrot.lane.b32.xlu1 %v13337_v57, %s10205_s17  ;;  %v5240_v2 = vpop.permute.xlu0 %5239  ;;  %v6018_v46 = vld [vmem:[#allocation5 + $0x758] sm:$0xff]  ;;  %v5657_v57 = vld [vmem:[#allocation3 + $0x169] sm:$0xff] }
 0x5ef   : > { %v4988_v53 = vpop.permute.xlu1 %4987  ;;  %5307 = vst.msk [vmem:[#allocation5 + $0x7e8] sm:$0xff] %vm2859_vm14, %v5240_v2  ;;  %6416 = vmatprep.mubr.f32.mxu0 %v6018_v46  ;;  %v6027_v25 = vld [vmem:[#allocation5 + $0x7e0] sm:$0xff] }
 0x5f0   : > { %5053 = vst.msk [vmem:[#allocation5 + $0x870] sm:$0xff] %vm2859_vm14, %v4988_v53 }
 0x5f1   : > { %5745 = vrot.lane.b32.xlu0 %v5656_v41, %s10205_s17  ;;  %6417 = vmatmul.mubr.f32.gmra.mxu0 %v6017_v24 }
 0x5f2   : > { %5493 = vrot.lane.b32.xlu1 %v13339_v32, %s10205_s17  ;;  %v5242_v44 = vpop.permute.xlu0 %5241  ;;  %v6023_v39 = vld [vmem:[#allocation5 + $0x7a0] sm:$0xff] }
 0x5f3   : > { %v4990_v23 = vpop.permute.xlu1 %4989  ;;  %5308 = vst.msk [vmem:[#allocation5 + $0x830] sm:$0xff] %vm2859_vm14, %v5242_v44  ;;  %6421 = vmatprep.mubr.f32.mxu0 %v6023_v39  ;;  %v6032_v1 = vld [vmem:[#allocation5 + $0x828] sm:$0xff]  ;;  %v5891_v39 = vld [vmem:[#allocation5 + $0x20] sm:$0xff] }
 0x5f4   : > { %5054 = vst.msk [vmem:[#allocation5 + $0x8b8] sm:$0xff] %vm2859_vm14, %v4990_v23 }
 0x5f5   : > { %5747 = vrot.lane.b32.xlu0 %v5657_v57, %s10205_s17  ;;  %6422 = vmatmul.mubr.f32.gmra.mxu0 %v6022_v15 }
 0x5f6   : > { %5495 = vrot.lane.b32.xlu1 %v13361_v7, %s10205_s17  ;;  %v5244_v54 = vpop.permute.xlu0 %5243  ;;  %v6028_v32 = vld [vmem:[#allocation5 + $0x7e8] sm:$0xff]  ;;  %v5598_v7 = vld [vmem:[#allocation3 + $0x1a0] sm:$0xff] }
 0x5f7   : > { %v5440_v9 = vpop.permute.xlu1 %5439  ;;  %5309 = vst.msk [vmem:[#allocation5 + $0x878] sm:$0xff] %vm2859_vm14, %v5244_v54  ;;  %6426 = vmatprep.mubr.f32.mxu0 %v6028_v32  ;;  %v6037_v19 = vld [vmem:[#allocation5 + $0x870] sm:$0xff]  ;;  %v5896_v32 = vld [vmem:[#allocation5 + $0x68] sm:$0xff] }
 0x5f8   : > { %5535 = vst.msk [vmem:[#allocation5 + $0x10] sm:$0xff] %vm2859_vm14, %v5440_v9 }
 0x5f9   : > { %5749 = vrot.lane.b32.xlu0 %v5658_v30, %s10205_s17  ;;  %6427 = vmatmul.mubr.f32.gmra.mxu0 %v6027_v25  ;;  %5630 = vst.msk [vmem:[#allocation5 + $0x8d0] sm:$0xff] %vm417_vm3, %v5598_v7  ;;  %v5901_v30 = vld [vmem:[#allocation5 + $0xb0] sm:$0xff] }
 0x5fa   : > { %5497 = vrot.lane.b32.xlu1 %v13369_v22, %s10205_s17  ;;  %v5246_v38 = vpop.permute.xlu0 %5245  ;;  %v6033_v51 = vld [vmem:[#allocation5 + $0x830] sm:$0xff] }
 0x5fb   : > { %5310 = vst.msk [vmem:[#allocation5 + $0x8c0] sm:$0xff] %vm2859_vm14, %v5246_v38  ;;  %v5442_v55 = vpop.permute.xlu1 %5441  ;;  %6431 = vmatprep.mubr.f32.mxu0 %v6033_v51  ;;  %v6042_v17 = vld [vmem:[#allocation5 + $0x8b8] sm:$0xff]  ;;  %v7841_v25 = vld [vmem:[#allocation9 + $0x70] sm:$0xff] }
 0x5fc   : > { %5536 = vst.msk [vmem:[#allocation5 + $0x58] sm:$0xff] %vm2859_vm14, %v5442_v55 }
 0x5fd   : > { %5751 = vrot.lane.b32.xlu0 %v5659_v36, %s10205_s17  ;;  %6432 = vmatmul.mubr.f32.gmra.mxu0 %v6032_v1  ;;  %v5906_v36 = vld [vmem:[#allocation5 + $0xf8] sm:$0xff]  ;;  %v7840_v1 = vld [vmem:[#allocation9 + $0x68] sm:$0xff] }
 0x5fe   : > { %5499 = vrot.lane.b32.xlu1 %v13397_v14, %s10205_s17  ;;  %v6038_v33 = vld [vmem:[#allocation5 + $0x878] sm:$0xff] }
 0x5ff   : > { %v5889_v22 = vld [vmem:[#allocation5 + $0x10] sm:$0xff]  ;;  %v5696_v37 = vpop.permute.xlu0 %5695  ;;  %6436 = vmatprep.mubr.f32.mxu0 %v6038_v33  ;;  %v7091_v14 = vld [vmem:[#allocation4 + $0xa] sm:$0xff] }
 0x600   : > { %7122 = vst [vmem:[#allocation5 + $0x10] sm:$0xff] %v7090_v18  ;;  %5791 = vst.msk [vmem:[#allocation5 + $0x18] sm:$0xff] %vm2859_vm14, %v5696_v37  ;;  %v5444_v59 = vpop.permute.xlu1 %5443  ;;  %v5911_v18 = vld [vmem:[#allocation5 + $0x140] sm:$0xff] }
 0x601   : > { %5537 = vst.msk [vmem:[#allocation5 + $0xa0] sm:$0xff] %vm2859_vm14, %v5444_v59  ;;  %5753 = vrot.lane.b32.xlu0 %v5660_v26, %s10205_s17  ;;  %6437 = vmatmul.mubr.f32.gmra.mxu0 %v6037_v19  ;;  %v7839_v33 = vld [vmem:[#allocation9 + $0x60] sm:$0xff]  ;;  %v5916_v19 = vld [vmem:[#allocation5 + $0x188] sm:$0xff] }
 0x602   : > { %5501 = vrot.lane.b32.xlu1 %v13399_v8, %s10205_s17  ;;  %v6043_v62 = vld [vmem:[#allocation5 + $0x8c0] sm:$0xff] }
 0x603   : > { %v5698_v42 = vpop.permute.xlu0 %5697  ;;  %6441 = vmatprep.mubr.f32.mxu0 %v6043_v62  ;;  %v5894_v29 = vld [vmem:[#allocation5 + $0x58] sm:$0xff] }
 0x604   : > { %5792 = vst.msk [vmem:[#allocation5 + $0x60] sm:$0xff] %vm2859_vm14, %v5698_v42  ;;  %v5446_v21 = vpop.permute.xlu1 %5445  ;;  %7123 = vst [vmem:[#allocation5 + $0x58] sm:$0xff] %v7091_v14  ;;  %v7838_v14 = vld [vmem:[#allocation9 + $0x58] sm:$0xff] }
 0x605   : > { %5538 = vst.msk [vmem:[#allocation5 + $0xe8] sm:$0xff] %vm2859_vm14, %v5446_v21  ;;  %5755 = vrot.lane.b32.xlu0 %v5661_v49, %s10205_s17  ;;  %6442 = vmatmul.mubr.f32.gmra.mxu0 %v6042_v17  ;;  %v5921_v49 = vld [vmem:[#allocation5 + $0x1d0] sm:$0xff] }
 0x607   : > { %v5700_v35 = vpop.permute.xlu0 %5699  ;;  %v5890_v48 = vld [vmem:[#allocation5 + $0x18] sm:$0xff] }
 0x608   : > { %5793 = vst.msk [vmem:[#allocation5 + $0xa8] sm:$0xff] %vm2859_vm14, %v5700_v35  ;;  %v5448_v8 = vpop.permute.xlu1 %5447  ;;  %6511 = vmatprep.mubr.f32.mxu0 %v5890_v48  ;;  %v5899_v50 = vld [vmem:[#allocation5 + $0xa0] sm:$0xff] }
 0x609   : > { %5539 = vst.msk [vmem:[#allocation5 + $0x130] sm:$0xff] %vm2859_vm14, %v5448_v8  ;;  %5757 = vrot.lane.b32.xlu0 %v5662_v40, %s10205_s17  ;;  %6512 = vmatmul.mubr.f32.vlgmr.msra.gmra.mxu0 %v5889_v22  ;;  %v7837_v40 = vld [vmem:[#allocation9 + $0x50] sm:$0xff]  ;;  %v5931_v35 = vld [vmem:[#allocation5 + $0x260] sm:$0xff] }
 0x60a   : > { %9669 = vmatpush3.msra.mxu0 %v13564_v28 }
 0x60b   : > { %v5702_v20 = vpop.permute.xlu0 %5701  ;;  %v5895_v61 = vld [vmem:[#allocation5 + $0x60] sm:$0xff]  ;;  %9670 = vmatprep.subr.mxu0 %v6117_v4 }
 0x60c   : > { %5794 = vst.msk [vmem:[#allocation5 + $0xf0] sm:$0xff] %vm2859_vm14, %v5702_v20  ;;  %v5450_v31 = vpop.permute.xlu1 %5449  ;;  %6516 = vmatprep.mubr.f32.mxu0 %v5895_v61  ;;  %9671 = vmatpush3.msra.mxu0 %v6117_v4  ;;  %v5904_v27 = vld [vmem:[#allocation5 + $0xe8] sm:$0xff] }
 0x60d   : > { %5540 = vst.msk [vmem:[#allocation5 + $0x178] sm:$0xff] %vm2859_vm14, %v5450_v31  ;;  %6517 = vmatmul.mubr.f32.gmra.mxu0 %v5894_v29  ;;  %9672 = vmatprep.subr.mxu0 %v6116_v47  ;;  %v5926_v29 = vld [vmem:[#allocation5 + $0x218] sm:$0xff]  ;;  %v7836_v4 = vld [vmem:[#allocation9 + $0x48] sm:$0xff]  ;;  %v5941_v31 = vld [vmem:[#allocation5 + $0x2f0] sm:$0xff] }
 0x60e   : > { %9673 = vmatpush3.msra.mxu0 %v6116_v47  ;;  %v5936_v61 = vld [vmem:[#allocation5 + $0x2a8] sm:$0xff] }
 0x60f   : > { %v5704_v58 = vpop.permute.xlu0 %5703  ;;  %v5900_v11 = vld [vmem:[#allocation5 + $0xa8] sm:$0xff]  ;;  %9674 = vmatprep.subr.mxu0 %v6115_v60 }
 0x610   : > { %5795 = vst.msk [vmem:[#allocation5 + $0x138] sm:$0xff] %vm2859_vm14, %v5704_v58  ;;  %v5452_v28 = vpop.permute.xlu1 %5451  ;;  %6521 = vmatprep.mubr.f32.mxu0 %v5900_v11  ;;  %9675 = vmatpush3.msra.mxu0 %v6115_v60  ;;  %v5909_v13 = vld [vmem:[#allocation5 + $0x130] sm:$0xff]  ;;  %v7835_v60 = vld [vmem:[#allocation9 + $0x40] sm:$0xff] }
 0x611   : > { %5541 = vst.msk [vmem:[#allocation5 + $0x1c0] sm:$0xff] %vm2859_vm14, %v5452_v28  ;;  %6522 = vmatmul.mubr.f32.gmra.mxu0 %v5899_v50  ;;  %9676 = vmatprep.subr.mxu0 %v6114_v10  ;;  %v5946_v50 = vld [vmem:[#allocation5 + $0x338] sm:$0xff] }
 0x612   : > { %9677 = vmatpush3.msra.mxu0 %v6114_v10 }
 0x613   : > { %v5706_v52 = vpop.permute.xlu0 %5705  ;;  %v5905_v3 = vld [vmem:[#allocation5 + $0xf0] sm:$0xff]  ;;  %9678 = vmatprep.subr.mxu0 %v6113_v43 }
 0x614   : > { %5796 = vst.msk [vmem:[#allocation5 + $0x180] sm:$0xff] %vm2859_vm14, %v5706_v52  ;;  %v5454_v6 = vpop.permute.xlu1 %5453  ;;  %6526 = vmatprep.mubr.f32.mxu0 %v5905_v3  ;;  %9679 = vmatpush3.msra.mxu0 %v6113_v43  ;;  %v5914_v46 = vld [vmem:[#allocation5 + $0x178] sm:$0xff] }
 0x615   : > { %5542 = vst.msk [vmem:[#allocation5 + $0x208] sm:$0xff] %vm2859_vm14, %v5454_v6  ;;  %6527 = vmatmul.mubr.f32.gmra.mxu0 %v5904_v27  ;;  %9680 = vmatprep.subr.mxu0 %v6112_v12  ;;  %v7834_v43 = vld [vmem:[#allocation9 + $0x38] sm:$0xff]  ;;  %v7833_v27 = vld [vmem:[#allocation9 + $0x30] sm:$0xff] }
 0x616   : > { %9681 = vmatpush3.msra.mxu0 %v6112_v12  ;;  %v5951_v12 = vld [vmem:[#allocation5 + $0x380] sm:$0xff]  ;;  %v7874_v52 = vld [vmem:[#allocation9 + $0x178] sm:$0xff] }
 0x617   : > { %v5708_v34 = vpop.permute.xlu0 %5707  ;;  %v5910_v5 = vld [vmem:[#allocation5 + $0x138] sm:$0xff]  ;;  %9682 = vmatprep.subr.mxu0 %v6111_v16 }
 0x618   : > { %5797 = vst.msk [vmem:[#allocation5 + $0x1c8] sm:$0xff] %vm2859_vm14, %v5708_v34  ;;  %v5456_v63 = vpop.permute.xlu1 %5455  ;;  %6531 = vmatprep.mubr.f32.mxu0 %v5910_v5  ;;  %9683 = vmatpush3.msra.mxu0 %v6111_v16  ;;  %v5919_v23 = vld [vmem:[#allocation5 + $0x1c0] sm:$0xff]  ;;  %v5956_v5 = vld [vmem:[#allocation5 + $0x3c8] sm:$0xff] }
 0x619   : > { %5543 = vst.msk [vmem:[#allocation5 + $0x250] sm:$0xff] %vm2859_vm14, %v5456_v63  ;;  %6532 = vmatmul.mubr.f32.gmra.mxu0 %v5909_v13  ;;  %8203 = vmatprep.subr.mxu0 %v13452_v56  ;;  %v13674_v63 = vld [vmem:[#allocation4] sm:$0xff]  ;;  %v7832_v13 = vld [vmem:[#allocation9 + $0x28] sm:$0xff] }
 0x61b   : > { %v5710_v45 = vpop.permute.xlu0 %5709  ;;  %v5915_v2 = vld [vmem:[#allocation5 + $0x180] sm:$0xff] }
 0x61c   : > { %5798 = vst.msk [vmem:[#allocation5 + $0x210] sm:$0xff] %vm2859_vm14, %v5710_v45  ;;  %v5458_v53 = vpop.permute.xlu1 %5457  ;;  %6536 = vmatprep.mubr.f32.mxu0 %v5915_v2  ;;  %v5924_v9 = vld [vmem:[#allocation5 + $0x208] sm:$0xff] }
 0x61d   : > { %5544 = vst.msk [vmem:[#allocation5 + $0x298] sm:$0xff] %vm2859_vm14, %v5458_v53  ;;  %6537 = vmatmul.mubr.f32.gmra.mxu0 %v5914_v46  ;;  %v5966_v53 = vld [vmem:[#allocation5 + $0x458] sm:$0xff] }
 0x61f   : > { %v5712_v41 = vpop.permute.xlu0 %5711  ;;  %v5920_v24 = vld [vmem:[#allocation5 + $0x1c8] sm:$0xff] }
 0x620   : > { %5799 = vst.msk [vmem:[#allocation5 + $0x258] sm:$0xff] %vm2859_vm14, %v5712_v41  ;;  %v5460_v44 = vpop.permute.xlu1 %5459  ;;  %6541 = vmatprep.mubr.f32.mxu0 %v5920_v24  ;;  %v5929_v55 = vld [vmem:[#allocation5 + $0x250] sm:$0xff]  ;;  %v7831_v24 = vld [vmem:[#allocation9 + $0x20] sm:$0xff] }
 0x621   : > { %5545 = vst.msk [vmem:[#allocation5 + $0x2e0] sm:$0xff] %vm2859_vm14, %v5460_v44  ;;  %6542 = vmatmul.mubr.f32.gmra.mxu0 %v5919_v23  ;;  %v7873_v44 = vld [vmem:[#allocation9 + $0x170] sm:$0xff]  ;;  %v5971_v23 = vld [vmem:[#allocation5 + $0x4a0] sm:$0xff] }
 0x622   : > { %9684 = vmatprep.mubr.msk.f32.mxu0 %vm417_vm3, %v5891_v39 }
 0x623   : > { %v5714_v57 = vpop.permute.xlu0 %5713  ;;  %v5925_v15 = vld [vmem:[#allocation5 + $0x210] sm:$0xff] }
 0x624   : > { %5800 = vst.msk [vmem:[#allocation5 + $0x2a0] sm:$0xff] %vm2859_vm14, %v5714_v57  ;;  %v5462_v54 = vpop.permute.xlu1 %5461  ;;  %6546 = vmatprep.mubr.f32.mxu1 %v5925_v15  ;;  %v5934_v26 = vld [vmem:[#allocation5 + $0x298] sm:$0xff] }
 0x625   : > { %5546 = vst.msk [vmem:[#allocation5 + $0x328] sm:$0xff] %vm2859_vm14, %v5462_v54  ;;  %6547 = vmatmul.mubr.f32.vlgmr.msra.gmra.mxu1 %v5924_v9  ;;  %9685 = vmatmul.mubr.msk.f32.vlgmr.msra.gmra.mxu0 %vm417_vm3, %v5896_v32  ;;  %v7830_v15 = vld [vmem:[#allocation9 + $0x18] sm:$0xff]  ;;  %v5976_v9 = vld [vmem:[#allocation5 + $0x4e8] sm:$0xff]  ;;  %v5981_v32 = vld [vmem:[#allocation5 + $0x530] sm:$0xff] }
 0x626   : > { %9687 = vmatprep.mubr.msk.f32.mxu0 %vm417_vm3, %v5901_v30  ;;  %7979 = vmatpush1.msra.mxu1 %v7842_v0  ;;  %v7829_v30 = vld [vmem:[#allocation9 + $0x10] sm:$0xff] }
 0x627   : > { %v5716_v7 = vpop.permute.xlu0 %5715  ;;  %v5930_v38 = vld [vmem:[#allocation5 + $0x258] sm:$0xff]  ;;  %7980 = vmatprep.subr.mxu1 %v13452_v56  ;;  %8204 = vmatpush1.msra.mxu0 %v7874_v52  ;;  %v7869_v52 = vld [vmem:[#allocation9 + $0x150] sm:$0xff] }
 0x628   : > { %5801 = vst.msk [vmem:[#allocation5 + $0x2e8] sm:$0xff] %vm2859_vm14, %v5716_v7  ;;  %v5464_v51 = vpop.permute.xlu1 %5463  ;;  %6551 = vmatprep.mubr.f32.mxu1 %v5930_v38  ;;  %7981 = vmatpush1.msra.mxu1 %v7841_v25  ;;  %v5939_v17 = vld [vmem:[#allocation5 + $0x2e0] sm:$0xff]  ;;  %v5986_v38 = vld [vmem:[#allocation5 + $0x578] sm:$0xff] }
 0x629   : > { %5547 = vst.msk [vmem:[#allocation5 + $0x370] sm:$0xff] %vm2859_vm14, %v5464_v51  ;;  %6552 = vmatmul.mubr.f32.gmra.mxu1 %v5929_v55  ;;  %9688 = vmatmul.mubr.msk.f32.gmra.mxu0 %vm417_vm3, %v5906_v36  ;;  %v7828_v36 = vld [vmem:[#allocation9 + $0x8] sm:$0xff] }
 0x62a   : > { %9690 = vmatprep.mubr.msk.f32.mxu0 %vm417_vm3, %v5911_v18  ;;  %7982 = vmatprep.subr.mxu1 %v13452_v56 }
 0x62b   : > { %v5718_v22 = vpop.permute.xlu0 %5717  ;;  %v5935_v37 = vld [vmem:[#allocation5 + $0x2a0] sm:$0xff]  ;;  %7983 = vmatpush1.msra.mxu1 %v7840_v1  ;;  %8205 = vmatprep.subr.mxu0 %v13674_v63  ;;  %v7872_v1 = vld [vmem:[#allocation9 + $0x168] sm:$0xff] }
 0x62c   : > { %5802 = vst.msk [vmem:[#allocation5 + $0x330] sm:$0xff] %vm2859_vm14, %v5718_v22  ;;  %v5466_v59 = vpop.permute.xlu1 %5465  ;;  %6556 = vmatprep.mubr.f32.mxu1 %v5935_v37  ;;  %7984 = vmatprep.subr.mxu1 %v13452_v56  ;;  %v5944_v20 = vld [vmem:[#allocation5 + $0x328] sm:$0xff]  ;;  %v5991_v22 = vld [vmem:[#allocation5 + $0x5c0] sm:$0xff] }
 0x62d   : > { %5548 = vst.msk [vmem:[#allocation5 + $0x3b8] sm:$0xff] %vm2859_vm14, %v5466_v59  ;;  %6557 = vmatmul.mubr.f32.gmra.mxu1 %v5934_v26  ;;  %9691 = vmatmul.mubr.msk.f32.gmra.mxu0 %vm417_vm3, %v5916_v19  ;;  %v7827_v26 = vld [vmem:[#allocation9] sm:$0xff] }
 0x62e   : > { %9693 = vmatprep.mubr.msk.f32.mxu0 %vm417_vm3, %v5921_v49  ;;  %7985 = vmatpush1.msra.mxu1 %v7839_v33 }
 0x62f   : > { %v5720_v42 = vpop.permute.xlu0 %5719  ;;  %v5940_v62 = vld [vmem:[#allocation5 + $0x2e8] sm:$0xff]  ;;  %7986 = vmatprep.subr.mxu1 %v13452_v56  ;;  %8206 = vmatpush1.msra.mxu0 %v7873_v44  ;;  %v6041_v44 = vld [vmem:[#allocation5 + $0x890] sm:$0xff] }
 0x630   : > { %5803 = vst.msk [vmem:[#allocation5 + $0x378] sm:$0xff] %vm2859_vm14, %v5720_v42  ;;  %v5468_v21 = vpop.permute.xlu1 %5467  ;;  %6561 = vmatprep.mubr.f32.mxu1 %v5940_v62  ;;  %7987 = vmatpush1.msra.mxu1 %v7838_v14  ;;  %v5949_v28 = vld [vmem:[#allocation5 + $0x370] sm:$0xff]  ;;  %v5996_v14 = vld [vmem:[#allocation5 + $0x608] sm:$0xff] }
 0x631   : > { %5549 = vst.msk [vmem:[#allocation5 + $0x400] sm:$0xff] %vm2859_vm14, %v5468_v21  ;;  %6562 = vmatmul.mubr.f32.gmra.mxu1 %v5939_v17  ;;  %9694 = vmatmul.mubr.msk.f32.gmra.mxu0 %vm417_vm3, %v5926_v29  ;;  %v6001_v62 = vld [vmem:[#allocation5 + $0x650] sm:$0xff]  ;;  %v7858_v21 = vld [vmem:[#allocation9 + $0xf8] sm:$0xff] }
 0x632   : > { %9696 = vmatprep.mubr.msk.f32.mxu0 %vm417_vm3, %v5931_v35  ;;  %7988 = vmatprep.subr.mxu1 %v13452_v56  ;;  %v7871_v35 = vld [vmem:[#allocation9 + $0x160] sm:$0xff] }
 0x633   : > { %v5722_v48 = vpop.permute.xlu0 %5721  ;;  %v5945_v8 = vld [vmem:[#allocation5 + $0x330] sm:$0xff]  ;;  %7989 = vmatpush1.msra.mxu1 %v7837_v40  ;;  %8207 = vmatprep.subr.mxu0 %v13674_v63 }
 0x634   : > { %5804 = vst.msk [vmem:[#allocation5 + $0x3c0] sm:$0xff] %vm2859_vm14, %v5722_v48  ;;  %v5470_v47 = vpop.permute.xlu1 %5469  ;;  %6566 = vmatprep.mubr.f32.mxu1 %v5945_v8  ;;  %7990 = vmatprep.subr.mxu1 %v13452_v56  ;;  %v5954_v34 = vld [vmem:[#allocation5 + $0x3b8] sm:$0xff] }
 0x635   : > { %5550 = vst.msk [vmem:[#allocation5 + $0x448] sm:$0xff] %vm2859_vm14, %v5470_v47  ;;  %6567 = vmatmul.mubr.f32.gmra.mxu1 %v5944_v20  ;;  %9697 = vmatmul.mubr.msk.f32.gmra.mxu0 %vm417_vm3, %v5936_v61  ;;  %v6011_v20 = vld [vmem:[#allocation5 + $0x6e0] sm:$0xff]  ;;  %v7870_v61 = vld [vmem:[#allocation9 + $0x158] sm:$0xff] }
 0x636   : > { %9699 = vmatprep.mubr.msk.f32.mxu0 %vm417_vm3, %v5941_v31  ;;  %7991 = vmatpush1.msra.mxu1 %v7836_v4  ;;  %v6006_v4 = vld [vmem:[#allocation5 + $0x698] sm:$0xff] }
 0x637   : > { %v5724_v10 = vpop.permute.xlu0 %5723  ;;  %v5950_v58 = vld [vmem:[#allocation5 + $0x378] sm:$0xff]  ;;  %7992 = vmatprep.subr.mxu1 %v13452_v56  ;;  %8208 = vmatpush1.msra.mxu0 %v7872_v1 }
 0x638   : > { %5805 = vst.msk [vmem:[#allocation5 + $0x408] sm:$0xff] %vm2859_vm14, %v5724_v10  ;;  %v5472_v11 = vpop.permute.xlu1 %5471  ;;  %6571 = vmatprep.mubr.f32.mxu1 %v5950_v58  ;;  %7993 = vmatpush1.msra.mxu1 %v7835_v60  ;;  %v5959_v41 = vld [vmem:[#allocation5 + $0x400] sm:$0xff]  ;;  %v7857_v58 = vld [vmem:[#allocation9 + $0xf0] sm:$0xff] }
 0x639   : > { %5551 = vst.msk [vmem:[#allocation5 + $0x490] sm:$0xff] %vm2859_vm14, %v5472_v11  ;;  %6572 = vmatmul.mubr.f32.gmra.mxu1 %v5949_v28  ;;  %9700 = vmatmul.mubr.msk.f32.gmra.mxu0 %vm417_vm3, %v5946_v50  ;;  %v6016_v50 = vld [vmem:[#allocation5 + $0x728] sm:$0xff] }
 0x63a   : > { %9702 = vmatprep.mubr.msk.f32.mxu0 %vm417_vm3, %v5951_v12  ;;  %7994 = vmatprep.subr.mxu1 %v13452_v56  ;;  %v5961_v56 = vld [vmem:[#allocation5 + $0x410] sm:$0xff] }
 0x63b   : > { %v5726_v3 = vpop.permute.xlu0 %5725  ;;  %v5955_v6 = vld [vmem:[#allocation5 + $0x3c0] sm:$0xff]  ;;  %7995 = vmatpush1.msra.mxu1 %v7834_v43  ;;  %8209 = vmatprep.subr.mxu0 %v13674_v63  ;;  %v6021_v12 = vld [vmem:[#allocation5 + $0x770] sm:$0xff] }
 0x63c   : > { %5806 = vst.msk [vmem:[#allocation5 + $0x450] sm:$0xff] %vm2859_vm14, %v5726_v3  ;;  %v5474_v16 = vpop.permute.xlu1 %5473  ;;  %6576 = vmatprep.mubr.f32.mxu1 %v5955_v6  ;;  %7996 = vmatprep.subr.mxu1 %v13674_v63  ;;  %v5964_v54 = vld [vmem:[#allocation5 + $0x448] sm:$0xff] }
 0x63d   : > { %5552 = vst.msk [vmem:[#allocation5 + $0x4d8] sm:$0xff] %vm2859_vm14, %v5474_v16  ;;  %6577 = vmatmul.mubr.f32.gmra.mxu1 %v5954_v34  ;;  %9703 = vmatmul.mubr.msk.f32.gmra.mxu0 %vm417_vm3, %v5956_v5  ;;  %v6026_v16 = vld [vmem:[#allocation5 + $0x7b8] sm:$0xff] }
 0x63e   : > { %9705 = vmatprep.mubr.msk.f32.mxu0 %vm417_vm3, %v5961_v56  ;;  %7997 = vmatpush1.msra.mxu1 %v7833_v27  ;;  %v7856_v56 = vld [vmem:[#allocation9 + $0xe8] sm:$0xff] }
 0x63f   : > { %v5728_v45 = vpop.permute.xlu0 %5727  ;;  %v5960_v2 = vld [vmem:[#allocation5 + $0x408] sm:$0xff]  ;;  %7998 = vmatprep.subr.mxu1 %v13674_v63  ;;  %8210 = vmatpush1.msra.mxu0 %v7871_v35 }
 0x640   : > { %5807 = vst.msk [vmem:[#allocation5 + $0x498] sm:$0xff] %vm2859_vm14, %v5728_v45  ;;  %v5476_v46 = vpop.permute.xlu1 %5475  ;;  %6581 = vmatprep.mubr.f32.mxu1 %v5960_v2  ;;  %7999 = vmatpush1.msra.mxu1 %v7832_v13  ;;  %v5969_v55 = vld [vmem:[#allocation5 + $0x490] sm:$0xff]  ;;  %v7868_v13 = vld [vmem:[#allocation9 + $0x148] sm:$0xff]  ;;  %v6031_v2 = vld [vmem:[#allocation5 + $0x800] sm:$0xff] }
 0x641   : > { %5553 = vst.msk [vmem:[#allocation5 + $0x520] sm:$0xff] %vm2859_vm14, %v5476_v46  ;;  %6582 = vmatmul.mubr.f32.gmra.mxu1 %v5959_v41  ;;  %9706 = vmatmul.mubr.msk.f32.gmra.mxu0 %vm417_vm3, %v5966_v53 }
 0x642   : > { %9708 = vmatprep.mubr.msk.f32.mxu0 %vm417_vm3, %v5971_v23  ;;  %8000 = vmatprep.subr.mxu1 %v13674_v63 }
 0x643   : > { %v5730_v39 = vpop.permute.xlu0 %5729  ;;  %v5965_v57 = vld [vmem:[#allocation5 + $0x450] sm:$0xff]  ;;  %8001 = vmatpush1.msra.mxu1 %v7831_v24  ;;  %8211 = vmatprep.subr.mxu0 %v13674_v63  ;;  %v6036_v24 = vld [vmem:[#allocation5 + $0x848] sm:$0xff] }
 0x644   : > { %5808 = vst.msk [vmem:[#allocation5 + $0x4e0] sm:$0xff] %vm2859_vm14, %v5730_v39  ;;  %v5478_v0 = vpop.permute.xlu1 %5477  ;;  %6586 = vmatprep.mubr.f32.mxu1 %v5965_v57  ;;  %8002 = vmatprep.subr.mxu1 %v13674_v63  ;;  %v5974_v49 = vld [vmem:[#allocation5 + $0x4d8] sm:$0xff]  ;;  %v7867_v57 = vld [vmem:[#allocation9 + $0x140] sm:$0xff] }
 0x645   : > { %5554 = vst.msk [vmem:[#allocation5 + $0x568] sm:$0xff] %vm2859_vm14, %v5478_v0  ;;  %6587 = vmatmul.mubr.f32.gmra.mxu1 %v5964_v54  ;;  %9709 = vmatmul.mubr.msk.f32.gmra.mxu0 %vm417_vm3, %v5976_v9  ;;  %v6046_v54 = vld [vmem:[#allocation5 + $0x8d8] sm:$0xff] }
 0x646   : > { %9711 = vmatprep.mubr.msk.f32.mxu0 %vm417_vm3, %v5981_v32  ;;  %8003 = vmatpush1.msra.mxu1 %v7830_v15  ;;  %v7855_v15 = vld [vmem:[#allocation9 + $0xe0] sm:$0xff] }
 0x647   : > { %v5732_v25 = vpop.permute.xlu0 %5731  ;;  %v5970_v7 = vld [vmem:[#allocation5 + $0x498] sm:$0xff]  ;;  %8004 = vmatprep.subr.mxu1 %v13674_v63  ;;  %8212 = vmatpush1.msra.mxu0 %v7870_v61 }
 0x648   : > { %5809 = vst.msk [vmem:[#allocation5 + $0x528] sm:$0xff] %vm2859_vm14, %v5732_v25  ;;  %v5480_v51 = vpop.permute.xlu1 %5479  ;;  %6591 = vmatprep.mubr.f32.mxu1 %v5970_v7  ;;  %8005 = vmatpush1.msra.mxu1 %v7829_v30  ;;  %v5979_v8 = vld [vmem:[#allocation5 + $0x520] sm:$0xff]  ;;  %v7866_v25 = vld [vmem:[#allocation9 + $0x138] sm:$0xff] }
 0x649   : > { %5555 = vst.msk [vmem:[#allocation5 + $0x5b0] sm:$0xff] %vm2859_vm14, %v5480_v51  ;;  %v13696_v18 = vpop.f32.mrf.mxu0  ;;  %6592 = vmatmul.mubr.f32.gmra.mxu1 %v5969_v55  ;;  %9712 = vmatmul.mubr.msk.f32.gmra.mxu0 %vm417_vm3, %v5986_v38  ;;  %v7854_v51 = vld [vmem:[#allocation9 + $0xd8] sm:$0xff] }
 0x64a   : > { %9714 = vmatprep.mubr.msk.f32.mxu0 %vm417_vm3, %v5991_v22  ;;  %8006 = vmatprep.subr.mxu1 %v13674_v63 }
 0x64b   : > { %v6290_v37 = vpop.f32.mrf.mxu0  ;;  %v5734_v33 = vpop.permute.xlu0 %5733  ;;  %v5975_v59 = vld [vmem:[#allocation5 + $0x4e0] sm:$0xff]  ;;  %8007 = vmatpush1.msra.mxu1 %v7828_v36  ;;  %8213 = vmatprep.subr.mxu0 %v13674_v63  ;;  %v7865_v36 = vld [vmem:[#allocation9 + $0x130] sm:$0xff] }
 0x64c   : > { %5810 = vst.msk [vmem:[#allocation5 + $0x570] sm:$0xff] %vm2859_vm14, %v5734_v33  ;;  %v5482_v19 = vpop.permute.xlu1 %5481  ;;  %6596 = vmatprep.mubr.f32.mxu1 %v5975_v59  ;;  %8008 = vmatprep.subr.mxu1 %v13674_v63  ;;  %v5984_v28 = vld [vmem:[#allocation5 + $0x568] sm:$0xff] }
 0x64d   : > { %5556 = vst.msk [vmem:[#allocation5 + $0x5f8] sm:$0xff] %vm2859_vm14, %v5482_v19  ;;  %v13704_v42 = vpop.f32.mrf.mxu0  ;;  %6597 = vmatmul.mubr.f32.gmra.mxu1 %v5974_v49  ;;  %9715 = vmatmul.mubr.msk.f32.gmra.mxu0 %vm417_vm3, %v5996_v14  ;;  %v7864_v33 = vld [vmem:[#allocation9 + $0x128] sm:$0xff]  ;;  %v7853_v19 = vld [vmem:[#allocation9 + $0xd0] sm:$0xff]  ;;  %v7863_v14 = vld [vmem:[#allocation9 + $0x120] sm:$0xff] }
 0x64e   : > { %9717 = vmatprep.mubr.msk.f32.mxu0 %vm417_vm3, %v6001_v62  ;;  %8009 = vmatpush1.msra.mxu1 %v7827_v26 }
 0x64f   : > { %v6295_v17 = vpop.f32.mrf.mxu0  ;;  %v5736_v29 = vpop.permute.xlu0 %5735  ;;  %v5980_v40 = vld [vmem:[#allocation5 + $0x528] sm:$0xff]  ;;  %8010 = vmatprep.subr.mxu1 %v13674_v63  ;;  %8214 = vmatpush1.msra.mxu0 %v7869_v52 }
 0x650   : > { %5811 = vst.msk [vmem:[#allocation5 + $0x5b8] sm:$0xff] %vm2859_vm14, %v5736_v29  ;;  %v5484_v48 = vpop.permute.xlu1 %5483  ;;  %6601 = vmatprep.mubr.f32.mxu1 %v5980_v40  ;;  %8011 = vmatpush2.msra.mxu1 %v7858_v21  ;;  %v5989_v5 = vld [vmem:[#allocation5 + $0x5b0] sm:$0xff]  ;;  %v7852_v29 = vld [vmem:[#allocation9 + $0xc8] sm:$0xff] }
 0x651   : > { %5557 = vst.msk [vmem:[#allocation5 + $0x640] sm:$0xff] %vm2859_vm14, %v5484_v48  ;;  %v13712_v47 = vpop.f32.mrf.mxu0  ;;  %6602 = vmatmul.mubr.f32.gmra.mxu1 %v5979_v8  ;;  %9718 = vmatmul.mubr.msk.f32.gmra.mxu0 %vm417_vm3, %v6006_v4  ;;  %v7862_v48 = vld [vmem:[#allocation9 + $0x118] sm:$0xff]  ;;  %v7861_v4 = vld [vmem:[#allocation9 + $0x110] sm:$0xff] }
 0x652   : > { %9720 = vmatprep.mubr.msk.f32.mxu0 %vm417_vm3, %v6011_v20  ;;  %8012 = vmatprep.subr.mxu1 %v13674_v63 }
 0x653   : > { %v6300_v31 = vpop.f32.mrf.mxu0  ;;  %v5738_v60 = vpop.permute.xlu0 %5737  ;;  %v5985_v10 = vld [vmem:[#allocation5 + $0x570] sm:$0xff]  ;;  %8013 = vmatpush2.msra.mxu1 %v7857_v58  ;;  %8215 = vmatprep.subr.mxu0 %v13674_v63 }
 0x654   : > { %5812 = vst.msk [vmem:[#allocation5 + $0x600] sm:$0xff] %vm2859_vm14, %v5738_v60  ;;  %v5486_v11 = vpop.permute.xlu1 %5485  ;;  %6606 = vmatprep.mubr.f32.mxu1 %v5985_v10  ;;  %8014 = vmatprep.subr.mxu1 %v13674_v63  ;;  %v5994_v39 = vld [vmem:[#allocation5 + $0x5f8] sm:$0xff]  ;;  %v7851_v60 = vld [vmem:[#allocation9 + $0xc0] sm:$0xff] }
 0x655   : > { %5558 = vst.msk [vmem:[#allocation5 + $0x688] sm:$0xff] %vm2859_vm14, %v5486_v11  ;;  %v13720_v43 = vpop.f32.mrf.mxu0  ;;  %6607 = vmatmul.mubr.f32.gmra.mxu1 %v5984_v28  ;;  %9721 = vmatmul.mubr.msk.f32.gmra.mxu0 %vm417_vm3, %v6016_v50  ;;  %v7860_v11 = vld [vmem:[#allocation9 + $0x108] sm:$0xff]  ;;  %v7859_v50 = vld [vmem:[#allocation9 + $0x100] sm:$0xff] }
 0x656   : > { %9723 = vmatprep.mubr.msk.f32.mxu0 %vm417_vm3, %v6021_v12  ;;  %8015 = vmatpush2.msra.mxu1 %v7856_v56  ;;  %v7889_v56 = vld [vmem:[#allocation9 + $0x1f0] sm:$0xff] }
 0x657   : > { %v6305_v3 = vpop.f32.mrf.mxu0  ;;  %v5740_v6 = vpop.permute.xlu0 %5739  ;;  %v5990_v27 = vld [vmem:[#allocation5 + $0x5b8] sm:$0xff]  ;;  %8216 = vmatpush1.msra.mxu0 %v7868_v13  ;;  %8016 = vmatprep.subr.mxu1 %v13674_v63 }
 0x658   : > { %5813 = vst.msk [vmem:[#allocation5 + $0x648] sm:$0xff] %vm2859_vm14, %v5740_v6  ;;  %v5488_v34 = vpop.permute.xlu1 %5487  ;;  %6611 = vmatprep.mubr.f32.mxu1 %v5990_v27  ;;  %8217 = vmatprep.subr.mxu0 %v13674_v63  ;;  %v5999_v38 = vld [vmem:[#allocation5 + $0x640] sm:$0xff]  ;;  %v7850_v6 = vld [vmem:[#allocation9 + $0xb8] sm:$0xff] }
 0x659   : > { %5559 = vst.msk [vmem:[#allocation5 + $0x6d0] sm:$0xff] %vm2859_vm14, %v5488_v34  ;;  %v13728_v45 = vpop.f32.mrf.mxu0  ;;  %6612 = vmatmul.mubr.f32.gmra.mxu1 %v5989_v5  ;;  %9724 = vmatmul.mubr.msk.f32.gmra.mxu0 %vm417_vm3, %v6026_v16  ;;  %v7890_v34 = vld [vmem:[#allocation9 + $0x1f8] sm:$0xff] }
 0x65a   : > { %9726 = vmatprep.mubr.msk.f32.mxu0 %vm417_vm3, %v6031_v2  ;;  %8218 = vmatpush1.msra.mxu0 %v7867_v57 }
 0x65b   : > { %v5742_v53 = vpop.permute.xlu0 %5741  ;;  %v6310_v46 = vpop.f32.mrf.mxu0  ;;  %v5995_v41 = vld [vmem:[#allocation5 + $0x600] sm:$0xff]  ;;  %8017 = vmatpush2.msra.mxu1 %v7855_v15  ;;  %8219 = vmatprep.subr.mxu0 %v13674_v63 }
 0x65c   : > { %5814 = vst.msk [vmem:[#allocation5 + $0x690] sm:$0xff] %vm2859_vm14, %v5742_v53  ;;  %v5490_v23 = vpop.permute.xlu1 %5489  ;;  %6616 = vmatprep.mubr.f32.mxu1 %v5995_v41  ;;  %8220 = vmatpush1.msra.mxu0 %v7866_v25  ;;  %v6004_v26 = vld [vmem:[#allocation5 + $0x688] sm:$0xff]  ;;  %v7849_v46 = vld [vmem:[#allocation9 + $0xb0] sm:$0xff] }
 0x65d   : > { %5560 = vst.msk [vmem:[#allocation5 + $0x718] sm:$0xff] %vm2859_vm14, %v5490_v23  ;;  %v13736_v0 = vpop.f32.mrf.mxu0  ;;  %6617 = vmatmul.mubr.f32.gmra.mxu1 %v5994_v39  ;;  %9727 = vmatmul.mubr.msk.f32.gmra.mxu0 %vm417_vm3, %v6036_v24  ;;  %v7848_v39 = vld [vmem:[#allocation9 + $0xa8] sm:$0xff] }
 0x65e   : > { %9729 = vmatprep.mubr.msk.f32.mxu0 %vm417_vm3, %v6041_v44  ;;  %8018 = vmatprep.subr.mxu1 %v13674_v63  ;;  %v7888_v44 = vld [vmem:[#allocation9 + $0x1e8] sm:$0xff] }
 0x65f   : > { %v5744_v9 = vpop.permute.xlu0 %5743  ;;  %v6315_v32 = vpop.f32.mrf.mxu0  ;;  %v6000_v30 = vld [vmem:[#allocation5 + $0x648] sm:$0xff]  ;;  %8221 = vmatprep.subr.mxu0 %v13674_v63  ;;  %8019 = vmatpush2.msra.mxu1 %v7854_v51 }
 0x660   : > { %5815 = vst.msk [vmem:[#allocation5 + $0x6d8] sm:$0xff] %vm2859_vm14, %v5744_v9  ;;  %v5492_v7 = vpop.permute.xlu1 %5491  ;;  %6621 = vmatprep.mubr.f32.mxu1 %v6000_v30  ;;  %8222 = vmatpush1.msra.mxu0 %v7865_v36  ;;  %v6009_v35 = vld [vmem:[#allocation5 + $0x6d0] sm:$0xff]  ;;  %v7887_v9 = vld [vmem:[#allocation9 + $0x1e0] sm:$0xff] }
 0x661   : > { %5561 = vst.msk [vmem:[#allocation5 + $0x760] sm:$0xff] %vm2859_vm14, %v5492_v7  ;;  %v13744_v55 = vpop.f32.mrf.mxu0  ;;  %6622 = vmatmul.mubr.f32.gmra.mxu1 %v5999_v38  ;;  %9730 = vmatmul.mubr.msk.f32.gmra.mxu0 %vm417_vm3, %v6046_v54  ;;  %v7847_v30 = vld [vmem:[#allocation9 + $0xa0] sm:$0xff]  ;;  %v7886_v7 = vld [vmem:[#allocation9 + $0x1d8] sm:$0xff] }
 0x662   : > { %8223 = vmatprep.subr.mxu0 %v13674_v63  ;;  %8020 = vmatprep.subr.mxu1 %v13674_v63 }
 0x663   : > { %v5746_v1 = vpop.permute.xlu0 %5745  ;;  %v6320_v22 = vpop.f32.mrf.mxu0  ;;  %v6005_v37 = vld [vmem:[#allocation5 + $0x690] sm:$0xff]  ;;  %8224 = vmatpush1.msra.mxu0 %v7864_v33  ;;  %8021 = vmatpush2.msra.mxu1 %v7853_v19 }
 0x664   : > { %5816 = vst.msk [vmem:[#allocation5 + $0x720] sm:$0xff] %vm2859_vm14, %v5746_v1  ;;  %v5494_v59 = vpop.permute.xlu1 %5493  ;;  %6626 = vmatprep.mubr.f32.mxu1 %v6005_v37  ;;  %8225 = vmatprep.subr.mxu0 %v13674_v63  ;;  %v6014_v58 = vld [vmem:[#allocation5 + $0x718] sm:$0xff]  ;;  %v7885_v1 = vld [vmem:[#allocation9 + $0x1d0] sm:$0xff] }
 0x665   : > { %5562 = vst.msk [vmem:[#allocation5 + $0x7a8] sm:$0xff] %vm2859_vm14, %v5494_v59  ;;  %v13751_v49 = vpop.f32.mrf.mxu0  ;;  %6627 = vmatmul.mubr.f32.gmra.mxu1 %v6004_v26  ;;  %8226 = vmatpush1.msra.mxu0 %v7863_v14  ;;  %v7846_v37 = vld [vmem:[#allocation9 + $0x98] sm:$0xff]  ;;  %v7884_v59 = vld [vmem:[#allocation9 + $0x1c8] sm:$0xff]  ;;  %v7845_v14 = vld [vmem:[#allocation9 + $0x90] sm:$0xff] }
 0x666   : > { %8022 = vmatprep.subr.mxu1 %v13674_v63  ;;  %8227 = vmatprep.subr.mxu0 %v13674_v63 }
 0x667   : > { %v5748_v62 = vpop.permute.xlu0 %5747  ;;  %v6325_v21 = vpop.f32.mrf.mxu0  ;;  %v6010_v17 = vld [vmem:[#allocation5 + $0x6d8] sm:$0xff]  ;;  %8023 = vmatpush2.msra.mxu1 %v7852_v29  ;;  %8228 = vmatpush1.msra.mxu0 %v7862_v48  ;;  %v7844_v48 = vld [vmem:[#allocation9 + $0x88] sm:$0xff] }
 0x668   : > { %5817 = vst.msk [vmem:[#allocation5 + $0x768] sm:$0xff] %vm2859_vm14, %v5748_v62  ;;  %v5496_v40 = vpop.permute.xlu1 %5495  ;;  %6631 = vmatprep.mubr.f32.mxu1 %v6010_v17  ;;  %8024 = vmatprep.subr.mxu1 %v13674_v63  ;;  %v6019_v16 = vld [vmem:[#allocation5 + $0x760] sm:$0xff]  ;;  %v7882_v29 = vld [vmem:[#allocation9 + $0x1b8] sm:$0xff] }
 0x669   : > { %5563 = vst.msk [vmem:[#allocation5 + $0x7f0] sm:$0xff] %vm2859_vm14, %v5496_v40  ;;  %v13758_v8 = vpop.f32.mrf.mxu0  ;;  %6632 = vmatmul.mubr.f32.gmra.mxu1 %v6009_v35  ;;  %8229 = vmatprep.subr.mxu0 %v13674_v63  ;;  %v7883_v21 = vld [vmem:[#allocation9 + $0x1c0] sm:$0xff] }
 0x66a   : > { %8230 = vmatpush1.msra.mxu0 %v7861_v4  ;;  %8025 = vmatpush2.msra.mxu1 %v7851_v60  ;;  %v7540_v60 = vld [vmem:[#allocation5 + $0x8] sm:$0xff] }
 0x66b   : > { %v5750_v20 = vpop.permute.xlu0 %5749  ;;  %v6330_v61 = vpop.f32.mrf.mxu0  ;;  %v6015_v31 = vld [vmem:[#allocation5 + $0x720] sm:$0xff]  ;;  %8231 = vmatprep.subr.mxu0 %v13674_v63  ;;  %8026 = vmatprep.subr.mxu1 %v13674_v63 }
 0x66c   : > { %5818 = vst.msk [vmem:[#allocation5 + $0x7b0] sm:$0xff] %vm2859_vm14, %v5750_v20  ;;  %v5498_v10 = vpop.permute.xlu1 %5497  ;;  %6636 = vmatprep.mubr.f32.mxu1 %v6015_v31  ;;  %8232 = vmatpush1.msra.mxu0 %v7860_v11  ;;  %v6024_v24 = vld [vmem:[#allocation5 + $0x7a8] sm:$0xff]  ;;  %v7881_v20 = vld [vmem:[#allocation9 + $0x1b0] sm:$0xff]  ;;  %v7843_v31 = vld [vmem:[#allocation9 + $0x80] sm:$0xff] }
 0x66d   : > { %5564 = vst.msk [vmem:[#allocation5 + $0x838] sm:$0xff] %vm2859_vm14, %v5498_v10  ;;  %v13766_v28 = vpop.f32.mrf.mxu0  ;;  %6637 = vmatmul.mubr.f32.gmra.mxu1 %v6014_v58  ;;  %8233 = vmatprep.subr.mxu0 %v13674_v63  ;;  %v7880_v10 = vld [vmem:[#allocation9 + $0x1a8] sm:$0xff]  ;;  %v7879_v11 = vld [vmem:[#allocation9 + $0x1a0] sm:$0xff] }
 0x66e   : > { %8234 = vmatpush1.msra.mxu0 %v7859_v50  ;;  %8027 = vmatpush2.msra.mxu1 %v7850_v6 }
 0x66f   : > { %v5752_v12 = vpop.permute.xlu0 %5751  ;;  %v6335_v52 = vpop.f32.mrf.mxu0  ;;  %v6020_v3 = vld [vmem:[#allocation5 + $0x768] sm:$0xff]  ;;  %8235 = vmatprep.subr.mxu0 %v13674_v63  ;;  %8028 = vmatprep.subr.mxu1 %v13674_v63 }
 0x670   : > { %5819 = vst.msk [vmem:[#allocation5 + $0x7f8] sm:$0xff] %vm2859_vm14, %v5752_v12  ;;  %v5500_v27 = vpop.permute.xlu1 %5499  ;;  %6641 = vmatprep.mubr.f32.mxu1 %v6020_v3  ;;  %8236 = vmatpush2.msra.mxu0 %v7890_v34  ;;  %v6029_v32 = vld [vmem:[#allocation5 + $0x7f0] sm:$0xff]  ;;  %v7906_v12 = vld [vmem:[#allocation9 + $0x278] sm:$0xff] }
 0x671   : > { %5565 = vst.msk [vmem:[#allocation5 + $0x880] sm:$0xff] %vm2859_vm14, %v5500_v27  ;;  %v13773_v5 = vpop.f32.mrf.mxu0  ;;  %6642 = vmatmul.mubr.f32.gmra.mxu1 %v6019_v16  ;;  %8237 = vmatprep.subr.mxu0 %v13674_v63  ;;  %v7549_v52 = vld [vmem:[#allocation5 + $0x50] sm:$0xff]  ;;  %v7878_v3 = vld [vmem:[#allocation9 + $0x198] sm:$0xff] }
 0x672   : > { %8238 = vmatpush2.msra.mxu0 %v7889_v56  ;;  %8029 = vmatpush2.msra.mxu1 %v7849_v46  ;;  %v7877_v27 = vld [vmem:[#allocation9 + $0x190] sm:$0xff]  ;;  %v7876_v56 = vld [vmem:[#allocation9 + $0x188] sm:$0xff] }
 0x673   : > { %v5754_v13 = vpop.permute.xlu0 %5753  ;;  %v6340_v2 = vpop.f32.mrf.mxu0  ;;  %v6025_v53 = vld [vmem:[#allocation5 + $0x7b0] sm:$0xff]  ;;  %8239 = vmatprep.subr.mxu0 %v13674_v63  ;;  %8030 = vmatprep.subr.mxu1 %v13674_v63 }
 0x674   : > { %5820 = vst.msk [vmem:[#allocation5 + $0x840] sm:$0xff] %vm2859_vm14, %v5754_v13  ;;  %v5502_v41 = vpop.permute.xlu1 %5501  ;;  %6646 = vmatprep.mubr.f32.mxu1 %v6025_v53  ;;  %8240 = vmatpush2.msra.mxu0 %v7888_v44  ;;  %v6034_v22 = vld [vmem:[#allocation5 + $0x838] sm:$0xff]  ;;  %v7905_v34 = vld [vmem:[#allocation9 + $0x270] sm:$0xff]  ;;  %v7904_v2 = vld [vmem:[#allocation9 + $0x268] sm:$0xff] }
 0x675   : > { %5566 = vst.msk [vmem:[#allocation5 + $0x8c8] sm:$0xff] %vm2859_vm14, %v5502_v41  ;;  %v13780_v23 = vpop.f32.mrf.mxu0  ;;  %6647 = vmatmul.mubr.f32.gmra.mxu1 %v6024_v24  ;;  %8241 = vmatprep.subr.mxu0 %v13674_v63  ;;  %v7875_v53 = vld [vmem:[#allocation9 + $0x180] sm:$0xff]  ;;  %v7902_v44 = vld [vmem:[#allocation9 + $0x258] sm:$0xff] }
 0x676   : > { %8031 = vmatpush2.msra.mxu1 %v7848_v39  ;;  %8242 = vmatpush2.msra.mxu0 %v7887_v9  ;;  %v7903_v41 = vld [vmem:[#allocation9 + $0x260] sm:$0xff] }
 0x677   : > { %v5756_v57 = vpop.permute.xlu0 %5755  ;;  %v6345_v15 = vpop.f32.mrf.mxu0  ;;  %v6030_v54 = vld [vmem:[#allocation5 + $0x7f8] sm:$0xff]  ;;  %8032 = vmatprep.subr.mxu1 %v13674_v63  ;;  %8243 = vmatprep.subr.mxu0 %v13674_v63 }
 0x678   : > { %5821 = vst.msk [vmem:[#allocation5 + $0x888] sm:$0xff] %vm2859_vm14, %v5756_v57  ;;  %6651 = vmatprep.mubr.f32.mxu1 %v6030_v54  ;;  %8033 = vmatpush2.msra.mxu1 %v7847_v30  ;;  %v6039_v62 = vld [vmem:[#allocation5 + $0x880] sm:$0xff]  ;;  %v7901_v57 = vld [vmem:[#allocation9 + $0x250] sm:$0xff]  ;;  %v7900_v54 = vld [vmem:[#allocation9 + $0x248] sm:$0xff] }
 0x679   : > { %v13785_v25 = vpop.f32.mrf.mxu0  ;;  %6652 = vmatmul.mubr.f32.gmra.mxu1 %v6029_v32  ;;  %8244 = vmatpush2.msra.mxu0 %v7886_v7  ;;  %v7899_v32 = vld [vmem:[#allocation9 + $0x240] sm:$0xff]  ;;  %v7898_v7 = vld [vmem:[#allocation9 + $0x238] sm:$0xff] }
 0x67a   : > { %8245 = vmatprep.subr.mxu0 %v13674_v63  ;;  %8034 = vmatprep.subr.mxu1 %v13674_v63 }
 0x67b   : > { %v5758_v38 = vpop.permute.xlu0 %5757  ;;  %v6350_v51 = vpop.f32.mrf.mxu0  ;;  %v6035_v36 = vld [vmem:[#allocation5 + $0x840] sm:$0xff]  ;;  %8246 = vmatpush2.msra.mxu0 %v7885_v1  ;;  %8035 = vmatpush2.msra.mxu1 %v7846_v37  ;;  %v7896_v37 = vld [vmem:[#allocation9 + $0x228] sm:$0xff] }
 0x67c   : > { %5822 = vst.msk [vmem:[#allocation5 + $0x8d0] sm:$0xff] %vm2859_vm14, %v5758_v38  ;;  %6656 = vmatprep.mubr.f32.mxu1 %v6035_v36  ;;  %8247 = vmatprep.subr.mxu0 %v13674_v63  ;;  %v6044_v4 = vld [vmem:[#allocation5 + $0x8c8] sm:$0xff]  ;;  %v7897_v36 = vld [vmem:[#allocation9 + $0x230] sm:$0xff] }
 0x67d   : > { %v13791_v33 = vpop.f32.mrf.mxu0  ;;  %6657 = vmatmul.mubr.f32.gmra.mxu1 %v6034_v22  ;;  %8248 = vmatpush2.msra.mxu0 %v7884_v59 }
 0x67e   : > { %8036 = vmatprep.subr.mxu1 %v13674_v63  ;;  %8249 = vmatprep.subr.mxu0 %v13674_v63 }
 0x67f   : > { %v6355_v26 = vpop.f32.mrf.mxu0  ;;  %v6040_v19 = vld [vmem:[#allocation5 + $0x888] sm:$0xff]  ;;  %8037 = vmatpush2.msra.mxu1 %v7845_v14  ;;  %8250 = vmatpush2.msra.mxu0 %v7883_v21  ;;  %v7894_v21 = vld [vmem:[#allocation9 + $0x218] sm:$0xff] }
 0x680   : > { %6661 = vmatprep.mubr.f32.mxu1 %v6040_v19  ;;  %8038 = vmatprep.subr.mxu1 %v13674_v63  ;;  %v7895_v19 = vld [vmem:[#allocation9 + $0x220] sm:$0xff] }
 0x681   : > { %v13796_v17 = vpop.f32.mrf.mxu0  ;;  %6662 = vmatmul.mubr.f32.gmra.mxu1 %v6039_v62  ;;  %8251 = vmatprep.subr.mxu0 %v13674_v63 }
 0x682   : > { %8252 = vmatpush2.msra.mxu0 %v7882_v29  ;;  %8039 = vmatpush2.msra.mxu1 %v7844_v48 }
 0x683   : > { %v6360_v40 = vpop.f32.mrf.mxu0  ;;  %v6045_v35 = vld [vmem:[#allocation5 + $0x8d0] sm:$0xff]  ;;  %8253 = vmatprep.subr.mxu0 %v13674_v63  ;;  %8040 = vmatprep.subr.mxu1 %v13674_v63 }
 0x684   : > { %6666 = vmatprep.mubr.f32.mxu1 %v6045_v35  ;;  %8254 = vmatpush2.msra.mxu0 %v7881_v20  ;;  %v7893_v35 = vld [vmem:[#allocation9 + $0x210] sm:$0xff]  ;;  %v7892_v20 = vld [vmem:[#allocation9 + $0x208] sm:$0xff] }
 0x685   : > { %v13802_v61 = vpop.f32.mrf.mxu0  ;;  %6667 = vmatmul.mubr.f32.gmra.mxu1 %v6044_v4  ;;  %8255 = vmatprep.subr.mxu0 %v13674_v63 }
 0x686   : > { %8041 = vmatpush2.msra.mxu1 %v7843_v31  ;;  %8042 = vmatprep.mubr.f32.mxu1 %v7540_v60 }
 0x687   : > { %v6365_v58 = vpop.f32.mrf.mxu0  ;;  %8256 = vmatpush2.msra.mxu0 %v7880_v10  ;;  %8428 = vmatprep.subr.mxu1 %v13674_v63  ;;  %v7891_v10 = vld [vmem:[#allocation9 + $0x200] sm:$0xff] }
 0x688   : > { %8257 = vmatprep.subr.mxu0 %v13674_v63 }
 0x689   : > { %v13807_v50 = vpop.f32.mrf.mxu0  ;;  %8043 = vmatmul.mubr.f32.vlgmr.msra.gmra.mxu1 %v13674_v63  ;;  %8258 = vmatpush2.msra.mxu0 %v7879_v11 }
 0x68a   : > { %8259 = vmatprep.subr.mxu0 %v13674_v63  ;;  %8429 = vmatpush1.msra.mxu1 %v7906_v12  ;;  %v7922_v12 = vld [vmem:[#allocation9 + $0x2f8] sm:$0xff] }
 0x68b   : > { %v6370_v6 = vpop.f32.mrf.mxu0  ;;  %8047 = vmatprep.mubr.f32.mxu1 %v7549_v52  ;;  %8260 = vmatpush2.msra.mxu0 %v7878_v3 }
 0x68c   : > { %8261 = vmatprep.subr.mxu0 %v13674_v63  ;;  %8430 = vmatprep.subr.mxu1 %v13674_v63  ;;  %v7921_v6 = vld [vmem:[#allocation9 + $0x2f0] sm:$0xff] }
 0x68d   : > { %v13813_v16 = vpop.f32.mrf.mxu0  ;;  %8048 = vmatmul.mubr.f32.gmra.mxu1 %v13674_v63  ;;  %8262 = vmatpush2.msra.mxu0 %v7877_v27 }
 0x68e   : > { %8263 = vmatprep.subr.mxu0 %v13674_v63  ;;  %8431 = vmatpush1.msra.mxu1 %v7905_v34 }
 0x68f   : > { %v6375_v13 = vpop.f32.mrf.mxu0  ;;  %8264 = vmatpush2.msra.mxu0 %v7876_v56  ;;  %8432 = vmatprep.subr.mxu1 %v13674_v63  ;;  %v7920_v56 = vld [vmem:[#allocation9 + $0x2e8] sm:$0xff] }
 0x690   : > { %8265 = vmatprep.subr.mxu0 %v13674_v63  ;;  %8433 = vmatpush1.msra.mxu1 %v7904_v2  ;;  %v7919_v13 = vld [vmem:[#allocation9 + $0x2e0] sm:$0xff] }
 0x691   : > { %v13819_v46 = vpop.f32.mrf.mxu0  ;;  %8266 = vmatpush2.msra.mxu0 %v7875_v53  ;;  %8434 = vmatprep.subr.mxu1 %v13674_v63 }
 0x692   : > { %8435 = vmatpush1.msra.mxu1 %v7903_v41  ;;  %8653 = vmatprep.subr.mxu0 %v13674_v63 }
 0x693   : > { %v6380_v24 = vpop.f32.mrf.mxu0  ;;  %8436 = vmatprep.subr.mxu1 %v13674_v63 }
 0x694   : > { %8437 = vmatpush1.msra.mxu1 %v7902_v44  ;;  %v7918_v44 = vld [vmem:[#allocation9 + $0x2d8] sm:$0xff] }
 0x695   : > { %v13825_v39 = vpop.f32.mrf.mxu0  ;;  %8438 = vmatprep.subr.mxu1 %v13674_v63 }
 0x696   : > { %8439 = vmatpush1.msra.mxu1 %v7901_v57  ;;  %v7917_v57 = vld [vmem:[#allocation9 + $0x2d0] sm:$0xff] }
 0x697   : > { %v6385_v15 = vpop.f32.mrf.mxu0  ;;  %8440 = vmatprep.subr.mxu1 %v13674_v63 }
 0x698   : > { %8441 = vmatpush1.msra.mxu1 %v7900_v54  ;;  %v7916_v54 = vld [vmem:[#allocation9 + $0x2c8] sm:$0xff] }
 0x699   : > { %v13829_v9 = vpop.f32.mrf.mxu0  ;;  %8442 = vmatprep.subr.mxu1 %v13674_v63 }
 0x69a   : > { %8443 = vmatpush1.msra.mxu1 %v7899_v32 }
 0x69b   : > { %v6390_v30 = vpop.f32.mrf.mxu0  ;;  %8444 = vmatprep.subr.mxu1 %v13674_v63 }
 0x69c   : > { %8445 = vmatpush1.msra.mxu1 %v7898_v7  ;;  %v7915_v30 = vld [vmem:[#allocation9 + $0x2c0] sm:$0xff] }
 0x69d   : > { %v13833_v38 = vpop.f32.mrf.mxu0  ;;  %8446 = vmatprep.subr.mxu1 %v13674_v63 }
 0x69e   : > { %8447 = vmatpush1.msra.mxu1 %v7897_v36 }
 0x69f   : > { %v6395_v51 = vpop.f32.mrf.mxu0  ;;  %8448 = vmatprep.subr.mxu1 %v13674_v63 }
 0x6a0   : > { %8449 = vmatpush1.msra.mxu1 %v7896_v37  ;;  %v7914_v51 = vld [vmem:[#allocation9 + $0x2b8] sm:$0xff] }
 0x6a1   : > { %v13837_v1 = vpop.f32.mrf.mxu0  ;;  %8450 = vmatprep.subr.mxu1 %v13674_v63 }
 0x6a2   : > { %8451 = vmatpush1.msra.mxu1 %v7895_v19 }
 0x6a3   : > { %v6400_v22 = vpop.f32.mrf.mxu0  ;;  %8452 = vmatprep.subr.mxu1 %v13674_v63 }
 0x6a4   : > { %8453 = vmatpush1.msra.mxu1 %v7894_v21  ;;  %v7913_v22 = vld [vmem:[#allocation9 + $0x2b0] sm:$0xff]  ;;  %v7911_v21 = vld [vmem:[#allocation9 + $0x2a0] sm:$0xff] }
 0x6a5   : > { %v13840_v59 = vpop.f32.mrf.mxu0  ;;  %8454 = vmatprep.subr.mxu1 %v13674_v63 }
 0x6a6   : > { %8455 = vmatpush1.msra.mxu1 %v7893_v35 }
 0x6a7   : > { %v6405_v26 = vpop.f32.mrf.mxu0  ;;  %8456 = vmatprep.subr.mxu1 %v13674_v63 }
 0x6a8   : > { %8457 = vmatpush1.msra.mxu1 %v7892_v20  ;;  %v7912_v26 = vld [vmem:[#allocation9 + $0x2a8] sm:$0xff] }
 0x6a9   : > { %v13843_v14 = vpop.f32.mrf.mxu0  ;;  %8458 = vmatprep.subr.mxu1 %v13674_v63 }
 0x6aa   : > { %8459 = vmatpush1.msra.mxu1 %v7891_v10 }
 0x6ab   : > { %v6410_v62 = vpop.f32.mrf.mxu0  ;;  %8460 = vmatprep.subr.mxu1 %v13674_v63 }
 0x6ac   : > { %8461 = vmatpush2.msra.mxu1 %v7922_v12 }
 0x6ad   : > { %v13846_v29 = vpop.f32.mrf.mxu0  ;;  %8462 = vmatprep.subr.mxu1 %v13674_v63 }
 0x6ae   : > { %8463 = vmatpush2.msra.mxu1 %v7921_v6 }
 0x6af   : > { %v6415_v40 = vpop.f32.mrf.mxu0  ;;  %8464 = vmatprep.subr.mxu1 %v13674_v63 }
 0x6b0   : > { %8465 = vmatpush2.msra.mxu1 %v7920_v56 }
 0x6b1   : > { %v13849_v48 = vpop.f32.mrf.mxu0  ;;  %8466 = vmatprep.subr.mxu1 %v13674_v63 }
 0x6b2   : > { %8467 = vmatpush2.msra.mxu1 %v7919_v13 }
 0x6b3   : > { %v6420_v4 = vpop.f32.mrf.mxu0  ;;  %8468 = vmatprep.subr.mxu1 %v13674_v63 }
 0x6b4   : > { %8469 = vmatpush2.msra.mxu1 %v7918_v44  ;;  %v7910_v4 = vld [vmem:[#allocation9 + $0x298] sm:$0xff] }
 0x6b5   : > { %v13852_v31 = vpop.f32.mrf.mxu0  ;;  %8470 = vmatprep.subr.mxu1 %v13674_v63 }
 0x6b6   : > { %8471 = vmatpush2.msra.mxu1 %v7917_v57 }
 0x6b7   : > { %v6425_v60 = vpop.f32.mrf.mxu0  ;;  %8472 = vmatprep.subr.mxu1 %v13674_v63 }
 0x6b8   : > { %8473 = vmatpush2.msra.mxu1 %v7916_v54  ;;  %v13880_v60 = vld [vmem:[%s14986_s6] ss:$0 sm:$0xff] }
 0x6b9   : > { %v13855_v58 = vpop.f32.mrf.mxu0  ;;  %8474 = vmatprep.subr.mxu1 %v13674_v63  ;;  %v6294_v12 = vadd.f32 %v13880_v60, %v13704_v42  ;;  %v6289_v6 = vadd.f32 %v13880_v60, %v13696_v18  ;;  %v13891_v42 = vld [vmem:[#allocation4] sm:$0xff] }
 0x6ba   : > { %8475 = vmatpush2.msra.mxu1 %v7915_v30 }
 0x6bb   : > { %v6430_v11 = vpop.f32.mrf.mxu0  ;;  %8476 = vmatprep.subr.mxu1 %v13674_v63 }
 0x6bc   : > { %8477 = vmatpush2.msra.mxu1 %v7914_v51  ;;  %v7909_v11 = vld [vmem:[#allocation9 + $0x290] sm:$0xff] }
 0x6bd   : > { %v13858_v52 = vpop.f32.mrf.mxu0  ;;  %8478 = vmatprep.subr.mxu1 %v13674_v63 }
 0x6be   : > { %8479 = vmatpush2.msra.mxu1 %v7913_v22 }
 0x6bf   : > { %v6435_v3 = vpop.f32.mrf.mxu0  ;;  %8480 = vmatprep.subr.mxu1 %v13674_v63 }
 0x6c0   : > { %8481 = vmatpush2.msra.mxu1 %v7912_v26 }
 0x6c1   : > { %v13861_v27 = vpop.f32.mrf.mxu0  ;;  %8482 = vmatprep.subr.mxu1 %v13674_v63 }
 0x6c2   : > { %8483 = vmatpush2.msra.mxu1 %v7911_v21 }
 0x6c3   : > { %v6440_v34 = vpop.f32.mrf.mxu0  ;;  %8484 = vmatprep.subr.mxu1 %v13674_v63 }
 0x6c4   : > { %8485 = vmatpush2.msra.mxu1 %v7910_v4 }
 0x6c5   : > { %v13864_v2 = vpop.f32.mrf.mxu0  ;;  %8486 = vmatprep.subr.mxu1 %v13674_v63 }
 0x6c6   : > { %8487 = vmatpush2.msra.mxu1 %v7909_v11 }
 0x6c7   : > { %v6445_v53 = vpop.f32.mrf.mxu0  ;;  %8488 = vmatprep.subr.mxu1 %v13674_v63  ;;  %v6299_v63 = vadd.f32 %v13880_v60, %v13712_v47  ;;  %v7970_v47 = vld [vmem:[#allocation9 + $0x478] sm:$0xff] }
 0x6c8   : > { %v7908_v53 = vld [vmem:[#allocation9 + $0x288] sm:$0xff] }
 0x6c9   : > { %v6513_v41 = vpop.f32.mrf.mxu0  ;;  %8489 = vmatpush2.msra.mxu1 %v7908_v53 }
 0x6ca   : > { %v6514_v44 = vadd.f32 %v6513_v41, %v6289_v6  ;;  %8490 = vmatprep.subr.mxu1 %v13891_v42  ;;  %v6314_v41 = vadd.f32 %v13880_v60, %v13736_v0 }
 0x6cb   : > { %v6515_v24 = vpop.f32.mrf.mxu0 }
 0x6cc   : > { %v6304_v24 = vadd.f32 %v13880_v60, %v13720_v43  ;;  %v7907_v43 = vld [vmem:[#allocation9 + $0x280] sm:$0xff] }
 0x6cd   : > { %v6518_v15 = vpop.f32.mrf.mxu0  ;;  %8491 = vmatpush2.msra.mxu1 %v7907_v43 }
 0x6ce   : > { %v6519_v34 = vadd.f32 %v6518_v15, %v6294_v12  ;;  %9732 = vmatprep.subr.mxu1 %v7970_v47  ;;  %v6324_v12 = vadd.f32 %v13880_v60, %v13751_v49 }
 0x6cf   : > { %v6520_v32 = vpop.f32.mrf.mxu0 }
 0x6d1   : > { %v6523_v7 = vpop.f32.mrf.mxu0 }
 0x6d2   : > { %v6524_v22 = vadd.f32 %v6523_v7, %v6299_v63  ;;  %v6334_v63 = vadd.f32 %v13880_v60, %v13766_v28 }
 0x6d3   : > { %v6525_v36 = vpop.f32.mrf.mxu0 }
 0x6d5   : > { %v6528_v37 = vpop.f32.mrf.mxu0 }
 0x6d6   : > { %v6529_v18 = vadd.f32 %v6528_v37, %v6304_v24 }
 0x6d7   : > { %v6530_v19 = vpop.f32.mrf.mxu0 }
 0x6d9   : > { %v6533_v62 = vpop.f32.mrf.mxu0 }
 0x6db   : > { %v6535_v40 = vpop.f32.mrf.mxu0 }
 0x6dc   : > { %v6309_v40 = vadd.f32 %v13880_v60, %v13728_v45 }
 0x6dd   : > { %v6538_v35 = vpop.f32.mrf.mxu0 }
 0x6de   : > { %v6539_v4 = vadd.f32 %v6538_v35, %v6314_v41 }
 0x6df   : > { %v6540_v20 = vpop.f32.mrf.mxu0 }
 0x6e1   : > { %v13882_v10 = vpop.f32.mrf.mxu0 }
 0x6e3   : > { %v6545_v3 = vpop.f32.mrf.mxu0 }
 0x6e4   : > { %v6534_v3 = vadd.f32 %v6533_v62, %v6309_v40 }
 0x6e5   : > { %v6548_v56 = vpop.f32.mrf.mxu1  ;;  %v9686_v13 = vpop.f32.mrf.mxu0 }
 0x6e6   : > { %v6744_v57 = vadd.f32 %v9686_v13, %v6519_v34  ;;  %v6319_v13 = vadd.f32 %v13880_v60, %v13744_v55  ;;  %v6549_v53 = vadd.f32 %v6548_v56, %v6324_v12  ;;  %v6344_v12 = vadd.f32 %v13880_v60, %v13780_v23 }
 0x6e7   : > { %v6550_v54 = vpop.f32.mrf.mxu1  ;;  %v6738_v32 = vpop.f32.mrf.mxu0 }
 0x6e8   : > { %v13896_v15 = vmax.f32 %v6744_v57, 0.0  ;;  %v6739_v30 = vadd.f32 %v6738_v32, %v6514_v44  ;;  %v6544_v55 = vadd.f32 %v13882_v10, %v6319_v13  ;;  %v6329_v10 = vadd.f32 %v13880_v60, %v13758_v8 }
 0x6e9   : > { %v13898_v51 = vpop.f32.mrf.mxu1  ;;  %v9689_v36 = vpop.f32.mrf.mxu0 }
 0x6ea   : > { %6931 = vst [vmem:[#allocation4 + $0x21] sm:$0xff] %v13896_v15  ;;  %v6897_v26 = vmax.f32 %v6739_v30, 0.0  ;;  %v6754_v19 = vadd.f32 %v9689_v36, %v6529_v18  ;;  %7061 = vst [vmem:[#allocation5 + $0xe0] sm:$0xff] %v13896_v15  ;;  %v7541_v30 = vld [vmem:[#allocation5 + $0x10] sm:$0xff]  ;;  %v7938_v36 = vld [vmem:[#allocation9 + $0x378] sm:$0xff] }
 0x6eb   : > { %v6555_v37 = vpop.f32.mrf.mxu1  ;;  %v6748_v21 = vpop.f32.mrf.mxu0 }
 0x6ec   : > { %6930 = vst [vmem:[#allocation4 + $0x19] sm:$0xff] %v6897_v26  ;;  %7250 = vst [vmem:[#allocation5 + $0x20] sm:$0xff] %v6897_v26  ;;  %v13906_v20 = vmax.f32 %v6754_v19, 0.0  ;;  %v6749_v0 = vadd.f32 %v6748_v21, %v6524_v22  ;;  %8052 = vmatprep.mubr.f32.mxu1 %v6897_v26  ;;  %v7937_v21 = vld [vmem:[#allocation9 + $0x370] sm:$0xff] }
 0x6ed   : > { %7060 = vst [vmem:[#allocation5 + $0x98] sm:$0xff] %v6897_v26  ;;  %v6558_v7 = vpop.f32.mrf.mxu1  ;;  %v9692_v11 = vpop.f32.mrf.mxu0 }
 0x6ee   : > { %6933 = vst [vmem:[#allocation4 + $0x39] sm:$0xff] %v13906_v20  ;;  %v13911_v6 = vmax.f32 %v6749_v0, 0.0  ;;  %v6764_v34 = vadd.f32 %v9692_v11, %v6539_v4  ;;  %7063 = vst [vmem:[#allocation5 + $0x170] sm:$0xff] %v13906_v20  ;;  %v6559_v19 = vadd.f32 %v6558_v7, %v6334_v63 }
 0x6ef   : > { %v6560_v45 = vpop.f32.mrf.mxu1  ;;  %v6758_v35 = vpop.f32.mrf.mxu0 }
 0x6f0   : > { %6932 = vst [vmem:[#allocation4 + $0x31] sm:$0xff] %v13911_v6  ;;  %v13917_v24 = vmax.f32 %v6764_v34, 0.0  ;;  %v6759_v44 = vadd.f32 %v6758_v35, %v6534_v3  ;;  %7062 = vst [vmem:[#allocation5 + $0x128] sm:$0xff] %v13911_v6  ;;  %v6554_v3 = vadd.f32 %v13898_v51, %v6329_v10  ;;  %v7550_v35 = vld [vmem:[#allocation5 + $0x58] sm:$0xff] }
 0x6f1   : > { %v13920_v49 = vpop.f32.mrf.mxu1  ;;  %v9695_v62 = vpop.f32.mrf.mxu0  ;;  %v13922_v57 = vld [vmem:[#allocation4 + $0x22] sm:$0xff] }
 0x6f2   : > { %v7283_v54 = vld [vmem:[#allocation4 + $0x22] sm:$0xff]  ;;  %6935 = vst [vmem:[#allocation4 + $0x51] sm:$0xff] %v13917_v24  ;;  %v13928_v56 = vmax.f32 %v6759_v44, 0.0  ;;  %v6774_v18 = vadd.f32 %v9695_v62, %v6549_v53  ;;  %7125 = vst [vmem:[#allocation5 + $0xe8] sm:$0xff] %v13922_v57  ;;  %v6339_v62 = vadd.f32 %v13880_v60, %v13773_v5 }
 0x6f3   : > { %v7219_v32 = vld [vmem:[#allocation4 + $0x21] sm:$0xff]  ;;  %7065 = vst [vmem:[#allocation5 + $0x200] sm:$0xff] %v13917_v24  ;;  %7315 = vst [vmem:[#allocation5 + $0x70] sm:$0xff] %v7283_v54  ;;  %v6565_v43 = vpop.f32.mrf.mxu1  ;;  %v6768_v41 = vpop.f32.mrf.mxu0  ;;  %v7154_v22 = vld [vmem:[#allocation4 + $0x18] sm:$0xff] }
 0x6f4   : > { %7251 = vst [vmem:[#allocation5 + $0x68] sm:$0xff] %v7219_v32  ;;  %v7155_v26 = vld [vmem:[#allocation4 + $0x20] sm:$0xff]  ;;  %6934 = vst [vmem:[#allocation4 + $0x49] sm:$0xff] %v13928_v56  ;;  %v13937_v47 = vmax.f32 %v6774_v18, 0.0  ;;  %v6769_v37 = vadd.f32 %v6768_v41, %v6544_v55  ;;  %8267 = vmatprep.mubr.f32.mxu0 %v7154_v22  ;;  %8053 = vmatmul.mubr.f32.gmra.mxu1 %v7154_v22 }
 0x6f5   : > { %v13932_v28 = vld [vmem:[#allocation4 + $0x1a] sm:$0xff]  ;;  %7186 = vst [vmem:[#allocation5 + $0x18] sm:$0xff] %v7154_v22  ;;  %6996 = vst [vmem:[#allocation5 + $0x90] sm:$0xff] %v7154_v22  ;;  %v6568_v8 = vpop.f32.mrf.mxu1  ;;  %v9698_v0 = vpop.f32.mrf.mxu0  ;;  %8268 = vmatmul.mubr.f32.vlgmr.msra.gmra.mxu0 %v7541_v30  ;;  %8057 = vmatprep.mubr.f32.mxu1 %v13896_v15 }
 0x6f6   : > { %7187 = vst [vmem:[#allocation5 + $0x60] sm:$0xff] %v7155_v26  ;;  %6997 = vst [vmem:[#allocation5 + $0xd8] sm:$0xff] %v7155_v26  ;;  %v7282_v40 = vld [vmem:[#allocation4 + $0x1a] sm:$0xff]  ;;  %v13949_v34 = vmax.f32 %v6769_v37, 0.0  ;;  %v6784_v45 = vadd.f32 %v9698_v0, %v6559_v19  ;;  %8272 = vmatprep.mubr.f32.mxu0 %v7155_v26  ;;  %8654 = vmatpush1.msra.mxu0 %v7938_v36  ;;  %v6569_v54 = vadd.f32 %v6568_v8, %v6344_v12 }
 0x6f7   : > { %7124 = vst [vmem:[#allocation5 + $0xa0] sm:$0xff] %v13932_v28  ;;  %7064 = vst [vmem:[#allocation5 + $0x1b8] sm:$0xff] %v13928_v56  ;;  %v13941_v4 = vld [vmem:[#allocation4 + $0x3a] sm:$0xff]  ;;  %v6570_v23 = vpop.f32.mrf.mxu1  ;;  %v6778_v51 = vpop.f32.mrf.mxu0  ;;  %v7156_v13 = vld [vmem:[#allocation4 + $0x30] sm:$0xff]  ;;  %8655 = vmatprep.subr.mxu0 %v13891_v42  ;;  %v6349_v12 = vadd.f32 %v13880_v60, %v13785_v25 }
 0x6f8   : > { %7314 = vst [vmem:[#allocation5 + $0x28] sm:$0xff] %v7282_v40  ;;  %v7285_v7 = vld [vmem:[#allocation4 + $0x3a] sm:$0xff]  ;;  %7508 = vst [vmem:[#allocation5 + $0x88] sm:$0xff] %v13941_v4  ;;  %v13955_v44 = vld [vmem:[#allocation4 + $0x32] sm:$0xff]  ;;  %v13961_v32 = vmax.f32 %v6784_v45, 0.0  ;;  %v6779_v63 = vadd.f32 %v6778_v51, %v6554_v3  ;;  %8058 = vmatmul.mubr.f32.gmra.mxu1 %v7155_v26  ;;  %8656 = vmatpush1.msra.mxu0 %v7937_v21  ;;  %v6564_v26 = vadd.f32 %v13920_v49, %v6339_v62 }
 0x6f9   : > { %v7412_v11 = vld [vmem:[#allocation4 + $0x39] sm:$0xff]  ;;  %6937 = vst [vmem:[#allocation4 + $0x69] sm:$0xff] %v13937_v47  ;;  %7127 = vst [vmem:[#allocation5 + $0x178] sm:$0xff] %v13941_v4  ;;  %v7411_v5 = vld [vmem:[#allocation4 + $0x31] sm:$0xff]  ;;  %v6573_v30 = vpop.f32.mrf.mxu1  ;;  %v9701_v36 = vpop.f32.mrf.mxu0  ;;  %8273 = vmatmul.mubr.f32.gmra.mxu0 %v7550_v35  ;;  %8062 = vmatprep.mubr.f32.mxu1 %v13911_v6  ;;  %v6354_v3 = vadd.f32 %v13880_v60, %v13791_v33 }
 0x6fa   : > { %7067 = vst [vmem:[#allocation5 + $0x290] sm:$0xff] %v13937_v47  ;;  %v7936_v15 = vld [vmem:[#allocation9 + $0x368] sm:$0xff]  ;;  %7317 = vst [vmem:[#allocation5 + $0x100] sm:$0xff] %v7285_v7  ;;  %v7347_v18 = vld [vmem:[#allocation4 + $0x30] sm:$0xff]  ;;  %v13972_v10 = vmax.f32 %v6779_v63, 0.0  ;;  %v6794_v19 = vadd.f32 %v9701_v36, %v6569_v54  ;;  %8277 = vmatprep.mubr.f32.mxu0 %v7156_v13  ;;  %8657 = vmatprep.subr.mxu0 %v13891_v42  ;;  %v6574_v63 = vadd.f32 %v6573_v30, %v6349_v12 }
 0x6fb   : > { %7444 = vst [vmem:[#allocation5 + $0x80] sm:$0xff] %v7412_v11  ;;  %7253 = vst [vmem:[#allocation5 + $0xf8] sm:$0xff] %v7412_v11  ;;  %v13953_v53 = vld [vmem:[#allocation4 + $0x38] sm:$0xff]  ;;  %v7935_v6 = vld [vmem:[#allocation9 + $0x360] sm:$0xff]  ;;  %v6575_v40 = vpop.f32.mrf.mxu1  ;;  %v6788_v8 = vpop.f32.mrf.mxu0  ;;  %8658 = vmatpush1.msra.mxu0 %v7936_v15 }
 0x6fc   : > { %6936 = vst [vmem:[#allocation4 + $0x61] sm:$0xff] %v13949_v34  ;;  %7188 = vst [vmem:[#allocation5 + $0xa8] sm:$0xff] %v7156_v13  ;;  %v7284_v55 = vld [vmem:[#allocation4 + $0x32] sm:$0xff]  ;;  %v13977_v49 = vld [vmem:[#allocation4 + $0x48] sm:$0xff]  ;;  %v13990_v45 = vmax.f32 %v6794_v19, 0.0  ;;  %v6789_v35 = vadd.f32 %v6788_v8, %v6564_v26  ;;  %8063 = vmatmul.mubr.f32.gmra.mxu1 %v7156_v13  ;;  %8659 = vmatprep.subr.mxu0 %v13891_v42  ;;  %v6359_v19 = vadd.f32 %v13880_v60, %v13796_v17 }
 0x6fd   : > { %6998 = vst [vmem:[#allocation5 + $0x120] sm:$0xff] %v7156_v13  ;;  %7189 = vst [vmem:[#allocation5 + $0xf0] sm:$0xff] %v13953_v53  ;;  %v13968_v43 = vld [vmem:[#allocation4 + $0x52] sm:$0xff]  ;;  %v13981_v7 = vld [vmem:[#allocation4 + $0x4a] sm:$0xff]  ;;  %v6578_v23 = vpop.f32.mrf.mxu1  ;;  %v9704_v51 = vpop.f32.mrf.mxu0  ;;  %8278 = vmatmul.mubr.f32.gmra.mxu0 %v13932_v28  ;;  %8067 = vmatprep.mubr.f32.mxu1 %v13906_v20 }
 0x6fe   : > { %6999 = vst [vmem:[#allocation5 + $0x168] sm:$0xff] %v13953_v53  ;;  %7126 = vst [vmem:[#allocation5 + $0x130] sm:$0xff] %v13955_v44  ;;  %v7348_v41 = vld [vmem:[#allocation4 + $0x38] sm:$0xff]  ;;  %v13979_v0 = vld [vmem:[#allocation4 + $0x50] sm:$0xff]  ;;  %8282 = vmatprep.mubr.f32.mxu0 %v13953_v53  ;;  %8660 = vmatpush1.msra.mxu0 %v7935_v6 }
 0x6ff   : > { %7066 = vst [vmem:[#allocation5 + $0x248] sm:$0xff] %v13949_v34  ;;  %7316 = vst [vmem:[#allocation5 + $0xb8] sm:$0xff] %v7284_v55  ;;  %v7287_v22 = vld [vmem:[#allocation4 + $0x52] sm:$0xff]  ;;  %v13983_v11 = vld [vmem:[#allocation9 + $0x358] sm:$0xff]  ;;  %v14004_v55 = vmax.f32 %v6789_v35, 0.0  ;;  %v6580_v36 = vpop.f32.mrf.mxu1  ;;  %8661 = vmatprep.subr.mxu0 %v13891_v42 }
 0x700   : > { %7443 = vst [vmem:[#allocation5 + $0x38] sm:$0xff] %v7411_v5  ;;  %7252 = vst [vmem:[#allocation5 + $0xb0] sm:$0xff] %v7411_v5  ;;  %v7414_v37 = vld [vmem:[#allocation4 + $0x51] sm:$0xff]  ;;  %v7413_v33 = vld [vmem:[#allocation4 + $0x49] sm:$0xff]  ;;  %v6579_v5 = vadd.f32 %v6578_v23, %v6354_v3  ;;  %8068 = vmatmul.mubr.f32.gmra.mxu1 %v13953_v53  ;;  %8662 = vmatpush1.msra.mxu0 %v13983_v11 }
 0x701   : > { %7379 = vst [vmem:[#allocation5 + $0x30] sm:$0xff] %v7347_v18  ;;  %6939 = vst [vmem:[#allocation4 + $0x81] sm:$0xff] %v13961_v32  ;;  %v7475_v21 = vld [vmem:[#allocation4 + $0x32] sm:$0xff]  ;;  %v7286_v25 = vld [vmem:[#allocation4 + $0x4a] sm:$0xff]  ;;  %v6583_v8 = vpop.f32.mrf.mxu1  ;;  %8283 = vmatmul.mubr.f32.gmra.mxu0 %v13922_v57  ;;  %8072 = vmatprep.mubr.f32.mxu1 %v13928_v56 }
 0x702   : > { %7129 = vst [vmem:[#allocation5 + $0x208] sm:$0xff] %v13968_v43  ;;  %7069 = vst [vmem:[#allocation5 + $0x320] sm:$0xff] %v13961_v32  ;;  %v7349_v15 = vld [vmem:[#allocation4 + $0x48] sm:$0xff]  ;;  %v7350_v62 = vld [vmem:[#allocation4 + $0x50] sm:$0xff]  ;;  %v6804_v6 = vadd.f32 %v9704_v51, %v6579_v5  ;;  %8287 = vmatprep.mubr.f32.mxu0 %v13977_v49  ;;  %8663 = vmatprep.subr.mxu0 %v13891_v42 }
 0x703   : > { %7380 = vst [vmem:[#allocation5 + $0x78] sm:$0xff] %v7348_v41  ;;  %7319 = vst [vmem:[#allocation5 + $0x190] sm:$0xff] %v7287_v22  ;;  %v14001_v13 = vld [vmem:[#allocation4 + $0x6a] sm:$0xff]  ;;  %v7933_v20 = vld [vmem:[#allocation9 + $0x350] sm:$0xff]  ;;  %v6798_v41 = vpop.f32.mrf.mxu0  ;;  %v6585_v23 = vpop.f32.mrf.mxu1 }
 0x704   : > { %7446 = vst [vmem:[#allocation5 + $0x110] sm:$0xff] %v7414_v37  ;;  %7255 = vst [vmem:[#allocation5 + $0x188] sm:$0xff] %v7414_v37  ;;  %v7289_v54 = vld [vmem:[#allocation4 + $0x6a] sm:$0xff]  ;;  %v14009_v30 = vld [vmem:[#allocation4 + $0x60] sm:$0xff]  ;;  %v6799_v37 = vadd.f32 %v6798_v41, %v6574_v63  ;;  %8664 = vmatpush1.msra.mxu0 %v7933_v20  ;;  %8073 = vmatmul.mubr.f32.gmra.mxu1 %v13977_v49 }
 0x705   : > { %7507 = vst [vmem:[#allocation5 + $0x40] sm:$0xff] %v7475_v21  ;;  %6938 = vst [vmem:[#allocation4 + $0x79] sm:$0xff] %v13972_v10  ;;  %v7416_v28 = vld [vmem:[#allocation4 + $0x69] sm:$0xff]  ;;  %v7415_v21 = vld [vmem:[#allocation4 + $0x61] sm:$0xff]  ;;  %v14027_v12 = vpop.f32.mrf.mxu0  ;;  %8665 = vmatprep.subr.mxu0 %v13891_v42  ;;  %8288 = vmatmul.mubr.f32.gmra.mxu0 %v13955_v44 }
 0x706   : > { %7190 = vst [vmem:[#allocation5 + $0x138] sm:$0xff] %v13977_v49  ;;  %7000 = vst [vmem:[#allocation5 + $0x1b0] sm:$0xff] %v13977_v49  ;;  %v7477_v18 = vld [vmem:[#allocation4 + $0x4a] sm:$0xff]  ;;  %v14013_v26 = vld [vmem:[#allocation4 + $0x62] sm:$0xff]  ;;  %v14035_v11 = vmax.f32 %v6799_v37, 0.0  ;;  %v6588_v49 = vpop.f32.mrf.mxu1  ;;  %8077 = vmatprep.mubr.f32.mxu1 %v13917_v24  ;;  %8292 = vmatprep.mubr.f32.mxu0 %v13979_v0 }
 0x707   : > { %7191 = vst [vmem:[#allocation5 + $0x180] sm:$0xff] %v13979_v0  ;;  %7001 = vst [vmem:[#allocation5 + $0x1f8] sm:$0xff] %v13979_v0  ;;  %v14011_v22 = vld [vmem:[#allocation4 + $0x68] sm:$0xff]  ;;  %v7351_v40 = vld [vmem:[#allocation4 + $0x60] sm:$0xff]  ;;  %v6808_v51 = vpop.f32.mrf.mxu0 }
 0x708   : > { %7128 = vst [vmem:[#allocation5 + $0x1c0] sm:$0xff] %v13981_v7  ;;  %7068 = vst [vmem:[#allocation5 + $0x2d8] sm:$0xff] %v13972_v10  ;;  %v7288_v17 = vld [vmem:[#allocation4 + $0x62] sm:$0xff]  ;;  %v7932_v57 = vld [vmem:[#allocation9 + $0x348] sm:$0xff]  ;;  %8078 = vmatmul.mubr.f32.gmra.mxu1 %v13979_v0 }
 0x709   : > { %7318 = vst [vmem:[#allocation5 + $0x148] sm:$0xff] %v7286_v25  ;;  %7445 = vst [vmem:[#allocation5 + $0xc8] sm:$0xff] %v7413_v33  ;;  %v14031_v53 = vld [vmem:[#allocation4 + $0x82] sm:$0xff]  ;;  %v14033_v25 = vmax.f32 %v6804_v6, 0.0  ;;  %v7931_v5 = vld [vmem:[#allocation9 + $0x340] sm:$0xff]  ;;  %8666 = vmatpush1.msra.mxu0 %v7932_v57  ;;  %v6369_v57 = vadd.f32 %v13880_v60, %v13807_v50  ;;  %8082 = vmatprep.mubr.f32.mxu1 %v13949_v34 }
 0x70a   : > { %7254 = vst [vmem:[#allocation5 + $0x140] sm:$0xff] %v7413_v33  ;;  %7381 = vst [vmem:[#allocation5 + $0xc0] sm:$0xff] %v7349_v15  ;;  %v7352_v3 = vld [vmem:[#allocation4 + $0x68] sm:$0xff]  ;;  %v6584_v33 = vadd.f32 %v6583_v8, %v6359_v19  ;;  %v7478_v15 = vld [vmem:[#allocation4 + $0x52] sm:$0xff]  ;;  %v14067_v8 = vpop.f32.mrf.mxu0  ;;  %8667 = vmatprep.subr.mxu0 %v13891_v42  ;;  %8293 = vmatmul.mubr.f32.gmra.mxu0 %v13941_v4 }
 0x70b   : > { %6941 = vst [vmem:[#allocation4 + $0x99] sm:$0xff] %v13990_v45  ;;  %7131 = vst [vmem:[#allocation5 + $0x298] sm:$0xff] %v14001_v13  ;;  %v7291_v35 = vld [vmem:[#allocation4 + $0x82] sm:$0xff]  ;;  %8668 = vmatpush1.msra.mxu0 %v7931_v5  ;;  %8297 = vmatprep.mubr.f32.mxu0 %v14009_v30 }
 0x70c   : > { %7071 = vst [vmem:[#allocation5 + $0x3b0] sm:$0xff] %v13990_v45  ;;  %7382 = vst [vmem:[#allocation5 + $0x108] sm:$0xff] %v7350_v62  ;;  %v7418_v56 = vld [vmem:[#allocation4 + $0x81] sm:$0xff]  ;;  %v14040_v62 = vld [vmem:[#allocation4 + $0x78] sm:$0xff]  ;;  %8669 = vmatprep.subr.mxu0 %v13891_v42  ;;  %8083 = vmatmul.mubr.f32.gmra.mxu1 %v14009_v30 }
 0x70d   : > { %7321 = vst [vmem:[#allocation5 + $0x220] sm:$0xff] %v7289_v54  ;;  %7448 = vst [vmem:[#allocation5 + $0x1a0] sm:$0xff] %v7416_v28  ;;  %v14042_v54 = vld [vmem:[#allocation4 + $0x80] sm:$0xff]  ;;  %v7353_v36 = vld [vmem:[#allocation4 + $0x78] sm:$0xff]  ;;  %8087 = vmatprep.mubr.f32.mxu1 %v13937_v47 }
 0x70e   : > { %7257 = vst [vmem:[#allocation5 + $0x218] sm:$0xff] %v7416_v28  ;;  %7509 = vst [vmem:[#allocation5 + $0xd0] sm:$0xff] %v7477_v18  ;;  %v14044_v63 = vld [vmem:[#allocation4 + $0x7a] sm:$0xff]  ;;  %v6364_v28 = vadd.f32 %v13880_v60, %v13802_v61  ;;  %v6809_v18 = vadd.f32 %v6808_v51, %v6584_v33  ;;  %v7479_v44 = vld [vmem:[#allocation4 + $0x62] sm:$0xff]  ;;  %8298 = vmatmul.mubr.f32.gmra.mxu0 %v13981_v7 }
 0x70f   : > { %6940 = vst [vmem:[#allocation4 + $0x91] sm:$0xff] %v14004_v55  ;;  %7192 = vst [vmem:[#allocation5 + $0x1c8] sm:$0xff] %v14009_v30  ;;  %v7290_v61 = vld [vmem:[#allocation4 + $0x7a] sm:$0xff]  ;;  %8302 = vmatprep.mubr.f32.mxu0 %v14011_v22 }
 0x710   : > { %7002 = vst [vmem:[#allocation5 + $0x240] sm:$0xff] %v14009_v30  ;;  %7193 = vst [vmem:[#allocation5 + $0x210] sm:$0xff] %v14011_v22  ;;  %v7417_v20 = vld [vmem:[#allocation4 + $0x79] sm:$0xff]  ;;  %v14063_v37 = vmax.f32 %v6809_v18, 0.0  ;;  %v7482_v18 = vld [vmem:[#allocation4 + $0x82] sm:$0xff]  ;;  %8088 = vmatmul.mubr.f32.gmra.mxu1 %v14011_v22 }
 0x711   : > { %7003 = vst [vmem:[#allocation5 + $0x288] sm:$0xff] %v14011_v22  ;;  %7130 = vst [vmem:[#allocation5 + $0x250] sm:$0xff] %v14013_v26  ;;  %v7354_v19 = vld [vmem:[#allocation4 + $0x80] sm:$0xff]  ;;  %8092 = vmatprep.mubr.f32.mxu1 %v13972_v10  ;;  %v7926_v22 = vld [vmem:[#allocation9 + $0x318] sm:$0xff] }
 0x712   : > { %7070 = vst [vmem:[#allocation5 + $0x368] sm:$0xff] %v14004_v55  ;;  %7320 = vst [vmem:[#allocation5 + $0x1d8] sm:$0xff] %v7288_v17  ;;  %v14061_v41 = vld [vmem:[#allocation4 + $0x9a] sm:$0xff]  ;;  %v6589_v17 = vadd.f32 %v6588_v49, %v6364_v28  ;;  %8303 = vmatmul.mubr.f32.gmra.mxu0 %v13968_v43  ;;  %v6384_v43 = vadd.f32 %v13880_v60, %v13825_v39 }
 0x713   : > { %7447 = vst [vmem:[#allocation5 + $0x158] sm:$0xff] %v7415_v21  ;;  %7256 = vst [vmem:[#allocation5 + $0x1d0] sm:$0xff] %v7415_v21  ;;  %v7293_v6 = vld [vmem:[#allocation4 + $0x9a] sm:$0xff]  ;;  %v7930_v21 = vld [vmem:[#allocation9 + $0x338] sm:$0xff]  ;;  %8307 = vmatprep.mubr.f32.mxu0 %v14040_v62 }
 0x714   : > { %7383 = vst [vmem:[#allocation5 + $0x150] sm:$0xff] %v7351_v40  ;;  %7133 = vst [vmem:[#allocation5 + $0x328] sm:$0xff] %v14031_v53  ;;  %v7420_v24 = vld [vmem:[#allocation4 + $0x99] sm:$0xff]  ;;  %v7480_v40 = vld [vmem:[#allocation4 + $0x6a] sm:$0xff]  ;;  %8670 = vmatpush1.msra.mxu0 %v7930_v21  ;;  %8093 = vmatmul.mubr.f32.gmra.mxu1 %v14040_v62 }
 0x715   : > { %7384 = vst [vmem:[#allocation5 + $0x198] sm:$0xff] %v7352_v3  ;;  %7323 = vst [vmem:[#allocation5 + $0x2b0] sm:$0xff] %v7291_v35  ;;  %v6590_v3 = vpop.f32.mrf.mxu1  ;;  %v7929_v5 = vld [vmem:[#allocation9 + $0x330] sm:$0xff]  ;;  %8671 = vmatprep.subr.mxu0 %v13891_v42  ;;  %8097 = vmatprep.mubr.f32.mxu1 %v13961_v32 }
 0x716   : > { %7450 = vst [vmem:[#allocation5 + $0x230] sm:$0xff] %v7418_v56  ;;  %7259 = vst [vmem:[#allocation5 + $0x2a8] sm:$0xff] %v7418_v56  ;;  %v14069_v35 = vld [vmem:[#allocation4 + $0x90] sm:$0xff]  ;;  %v14071_v33 = vld [vmem:[#allocation4 + $0x98] sm:$0xff]  ;;  %8672 = vmatpush1.msra.mxu0 %v7929_v5  ;;  %v6379_v5 = vadd.f32 %v13880_v60, %v13819_v46 }
 0x717   : > { %7510 = vst [vmem:[#allocation5 + $0x118] sm:$0xff] %v7478_v15  ;;  %6943 = vst [vmem:[#allocation4 + $0xb1] sm:$0xff] %v14033_v25  ;;  %v14073_v56 = vld [vmem:[#allocation4 + $0x92] sm:$0xff]  ;;  %v6814_v15 = vadd.f32 %v14027_v12, %v6589_v17  ;;  %v6593_v28 = vpop.f32.mrf.mxu1  ;;  %v7481_v12 = vld [vmem:[#allocation4 + $0x7a] sm:$0xff]  ;;  %8673 = vmatprep.subr.mxu0 %v13891_v42  ;;  %8308 = vmatmul.mubr.f32.gmra.mxu0 %v14013_v26 }
 0x718   : > { %6942 = vst [vmem:[#allocation4 + $0xa9] sm:$0xff] %v14035_v11  ;;  %7194 = vst [vmem:[#allocation5 + $0x258] sm:$0xff] %v14040_v62  ;;  %v7292_v50 = vld [vmem:[#allocation4 + $0x92] sm:$0xff]  ;;  %v7484_v34 = vld [vmem:[#allocation4 + $0x9a] sm:$0xff]  ;;  %8312 = vmatprep.mubr.f32.mxu0 %v14042_v54  ;;  %8098 = vmatmul.mubr.f32.gmra.mxu1 %v14042_v54 }
 0x719   : > { %7004 = vst [vmem:[#allocation5 + $0x2d0] sm:$0xff] %v14040_v62  ;;  %7195 = vst [vmem:[#allocation5 + $0x2a0] sm:$0xff] %v14042_v54  ;;  %v7419_v23 = vld [vmem:[#allocation4 + $0x91] sm:$0xff]  ;;  %v6595_v49 = vpop.f32.mrf.mxu1  ;;  %v7925_v62 = vld [vmem:[#allocation9 + $0x310] sm:$0xff]  ;;  %8102 = vmatprep.mubr.f32.mxu1 %v14004_v55 }
 0x71a   : > { %7005 = vst [vmem:[#allocation5 + $0x318] sm:$0xff] %v14042_v54  ;;  %7132 = vst [vmem:[#allocation5 + $0x2e0] sm:$0xff] %v14044_v63  ;;  %v7355_v51 = vld [vmem:[#allocation4 + $0x90] sm:$0xff]  ;;  %v7356_v0 = vld [vmem:[#allocation4 + $0x98] sm:$0xff] }
 0x71b   : > { %7072 = vst [vmem:[#allocation5 + $0x3f8] sm:$0xff] %v14035_v11  ;;  %7073 = vst [vmem:[#allocation5 + $0x440] sm:$0xff] %v14033_v25  ;;  %v7483_v4 = vld [vmem:[#allocation4 + $0x92] sm:$0xff]  ;;  %8313 = vmatmul.mubr.f32.gmra.mxu0 %v14001_v13  ;;  %v6394_v13 = vadd.f32 %v13880_v60, %v13833_v38 }
 0x71c   : > { %7322 = vst [vmem:[#allocation5 + $0x268] sm:$0xff] %v7290_v61  ;;  %7449 = vst [vmem:[#allocation5 + $0x1e8] sm:$0xff] %v7417_v20  ;;  %v14089_v61 = vmax.f32 %v6814_v15, 0.0  ;;  %8317 = vmatprep.mubr.f32.mxu0 %v14069_v35  ;;  %v7923_v54 = vld [vmem:[#allocation9 + $0x300] sm:$0xff]  ;;  %8103 = vmatmul.mubr.f32.gmra.mxu1 %v14069_v35 }
 0x71d   : > { %7258 = vst [vmem:[#allocation5 + $0x260] sm:$0xff] %v7417_v20  ;;  %7385 = vst [vmem:[#allocation5 + $0x1e0] sm:$0xff] %v7353_v36  ;;  %v6594_v20 = vadd.f32 %v6593_v28, %v6369_v57  ;;  %v6818_v36 = vpop.f32.mrf.mxu0  ;;  %v6598_v57 = vpop.f32.mrf.mxu1  ;;  %8107 = vmatprep.mubr.f32.mxu1 %v13990_v45 }
 0x71e   : > { %7135 = vst [vmem:[#allocation5 + $0x3b8] sm:$0xff] %v14061_v41  ;;  %7386 = vst [vmem:[#allocation5 + $0x228] sm:$0xff] %v7354_v19  ;;  %v14109_v21 = vld [vmem:[#allocation4 + $0xb2] sm:$0xff] }
 0x71f   : > { %7325 = vst [vmem:[#allocation5 + $0x340] sm:$0xff] %v7293_v6  ;;  %7452 = vst [vmem:[#allocation5 + $0x2c0] sm:$0xff] %v7420_v24  ;;  %v14093_v19 = vld [vmem:[#allocation4 + $0xa8] sm:$0xff]  ;;  %v14095_v6 = vld [vmem:[#allocation4 + $0xb0] sm:$0xff]  ;;  %8318 = vmatmul.mubr.f32.gmra.mxu0 %v14044_v63 }
 0x720   : > { %7261 = vst [vmem:[#allocation5 + $0x338] sm:$0xff] %v7420_v24  ;;  %7511 = vst [vmem:[#allocation5 + $0x160] sm:$0xff] %v7479_v44  ;;  %v14097_v17 = vld [vmem:[#allocation4 + $0xaa] sm:$0xff]  ;;  %v7928_v24 = vld [vmem:[#allocation9 + $0x328] sm:$0xff]  ;;  %v6374_v44 = vadd.f32 %v13880_v60, %v13813_v16  ;;  %8322 = vmatprep.mubr.f32.mxu0 %v14071_v33  ;;  %8108 = vmatmul.mubr.f32.gmra.mxu1 %v14071_v33 }
 0x721   : > { %7512 = vst [vmem:[#allocation5 + $0x1a8] sm:$0xff] %v7480_v40  ;;  %6944 = vst [vmem:[#allocation4 + $0xc1] sm:$0xff] %v14063_v37  ;;  %v6819_v40 = vadd.f32 %v6818_v36, %v6594_v20  ;;  %v7294_v16 = vld [vmem:[#allocation4 + $0xaa] sm:$0xff]  ;;  %v7295_v15 = vld [vmem:[#allocation4 + $0xb2] sm:$0xff]  ;;  %8674 = vmatpush1.msra.mxu0 %v7928_v24  ;;  %8112 = vmatprep.mubr.f32.mxu1 %v14035_v11 }
 0x722   : > { %7196 = vst [vmem:[#allocation5 + $0x2e8] sm:$0xff] %v14069_v35  ;;  %7006 = vst [vmem:[#allocation5 + $0x360] sm:$0xff] %v14069_v35  ;;  %v7421_v3 = vld [vmem:[#allocation4 + $0xa9] sm:$0xff]  ;;  %v7486_v28 = vld [vmem:[#allocation4 + $0xb2] sm:$0xff]  ;;  %8675 = vmatprep.subr.mxu0 %v13891_v42 }
 0x723   : > { %7197 = vst [vmem:[#allocation5 + $0x330] sm:$0xff] %v14071_v33  ;;  %7007 = vst [vmem:[#allocation5 + $0x3a8] sm:$0xff] %v14071_v33  ;;  %v7357_v30 = vld [vmem:[#allocation4 + $0xa8] sm:$0xff]  ;;  %v7358_v7 = vld [vmem:[#allocation4 + $0xb0] sm:$0xff]  ;;  %8323 = vmatmul.mubr.f32.gmra.mxu0 %v14031_v53 }
 0x724   : > { %7134 = vst [vmem:[#allocation5 + $0x370] sm:$0xff] %v14073_v56  ;;  %7074 = vst [vmem:[#allocation5 + $0x488] sm:$0xff] %v14063_v37  ;;  %v7485_v47 = vld [vmem:[#allocation4 + $0xaa] sm:$0xff]  ;;  %8327 = vmatprep.mubr.f32.mxu0 %v14093_v19  ;;  %8113 = vmatmul.mubr.f32.gmra.mxu1 %v14093_v19 }
 0x725   : > { %7324 = vst [vmem:[#allocation5 + $0x2f8] sm:$0xff] %v7292_v50  ;;  %7451 = vst [vmem:[#allocation5 + $0x278] sm:$0xff] %v7419_v23  ;;  %v7422_v50 = vld [vmem:[#allocation4 + $0xb1] sm:$0xff]  ;;  %v7954_v35 = vld [vmem:[#allocation9 + $0x3f8] sm:$0xff]  ;;  %8117 = vmatprep.mubr.f32.mxu1 %v14033_v25 }
 0x726   : > { %7260 = vst [vmem:[#allocation5 + $0x2f0] sm:$0xff] %v7419_v23  ;;  %7387 = vst [vmem:[#allocation5 + $0x270] sm:$0xff] %v7355_v51  ;;  %v14115_v23 = vmax.f32 %v6819_v40, 0.0  ;;  %v6599_v51 = vadd.f32 %v6598_v57, %v6374_v44  ;;  %v7927_v36 = vld [vmem:[#allocation9 + $0x320] sm:$0xff] }
 0x727   : > { %7388 = vst [vmem:[#allocation5 + $0x2b8] sm:$0xff] %v7356_v0  ;;  %7513 = vst [vmem:[#allocation5 + $0x1f0] sm:$0xff] %v7481_v12  ;;  %v14118_v0 = vpop.f32.mrf.mxu0  ;;  %v6600_v12 = vpop.f32.mrf.mxu1  ;;  %8676 = vmatpush1.msra.mxu0 %v7927_v36 }
 0x728   : > { %7514 = vst [vmem:[#allocation5 + $0x238] sm:$0xff] %v7482_v18  ;;  %7515 = vst [vmem:[#allocation5 + $0x280] sm:$0xff] %v7483_v4  ;;  %v14120_v18 = vld [vmem:[#allocation4 + $0xc0] sm:$0xff]  ;;  %8677 = vmatprep.subr.mxu0 %v13891_v42  ;;  %8328 = vmatmul.mubr.f32.gmra.mxu0 %v14073_v56 }
 0x729   : > { %7516 = vst [vmem:[#allocation5 + $0x2c8] sm:$0xff] %v7484_v34  ;;  %6945 = vst [vmem:[#allocation4 + $0xc9] sm:$0xff] %v14089_v61  ;;  %v7423_v20 = vld [vmem:[#allocation4 + $0xc1] sm:$0xff]  ;;  %v6824_v34 = vadd.f32 %v14067_v8, %v6599_v51  ;;  %v6603_v49 = vpop.f32.mrf.mxu1  ;;  %v6828_v44 = vpop.f32.mrf.mxu0  ;;  %8678 = vmatpush1.msra.mxu0 %v7926_v22  ;;  %8332 = vmatprep.mubr.f32.mxu0 %v14095_v6 }
 0x72a   : > { %7198 = vst [vmem:[#allocation5 + $0x378] sm:$0xff] %v14093_v19  ;;  %7008 = vst [vmem:[#allocation5 + $0x3f0] sm:$0xff] %v14093_v19  ;;  %v7359_v4 = vld [vmem:[#allocation4 + $0xc0] sm:$0xff]  ;;  %v6604_v8 = vadd.f32 %v6603_v49, %v6379_v5  ;;  %8679 = vmatprep.subr.mxu0 %v13891_v42  ;;  %v7924_v5 = vld [vmem:[#allocation9 + $0x308] sm:$0xff]  ;;  %8118 = vmatmul.mubr.f32.gmra.mxu1 %v14095_v6 }
 0x72b   : > { %7199 = vst [vmem:[#allocation5 + $0x3c0] sm:$0xff] %v14095_v6  ;;  %7009 = vst [vmem:[#allocation5 + $0x438] sm:$0xff] %v14095_v6  ;;  %v14133_v46 = vmax.f32 %v6824_v34, 0.0  ;;  %v6605_v40 = vpop.f32.mrf.mxu1  ;;  %8680 = vmatpush1.msra.mxu0 %v7925_v62  ;;  %v7951_v19 = vld [vmem:[#allocation9 + $0x3e0] sm:$0xff]  ;;  %8122 = vmatprep.mubr.f32.mxu1 %v14063_v37  ;;  %v7949_v6 = vld [vmem:[#allocation9 + $0x3d0] sm:$0xff] }
 0x72c   : > { %7136 = vst [vmem:[#allocation5 + $0x400] sm:$0xff] %v14097_v17  ;;  %7075 = vst [vmem:[#allocation5 + $0x4d0] sm:$0xff] %v14089_v61  ;;  %v6829_v10 = vadd.f32 %v6828_v44, %v6604_v8  ;;  %8681 = vmatprep.subr.mxu0 %v13891_v42  ;;  %8333 = vmatmul.mubr.f32.gmra.mxu0 %v14061_v41 }
 0x72d   : > { %7137 = vst [vmem:[#allocation5 + $0x448] sm:$0xff] %v14109_v21  ;;  %7326 = vst [vmem:[#allocation5 + $0x388] sm:$0xff] %v7294_v16  ;;  %8682 = vmatpush1.msra.mxu0 %v7924_v5  ;;  %8337 = vmatprep.mubr.f32.mxu0 %v14120_v18 }
 0x72e   : > { %7453 = vst [vmem:[#allocation5 + $0x308] sm:$0xff] %v7421_v3  ;;  %7262 = vst [vmem:[#allocation5 + $0x380] sm:$0xff] %v7421_v3  ;;  %v14155_v51 = vmax.f32 %v6829_v10, 0.0  ;;  %8683 = vmatprep.subr.mxu0 %v13891_v42  ;;  %8123 = vmatmul.mubr.f32.gmra.mxu1 %v14120_v18 }
 0x72f   : > { %7389 = vst [vmem:[#allocation5 + $0x300] sm:$0xff] %v7357_v30  ;;  %7327 = vst [vmem:[#allocation5 + $0x3d0] sm:$0xff] %v7295_v15  ;;  %v6608_v15 = vpop.f32.mrf.mxu1  ;;  %8684 = vmatpush1.msra.mxu0 %v7923_v54  ;;  %8127 = vmatprep.mubr.f32.mxu1 %v14089_v61 }
 0x730   : > { %7454 = vst [vmem:[#allocation5 + $0x350] sm:$0xff] %v7422_v50  ;;  %7263 = vst [vmem:[#allocation5 + $0x3c8] sm:$0xff] %v7422_v50  ;;  %v14137_v24 = vld [vmem:[#allocation4 + $0xc8] sm:$0xff]  ;;  %8685 = vmatprep.subr.mxu0 %v13891_v42  ;;  %v7953_v42 = vld [vmem:[#allocation9 + $0x3f0] sm:$0xff]  ;;  %8338 = vmatmul.mubr.f32.gmra.mxu0 %v14097_v17 }
 0x731   : > { %7390 = vst [vmem:[#allocation5 + $0x348] sm:$0xff] %v7358_v7  ;;  %7517 = vst [vmem:[#allocation5 + $0x310] sm:$0xff] %v7485_v47  ;;  %v14139_v16 = vld [vmem:[#allocation4 + $0xc2] sm:$0xff]  ;;  %v14141_v3 = vld [vmem:[#allocation4 + $0xca] sm:$0xff]  ;;  %v6609_v7 = vadd.f32 %v6608_v15, %v6384_v43  ;;  %v14158_v47 = vpop.f32.mrf.mxu0  ;;  %8686 = vmatpush2.msra.mxu0 %v7954_v35  ;;  %8342 = vmatprep.mubr.f32.mxu0 %v14137_v24 }
 0x732   : > { %7518 = vst [vmem:[#allocation5 + $0x358] sm:$0xff] %v7486_v28  ;;  %6946 = vst [vmem:[#allocation4 + $0xd9] sm:$0xff] %v14115_v23  ;;  %v7296_v57 = vld [vmem:[#allocation4 + $0xc2] sm:$0xff]  ;;  %v7297_v30 = vld [vmem:[#allocation4 + $0xca] sm:$0xff]  ;;  %v6610_v28 = vpop.f32.mrf.mxu1  ;;  %8128 = vmatmul.mubr.f32.gmra.mxu1 %v14137_v24 }
 0x733   : > { %7200 = vst [vmem:[#allocation5 + $0x408] sm:$0xff] %v14120_v18  ;;  %7010 = vst [vmem:[#allocation5 + $0x480] sm:$0xff] %v14120_v18  ;;  %v7424_v39 = vld [vmem:[#allocation4 + $0xc9] sm:$0xff]  ;;  %v6838_v36 = vpop.f32.mrf.mxu0  ;;  %v7948_v18 = vld [vmem:[#allocation9 + $0x3c8] sm:$0xff]  ;;  %8132 = vmatprep.mubr.f32.mxu1 %v14115_v23 }
 0x734   : > { %7076 = vst [vmem:[#allocation5 + $0x518] sm:$0xff] %v14115_v23  ;;  %7455 = vst [vmem:[#allocation5 + $0x398] sm:$0xff] %v7423_v20  ;;  %v7360_v50 = vld [vmem:[#allocation4 + $0xc8] sm:$0xff]  ;;  %v6613_v34 = vpop.f32.mrf.mxu1  ;;  %8343 = vmatmul.mubr.f32.gmra.mxu0 %v14109_v21 }
 0x735   : > { %7264 = vst [vmem:[#allocation5 + $0x410] sm:$0xff] %v7423_v20  ;;  %7391 = vst [vmem:[#allocation5 + $0x390] sm:$0xff] %v7359_v4  ;;  %v6389_v20 = vadd.f32 %v13880_v60, %v13829_v9  ;;  %v6834_v4 = vadd.f32 %v14118_v0, %v6609_v7 }
 0x736   : > { %6947 = vst [vmem:[#allocation4 + $0xe1] sm:$0xff] %v14133_v46  ;;  %7201 = vst [vmem:[#allocation5 + $0x450] sm:$0xff] %v14137_v24  ;;  %v6615_v49 = vpop.f32.mrf.mxu1 }
 0x737   : > { %7011 = vst [vmem:[#allocation5 + $0x4c8] sm:$0xff] %v14137_v24  ;;  %7138 = vst [vmem:[#allocation5 + $0x490] sm:$0xff] %v14139_v16  ;;  %v14173_v9 = vmax.f32 %v6834_v4, 0.0  ;;  %v6614_v0 = vadd.f32 %v6613_v34, %v6389_v20  ;;  %v7946_v24 = vld [vmem:[#allocation9 + $0x3b8] sm:$0xff] }
 0x738   : > { %7077 = vst [vmem:[#allocation5 + $0x560] sm:$0xff] %v14133_v46  ;;  %7139 = vst [vmem:[#allocation5 + $0x4d8] sm:$0xff] %v14141_v3  ;;  %v6618_v60 = vpop.f32.mrf.mxu1 }
 0x739   : > { %7328 = vst [vmem:[#allocation5 + $0x418] sm:$0xff] %v7296_v57  ;;  %7329 = vst [vmem:[#allocation5 + $0x460] sm:$0xff] %v7297_v30  ;;  %v14160_v12 = vld [vmem:[#allocation4 + $0xd8] sm:$0xff]  ;;  %v6839_v55 = vadd.f32 %v6838_v36, %v6614_v0  ;;  %v6619_v30 = vadd.f32 %v6618_v60, %v6394_v13 }
 0x73a   : > { %7456 = vst [vmem:[#allocation5 + $0x3e0] sm:$0xff] %v7424_v39  ;;  %7265 = vst [vmem:[#allocation5 + $0x458] sm:$0xff] %v7424_v39  ;;  %v7425_v32 = vld [vmem:[#allocation4 + $0xd9] sm:$0xff]  ;;  %v14198_v39 = vpop.f32.mrf.mxu0  ;;  %v6620_v15 = vpop.f32.mrf.mxu1  ;;  %8347 = vmatprep.mubr.f32.mxu0 %v14160_v12  ;;  %8133 = vmatmul.mubr.f32.gmra.mxu1 %v14160_v12 }
 0x73b   : > { %7392 = vst [vmem:[#allocation5 + $0x3d8] sm:$0xff] %v7360_v50  ;;  %v7361_v26 = vld [vmem:[#allocation4 + $0xd8] sm:$0xff]  ;;  %6948 = vst [vmem:[#allocation4 + $0xf1] sm:$0xff] %v14155_v51  ;;  %v14195_v57 = vmax.f32 %v6839_v55, 0.0  ;;  %v14208_v50 = vld [vmem:[%s14986_s6] ss:$0 sm:$0xff]  ;;  %v6844_v28 = vadd.f32 %v14158_v47, %v6619_v30  ;;  %8348 = vmatmul.mubr.f32.gmra.mxu0 %v14139_v16  ;;  %8137 = vmatprep.mubr.f32.mxu1 %v14133_v46 }
 0x73c   : > { %7202 = vst [vmem:[#allocation5 + $0x498] sm:$0xff] %v14160_v12  ;;  %7012 = vst [vmem:[#allocation5 + $0x510] sm:$0xff] %v14160_v12  ;;  %v6399_v7 = vadd.f32 %v14208_v50, %v13837_v1  ;;  %v6623_v1 = vpop.f32.mrf.mxu1  ;;  %v6848_v20 = vpop.f32.mrf.mxu0  ;;  %v6404_v53 = vadd.f32 %v14208_v50, %v13840_v59  ;;  %v6409_v35 = vadd.f32 %v14208_v50, %v13843_v14  ;;  %v7950_v30 = vld [vmem:[#allocation9 + $0x3d8] sm:$0xff]  ;;  %v7945_v12 = vld [vmem:[#allocation9 + $0x3b0] sm:$0xff] }
 0x73d   : > { %7078 = vst [vmem:[#allocation5 + $0x5a8] sm:$0xff] %v14155_v51  ;;  %7457 = vst [vmem:[#allocation5 + $0x428] sm:$0xff] %v7425_v32  ;;  %v14177_v8 = vld [vmem:[#allocation4 + $0xe0] sm:$0xff]  ;;  %v14222_v47 = vmax.f32 %v6844_v28, 0.0  ;;  %v6414_v41 = vadd.f32 %v14208_v50, %v13846_v29  ;;  %v6424_v21 = vadd.f32 %v14208_v50, %v13852_v31 }
 0x73e   : > { %7266 = vst [vmem:[#allocation5 + $0x4a0] sm:$0xff] %v7425_v32  ;;  %7393 = vst [vmem:[#allocation5 + $0x420] sm:$0xff] %v7361_v26  ;;  %v14179_v22 = vld [vmem:[#allocation4 + $0xda] sm:$0xff]  ;;  %v14181_v44 = vld [vmem:[#allocation4 + $0xe2] sm:$0xff]  ;;  %v6624_v33 = vadd.f32 %v6623_v1, %v6399_v7  ;;  %v6625_v4 = vpop.f32.mrf.mxu1  ;;  %8352 = vmatprep.mubr.f32.mxu0 %v14177_v8  ;;  %8138 = vmatmul.mubr.f32.gmra.mxu1 %v14177_v8 }
 0x73f   : > { %6949 = vst [vmem:[#allocation4 + $0xf9] sm:$0xff] %v14173_v9  ;;  %7203 = vst [vmem:[#allocation5 + $0x4e0] sm:$0xff] %v14177_v8  ;;  %v7298_v40 = vld [vmem:[#allocation4 + $0xda] sm:$0xff]  ;;  %v7299_v43 = vld [vmem:[#allocation4 + $0xe2] sm:$0xff]  ;;  %8353 = vmatmul.mubr.f32.gmra.mxu0 %v14141_v3  ;;  %8142 = vmatprep.mubr.f32.mxu1 %v14155_v51  ;;  %v6434_v3 = vadd.f32 %v14208_v50, %v13858_v52 }
 0x740   : > { %7013 = vst [vmem:[#allocation5 + $0x558] sm:$0xff] %v14177_v8  ;;  %7140 = vst [vmem:[#allocation5 + $0x520] sm:$0xff] %v14179_v22  ;;  %v7426_v38 = vld [vmem:[#allocation4 + $0xe1] sm:$0xff]  ;;  %v7952_v26 = vld [vmem:[#allocation9 + $0x3e8] sm:$0xff]  ;;  %v6849_v11 = vadd.f32 %v6848_v20, %v6624_v33  ;;  %v6628_v49 = vpop.f32.mrf.mxu1 }
 0x741   : > { %7079 = vst [vmem:[#allocation5 + $0x5f0] sm:$0xff] %v14173_v9  ;;  %7141 = vst [vmem:[#allocation5 + $0x568] sm:$0xff] %v14181_v44  ;;  %v7362_v10 = vld [vmem:[#allocation4 + $0xe0] sm:$0xff]  ;;  %v7943_v8 = vld [vmem:[#allocation9 + $0x3a0] sm:$0xff] }
 0x742   : > { %7330 = vst [vmem:[#allocation5 + $0x4a8] sm:$0xff] %v7298_v40  ;;  %7331 = vst [vmem:[#allocation5 + $0x4f0] sm:$0xff] %v7299_v43  ;;  %v14200_v62 = vld [vmem:[#allocation4 + $0xf0] sm:$0xff]  ;;  %v14225_v32 = vld [vmem:[#allocation4] sm:$0xff]  ;;  %v14257_v55 = vmax.f32 %v6849_v11, 0.0  ;;  %v6629_v40 = vadd.f32 %v6628_v49, %v6404_v53  ;;  %v14260_v43 = vpop.f32.mrf.mxu0  ;;  %v6630_v56 = vpop.f32.mrf.mxu1 }
 0x743   : > { %7458 = vst [vmem:[#allocation5 + $0x470] sm:$0xff] %v7426_v38  ;;  %7267 = vst [vmem:[#allocation5 + $0x4e8] sm:$0xff] %v7426_v38  ;;  %v14203_v45 = vld [vmem:[#allocation4 + $0xf1] sm:$0xff]  ;;  %8687 = vmatprep.subr.mxu0 %v14225_v32  ;;  %v6419_v56 = vadd.f32 %v14208_v50, %v13849_v48  ;;  %8357 = vmatprep.mubr.f32.mxu0 %v14200_v62 }
 0x744   : > { %7394 = vst [vmem:[#allocation5 + $0x468] sm:$0xff] %v7362_v10  ;;  %v7363_v63 = vld [vmem:[#allocation4 + $0xf0] sm:$0xff]  ;;  %6950 = vst [vmem:[#allocation4 + $0x109] sm:$0xff] %v14195_v57  ;;  %8688 = vmatpush2.msra.mxu0 %v7953_v42  ;;  %v6854_v10 = vadd.f32 %v14198_v39, %v6629_v40  ;;  %v6633_v15 = vpop.f32.mrf.mxu1  ;;  %8143 = vmatmul.mubr.f32.gmra.mxu1 %v14200_v62 }
 0x745   : > { %7204 = vst [vmem:[#allocation5 + $0x528] sm:$0xff] %v14200_v62  ;;  %7014 = vst [vmem:[#allocation5 + $0x5a0] sm:$0xff] %v14200_v62  ;;  %8689 = vmatprep.subr.mxu0 %v14225_v32  ;;  %v6634_v39 = vadd.f32 %v6633_v15, %v6409_v35  ;;  %8358 = vmatmul.mubr.f32.gmra.mxu0 %v14179_v22  ;;  %v7942_v62 = vld [vmem:[#allocation9 + $0x398] sm:$0xff] }
 0x746   : > { %7080 = vst [vmem:[#allocation5 + $0x638] sm:$0xff] %v14195_v57  ;;  %7459 = vst [vmem:[#allocation5 + $0x4b8] sm:$0xff] %v14203_v45  ;;  %v14228_v5 = vld [vmem:[#allocation4 + $0xf8] sm:$0xff]  ;;  %8690 = vmatpush2.msra.mxu0 %v7952_v26  ;;  %v14280_v14 = vmax.f32 %v6854_v10, 0.0  ;;  %v6635_v7 = vpop.f32.mrf.mxu1  ;;  %v7947_v10 = vld [vmem:[#allocation9 + $0x3c0] sm:$0xff]  ;;  %8147 = vmatprep.mubr.f32.mxu1 %v14173_v9 }
 0x747   : > { %7268 = vst [vmem:[#allocation5 + $0x530] sm:$0xff] %v14203_v45  ;;  %7395 = vst [vmem:[#allocation5 + $0x4b0] sm:$0xff] %v7363_v63  ;;  %v14230_v34 = vld [vmem:[#allocation4 + $0xf2] sm:$0xff]  ;;  %v14232_v0 = vld [vmem:[#allocation4 + $0xfa] sm:$0xff]  ;;  %8691 = vmatprep.subr.mxu0 %v14225_v32  ;;  %v6858_v63 = vpop.f32.mrf.mxu0  ;;  %8362 = vmatprep.mubr.f32.mxu0 %v14228_v5 }
 0x748   : > { %6951 = vst [vmem:[#allocation4 + $0x111] sm:$0xff] %v14222_v47  ;;  %7205 = vst [vmem:[#allocation5 + $0x570] sm:$0xff] %v14228_v5  ;;  %v14244_v54 = vld [vmem:[#allocation4 + $0xf2] sm:$0xff]  ;;  %v14246_v59 = vld [vmem:[#allocation4 + $0xfa] sm:$0xff]  ;;  %8692 = vmatpush2.msra.mxu0 %v7951_v19  ;;  %v6859_v37 = vadd.f32 %v6858_v63, %v6634_v39  ;;  %v6638_v20 = vpop.f32.mrf.mxu1  ;;  %8148 = vmatmul.mubr.f32.gmra.mxu1 %v14228_v5 }
 0x749   : > { %7015 = vst [vmem:[#allocation5 + $0x5e8] sm:$0xff] %v14228_v5  ;;  %7142 = vst [vmem:[#allocation5 + $0x5b0] sm:$0xff] %v14230_v34  ;;  %v14248_v36 = vld [vmem:[#allocation4 + $0xf9] sm:$0xff]  ;;  %8693 = vmatprep.subr.mxu0 %v14225_v32  ;;  %v6639_v11 = vadd.f32 %v6638_v20, %v6414_v41  ;;  %v14316_v49 = vpop.f32.mrf.mxu0  ;;  %8363 = vmatmul.mubr.f32.gmra.mxu0 %v14181_v44  ;;  %v6444_v44 = vadd.f32 %v14208_v50, %v13864_v2 }
 0x74a   : > { %7081 = vst [vmem:[#allocation5 + $0x680] sm:$0xff] %v14222_v47  ;;  %7143 = vst [vmem:[#allocation5 + $0x5f8] sm:$0xff] %v14232_v0  ;;  %v14255_v13 = vld [vmem:[#allocation4 + $0xf8] sm:$0xff]  ;;  %8694 = vmatpush2.msra.mxu0 %v7950_v30  ;;  %v14313_v53 = vmax.f32 %v6859_v37, 0.0  ;;  %v6640_v17 = vpop.f32.mrf.mxu1  ;;  %8152 = vmatprep.mubr.f32.mxu1 %v14195_v57 }
 0x74b   : > { %7332 = vst [vmem:[#allocation5 + $0x538] sm:$0xff] %v14244_v54  ;;  %7333 = vst [vmem:[#allocation5 + $0x580] sm:$0xff] %v14246_v59  ;;  %v14262_v38 = vld [vmem:[#allocation4 + $0x108] sm:$0xff]  ;;  %8695 = vmatprep.subr.mxu0 %v14225_v32  ;;  %v6864_v35 = vadd.f32 %v14260_v43, %v6639_v11  ;;  %v6868_v15 = vpop.f32.mrf.mxu0  ;;  %v7940_v5 = vld [vmem:[#allocation9 + $0x388] sm:$0xff] }
 0x74c   : > { %7269 = vst [vmem:[#allocation5 + $0x578] sm:$0xff] %v14248_v36  ;;  %v14265_v25 = vld [vmem:[#allocation4 + $0x109] sm:$0xff]  ;;  %6952 = vst [vmem:[#allocation4 + $0x121] sm:$0xff] %v14257_v55  ;;  %8696 = vmatpush2.msra.mxu0 %v7949_v6  ;;  %v6643_v30 = vpop.f32.mrf.mxu1  ;;  %8367 = vmatprep.mubr.f32.mxu0 %v14262_v38 }
 0x74d   : > { %v14267_v60 = vld [vmem:[#allocation4 + $0x108] sm:$0xff]  ;;  %7206 = vst [vmem:[#allocation5 + $0x5b8] sm:$0xff] %v14262_v38  ;;  %7016 = vst [vmem:[#allocation5 + $0x630] sm:$0xff] %v14262_v38  ;;  %8697 = vmatprep.subr.mxu0 %v14225_v32  ;;  %v14336_v48 = vmax.f32 %v6864_v35, 0.0  ;;  %v6644_v43 = vadd.f32 %v6643_v30, %v6419_v56  ;;  %v14372_v56 = vpop.f32.mrf.mxu0  ;;  %v6429_v30 = vadd.f32 %v14208_v50, %v13855_v58  ;;  %8153 = vmatmul.mubr.f32.gmra.mxu1 %v14262_v38  ;;  %v7939_v38 = vld [vmem:[#allocation9 + $0x380] sm:$0xff] }
 0x74e   : > { %7082 = vst [vmem:[#allocation5 + $0x6c8] sm:$0xff] %v14257_v55  ;;  %7270 = vst [vmem:[#allocation5 + $0x5c0] sm:$0xff] %v14265_v25  ;;  %8698 = vmatpush2.msra.mxu0 %v7948_v18  ;;  %v6645_v39 = vpop.f32.mrf.mxu1  ;;  %8157 = vmatprep.mubr.f32.mxu1 %v14222_v47 }
 0x74f   : > { %v14284_v28 = vld [vmem:[#allocation4 + $0x110] sm:$0xff]  ;;  %6953 = vst [vmem:[#allocation4 + $0x129] sm:$0xff] %v14280_v14  ;;  %7083 = vst [vmem:[#allocation5 + $0x710] sm:$0xff] %v14280_v14  ;;  %8699 = vmatprep.subr.mxu0 %v14225_v32  ;;  %v6869_v23 = vadd.f32 %v6868_v15, %v6644_v43  ;;  %v6878_v39 = vpop.f32.mrf.mxu0  ;;  %8368 = vmatmul.mubr.f32.gmra.mxu0 %v14230_v34 }
 0x750   : > { %v14286_v42 = vld [vmem:[#allocation4 + $0x10a] sm:$0xff]  ;;  %v14288_v1 = vld [vmem:[#allocation4 + $0x112] sm:$0xff]  ;;  %7207 = vst [vmem:[#allocation5 + $0x600] sm:$0xff] %v14284_v28  ;;  %7017 = vst [vmem:[#allocation5 + $0x678] sm:$0xff] %v14284_v28  ;;  %8700 = vmatpush2.msra.mxu0 %v7947_v10  ;;  %v6648_v20 = vpop.f32.mrf.mxu1  ;;  %8372 = vmatprep.mubr.f32.mxu0 %v14284_v28 }
 0x751   : > { %7144 = vst [vmem:[#allocation5 + $0x640] sm:$0xff] %v14286_v42  ;;  %7145 = vst [vmem:[#allocation5 + $0x688] sm:$0xff] %v14288_v1  ;;  %v14300_v33 = vld [vmem:[#allocation4 + $0x10a] sm:$0xff]  ;;  %v14302_v29 = vld [vmem:[#allocation4 + $0x112] sm:$0xff]  ;;  %8701 = vmatprep.subr.mxu0 %v14225_v32  ;;  %v14369_v11 = vmax.f32 %v6869_v23, 0.0  ;;  %v6649_v17 = vadd.f32 %v6648_v20, %v6424_v21  ;;  %8158 = vmatmul.mubr.f32.gmra.mxu1 %v14284_v28 }
 0x752   : > { %v14304_v26 = vld [vmem:[#allocation4 + $0x111] sm:$0xff]  ;;  %7334 = vst [vmem:[#allocation5 + $0x5c8] sm:$0xff] %v14300_v33  ;;  %7335 = vst [vmem:[#allocation5 + $0x610] sm:$0xff] %v14302_v29  ;;  %8702 = vmatpush2.msra.mxu0 %v7946_v24  ;;  %v6650_v16 = vpop.f32.mrf.mxu1  ;;  %8162 = vmatprep.mubr.f32.mxu1 %v14257_v55 }
 0x753   : > { %7271 = vst [vmem:[#allocation5 + $0x608] sm:$0xff] %v14304_v26  ;;  %v14311_v4 = vld [vmem:[#allocation4 + $0x110] sm:$0xff]  ;;  %v14318_v19 = vld [vmem:[#allocation4 + $0x120] sm:$0xff]  ;;  %6954 = vst [vmem:[#allocation4 + $0x139] sm:$0xff] %v14313_v53  ;;  %8703 = vmatprep.subr.mxu0 %v14225_v32  ;;  %v6874_v43 = vadd.f32 %v14316_v49, %v6649_v17  ;;  %8373 = vmatmul.mubr.f32.gmra.mxu0 %v14232_v0 }
 0x754   : > { %v14321_v61 = vld [vmem:[#allocation4 + $0x121] sm:$0xff]  ;;  %7208 = vst [vmem:[#allocation5 + $0x648] sm:$0xff] %v14318_v19  ;;  %7018 = vst [vmem:[#allocation5 + $0x6c0] sm:$0xff] %v14318_v19  ;;  %8704 = vmatpush2.msra.mxu0 %v7945_v12  ;;  %v7944_v24 = vld [vmem:[#allocation9 + $0x3a8] sm:$0xff]  ;;  %v6653_v15 = vpop.f32.mrf.mxu1  ;;  %8377 = vmatprep.mubr.f32.mxu0 %v14318_v19 }
 0x755   : > { %v14323_v40 = vld [vmem:[#allocation4 + $0x120] sm:$0xff]  ;;  %7084 = vst [vmem:[#allocation5 + $0x758] sm:$0xff] %v14313_v53  ;;  %7272 = vst [vmem:[#allocation5 + $0x650] sm:$0xff] %v14321_v61  ;;  %v14392_v58 = vmax.f32 %v6874_v43, 0.0  ;;  %v6654_v49 = vadd.f32 %v6653_v15, %v6429_v30  ;;  %8705 = vmatprep.subr.mxu0 %v14225_v32  ;;  %v14416_v30 = vpop.f32.mrf.mxu0  ;;  %8163 = vmatmul.mubr.f32.gmra.mxu1 %v14318_v19 }
 0x756   : > { %v14340_v6 = vld [vmem:[#allocation4 + $0x128] sm:$0xff]  ;;  %6955 = vst [vmem:[#allocation4 + $0x141] sm:$0xff] %v14336_v48  ;;  %7085 = vst [vmem:[#allocation5 + $0x7a0] sm:$0xff] %v14336_v48  ;;  %v6655_v21 = vpop.f32.mrf.mxu1  ;;  %8706 = vmatpush2.msra.mxu0 %v7944_v24  ;;  %8167 = vmatprep.mubr.f32.mxu1 %v14280_v14 }
 0x757   : > { %v14342_v63 = vld [vmem:[#allocation4 + $0x122] sm:$0xff]  ;;  %v14344_v7 = vld [vmem:[#allocation4 + $0x12a] sm:$0xff]  ;;  %7209 = vst [vmem:[#allocation5 + $0x690] sm:$0xff] %v14340_v6  ;;  %7019 = vst [vmem:[#allocation5 + $0x708] sm:$0xff] %v14340_v6  ;;  %v6879_v51 = vadd.f32 %v6878_v39, %v6654_v49  ;;  %8707 = vmatprep.subr.mxu0 %v14225_v32  ;;  %8378 = vmatmul.mubr.f32.gmra.mxu0 %v14286_v42 }
 0x758   : > { %7146 = vst [vmem:[#allocation5 + $0x6d0] sm:$0xff] %v14342_v63  ;;  %7147 = vst [vmem:[#allocation5 + $0x718] sm:$0xff] %v14344_v7  ;;  %v14356_v41 = vld [vmem:[#allocation4 + $0x122] sm:$0xff]  ;;  %v14358_v31 = vld [vmem:[#allocation4 + $0x12a] sm:$0xff]  ;;  %v6658_v16 = vpop.f32.mrf.mxu1  ;;  %8708 = vmatpush2.msra.mxu0 %v7943_v8  ;;  %8382 = vmatprep.mubr.f32.mxu0 %v14340_v6 }
 0x759   : > { %v14360_v37 = vld [vmem:[#allocation4 + $0x129] sm:$0xff]  ;;  %7336 = vst [vmem:[#allocation5 + $0x658] sm:$0xff] %v14356_v41  ;;  %7337 = vst [vmem:[#allocation5 + $0x6a0] sm:$0xff] %v14358_v31  ;;  %v14426_v15 = vmax.f32 %v6879_v51, 0.0  ;;  %v6659_v49 = vadd.f32 %v6658_v16, %v6434_v3  ;;  %8709 = vmatprep.subr.mxu0 %v14225_v32  ;;  %v7941_v8 = vld [vmem:[#allocation9 + $0x390] sm:$0xff]  ;;  %v6888_v16 = vpop.f32.mrf.mxu0  ;;  %8168 = vmatmul.mubr.f32.gmra.mxu1 %v14340_v6 }
 0x75a   : > { %7273 = vst [vmem:[#allocation5 + $0x698] sm:$0xff] %v14360_v37  ;;  %v14367_v18 = vld [vmem:[#allocation4 + $0x128] sm:$0xff]  ;;  %v14374_v35 = vld [vmem:[#allocation4 + $0x138] sm:$0xff]  ;;  %6956 = vst [vmem:[#allocation4 + $0x151] sm:$0xff] %v14369_v11  ;;  %v6660_v22 = vpop.f32.mrf.mxu1  ;;  %8710 = vmatpush2.msra.mxu0 %v7942_v62  ;;  %8172 = vmatprep.mubr.f32.mxu1 %v14313_v53 }
 0x75b   : > { %v14377_v46 = vld [vmem:[#allocation4 + $0x139] sm:$0xff]  ;;  %7210 = vst [vmem:[#allocation5 + $0x6d8] sm:$0xff] %v14374_v35  ;;  %7020 = vst [vmem:[#allocation5 + $0x750] sm:$0xff] %v14374_v35  ;;  %v6884_v3 = vadd.f32 %v14372_v56, %v6659_v49  ;;  %8711 = vmatprep.subr.mxu0 %v14225_v32  ;;  %8383 = vmatmul.mubr.f32.gmra.mxu0 %v14288_v1  ;;  %v7543_v53 = vld [vmem:[#allocation5 + $0x20] sm:$0xff] }
 0x75c   : > { %v14379_v10 = vld [vmem:[#allocation4 + $0x138] sm:$0xff]  ;;  %7086 = vst [vmem:[#allocation5 + $0x7e8] sm:$0xff] %v14369_v11  ;;  %7274 = vst [vmem:[#allocation5 + $0x6e0] sm:$0xff] %v14377_v46  ;;  %v6663_v51 = vpop.f32.mrf.mxu1  ;;  %8712 = vmatpush2.msra.mxu0 %v7941_v8  ;;  %8387 = vmatprep.mubr.f32.mxu0 %v14374_v35 }
 0x75d   : > { %v14396_v23 = vld [vmem:[#allocation4 + $0x140] sm:$0xff]  ;;  %6957 = vst [vmem:[#allocation4 + $0x159] sm:$0xff] %v14392_v58  ;;  %7087 = vst [vmem:[#allocation5 + $0x830] sm:$0xff] %v14392_v58  ;;  %8713 = vmatprep.subr.mxu0 %v14225_v32  ;;  %8173 = vmatmul.mubr.f32.gmra.mxu1 %v14374_v35  ;;  %v9996_v1 = vld [vmem:[#allocation5 + $0x28] sm:$0xff] }
 0x75e   : > { %v14398_v20 = vld [vmem:[#allocation4 + $0x13a] sm:$0xff]  ;;  %v14400_v12 = vld [vmem:[#allocation4 + $0x142] sm:$0xff]  ;;  %7211 = vst [vmem:[#allocation5 + $0x720] sm:$0xff] %v14396_v23  ;;  %7021 = vst [vmem:[#allocation5 + $0x798] sm:$0xff] %v14396_v23  ;;  %v6665_v49 = vpop.f32.mrf.mxu1  ;;  %8714 = vmatpush2.msra.mxu0 %v7940_v5  ;;  %8177 = vmatprep.mubr.f32.mxu1 %v14336_v48 }
 0x75f   : > { %7148 = vst [vmem:[#allocation5 + $0x760] sm:$0xff] %v14398_v20  ;;  %7149 = vst [vmem:[#allocation5 + $0x7a8] sm:$0xff] %v14400_v12  ;;  %v14412_v17 = vld [vmem:[#allocation4 + $0x13a] sm:$0xff]  ;;  %v14414_v52 = vld [vmem:[#allocation4 + $0x142] sm:$0xff]  ;;  %8715 = vmatprep.subr.mxu0 %v14225_v32  ;;  %8388 = vmatmul.mubr.f32.gmra.mxu0 %v14342_v63 }
 0x760   : > { %7338 = vst [vmem:[#allocation5 + $0x6e8] sm:$0xff] %v14412_v17  ;;  %7339 = vst [vmem:[#allocation5 + $0x730] sm:$0xff] %v14414_v52  ;;  %v14422_v43 = vld [vmem:[#allocation4 + $0x141] sm:$0xff]  ;;  %8716 = vmatpush2.msra.mxu0 %v7939_v38  ;;  %8392 = vmatprep.mubr.f32.mxu0 %v14396_v23  ;;  %v14556_v48 = vld [vmem:[#allocation4 + $0x199] sm:$0xff] }
 0x761   : > { %v14424_v24 = vld [vmem:[#allocation4 + $0x140] sm:$0xff]  ;;  %7275 = vst [vmem:[#allocation5 + $0x728] sm:$0xff] %v14422_v43  ;;  %v14430_v39 = vld [vmem:[#allocation4 + $0x150] sm:$0xff]  ;;  %6958 = vst [vmem:[#allocation4 + $0x169] sm:$0xff] %v14426_v15  ;;  %8178 = vmatmul.mubr.f32.gmra.mxu1 %v14396_v23 }
 0x762   : > { %15014 = vst [vmem:[#allocation15_spill] sm:$0xff] %v14424_v24  ;;  %v14433_v9 = vld [vmem:[#allocation4 + $0x151] sm:$0xff]  ;;  %v6439_v24 = vadd.f32 %v14208_v50, %v13861_v27  ;;  %7212 = vst [vmem:[#allocation5 + $0x768] sm:$0xff] %v14430_v39  ;;  %v14448_v27 = vmax.f32 %v6884_v3, 0.0  ;;  %v6668_v50 = vpop.f32.mrf.mxu1  ;;  %8182 = vmatprep.mubr.f32.mxu1 %v14369_v11  ;;  %v7969_v63 = vld [vmem:[#allocation9 + $0x470] sm:$0xff] }
 0x763   : > { %v14435_v21 = vld [vmem:[#allocation4 + $0x150] sm:$0xff]  ;;  %7022 = vst [vmem:[#allocation5 + $0x7e0] sm:$0xff] %v14430_v39  ;;  %7088 = vst [vmem:[#allocation5 + $0x878] sm:$0xff] %v14426_v15  ;;  %8393 = vmatmul.mubr.f32.gmra.mxu0 %v14344_v7  ;;  %v9997_v7 = vld [vmem:[#allocation9 + $0x478] sm:$0xff] }
 0x764   : > { %15015 = vst [vmem:[#allocation16_spill] sm:$0xff] %v14435_v21  ;;  %7276 = vst [vmem:[#allocation5 + $0x770] sm:$0xff] %v14433_v9  ;;  %v6664_v56 = vadd.f32 %v6663_v51, %v6439_v24  ;;  %v14452_v22 = vld [vmem:[#allocation4 + $0x158] sm:$0xff]  ;;  %8397 = vmatprep.mubr.f32.mxu0 %v14430_v39  ;;  %v9998_v11 = vld [vmem:[#allocation5 + $0x70] sm:$0xff] }
 0x765   : > { %v14454_v62 = vld [vmem:[#allocation4 + $0x152] sm:$0xff]  ;;  %v14456_v21 = vld [vmem:[#allocation4 + $0x15a] sm:$0xff]  ;;  %6959 = vst [vmem:[#allocation4 + $0x171] sm:$0xff] %v14448_v27  ;;  %7213 = vst [vmem:[#allocation5 + $0x7b0] sm:$0xff] %v14452_v22  ;;  %8183 = vmatmul.mubr.f32.gmra.mxu1 %v14430_v39 }
 0x766   : > { %v6889_v57 = vadd.f32 %v6888_v16, %v6664_v56  ;;  %7023 = vst [vmem:[#allocation5 + $0x828] sm:$0xff] %v14452_v22  ;;  %7150 = vst [vmem:[#allocation5 + $0x7f0] sm:$0xff] %v14454_v62  ;;  %v14468_v24 = vld [vmem:[#allocation4 + $0x152] sm:$0xff]  ;;  %v14470_v2 = vld [vmem:[#allocation4 + $0x15a] sm:$0xff]  ;;  %v6669_v16 = vadd.f32 %v6668_v50, %v6444_v44  ;;  %v6670_v56 = vpop.f32.mrf.mxu1  ;;  %8187 = vmatprep.mubr.f32.mxu1 %v14392_v58 }
 0x767   : > { %7089 = vst [vmem:[#allocation5 + $0x8c0] sm:$0xff] %v14448_v27  ;;  %7151 = vst [vmem:[#allocation5 + $0x838] sm:$0xff] %v14456_v21  ;;  %v14474_v3 = vld [vmem:[#allocation4 + $0x159] sm:$0xff]  ;;  %8398 = vmatmul.mubr.f32.gmra.mxu0 %v14398_v20  ;;  %v14559_v35 = vld [vmem:[#allocation4 + $0x1a1] sm:$0xff] }
 0x768   : > { %15016 = vst [vmem:[#allocation17_spill] sm:$0xff] %v14470_v2  ;;  %v14476_v8 = vld [vmem:[#allocation4 + $0x158] sm:$0xff]  ;;  %v6927_v51 = vmax.f32 %v6889_v57, 0.0  ;;  %7277 = vst [vmem:[#allocation5 + $0x7b8] sm:$0xff] %v14474_v3  ;;  %v14480_v49 = vld [vmem:[#allocation4 + $0x168] sm:$0xff]  ;;  %v6894_v2 = vadd.f32 %v14416_v30, %v6669_v16  ;;  %v14495_v5 = vpop.f32.mrf.mxu1  ;;  %8402 = vmatprep.mubr.f32.mxu0 %v14452_v22 }
 0x769   : > { %v14483_v34 = vld [vmem:[#allocation4 + $0x169] sm:$0xff]  ;;  %7214 = vst [vmem:[#allocation5 + $0x7f8] sm:$0xff] %v14480_v49  ;;  %7024 = vst [vmem:[#allocation5 + $0x870] sm:$0xff] %v14480_v49  ;;  %8188 = vmatmul.mubr.f32.gmra.mxu1 %v14452_v22  ;;  %v9999_v58 = vld [vmem:[#allocation5 + $0x68] sm:$0xff] }
 0x76a   : > { %v14485_v47 = vld [vmem:[#allocation4 + $0x168] sm:$0xff]  ;;  %6960 = vst [vmem:[#allocation4 + $0x181] sm:$0xff] %v6927_v51  ;;  %7278 = vst [vmem:[#allocation5 + $0x800] sm:$0xff] %v14483_v34  ;;  %v6928_v32 = vmax.f32 %v6894_v2, 0.0  ;;  %v8046_v0 = vpop.f32.mrf.mxu1  ;;  %8192 = vmatprep.mubr.f32.mxu1 %v14426_v15  ;;  %v7968_v23 = vld [vmem:[#allocation9 + $0x468] sm:$0xff] }
 0x76b   : > { %8403 = vmatmul.mubr.f32.gmra.mxu0 %v14400_v12  ;;  %v10000_v20 = vld [vmem:[#allocation5 + $0xb8] sm:$0xff]  ;;  %v7967_v15 = vld [vmem:[#allocation9 + $0x460] sm:$0xff]  ;;  %v10002_v39 = vld [vmem:[#allocation5 + $0x30] sm:$0xff] }
 0x76c   : > { %v7183_v44 = vld [vmem:[#allocation4 + $0x170] sm:$0xff]  ;;  %6961 = vst [vmem:[#allocation4 + $0x189] sm:$0xff] %v6928_v32  ;;  %v14515_v19 = vpop.f32.mrf.mxu1  ;;  %8407 = vmatprep.mubr.f32.mxu0 %v14480_v49  ;;  %v10001_v12 = vld [vmem:[#allocation5 + $0x38] sm:$0xff] }
 0x76d   : > { %v14497_v30 = vld [vmem:[#allocation4 + $0x16a] sm:$0xff]  ;;  %v14499_v28 = vld [vmem:[#allocation4 + $0x172] sm:$0xff]  ;;  %7215 = vst [vmem:[#allocation5 + $0x840] sm:$0xff] %v7183_v44  ;;  %7025 = vst [vmem:[#allocation5 + $0x8b8] sm:$0xff] %v7183_v44  ;;  %8193 = vmatmul.mubr.f32.gmra.mxu1 %v14480_v49 }
 0x76e   : > { %7152 = vst [vmem:[#allocation5 + $0x880] sm:$0xff] %v14497_v30  ;;  %7153 = vst [vmem:[#allocation5 + $0x8c8] sm:$0xff] %v14499_v28  ;;  %v14504_v55 = vld [vmem:[#allocation4 + $0x16a] sm:$0xff]  ;;  %v14506_v57 = vld [vmem:[#allocation4 + $0x172] sm:$0xff]  ;;  %v8051_v42 = vpop.f32.mrf.mxu1  ;;  %8197 = vmatprep.mubr.f32.mxu1 %v14448_v27 }
 0x76f   : > { %v14510_v2 = vld [vmem:[#allocation4 + $0x171] sm:$0xff]  ;;  %8408 = vmatmul.mubr.f32.gmra.mxu0 %v14454_v62  ;;  %v7966_v22 = vld [vmem:[#allocation9 + $0x458] sm:$0xff]  ;;  %v10010_v42 = vld [vmem:[#allocation5 + $0x110] sm:$0xff] }
 0x770   : > { %v14512_v50 = vld [vmem:[#allocation4 + $0x170] sm:$0xff]  ;;  %7279 = vst [vmem:[#allocation5 + $0x848] sm:$0xff] %v14510_v2  ;;  %8412 = vmatprep.mubr.f32.mxu0 %v7183_v44  ;;  %v10005_v62 = vld [vmem:[#allocation5 + $0x78] sm:$0xff]  ;;  %v10006_v49 = vld [vmem:[#allocation5 + $0x148] sm:$0xff] }
 0x771   : > { %v7184_v38 = vld [vmem:[#allocation4 + $0x180] sm:$0xff]  ;;  %8198 = vmatmul.mubr.f32.gmra.mxu1 %v7183_v44  ;;  %v10004_v27 = vld [vmem:[#allocation5 + $0x80] sm:$0xff]  ;;  %v10007_v44 = vld [vmem:[#allocation5 + $0xc8] sm:$0xff] }
 0x772   : > { %v14518_v51 = vld [vmem:[#allocation4 + $0x181] sm:$0xff]  ;;  %7216 = vst [vmem:[#allocation5 + $0x888] sm:$0xff] %v7184_v38  ;;  %8492 = vmatprep.mubr.f32.mxu1 %v9996_v1  ;;  %v10011_v1 = vld [vmem:[#allocation5 + $0x108] sm:$0xff] }
 0x773   : > { %v14520_v16 = vld [vmem:[#allocation4 + $0x180] sm:$0xff]  ;;  %7280 = vst [vmem:[#allocation5 + $0x890] sm:$0xff] %v14518_v51  ;;  %v7185_v14 = vld [vmem:[#allocation4 + $0x188] sm:$0xff]  ;;  %8413 = vmatmul.mubr.f32.gmra.mxu0 %v14456_v21  ;;  %v10003_v21 = vld [vmem:[#allocation5 + $0x100] sm:$0xff] }
 0x774   : > { %v14527_v56 = vld [vmem:[#allocation4 + $0x182] sm:$0xff]  ;;  %7217 = vst [vmem:[#allocation5 + $0x8d0] sm:$0xff] %v7185_v14  ;;  %v14530_v32 = vld [vmem:[#allocation4 + $0x18a] sm:$0xff]  ;;  %8417 = vmatprep.mubr.f32.mxu0 %v7184_v38 }
 0x775   : > { %v14532_v0 = vld [vmem:[#allocation4 + $0x189] sm:$0xff]  ;;  %8493 = vmatmul.mubr.f32.vlgmr.msra.gmra.mxu1 %v7543_v53  ;;  %v10009_v38 = vld [vmem:[#allocation5 + $0x190] sm:$0xff] }
 0x776   : > { %v14534_v6 = vld [vmem:[#allocation4 + $0x188] sm:$0xff]  ;;  %7281 = vst [vmem:[#allocation5 + $0x8d8] sm:$0xff] %v14532_v0  ;;  %9733 = vmatpush3.msra.mxu1 %v9997_v7  ;;  %8497 = vmatprep.mubr.f32.mxu1 %v9998_v11  ;;  %v7963_v7 = vld [vmem:[#allocation9 + $0x440] sm:$0xff]  ;;  %v10014_v11 = vld [vmem:[#allocation5 + $0x150] sm:$0xff] }
 0x777   : > { %8418 = vmatmul.mubr.f32.gmra.mxu0 %v14497_v30  ;;  %9734 = vmatprep.subr.mxu1 %v7969_v63  ;;  %v7965_v30 = vld [vmem:[#allocation9 + $0x450] sm:$0xff]  ;;  %v10012_v53 = vld [vmem:[#allocation5 + $0x1d8] sm:$0xff] }
 0x778   : > { %8422 = vmatprep.mubr.f32.mxu0 %v7185_v14  ;;  %9735 = vmatpush3.msra.mxu1 %v7969_v63  ;;  %v7964_v14 = vld [vmem:[#allocation9 + $0x448] sm:$0xff]  ;;  %v10013_v63 = vld [vmem:[#allocation5 + $0x158] sm:$0xff] }
 0x779   : > { %8498 = vmatmul.mubr.f32.gmra.mxu1 %v9999_v58  ;;  %9736 = vmatprep.subr.mxu1 %v7968_v23  ;;  %v10015_v58 = vld [vmem:[#allocation5 + $0x220] sm:$0xff] }
 0x77a   : > { %8502 = vmatprep.mubr.f32.mxu1 %v10000_v20  ;;  %9737 = vmatpush3.msra.mxu1 %v7968_v23  ;;  %v10016_v23 = vld [vmem:[#allocation5 + $0x1a0] sm:$0xff]  ;;  %v7962_v20 = vld [vmem:[#allocation9 + $0x438] sm:$0xff] }
 0x77b   : > { %8423 = vmatmul.mubr.f32.gmra.mxu0 %v14499_v28  ;;  %9738 = vmatprep.subr.mxu1 %v7967_v15  ;;  %v10008_v28 = vld [vmem:[#allocation5 + $0xc0] sm:$0xff] }
 0x77c   : > { %8717 = vmatprep.mubr.f32.mxu0 %v10001_v12  ;;  %9739 = vmatpush3.msra.mxu1 %v7967_v15  ;;  %v10018_v15 = vld [vmem:[#allocation5 + $0x268] sm:$0xff] }
 0x77d   : > { %8503 = vmatmul.mubr.f32.gmra.mxu1 %v10001_v12  ;;  %9740 = vmatprep.subr.mxu1 %v7966_v22  ;;  %v10017_v12 = vld [vmem:[#allocation5 + $0x198] sm:$0xff] }
 0x77e   : > { %8507 = vmatprep.mubr.f32.mxu1 %v10003_v21  ;;  %9741 = vmatpush3.msra.mxu1 %v7966_v22  ;;  %v7961_v21 = vld [vmem:[#allocation9 + $0x430] sm:$0xff] }
 0x77f   : > { %8718 = vmatmul.mubr.f32.vlgmr.msra.gmra.mxu0 %v10002_v39  ;;  %9742 = vmatprep.subr.mxu1 %v7965_v30  ;;  %v10019_v39 = vld [vmem:[#allocation5 + $0x1e8] sm:$0xff]  ;;  %v10021_v22 = vld [vmem:[#allocation5 + $0x2b0] sm:$0xff] }
 0x780   : > { %8722 = vmatprep.mubr.f32.mxu0 %v10004_v27  ;;  %9743 = vmatpush3.msra.mxu1 %v7965_v30  ;;  %v10024_v30 = vld [vmem:[#allocation5 + $0x2f8] sm:$0xff] }
 0x781   : > { %8508 = vmatmul.mubr.f32.gmra.mxu1 %v10004_v27  ;;  %9744 = vmatprep.subr.mxu1 %v7964_v14  ;;  %v10020_v27 = vld [vmem:[#allocation5 + $0x1e0] sm:$0xff] }
 0x782   : > { %8512 = vmatprep.mubr.f32.mxu1 %v10006_v49  ;;  %9745 = vmatpush3.msra.mxu1 %v7964_v14  ;;  %v7960_v49 = vld [vmem:[#allocation9 + $0x428] sm:$0xff]  ;;  %v10027_v14 = vld [vmem:[#allocation5 + $0x340] sm:$0xff] }
 0x783   : > { %8723 = vmatmul.mubr.f32.gmra.mxu0 %v10005_v62  ;;  %9746 = vmatprep.subr.mxu1 %v7963_v7  ;;  %v10022_v62 = vld [vmem:[#allocation5 + $0x230] sm:$0xff] }
 0x784   : > { %8727 = vmatprep.mubr.f32.mxu0 %v10007_v44  ;;  %9747 = vmatpush3.msra.mxu1 %v7963_v7  ;;  %v10030_v7 = vld [vmem:[#allocation5 + $0x388] sm:$0xff] }
 0x785   : > { %8513 = vmatmul.mubr.f32.gmra.mxu1 %v10007_v44  ;;  %9748 = vmatprep.subr.mxu1 %v7962_v20  ;;  %v10023_v44 = vld [vmem:[#allocation5 + $0x228] sm:$0xff] }
 0x786   : > { %8517 = vmatprep.mubr.f32.mxu1 %v10009_v38  ;;  %9749 = vmatpush3.msra.mxu1 %v7962_v20  ;;  %v7959_v38 = vld [vmem:[#allocation9 + $0x420] sm:$0xff]  ;;  %v10033_v20 = vld [vmem:[#allocation5 + $0x3d0] sm:$0xff] }
 0x787   : > { %8728 = vmatmul.mubr.f32.gmra.mxu0 %v10008_v28  ;;  %9750 = vmatprep.subr.mxu1 %v7961_v21  ;;  %v10025_v28 = vld [vmem:[#allocation5 + $0x278] sm:$0xff] }
 0x788   : > { %8732 = vmatprep.mubr.f32.mxu0 %v10010_v42  ;;  %9751 = vmatpush3.msra.mxu1 %v7961_v21  ;;  %v14562_v21 = vld [vmem:[#allocation5 + $0x418] sm:$0xff] }
 0x789   : > { %8518 = vmatmul.mubr.f32.gmra.mxu1 %v10010_v42  ;;  %9752 = vmatprep.subr.mxu1 %v7960_v49  ;;  %v10026_v42 = vld [vmem:[#allocation5 + $0x270] sm:$0xff] }
 0x78a   : > { %8522 = vmatprep.mubr.f32.mxu1 %v10012_v53  ;;  %9753 = vmatpush3.msra.mxu1 %v7960_v49  ;;  %v7958_v53 = vld [vmem:[#allocation9 + $0x418] sm:$0xff]  ;;  %v14565_v49 = vld [vmem:[#allocation5 + $0x460] sm:$0xff] }
 0x78b   : > { %8733 = vmatmul.mubr.f32.gmra.mxu0 %v10011_v1  ;;  %v10028_v1 = vld [vmem:[#allocation5 + $0x2c0] sm:$0xff]  ;;  %9754 = vmatprep.subr.mxu1 %v7959_v38 }
 0x78c   : > { %8737 = vmatprep.mubr.f32.mxu0 %v10013_v63  ;;  %9755 = vmatpush3.msra.mxu1 %v7959_v38  ;;  %v14570_v38 = vld [vmem:[#allocation5 + $0x4a8] sm:$0xff] }
 0x78d   : > { %8523 = vmatmul.mubr.f32.gmra.mxu1 %v10013_v63  ;;  %v10029_v63 = vld [vmem:[#allocation5 + $0x2b8] sm:$0xff]  ;;  %9756 = vmatprep.subr.mxu1 %v7958_v53 }
 0x78e   : > { %8527 = vmatprep.mubr.f32.mxu1 %v10015_v58  ;;  %v7957_v58 = vld [vmem:[#allocation9 + $0x410] sm:$0xff]  ;;  %9757 = vmatpush3.msra.mxu1 %v7958_v53 }
 0x78f   : > { %8738 = vmatmul.mubr.f32.gmra.mxu0 %v10014_v11  ;;  %v10031_v11 = vld [vmem:[#allocation5 + $0x308] sm:$0xff]  ;;  %9758 = vmatprep.subr.mxu1 %v7957_v58  ;;  %v14575_v53 = vld [vmem:[#allocation5 + $0x4f0] sm:$0xff] }
 0x790   : > { %8742 = vmatprep.mubr.f32.mxu0 %v10016_v23  ;;  %9759 = vmatpush3.msra.mxu1 %v7957_v58 }
 0x791   : > { %8528 = vmatmul.mubr.f32.gmra.mxu1 %v10016_v23  ;;  %v10032_v23 = vld [vmem:[#allocation5 + $0x300] sm:$0xff] }
 0x792   : > { %8532 = vmatprep.mubr.f32.mxu1 %v10018_v15  ;;  %v7956_v15 = vld [vmem:[#allocation9 + $0x408] sm:$0xff] }
 0x793   : > { %8743 = vmatmul.mubr.f32.gmra.mxu0 %v10017_v12  ;;  %v10034_v12 = vld [vmem:[#allocation5 + $0x350] sm:$0xff]  ;;  %9760 = vmatprep.subr.mxu1 %v7956_v15 }
 0x794   : > { %8747 = vmatprep.mubr.f32.mxu0 %v10019_v39  ;;  %9761 = vmatpush3.msra.mxu1 %v7956_v15  ;;  %v10049_v15 = vld [vmem:[#allocation5 + $0x4b0] sm:$0xff] }
 0x795   : > { %8533 = vmatmul.mubr.f32.gmra.mxu1 %v10019_v39  ;;  %v10035_v39 = vld [vmem:[#allocation5 + $0x348] sm:$0xff] }
 0x796   : > { %8537 = vmatprep.mubr.f32.mxu1 %v10021_v22  ;;  %v7955_v22 = vld [vmem:[#allocation9 + $0x400] sm:$0xff] }
 0x797   : > { %8748 = vmatmul.mubr.f32.gmra.mxu0 %v10020_v27  ;;  %v10037_v27 = vld [vmem:[#allocation5 + $0x398] sm:$0xff]  ;;  %9762 = vmatprep.subr.mxu1 %v7955_v22 }
 0x798   : > { %8752 = vmatprep.mubr.f32.mxu0 %v10022_v62  ;;  %9763 = vmatpush3.msra.mxu1 %v7955_v22 }
 0x799   : > { %8538 = vmatmul.mubr.f32.gmra.mxu1 %v10022_v62  ;;  %v10038_v62 = vld [vmem:[#allocation5 + $0x390] sm:$0xff] }
 0x79a   : > { %8542 = vmatprep.mubr.f32.mxu1 %v10024_v30  ;;  %v14568_v30 = vld [vmem:[#allocation4 + $0x19a] sm:$0xff] }
 0x79b   : > { %8753 = vmatmul.mubr.f32.gmra.mxu0 %v10023_v44  ;;  %v10040_v44 = vld [vmem:[#allocation5 + $0x3e0] sm:$0xff] }
 0x79c   : > { %8757 = vmatprep.mubr.f32.mxu0 %v10025_v28 }
 0x79d   : > { %8543 = vmatmul.mubr.f32.gmra.mxu1 %v10025_v28  ;;  %v10041_v28 = vld [vmem:[#allocation5 + $0x3d8] sm:$0xff] }
 0x79e   : > { %8547 = vmatprep.mubr.f32.mxu1 %v10027_v14  ;;  %v14573_v14 = vld [vmem:[#allocation4 + $0x1a2] sm:$0xff] }
 0x79f   : > { %8758 = vmatmul.mubr.f32.gmra.mxu0 %v10026_v42  ;;  %v10043_v42 = vld [vmem:[#allocation5 + $0x428] sm:$0xff] }
 0x7a0   : > { %8762 = vmatprep.mubr.f32.mxu0 %v10028_v1 }
 0x7a1   : > { %8548 = vmatmul.mubr.f32.gmra.mxu1 %v10028_v1  ;;  %v10044_v1 = vld [vmem:[#allocation5 + $0x420] sm:$0xff] }
 0x7a2   : > { %8552 = vmatprep.mubr.f32.mxu1 %v10030_v7  ;;  %v14581_v7 = vld [vmem:[%s14988_s8] ss:$0 sm:$0xff] }
 0x7a3   : > { %8763 = vmatmul.mubr.f32.gmra.mxu0 %v10029_v63  ;;  %v10046_v63 = vld [vmem:[#allocation5 + $0x470] sm:$0xff]  ;;  %v8045_v58 = vadd.f32 %v14581_v7, %v14495_v5 }
 0x7a4   : > { %8767 = vmatprep.mubr.f32.mxu0 %v10031_v11 }
 0x7a5   : > { %8553 = vmatmul.mubr.f32.gmra.mxu1 %v10031_v11  ;;  %v10047_v11 = vld [vmem:[#allocation5 + $0x468] sm:$0xff] }
 0x7a6   : > { %8557 = vmatprep.mubr.f32.mxu1 %v10033_v20  ;;  %v10048_v20 = vld [vmem:[#allocation5 + $0x4b8] sm:$0xff] }
 0x7a7   : > { %8768 = vmatmul.mubr.f32.gmra.mxu0 %v10032_v23 }
 0x7a8   : > { %8772 = vmatprep.mubr.f32.mxu0 %v10034_v12 }
 0x7a9   : > { %8558 = vmatmul.mubr.f32.gmra.mxu1 %v10034_v12 }
 0x7aa   : > { %8562 = vmatprep.mubr.f32.mxu1 %v14562_v21 }
 0x7ab   : > { %8773 = vmatmul.mubr.f32.gmra.mxu0 %v10035_v39 }
 0x7ac   : > { %8777 = vmatprep.mubr.f32.mxu0 %v10037_v27 }
 0x7ad   : > { %8563 = vmatmul.mubr.f32.gmra.mxu1 %v10037_v27 }
 0x7ae   : > { %8567 = vmatprep.mubr.f32.mxu1 %v14565_v49 }
 0x7af   : > { %8778 = vmatmul.mubr.f32.gmra.mxu0 %v10038_v62 }
 0x7b0   : > { %8782 = vmatprep.mubr.f32.mxu0 %v10040_v44 }
 0x7b1   : > { %8568 = vmatmul.mubr.f32.gmra.mxu1 %v10040_v44 }
 0x7b2   : > { %8572 = vmatprep.mubr.f32.mxu1 %v14570_v38 }
 0x7b3   : > { %8783 = vmatmul.mubr.f32.gmra.mxu0 %v10041_v28 }
 0x7b4   : > { %8787 = vmatprep.mubr.f32.mxu0 %v10043_v42  ;;  %v8054_v23 = vpop.f32.mrf.mxu1 }
 0x7b5   : > { %8573 = vmatmul.mubr.f32.gmra.mxu1 %v10043_v42  ;;  %v8269_v12 = vpop.f32.mrf.mxu0  ;;  %v8055_v28 = vadd.f32 %v14581_v7, %v8054_v23 }
 0x7b6   : > { %8577 = vmatprep.mubr.f32.mxu1 %v14575_v53  ;;  %v14588_v39 = vadd.f32 %v8269_v12, %v8045_v58  ;;  %v8056_v27 = vpop.f32.mrf.mxu1 }
 0x7b7   : > { %8788 = vmatmul.mubr.f32.gmra.mxu0 %v10044_v1  ;;  %v8271_v22 = vpop.f32.mrf.mxu0 }
 0x7b8   : > { %8792 = vmatprep.mubr.f32.mxu0 %v10046_v63 }
 0x7b9   : > { %8578 = vmatmul.mubr.f32.gmra.mxu1 %v10046_v63  ;;  %v8274_v5 = vpop.f32.mrf.mxu0 }
 0x7ba   : > { %8582 = vmatprep.mubr.f32.mxu1 %v14244_v54  ;;  %v8059_v54 = vpop.f32.mrf.mxu1 }
 0x7bb   : > { %8793 = vmatmul.mubr.f32.gmra.mxu0 %v10047_v11  ;;  %v8276_v44 = vpop.f32.mrf.mxu0  ;;  %v8060_v1 = vadd.f32 %v14581_v7, %v8059_v54 }
 0x7bc   : > { %8797 = vmatprep.mubr.f32.mxu0 %v14203_v45  ;;  %v8050_v45 = vadd.f32 %v14581_v7, %v14515_v19 }
 0x7bd   : > { %8583 = vmatmul.mubr.f32.gmra.mxu1 %v10048_v20  ;;  %v8279_v19 = vpop.f32.mrf.mxu0 }
 0x7be   : > { %8587 = vmatprep.mubr.f32.mxu1 %v14246_v59  ;;  %v14596_v62 = vadd.f32 %v8274_v5, %v8050_v45  ;;  %v8061_v59 = vpop.f32.mrf.mxu1 }
 0x7bf   : > { %8798 = vmatmul.mubr.f32.gmra.mxu0 %v10049_v15 }
 0x7c0   : > { %8802 = vmatprep.mubr.f32.mxu0 %v14248_v36  ;;  %v8064_v42 = vpop.f32.mrf.mxu1 }
 0x7c1   : > { %8588 = vmatmul.mubr.f32.gmra.mxu1 %v14248_v36  ;;  %v14603_v36 = vadd.f32 %v8279_v19, %v8055_v28  ;;  %v8065_v58 = vadd.f32 %v14581_v7, %v8064_v42  ;;  %v15017_v28 = vld [vmem:[#allocation15_spill] sm:$0xff] }
 0x7c2   : > { %8592 = vmatprep.mubr.f32.mxu1 %v14300_v33  ;;  %v8281_v33 = vpop.f32.mrf.mxu0 }
 0x7c3   : > { %8803 = vmatmul.mubr.f32.gmra.mxu0 %v14255_v13  ;;  %v8066_v13 = vpop.f32.mrf.mxu1  ;;  %v15018_v33 = vld [vmem:[#allocation16_spill] sm:$0xff] }
 0x7c4   : > { %8807 = vmatprep.mubr.f32.mxu0 %v14265_v25  ;;  %v8284_v11 = vpop.f32.mrf.mxu0 }
 0x7c5   : > { %8593 = vmatmul.mubr.f32.gmra.mxu1 %v14265_v25  ;;  %v8069_v63 = vpop.f32.mrf.mxu1  ;;  %v14610_v25 = vadd.f32 %v8284_v11, %v8060_v1 }
 0x7c6   : > { %8597 = vmatprep.mubr.f32.mxu1 %v14302_v29  ;;  %v8286_v29 = vpop.f32.mrf.mxu0  ;;  %v8070_v12 = vadd.f32 %v14581_v7, %v8069_v63 }
 0x7c7   : > { %8808 = vmatmul.mubr.f32.gmra.mxu0 %v14267_v60  ;;  %v8071_v60 = vpop.f32.mrf.mxu1 }
 0x7c8   : > { %8812 = vmatprep.mubr.f32.mxu0 %v14304_v26  ;;  %v8289_v20 = vpop.f32.mrf.mxu0 }
 0x7c9   : > { %8598 = vmatmul.mubr.f32.gmra.mxu1 %v14304_v26  ;;  %v8074_v23 = vpop.f32.mrf.mxu1  ;;  %v14617_v26 = vadd.f32 %v8289_v20, %v8065_v58 }
 0x7ca   : > { %8602 = vmatprep.mubr.f32.mxu1 %v14356_v41  ;;  %v8291_v41 = vpop.f32.mrf.mxu0  ;;  %v8075_v22 = vadd.f32 %v14581_v7, %v8074_v23 }
 0x7cb   : > { %8813 = vmatmul.mubr.f32.gmra.mxu0 %v14311_v4  ;;  %v8076_v4 = vpop.f32.mrf.mxu1 }
 0x7cc   : > { %8817 = vmatprep.mubr.f32.mxu0 %v14321_v61  ;;  %v8294_v27 = vpop.f32.mrf.mxu0 }
 0x7cd   : > { %8603 = vmatmul.mubr.f32.gmra.mxu1 %v14321_v61  ;;  %v8079_v15 = vpop.f32.mrf.mxu1  ;;  %v14624_v61 = vadd.f32 %v8294_v27, %v8070_v12 }
 0x7ce   : > { %8607 = vmatprep.mubr.f32.mxu1 %v14358_v31  ;;  %v8296_v31 = vpop.f32.mrf.mxu0  ;;  %v8080_v5 = vadd.f32 %v14581_v7, %v8079_v15 }
 0x7cf   : > { %8818 = vmatmul.mubr.f32.gmra.mxu0 %v14323_v40  ;;  %v8081_v40 = vpop.f32.mrf.mxu1 }
 0x7d0   : > { %8822 = vmatprep.mubr.f32.mxu0 %v14360_v37  ;;  %v8299_v54 = vpop.f32.mrf.mxu0 }
 0x7d1   : > { %8608 = vmatmul.mubr.f32.gmra.mxu1 %v14360_v37  ;;  %v8084_v45 = vpop.f32.mrf.mxu1  ;;  %v14631_v37 = vadd.f32 %v8299_v54, %v8075_v22 }
 0x7d2   : > { %8612 = vmatprep.mubr.f32.mxu1 %v14412_v17  ;;  %v8301_v17 = vpop.f32.mrf.mxu0  ;;  %v8085_v42 = vadd.f32 %v14581_v7, %v8084_v45 }
 0x7d3   : > { %8823 = vmatmul.mubr.f32.gmra.mxu0 %v14367_v18  ;;  %v8086_v18 = vpop.f32.mrf.mxu1 }
 0x7d4   : > { %8827 = vmatprep.mubr.f32.mxu0 %v14377_v46  ;;  %v8304_v44 = vpop.f32.mrf.mxu0 }
 0x7d5   : > { %8613 = vmatmul.mubr.f32.gmra.mxu1 %v14377_v46  ;;  %v8089_v59 = vpop.f32.mrf.mxu1  ;;  %v14638_v46 = vadd.f32 %v8304_v44, %v8080_v5 }
 0x7d6   : > { %8617 = vmatprep.mubr.f32.mxu1 %v14414_v52  ;;  %v8306_v52 = vpop.f32.mrf.mxu0  ;;  %v8090_v60 = vadd.f32 %v14581_v7, %v8089_v59 }
 0x7d7   : > { %8828 = vmatmul.mubr.f32.gmra.mxu0 %v14379_v10  ;;  %v8091_v10 = vpop.f32.mrf.mxu1  ;;  %v7556_v52 = vld [vmem:[#allocation5 + $0x88] sm:$0xff] }
 0x7d8   : > { %8832 = vmatprep.mubr.f32.mxu0 %v14422_v43  ;;  %v8309_v13 = vpop.f32.mrf.mxu0 }
 0x7d9   : > { %8618 = vmatmul.mubr.f32.gmra.mxu1 %v14422_v43  ;;  %v8094_v19 = vpop.f32.mrf.mxu1  ;;  %v15019_v43 = vld [vmem:[#allocation17_spill] sm:$0xff]  ;;  %v14645_v1 = vadd.f32 %v8309_v13, %v8085_v42 }
 0x7da   : > { %8622 = vmatprep.mubr.f32.mxu1 %v14468_v24  ;;  %v8311_v11 = vpop.f32.mrf.mxu0  ;;  %v8095_v4 = vadd.f32 %v14581_v7, %v8094_v19 }
 0x7db   : > { %8833 = vmatmul.mubr.f32.gmra.mxu0 %v15017_v28  ;;  %v8096_v63 = vpop.f32.mrf.mxu1 }
 0x7dc   : > { %8837 = vmatprep.mubr.f32.mxu0 %v14433_v9  ;;  %v8314_v58 = vpop.f32.mrf.mxu0 }
 0x7dd   : > { %8623 = vmatmul.mubr.f32.gmra.mxu1 %v14433_v9  ;;  %v8099_v29 = vpop.f32.mrf.mxu1  ;;  %v14652_v9 = vadd.f32 %v8314_v58, %v8090_v60 }
 0x7de   : > { %8627 = vmatprep.mubr.f32.mxu1 %v15019_v43  ;;  %v8316_v20 = vpop.f32.mrf.mxu0  ;;  %v8100_v27 = vadd.f32 %v14581_v7, %v8099_v29  ;;  %v10053_v29 = vld [vmem:[#allocation5 + $0x118] sm:$0xff] }
 0x7df   : > { %8838 = vmatmul.mubr.f32.gmra.mxu0 %v15018_v33  ;;  %v8101_v23 = vpop.f32.mrf.mxu1  ;;  %v10051_v33 = vld [vmem:[#allocation4] sm:$0xff] }
 0x7e0   : > { %8842 = vmatprep.mubr.f32.mxu0 %v14474_v3  ;;  %v8319_v12 = vpop.f32.mrf.mxu0  ;;  %v10054_v23 = vld [vmem:[#allocation5 + $0x160] sm:$0xff] }
 0x7e1   : > { %8628 = vmatmul.mubr.f32.gmra.mxu1 %v14474_v3  ;;  %v8104_v41 = vpop.f32.mrf.mxu1  ;;  %v14659_v3 = vadd.f32 %v8319_v12, %v8095_v4 }
 0x7e2   : > { %8632 = vmatprep.mubr.f32.mxu1 %v14504_v55  ;;  %v8321_v15 = vpop.f32.mrf.mxu0  ;;  %v8105_v45 = vadd.f32 %v14581_v7, %v8104_v41 }
 0x7e3   : > { %8843 = vmatmul.mubr.f32.gmra.mxu0 %v14476_v8  ;;  %v8106_v8 = vpop.f32.mrf.mxu1  ;;  %v10055_v15 = vld [vmem:[#allocation5 + $0x1a8] sm:$0xff] }
 0x7e4   : > { %8847 = vmatprep.mubr.f32.mxu0 %v14483_v34  ;;  %v8324_v31 = vpop.f32.mrf.mxu0 }
 0x7e5   : > { %8633 = vmatmul.mubr.f32.gmra.mxu1 %v14483_v34  ;;  %v8109_v40 = vpop.f32.mrf.mxu1  ;;  %v14666_v34 = vadd.f32 %v8324_v31, %v8100_v27  ;;  %v10056_v27 = vld [vmem:[#allocation5 + $0x1f0] sm:$0xff] }
 0x7e6   : > { %8637 = vmatprep.mubr.f32.mxu1 %v14506_v57  ;;  %v8326_v22 = vpop.f32.mrf.mxu0  ;;  %v8110_v5 = vadd.f32 %v14581_v7, %v8109_v40 }
 0x7e7   : > { %8848 = vmatmul.mubr.f32.gmra.mxu0 %v14485_v47  ;;  %v8111_v47 = vpop.f32.mrf.mxu1 }
 0x7e8   : > { %8852 = vmatprep.mubr.f32.mxu0 %v14510_v2  ;;  %v8329_v18 = vpop.f32.mrf.mxu0 }
 0x7e9   : > { %8638 = vmatmul.mubr.f32.gmra.mxu1 %v14510_v2  ;;  %v8114_v54 = vpop.f32.mrf.mxu1  ;;  %v14673_v2 = vadd.f32 %v8329_v18, %v8105_v45 }
 0x7ea   : > { %8642 = vmatprep.mubr.f32.mxu1 %v14527_v56  ;;  %v8331_v17 = vpop.f32.mrf.mxu0  ;;  %v8115_v42 = vadd.f32 %v14581_v7, %v8114_v54  ;;  %v10057_v54 = vld [vmem:[#allocation5 + $0x238] sm:$0xff] }
 0x7eb   : > { %8853 = vmatmul.mubr.f32.gmra.mxu0 %v14512_v50  ;;  %v8116_v50 = vpop.f32.mrf.mxu1 }
 0x7ec   : > { %8857 = vmatprep.mubr.f32.mxu0 %v14518_v51  ;;  %v8334_v44 = vpop.f32.mrf.mxu0  ;;  %v10058_v50 = vld [vmem:[#allocation5 + $0x280] sm:$0xff] }
 0x7ed   : > { %8643 = vmatmul.mubr.f32.gmra.mxu1 %v14518_v51  ;;  %v8119_v59 = vpop.f32.mrf.mxu1  ;;  %v10050_v51 = vld [vmem:[#allocation5 + $0x40] sm:$0xff]  ;;  %v14679_v28 = vadd.f32 %v8334_v44, %v8110_v5 }
 0x7ee   : > { %8647 = vmatprep.mubr.f32.mxu1 %v14530_v32  ;;  %v8336_v10 = vpop.f32.mrf.mxu0  ;;  %v8120_v60 = vadd.f32 %v14581_v7, %v8119_v59 }
 0x7ef   : > { %8858 = vmatmul.mubr.f32.gmra.mxu0 %v14520_v16  ;;  %v8121_v16 = vpop.f32.mrf.mxu1 }
 0x7f0   : > { %8862 = vmatprep.mubr.f32.mxu0 %v14532_v0  ;;  %v8339_v13 = vpop.f32.mrf.mxu0  ;;  %v10059_v16 = vld [vmem:[#allocation5 + $0x2c8] sm:$0xff] }
 0x7f1   : > { %8648 = vmatmul.mubr.f32.gmra.mxu1 %v14532_v0  ;;  %v8124_v19 = vpop.f32.mrf.mxu1  ;;  %v10052_v0 = vld [vmem:[#allocation5 + $0xd0] sm:$0xff]  ;;  %v14683_v63 = vadd.f32 %v8339_v13, %v8115_v42 }
 0x7f2   : > { %9764 = vmatprep.mubr.f32.mxu1 %v10050_v51  ;;  %v8341_v11 = vpop.f32.mrf.mxu0  ;;  %v8125_v12 = vadd.f32 %v14581_v7, %v8124_v19 }
 0x7f3   : > { %8863 = vmatmul.mubr.f32.gmra.mxu0 %v14534_v6  ;;  %v8126_v6 = vpop.f32.mrf.mxu1 }
 0x7f4   : > { %8867 = vmatprep.mubr.f32.mxu0 %v14556_v48  ;;  %v8344_v58 = vpop.f32.mrf.mxu0  ;;  %v10061_v6 = vld [vmem:[#allocation5 + $0x358] sm:$0xff] }
 0x7f5   : > { %9765 = vmatmul.mubr.f32.vlgmr.msra.gmra.mxu1 %v7556_v52  ;;  %v8129_v48 = vpop.f32.mrf.mxu1  ;;  %v14687_v20 = vadd.f32 %v8344_v58, %v8120_v60  ;;  %v10060_v52 = vld [vmem:[#allocation5 + $0x310] sm:$0xff] }
 0x7f6   : > { %9767 = vmatprep.mubr.f32.mxu1 %v10052_v0  ;;  %v8346_v41 = vpop.f32.mrf.mxu0  ;;  %v8130_v22 = vadd.f32 %v14581_v7, %v8129_v48 }
 0x7f7   : > { %8868 = vmatmul.mubr.f32.gmra.mxu0 %v10051_v33  ;;  %v8131_v4 = vpop.f32.mrf.mxu1 }
 0x7f8   : > { %8872 = vmatprep.mubr.f32.mxu0 %v14559_v35 }
 0x7f9   : > { %9768 = vmatmul.mubr.f32.gmra.mxu1 %v10053_v29 }
 0x7fa   : > { %9770 = vmatprep.mubr.f32.mxu1 %v10054_v23  ;;  %v8134_v8 = vpop.f32.mrf.mxu1 }
 0x7fb   : > { %8873 = vmatmul.mubr.f32.gmra.mxu0 %v10051_v33  ;;  %v8349_v35 = vpop.f32.mrf.mxu0  ;;  %v8135_v44 = vadd.f32 %v14581_v7, %v8134_v8 }
 0x7fc   : > { %v14690_v40 = vadd.f32 %v8349_v35, %v8125_v12  ;;  %v8136_v31 = vpop.f32.mrf.mxu1 }
 0x7fd   : > { %9771 = vmatmul.mubr.f32.gmra.mxu1 %v10055_v15  ;;  %v8351_v47 = vpop.f32.mrf.mxu0 }
 0x7fe   : > { %9773 = vmatprep.mubr.f32.mxu1 %v10056_v27  ;;  %v8139_v45 = vpop.f32.mrf.mxu1  ;;  %v10062_v27 = vld [vmem:[#allocation5 + $0x538] sm:$0xff] }
 0x7ff   : > { %v8354_v18 = vpop.f32.mrf.mxu0  ;;  %v8140_v33 = vadd.f32 %v14581_v7, %v8139_v45 }
 0x800   : > { %v14693_v17 = vadd.f32 %v8354_v18, %v8130_v22  ;;  %v8141_v5 = vpop.f32.mrf.mxu1  ;;  %v10064_v18 = vld [vmem:[#allocation5 + $0x5c8] sm:$0xff] }
 0x801   : > { %9774 = vmatmul.mubr.f32.gmra.mxu1 %v10057_v54  ;;  %v8356_v59 = vpop.f32.mrf.mxu0 }
 0x802   : > { %9776 = vmatprep.mubr.f32.mxu1 %v10058_v50 }
 0x804   : > { %v8144_v51 = vpop.f32.mrf.mxu1 }
 0x805   : > { %9777 = vmatmul.mubr.f32.gmra.mxu1 %v10059_v16  ;;  %v8359_v10 = vpop.f32.mrf.mxu0  ;;  %v8145_v58 = vadd.f32 %v14581_v7, %v8144_v51  ;;  %v10065_v51 = vld [vmem:[#allocation5 + $0x610] sm:$0xff] }
 0x806   : > { %9779 = vmatprep.mubr.f32.mxu1 %v10060_v52  ;;  %v14696_v42 = vadd.f32 %v8359_v10, %v8135_v44  ;;  %v8146_v19 = vpop.f32.mrf.mxu1  ;;  %v10066_v10 = vld [vmem:[#allocation5 + $0x658] sm:$0xff] }
 0x807   : > { %v8361_v13 = vpop.f32.mrf.mxu0 }
 0x808   : > { %v8149_v0 = vpop.f32.mrf.mxu1 }
 0x809   : > { %9780 = vmatmul.mubr.f32.gmra.mxu1 %v10061_v6  ;;  %v8364_v11 = vpop.f32.mrf.mxu0  ;;  %v8150_v15 = vadd.f32 %v14581_v7, %v8149_v0  ;;  %v10067_v6 = vld [vmem:[#allocation5 + $0x6a0] sm:$0xff] }
 0x80a   : > { %9782 = vmatprep.mubr.f32.mxu1 %v14562_v21  ;;  %v14700_v60 = vadd.f32 %v8364_v11, %v8140_v33  ;;  %v8151_v48 = vpop.f32.mrf.mxu1 }
 0x80b   : > { %v8366_v29 = vpop.f32.mrf.mxu0  ;;  %v10068_v48 = vld [vmem:[#allocation5 + $0x6e8] sm:$0xff] }
 0x80d   : > { %v8154_v23 = vpop.f32.mrf.mxu1  ;;  %9783 = vmatmul.mubr.f32.gmra.mxu1 %v14565_v49 }
 0x80e   : > { %9785 = vmatprep.mubr.f32.mxu1 %v14570_v38  ;;  %v8155_v49 = vadd.f32 %v14581_v7, %v8154_v23  ;;  %v10063_v38 = vld [vmem:[#allocation5 + $0x580] sm:$0xff] }
 0x80f   : > { %v8369_v4 = vpop.f32.mrf.mxu0  ;;  %v8156_v12 = vpop.f32.mrf.mxu1 }
 0x810   : > { %v14705_v41 = vadd.f32 %v8369_v4, %v8145_v58 }
 0x811   : > { %v8371_v8 = vpop.f32.mrf.mxu0  ;;  %v8159_v35 = vpop.f32.mrf.mxu1  ;;  %9786 = vmatmul.mubr.f32.gmra.mxu1 %v14575_v53 }
 0x812   : > { %9788 = vmatprep.mubr.f32.mxu1 %v10062_v27  ;;  %v8160_v53 = vadd.f32 %v14581_v7, %v8159_v35  ;;  %v10069_v8 = vld [vmem:[#allocation5 + $0x730] sm:$0xff] }
 0x813   : > { %v8374_v21 = vpop.f32.mrf.mxu0  ;;  %v8161_v47 = vpop.f32.mrf.mxu1 }
 0x814   : > { %v14709_v31 = vadd.f32 %v8374_v21, %v8150_v15 }
 0x815   : > { %v8376_v22 = vpop.f32.mrf.mxu0  ;;  %v8164_v45 = vpop.f32.mrf.mxu1  ;;  %9789 = vmatmul.mubr.f32.gmra.mxu1 %v10063_v38 }
 0x816   : > { %9791 = vmatprep.mubr.f32.mxu1 %v10064_v18  ;;  %v8165_v33 = vadd.f32 %v14581_v7, %v8164_v45 }
 0x817   : > { %v8379_v54 = vpop.f32.mrf.mxu0  ;;  %v8166_v5 = vpop.f32.mrf.mxu1 }
 0x818   : > { %v14712_v50 = vadd.f32 %v8379_v54, %v8155_v49 }
 0x819   : > { %v8381_v59 = vpop.f32.mrf.mxu0  ;;  %v8169_v44 = vpop.f32.mrf.mxu1  ;;  %9792 = vmatmul.mubr.f32.gmra.mxu1 %v10065_v51 }
 0x81a   : > { %9794 = vmatprep.mubr.f32.mxu1 %v10066_v10  ;;  %v8170_v4 = vadd.f32 %v14581_v7, %v8169_v44 }
 0x81b   : > { %v8384_v16 = vpop.f32.mrf.mxu0  ;;  %v8171_v19 = vpop.f32.mrf.mxu1 }
 0x81c   : > { %v14715_v52 = vadd.f32 %v8384_v16, %v8160_v53 }
 0x81d   : > { %v8386_v13 = vpop.f32.mrf.mxu0  ;;  %v8174_v0 = vpop.f32.mrf.mxu1  ;;  %9795 = vmatmul.mubr.f32.gmra.mxu1 %v10067_v6 }
 0x81e   : > { %9797 = vmatprep.mubr.f32.mxu1 %v10068_v48  ;;  %v8175_v47 = vadd.f32 %v14581_v7, %v8174_v0 }
 0x81f   : > { %v8389_v11 = vpop.f32.mrf.mxu0  ;;  %v8176_v58 = vpop.f32.mrf.mxu1 }
 0x820   : > { %v14718_v29 = vadd.f32 %v8389_v11, %v8165_v33 }
 0x821   : > { %v8391_v23 = vpop.f32.mrf.mxu0  ;;  %v8179_v12 = vpop.f32.mrf.mxu1  ;;  %9798 = vmatmul.mubr.f32.gmra.mxu1 %v10069_v8 }
 0x822   : > { %9800 = vmatprep.mubr.f32.mxu1 %v14468_v24  ;;  %v8180_v18 = vadd.f32 %v14581_v7, %v8179_v12 }
 0x823   : > { %v8394_v15 = vpop.f32.mrf.mxu0  ;;  %v8181_v21 = vpop.f32.mrf.mxu1 }
 0x824   : > { %v14722_v35 = vadd.f32 %v8394_v15, %v8170_v4 }
 0x825   : > { %v8396_v27 = vpop.f32.mrf.mxu0  ;;  %v8184_v22 = vpop.f32.mrf.mxu1  ;;  %9801 = vmatmul.mubr.f32.gmra.mxu1 %v15019_v43 }
 0x826   : > { %9803 = vmatprep.mubr.f32.mxu1 %v14504_v55  ;;  %v8185_v43 = vadd.f32 %v14581_v7, %v8184_v22 }
 0x827   : > { %v8399_v49 = vpop.f32.mrf.mxu0  ;;  %v8186_v38 = vpop.f32.mrf.mxu1 }
 0x828   : > { %v14727_v45 = vadd.f32 %v8399_v49, %v8175_v47 }
 0x829   : > { %v8401_v54 = vpop.f32.mrf.mxu0  ;;  %v8189_v5 = vpop.f32.mrf.mxu1  ;;  %9804 = vmatmul.mubr.f32.gmra.mxu1 %v14506_v57 }
 0x82a   : > { %9806 = vmatprep.mubr.f32.mxu1 %v14527_v56  ;;  %v8190_v57 = vadd.f32 %v14581_v7, %v8189_v5 }
 0x82b   : > { %v8404_v24 = vpop.f32.mrf.mxu0  ;;  %v8191_v53 = vpop.f32.mrf.mxu1 }
 0x82c   : > { %v14732_v59 = vadd.f32 %v8404_v24, %v8180_v18 }
 0x82d   : > { %v8406_v44 = vpop.f32.mrf.mxu0  ;;  %v8194_v51 = vpop.f32.mrf.mxu1  ;;  %9807 = vmatmul.mubr.f32.gmra.mxu1 %v14530_v32 }
 0x82e   : > { %9809 = vmatprep.mubr.f32.mxu1 %v14568_v30  ;;  %v8195_v11 = vadd.f32 %v14581_v7, %v8194_v51 }
 0x82f   : > { %v8409_v55 = vpop.f32.mrf.mxu0  ;;  %v8196_v10 = vpop.f32.mrf.mxu1 }
 0x830   : > { %v14737_v16 = vadd.f32 %v8409_v55, %v8185_v43 }
 0x831   : > { %v8411_v19 = vpop.f32.mrf.mxu0  ;;  %v8199_v13 = vpop.f32.mrf.mxu1  ;;  %9810 = vmatmul.mubr.f32.gmra.mxu1 %v14573_v14 }
 0x832   : > { %v8200_v12 = vadd.f32 %v14581_v7, %v8199_v13 }
 0x833   : > { %v8414_v56 = vpop.f32.mrf.mxu0  ;;  %v8201_v0 = vpop.f32.mrf.mxu1 }
 0x834   : > { %v14741_v33 = vadd.f32 %v8414_v56, %v8190_v57 }
 0x835   : > { %v8416_v6 = vpop.f32.mrf.mxu0  ;;  %v8494_v32 = vpop.f32.mrf.mxu1 }
 0x836   : > { %v8495_v30 = vadd.f32 %v8494_v32, %v14588_v39 }
 0x837   : > { %v8419_v48 = vpop.f32.mrf.mxu0  ;;  %v8496_v23 = vpop.f32.mrf.mxu1 }
 0x838   : > { %v14745_v58 = vadd.f32 %v8419_v48, %v8195_v11 }
 0x839   : > { %v8421_v4 = vpop.f32.mrf.mxu0  ;;  %v8499_v8 = vpop.f32.mrf.mxu1 }
 0x83a   : > { %v8500_v14 = vadd.f32 %v8499_v8, %v14596_v62 }
 0x83b   : > { %v8424_v15 = vpop.f32.mrf.mxu0  ;;  %v8501_v27 = vpop.f32.mrf.mxu1 }
 0x83c   : > { %v14749_v21 = vadd.f32 %v8424_v15, %v8200_v12 }
 0x83d   : > { %v8426_v47 = vpop.f32.mrf.mxu0  ;;  %v8504_v22 = vpop.f32.mrf.mxu1 }
 0x83e   : > { %v8505_v49 = vadd.f32 %v8504_v22, %v14603_v36 }
 0x83f   : > { %v8719_v38 = vpop.f32.mrf.mxu0  ;;  %v8506_v39 = vpop.f32.mrf.mxu1 }
 0x840   : > { %v14752_v54 = vadd.f32 %v8719_v38, %v8495_v30 }
 0x841   : > { %v8721_v18 = vpop.f32.mrf.mxu0  ;;  %v8509_v5 = vpop.f32.mrf.mxu1 }
 0x842   : > { %v8510_v24 = vadd.f32 %v8509_v5, %v14610_v25 }
 0x843   : > { %v8724_v7 = vpop.f32.mrf.mxu0  ;;  %v8511_v44 = vpop.f32.mrf.mxu1 }
 0x844   : > { %v14755_v53 = vadd.f32 %v8724_v7, %v8500_v14 }
 0x845   : > { %v8726_v62 = vpop.f32.mrf.mxu0  ;;  %v8514_v43 = vpop.f32.mrf.mxu1 }
 0x846   : > { %v8515_v51 = vadd.f32 %v8514_v43, %v14617_v26 }
 0x847   : > { %v8729_v55 = vpop.f32.mrf.mxu0  ;;  %v8516_v36 = vpop.f32.mrf.mxu1 }
 0x848   : > { %v14758_v10 = vadd.f32 %v8729_v55, %v8505_v49 }
 0x849   : > { %v8731_v19 = vpop.f32.mrf.mxu0  ;;  %v8519_v57 = vpop.f32.mrf.mxu1 }
 0x84a   : > { %v8520_v13 = vadd.f32 %v8519_v57, %v14624_v61 }
 0x84b   : > { %v8734_v56 = vpop.f32.mrf.mxu0  ;;  %v8521_v25 = vpop.f32.mrf.mxu1 }
 0x84c   : > { %v14761_v0 = vadd.f32 %v8734_v56, %v8510_v24 }
 0x84d   : > { %v8736_v6 = vpop.f32.mrf.mxu0  ;;  %v8524_v11 = vpop.f32.mrf.mxu1 }
 0x84e   : > { %v8525_v32 = vadd.f32 %v8524_v11, %v14631_v37 }
 0x84f   : > { %v8739_v48 = vpop.f32.mrf.mxu0  ;;  %v8526_v26 = vpop.f32.mrf.mxu1 }
 0x850   : > { %v14764_v30 = vadd.f32 %v8739_v48, %v8515_v51 }
 0x851   : > { %v8741_v23 = vpop.f32.mrf.mxu0  ;;  %v8529_v4 = vpop.f32.mrf.mxu1 }
 0x852   : > { %v8530_v12 = vadd.f32 %v8529_v4, %v14638_v46 }
 0x853   : > { %v8744_v8 = vpop.f32.mrf.mxu0  ;;  %v8531_v61 = vpop.f32.mrf.mxu1 }
 0x854   : > { %v14767_v15 = vadd.f32 %v8744_v8, %v8520_v13 }
 0x855   : > { %v8746_v14 = vpop.f32.mrf.mxu0  ;;  %v8534_v27 = vpop.f32.mrf.mxu1 }
 0x856   : > { %v8535_v47 = vadd.f32 %v8534_v27, %v14645_v1 }
 0x857   : > { %v8749_v22 = vpop.f32.mrf.mxu0  ;;  %v8536_v37 = vpop.f32.mrf.mxu1 }
 0x858   : > { %v14770_v49 = vadd.f32 %v8749_v22, %v8525_v32 }
 0x859   : > { %v8751_v38 = vpop.f32.mrf.mxu0  ;;  %v8539_v39 = vpop.f32.mrf.mxu1 }
 0x85a   : > { %v8540_v18 = vadd.f32 %v8539_v39, %v14652_v9 }
 0x85b   : > { %v8754_v5 = vpop.f32.mrf.mxu0  ;;  %v8541_v46 = vpop.f32.mrf.mxu1 }
 0x85c   : > { %v14773_v24 = vadd.f32 %v8754_v5, %v8530_v12 }
 0x85d   : > { %v8756_v7 = vpop.f32.mrf.mxu0  ;;  %v8544_v44 = vpop.f32.mrf.mxu1 }
 0x85e   : > { %v8545_v62 = vadd.f32 %v8544_v44, %v14659_v3 }
 0x85f   : > { %v8759_v43 = vpop.f32.mrf.mxu0  ;;  %v8546_v1 = vpop.f32.mrf.mxu1 }
 0x860   : > { %v14776_v51 = vadd.f32 %v8759_v43, %v8535_v47 }
 0x861   : > { %v8761_v55 = vpop.f32.mrf.mxu0  ;;  %v8549_v36 = vpop.f32.mrf.mxu1 }
 0x862   : > { %v8550_v19 = vadd.f32 %v8549_v36, %v14666_v34 }
 0x863   : > { %v8764_v57 = vpop.f32.mrf.mxu0  ;;  %v8551_v9 = vpop.f32.mrf.mxu1 }
 0x864   : > { %v14779_v13 = vadd.f32 %v8764_v57, %v8540_v18 }
 0x865   : > { %v8766_v56 = vpop.f32.mrf.mxu0  ;;  %v8554_v25 = vpop.f32.mrf.mxu1 }
 0x866   : > { %v8555_v6 = vadd.f32 %v8554_v25, %v14673_v2 }
 0x867   : > { %v8769_v11 = vpop.f32.mrf.mxu0  ;;  %v8556_v3 = vpop.f32.mrf.mxu1 }
 0x868   : > { %v14782_v32 = vadd.f32 %v8769_v11, %v8545_v62 }
 0x869   : > { %v8771_v48 = vpop.f32.mrf.mxu0  ;;  %v8559_v26 = vpop.f32.mrf.mxu1 }
 0x86a   : > { %v8560_v23 = vadd.f32 %v8559_v26, %v14679_v28 }
 0x86b   : > { %v8774_v4 = vpop.f32.mrf.mxu0  ;;  %v8561_v34 = vpop.f32.mrf.mxu1 }
 0x86c   : > { %v14785_v12 = vadd.f32 %v8774_v4, %v8550_v19 }
 0x86d   : > { %v8776_v8 = vpop.f32.mrf.mxu0  ;;  %v8564_v61 = vpop.f32.mrf.mxu1 }
 0x86e   : > { %v8565_v14 = vadd.f32 %v8564_v61, %v14683_v63 }
 0x86f   : > { %v8779_v27 = vpop.f32.mrf.mxu0  ;;  %v8566_v2 = vpop.f32.mrf.mxu1 }
 0x870   : > { %v14788_v47 = vadd.f32 %v8779_v27, %v8555_v6 }
 0x871   : > { %v8781_v22 = vpop.f32.mrf.mxu0  ;;  %v8569_v37 = vpop.f32.mrf.mxu1 }
 0x872   : > { %v8570_v38 = vadd.f32 %v8569_v37, %v14687_v20 }
 0x873   : > { %v8784_v39 = vpop.f32.mrf.mxu0  ;;  %v8571_v28 = vpop.f32.mrf.mxu1 }
 0x874   : > { %v14791_v18 = vadd.f32 %v8784_v39, %v8560_v23 }
 0x875   : > { %v8786_v5 = vpop.f32.mrf.mxu0  ;;  %v8574_v46 = vpop.f32.mrf.mxu1 }
 0x876   : > { %v8575_v7 = vadd.f32 %v8574_v46, %v14690_v40 }
 0x877   : > { %v8789_v44 = vpop.f32.mrf.mxu0  ;;  %v8576_v63 = vpop.f32.mrf.mxu1 }
 0x878   : > { %v14794_v62 = vadd.f32 %v8789_v44, %v8565_v14 }
 0x879   : > { %v8791_v43 = vpop.f32.mrf.mxu0  ;;  %v8579_v1 = vpop.f32.mrf.mxu1 }
 0x87a   : > { %v8580_v55 = vadd.f32 %v8579_v1, %v14693_v17 }
 0x87b   : > { %v8794_v36 = vpop.f32.mrf.mxu0  ;;  %v8581_v20 = vpop.f32.mrf.mxu1 }
 0x87c   : > { %v14797_v19 = vadd.f32 %v8794_v36, %v8570_v38 }
 0x87d   : > { %v8796_v57 = vpop.f32.mrf.mxu0  ;;  %v8584_v9 = vpop.f32.mrf.mxu1 }
 0x87e   : > { %v8585_v56 = vadd.f32 %v8584_v9, %v14696_v42 }
 0x87f   : > { %v8799_v25 = vpop.f32.mrf.mxu0  ;;  %v8586_v40 = vpop.f32.mrf.mxu1 }
 0x880   : > { %v14800_v6 = vadd.f32 %v8799_v25, %v8575_v7 }
 0x881   : > { %v8801_v11 = vpop.f32.mrf.mxu0  ;;  %v8589_v3 = vpop.f32.mrf.mxu1 }
 0x882   : > { %v8590_v48 = vadd.f32 %v8589_v3, %v14700_v60 }
 0x883   : > { %v8804_v26 = vpop.f32.mrf.mxu0  ;;  %v8591_v17 = vpop.f32.mrf.mxu1 }
 0x884   : > { %v14803_v23 = vadd.f32 %v8804_v26, %v8580_v55 }
 0x885   : > { %v8806_v4 = vpop.f32.mrf.mxu0  ;;  %v8594_v34 = vpop.f32.mrf.mxu1 }
 0x886   : > { %v8595_v8 = vadd.f32 %v8594_v34, %v14705_v41 }
 0x887   : > { %v8809_v61 = vpop.f32.mrf.mxu0  ;;  %v8596_v42 = vpop.f32.mrf.mxu1 }
 0x888   : > { %v14806_v14 = vadd.f32 %v8809_v61, %v8585_v56 }
 0x889   : > { %v8811_v27 = vpop.f32.mrf.mxu0  ;;  %v8599_v2 = vpop.f32.mrf.mxu1 }
 0x88a   : > { %v8600_v22 = vadd.f32 %v8599_v2, %v14709_v31 }
 0x88b   : > { %v8814_v37 = vpop.f32.mrf.mxu0  ;;  %v8601_v60 = vpop.f32.mrf.mxu1 }
 0x88c   : > { %v14809_v38 = vadd.f32 %v8814_v37, %v8590_v48 }
 0x88d   : > { %v8816_v39 = vpop.f32.mrf.mxu0  ;;  %v8604_v28 = vpop.f32.mrf.mxu1 }
 0x88e   : > { %v8605_v5 = vadd.f32 %v8604_v28, %v14712_v50 }
 0x88f   : > { %v8819_v46 = vpop.f32.mrf.mxu0  ;;  %v8606_v41 = vpop.f32.mrf.mxu1 }
 0x890   : > { %v14812_v7 = vadd.f32 %v8819_v46, %v8595_v8 }
 0x891   : > { %v8821_v44 = vpop.f32.mrf.mxu0  ;;  %v8609_v63 = vpop.f32.mrf.mxu1 }
 0x892   : > { %v8610_v43 = vadd.f32 %v8609_v63, %v14715_v52 }
 0x893   : > { %v8824_v1 = vpop.f32.mrf.mxu0  ;;  %v8611_v31 = vpop.f32.mrf.mxu1 }
 0x894   : > { %v14815_v55 = vadd.f32 %v8824_v1, %v8600_v22 }
 0x895   : > { %v8826_v36 = vpop.f32.mrf.mxu0  ;;  %v8614_v20 = vpop.f32.mrf.mxu1 }
 0x896   : > { %v8615_v57 = vadd.f32 %v8614_v20, %v14718_v29 }
 0x897   : > { %v8829_v9 = vpop.f32.mrf.mxu0  ;;  %v8616_v50 = vpop.f32.mrf.mxu1 }
 0x898   : > { %v14818_v56 = vadd.f32 %v8829_v9, %v8605_v5 }
 0x899   : > { %v8831_v25 = vpop.f32.mrf.mxu0  ;;  %v8619_v40 = vpop.f32.mrf.mxu1 }
 0x89a   : > { %v8620_v11 = vadd.f32 %v8619_v40, %v14722_v35 }
 0x89b   : > { %v8834_v3 = vpop.f32.mrf.mxu0  ;;  %v8621_v52 = vpop.f32.mrf.mxu1 }
 0x89c   : > { %v14821_v48 = vadd.f32 %v8834_v3, %v8610_v43 }
 0x89d   : > { %v8836_v26 = vpop.f32.mrf.mxu0  ;;  %v8624_v17 = vpop.f32.mrf.mxu1 }
 0x89e   : > { %v8625_v4 = vadd.f32 %v8624_v17, %v14727_v45 }
 0x89f   : > { %v8839_v34 = vpop.f32.mrf.mxu0  ;;  %v8626_v29 = vpop.f32.mrf.mxu1 }
 0x8a0   : > { %v14824_v8 = vadd.f32 %v8839_v34, %v8615_v57 }
 0x8a1   : > { %v8841_v61 = vpop.f32.mrf.mxu0  ;;  %v8629_v42 = vpop.f32.mrf.mxu1 }
 0x8a2   : > { %v14827_v27 = vadd.f32 %v8629_v42, %v14732_v59 }
 0x8a3   : > { %v8844_v2 = vpop.f32.mrf.mxu0  ;;  %v8631_v35 = vpop.f32.mrf.mxu1 }
 0x8a4   : > { %v14829_v22 = vadd.f32 %v8844_v2, %v8620_v11 }
 0x8a5   : > { %v8846_v37 = vpop.f32.mrf.mxu0  ;;  %v8634_v60 = vpop.f32.mrf.mxu1 }
 0x8a6   : > { %v14832_v39 = vadd.f32 %v8634_v60, %v14737_v16 }
 0x8a7   : > { %v8849_v45 = vpop.f32.mrf.mxu0  ;;  %v8636_v5 = vpop.f32.mrf.mxu1 }
 0x8a8   : > { %v14834_v28 = vadd.f32 %v8849_v45, %v8625_v4 }
 0x8a9   : > { %v8851_v46 = vpop.f32.mrf.mxu0  ;;  %v8639_v41 = vpop.f32.mrf.mxu1 }
 0x8aa   : > { %v14837_v59 = vadd.f32 %v8639_v41, %v14741_v33 }
 0x8ab   : > { %v14839_v44 = vpop.f32.mrf.mxu0  ;;  %v8641_v63 = vpop.f32.mrf.mxu1 }
 0x8ad   : > { %v8856_v43 = vpop.f32.mrf.mxu0  ;;  %v8644_v1 = vpop.f32.mrf.mxu1 }
 0x8ae   : > { %v14842_v31 = vadd.f32 %v8644_v1, %v14745_v58 }
 0x8af   : > { %v14844_v16 = vpop.f32.mrf.mxu0  ;;  %v8646_v36 = vpop.f32.mrf.mxu1 }
 0x8b1   : > { %v8861_v20 = vpop.f32.mrf.mxu0  ;;  %v14846_v57 = vpop.f32.mrf.mxu1 }
 0x8b3   : > { %v14849_v9 = vpop.f32.mrf.mxu0  ;;  %v8651_v50 = vpop.f32.mrf.mxu1 }
 0x8b5   : > { %v8866_v33 = vpop.f32.mrf.mxu0  ;;  %v9766_v25 = vpop.f32.mrf.mxu1 }
 0x8b6   : > { %v8950_v11 = vadd.f32 %v9766_v25, %v14755_v53 }
 0x8b7   : > { %v14853_v40 = vpop.f32.mrf.mxu0  ;;  %v8944_v58 = vpop.f32.mrf.mxu1 }
 0x8b8   : > { %v9104_v3 = vmax.f32 %v8950_v11, 0.0  ;;  %v8945_v26 = vadd.f32 %v8944_v58, %v14752_v54 }
 0x8b9   : > { %v8871_v52 = vpop.f32.mrf.mxu0  ;;  %v9769_v17 = vpop.f32.mrf.mxu1 }
 0x8ba   : > { %9136 = vst [vmem:[%s14857_s29 + $0x8] sm:$0xff] %v9104_v3  ;;  %v9103_v4 = vmax.f32 %v8945_v26, 0.0  ;;  %v8960_v29 = vadd.f32 %v9769_v17, %v14761_v0 }
 0x8bb   : > { %v14860_v34 = vpop.f32.mrf.mxu0  ;;  %v8954_v53 = vpop.f32.mrf.mxu1 }
 0x8bc   : > { %9135 = vst [vmem:[%s14857_s29] sm:$0xff] %v9103_v4  ;;  %v9106_v61 = vmax.f32 %v8960_v29, 0.0  ;;  %v8955_v54 = vadd.f32 %v8954_v53, %v14758_v10 }
 0x8bd   : > { %v8876_v42 = vpop.f32.mrf.mxu0  ;;  %v9772_v2 = vpop.f32.mrf.mxu1 }
 0x8be   : > { %9138 = vst [vmem:[%s14857_s29 + $0x18] sm:$0xff] %v9106_v61  ;;  %v9105_v35 = vmax.f32 %v8955_v54, 0.0  ;;  %v8970_v37 = vadd.f32 %v9772_v2, %v14767_v15 }
 0x8bf   : > { %v8964_v60 = vpop.f32.mrf.mxu1 }
 0x8c0   : > { %9137 = vst [vmem:[%s14857_s29 + $0x10] sm:$0xff] %v9105_v35  ;;  %v9108_v45 = vmax.f32 %v8970_v37, 0.0  ;;  %v8965_v5 = vadd.f32 %v8964_v60, %v14764_v30 }
 0x8c1   : > { %v9775_v0 = vpop.f32.mrf.mxu1 }
 0x8c2   : > { %9140 = vst [vmem:[%s14857_s29 + $0x28] sm:$0xff] %v9108_v45  ;;  %v9107_v46 = vmax.f32 %v8965_v5, 0.0  ;;  %v8980_v41 = vadd.f32 %v9775_v0, %v14773_v24 }
 0x8c3   : > { %v8974_v10 = vpop.f32.mrf.mxu1 }
 0x8c4   : > { %9139 = vst [vmem:[%s14857_s29 + $0x20] sm:$0xff] %v9107_v46  ;;  %v9110_v63 = vmax.f32 %v8980_v41, 0.0  ;;  %v8975_v43 = vadd.f32 %v8974_v10, %v14770_v49 }
 0x8c5   : > { %v9778_v1 = vpop.f32.mrf.mxu1 }
 0x8c6   : > { %9142 = vst [vmem:[%s14857_s29 + $0x38] sm:$0xff] %v9110_v63  ;;  %v9109_v15 = vmax.f32 %v8975_v43, 0.0  ;;  %v8990_v36 = vadd.f32 %v9778_v1, %v14779_v13 }
 0x8c7   : > { %v8984_v20 = vpop.f32.mrf.mxu1 }
 0x8c8   : > { %9141 = vst [vmem:[%s14857_s29 + $0x30] sm:$0xff] %v9109_v15  ;;  %v9112_v30 = vmax.f32 %v8990_v36, 0.0  ;;  %v8985_v50 = vadd.f32 %v8984_v20, %v14776_v51 }
 0x8c9   : > { %v9781_v33 = vpop.f32.mrf.mxu1 }
 0x8ca   : > { %9144 = vst [vmem:[%s14857_s29 + $0x48] sm:$0xff] %v9112_v30  ;;  %v9111_v24 = vmax.f32 %v8985_v50, 0.0  ;;  %v9000_v25 = vadd.f32 %v9781_v33, %v14785_v12 }
 0x8cb   : > { %v8994_v11 = vpop.f32.mrf.mxu1 }
 0x8cc   : > { %9143 = vst [vmem:[%s14857_s29 + $0x40] sm:$0xff] %v9111_v24  ;;  %v9114_v49 = vmax.f32 %v9000_v25, 0.0  ;;  %v8995_v58 = vadd.f32 %v8994_v11, %v14782_v32  ;;  %v8865_v11 = vadd.f32 %v14849_v9, %v14837_v59 }
 0x8cd   : > { %v9784_v3 = vpop.f32.mrf.mxu1 }
 0x8ce   : > { %9146 = vst [vmem:[%s14857_s29 + $0x58] sm:$0xff] %v9114_v49  ;;  %v9113_v13 = vmax.f32 %v8995_v58, 0.0  ;;  %v9010_v52 = vadd.f32 %v9784_v3, %v14791_v18 }
 0x8cf   : > { %v9004_v26 = vpop.f32.mrf.mxu1 }
 0x8d0   : > { %9145 = vst [vmem:[%s14857_s29 + $0x50] sm:$0xff] %v9113_v13  ;;  %v9116_v51 = vmax.f32 %v9010_v52, 0.0  ;;  %v9005_v17 = vadd.f32 %v9004_v26, %v14788_v47 }
 0x8d1   : > { %v9787_v4 = vpop.f32.mrf.mxu1 }
 0x8d2   : > { %9148 = vst [vmem:[%s14857_s29 + $0x68] sm:$0xff] %v9116_v51  ;;  %v9115_v12 = vmax.f32 %v9005_v17, 0.0  ;;  %v9020_v29 = vadd.f32 %v9787_v4, %v14797_v19 }
 0x8d3   : > { %v9014_v53 = vpop.f32.mrf.mxu1 }
 0x8d4   : > { %9147 = vst [vmem:[%s14857_s29 + $0x60] sm:$0xff] %v9115_v12  ;;  %v9118_v32 = vmax.f32 %v9020_v29, 0.0  ;;  %v9015_v61 = vadd.f32 %v9014_v53, %v14794_v62 }
 0x8d5   : > { %v9790_v54 = vpop.f32.mrf.mxu1 }
 0x8d6   : > { %9150 = vst [vmem:[%s14857_s29 + $0x78] sm:$0xff] %v9118_v32  ;;  %v9117_v18 = vmax.f32 %v9015_v61, 0.0  ;;  %v9030_v42 = vadd.f32 %v9790_v54, %v14803_v23 }
 0x8d7   : > { %v9024_v2 = vpop.f32.mrf.mxu1 }
 0x8d8   : > { %9149 = vst [vmem:[%s14857_s29 + $0x70] sm:$0xff] %v9117_v18  ;;  %v9120_v47 = vmax.f32 %v9030_v42, 0.0  ;;  %v9025_v35 = vadd.f32 %v9024_v2, %v14800_v6 }
 0x8d9   : > { %v9793_v37 = vpop.f32.mrf.mxu1 }
 0x8da   : > { %9152 = vst [vmem:[%s14857_s29 + $0x88] sm:$0xff] %v9120_v47  ;;  %v9119_v19 = vmax.f32 %v9025_v35, 0.0  ;;  %v9040_v60 = vadd.f32 %v9793_v37, %v14809_v38 }
 0x8db   : > { %v9034_v45 = vpop.f32.mrf.mxu1 }
 0x8dc   : > { %9151 = vst [vmem:[%s14857_s29 + $0x80] sm:$0xff] %v9119_v19  ;;  %v9122_v62 = vmax.f32 %v9040_v60, 0.0  ;;  %v9035_v5 = vadd.f32 %v9034_v45, %v14806_v14 }
 0x8dd   : > { %v9796_v0 = vpop.f32.mrf.mxu1 }
 0x8de   : > { %9154 = vst [vmem:[%s14857_s29 + $0x98] sm:$0xff] %v9122_v62  ;;  %v9121_v23 = vmax.f32 %v9035_v5, 0.0  ;;  %v9050_v46 = vadd.f32 %v9796_v0, %v14815_v55 }
 0x8df   : > { %v9044_v41 = vpop.f32.mrf.mxu1 }
 0x8e0   : > { %9153 = vst [vmem:[%s14857_s29 + $0x90] sm:$0xff] %v9121_v23  ;;  %v9124_v6 = vmax.f32 %v9050_v46, 0.0  ;;  %v9045_v10 = vadd.f32 %v9044_v41, %v14812_v7  ;;  %v8855_v7 = vadd.f32 %v14839_v44, %v14827_v27  ;;  %v8860_v44 = vadd.f32 %v14844_v16, %v14832_v39 }
 0x8e1   : > { %v9799_v63 = vpop.f32.mrf.mxu1  ;;  %v8870_v39 = vadd.f32 %v14853_v40, %v14842_v31 }
 0x8e2   : > { %9156 = vst [vmem:[%s14857_s29 + $0xa8] sm:$0xff] %v9124_v6  ;;  %v9123_v38 = vmax.f32 %v9045_v10, 0.0  ;;  %v9060_v43 = vadd.f32 %v9799_v63, %v14821_v48 }
 0x8e3   : > { %v9054_v1 = vpop.f32.mrf.mxu1 }
 0x8e4   : > { %9155 = vst [vmem:[%s14857_s29 + $0xa0] sm:$0xff] %v9123_v38  ;;  %v9126_v14 = vmax.f32 %v9060_v43, 0.0  ;;  %v9055_v15 = vadd.f32 %v9054_v1, %v14818_v56 }
 0x8e5   : > { %v9802_v36 = vpop.f32.mrf.mxu1 }
 0x8e6   : > { %9158 = vst [vmem:[%s14857_s29 + $0xb8] sm:$0xff] %v9126_v14  ;;  %v9125_v55 = vmax.f32 %v9055_v15, 0.0  ;;  %v9070_v20 = vadd.f32 %v9802_v36, %v14829_v22 }
 0x8e7   : > { %v9064_v30 = vpop.f32.mrf.mxu1 }
 0x8e8   : > { %9157 = vst [vmem:[%s14857_s29 + $0xb0] sm:$0xff] %v9125_v55  ;;  %v9128_v50 = vmax.f32 %v9070_v20, 0.0  ;;  %v9065_v48 = vadd.f32 %v9064_v30, %v14824_v8  ;;  %v8650_v8 = vadd.f32 %v14846_v57, %v14749_v21 }
 0x8e9   : > { %v9805_v33 = vpop.f32.mrf.mxu1 }
 0x8ea   : > { %9160 = vst [vmem:[%s14857_s29 + $0xc8] sm:$0xff] %v9128_v50  ;;  %v9127_v24 = vmax.f32 %v9065_v48, 0.0  ;;  %v9080_v56 = vadd.f32 %v9805_v33, %v8855_v7  ;;  %v8875_v59 = vadd.f32 %v14860_v34, %v8650_v8 }
 0x8eb   : > { %v9074_v25 = vpop.f32.mrf.mxu1 }
 0x8ec   : > { %9159 = vst [vmem:[%s14857_s29 + $0xc0] sm:$0xff] %v9127_v24  ;;  %v9130_v22 = vmax.f32 %v9080_v56, 0.0  ;;  %v9075_v49 = vadd.f32 %v9074_v25, %v14834_v28 }
 0x8ed   : > { %v9808_v27 = vpop.f32.mrf.mxu1 }
 0x8ee   : > { %9162 = vst [vmem:[%s14857_s29 + $0xd8] sm:$0xff] %v9130_v22  ;;  %v9129_v58 = vmax.f32 %v9075_v49, 0.0  ;;  %v9090_v3 = vadd.f32 %v9808_v27, %v8865_v11 }
 0x8ef   : > { %v9084_v13 = vpop.f32.mrf.mxu1 }
 0x8f0   : > { %9161 = vst [vmem:[%s14857_s29 + $0xd0] sm:$0xff] %v9129_v58  ;;  %v9132_v9 = vmax.f32 %v9090_v3, 0.0  ;;  %v9085_v28 = vadd.f32 %v9084_v13, %v8860_v44 }
 0x8f1   : > { %v9811_v52 = vpop.f32.mrf.mxu1 }
 0x8f2   : > { %9164 = vst [vmem:[%s14857_s29 + $0xe8] sm:$0xff] %v9132_v9  ;;  %v9131_v16 = vmax.f32 %v9085_v28, 0.0  ;;  %v9100_v21 = vadd.f32 %v9811_v52, %v8875_v59 }
 0x8f3   : > { %v9094_v57 = vpop.f32.mrf.mxu1 }
 0x8f4   : > { %9163 = vst [vmem:[%s14857_s29 + $0xe0] sm:$0xff] %v9131_v16  ;;  %v9134_v26 = vmax.f32 %v9100_v21, 0.0  ;;  %v9095_v34 = vadd.f32 %v9094_v57, %v8870_v39 }
 0x8f6   : > { %9166 = vst [vmem:[%s14857_s29 + $0xf8] sm:$0xff] %v9134_v26  ;;  %v9133_v31 = vmax.f32 %v9095_v34, 0.0 }
 0x8f8   : > { %9165 = vst [vmem:[%s14857_s29 + $0xf0] sm:$0xff] %v9133_v31 }
 0x8f9   : > { %10135 = shalt.err (!%p10132_p3)
}
 0x8fa   : > { %s10136_s14 = scalar_lea.hbm %s14932_s24, 4096  ;;  %s10140_s25 = scalar_lea.hbm %s14989_s9, 8192 }
 0x8fb   : > { %p10137_p2 = scmp.ne.s32.totalorder %s14932_s24, %s10136_s14  ;;  %p10141_p7 = scmp.lt.s32.totalorder %s14932_s24, %s14989_s9 }
 0x8fc   : > { %p10142_p6 = scmp.lt.s32.totalorder %s10140_s25, %s10136_s14 }
 0x8fd   : > { %p10138_p4 = pnand %p10137_p2, %p10297_p5 }
 0x8fe   : > { %p10143_p9 = por %p10142_p6, %p10141_p7 }
 0x8ff   : > { %p10139_p13 = pneg %p10138_p4 }
 0x901   : > { %p10144_p10 = pnand %p10143_p9, %p10139_p13 }
 0x903   : > { %10147 = shalt.err (!%p10144_p10)
}
 0x904   : > { %s10207_s26 = smov 128   ;;  %s10208_s27 = smov 8  }
 0x905   : > { %9884 = dma.vmem_to_hbm [thread:$0]  (%p10297_p5), %s14934_s16, 4096, %s14932_s24, %s14940_s13, %s10207_s26, %s10207_s26, %s10208_s27  }
 0x906 PF: > { %p9901_p12 = scmp.ge.s32.totalorder %s10190_s12, 2  ;;  %s9196_s28 = sand.u32 1, %s10178_s30  }
 0x907   : > { %p15020_p8 = scmp.ne.s32.totalorder %s14997_s20, 0  ;;  %s9197_s21 = scalar_lea.sflag [#allocation8], %s9196_s28 }
 0x909   : > { %p9894_p11 = pnand %p9901_p12, %p15020_p8 }
 0x90b   : > { %p9895_p0 = pneg %p9894_p11 }
 0x90d   : > { %10173 = dma.done.wait (%p9895_p0), %s9197_s21, 4096  }
 0x90e   : > { %10175 = vsyncadd (%p9895_p0), %s9197_s21, 4294963200  ;;  %p21_p1 = scmp.ge.s32.totalorder %s10284_s15, 4   ;;  %s15021_s30 = smov %s10182_s10 }
 0x90f   : > { %s15022_s10 = smov %s10186_s11  ;;  %s15023_s11 = smov %s10295_s18 }
 0x910   : > { %s15024_s12 = smov %s10284_s15  ;;  %23 = sbr.rel (!%p21_p1) target bundleno = 5 (0x5), region = 106 }
 0x915   :  { %9202 = vsyncpa [#allocation7], 1 }
 0x916   :  { %9204 = vsyncpa [#allocation7 + $0x1], 1 }
 0x917   :  { %9205 = vsyncpa [#allocation10], 1 }
 0x918   :  { %9206 = vsyncpa [#allocation8], 1 }
 0x919   :  { %9208 = vsyncpa [#allocation8 + $0x1], 1 }

</bundles_post_ra>
